<compile_context>
chip_gen: v7x
topology: tpu7x:2x2x1
jax: 0.10.0
libtpu: 0.0.40
codegen_flags: <defaults>
</compile_context>

<pallas_src>
import functools

import jax
import jax.numpy as jnp
from jax.experimental import pallas as pl
from jax.experimental.pallas import tpu as pltpu


# ----------------------------------------------------------------------------
# Kernel 1: ConvTranspose3d(k=2, s=2) as one lane-dense bf16 matmul.
# ----------------------------------------------------------------------------
def _upconv_kernel(x_ref, w_ref, b_ref, o_ref):
    # x_ref: (1, D*H, W*Cin) bf16 ; w_ref: (W*Cin, 8*W*Cout) bf16 block-diag ; b_ref: (1, 8*W*Cout) f32
    y = jnp.dot(x_ref[0], w_ref[...], preferred_element_type=jnp.float32) + b_ref[...]
    o_ref[0] = y.astype(o_ref.dtype)


def upconv(x2d, w_bd, b_row):
    N, M, K = x2d.shape
    Nout = w_bd.shape[1]
    return pl.pallas_call(
        _upconv_kernel,
        out_shape=jax.ShapeDtypeStruct((N, M, Nout), jnp.bfloat16),
        grid=(N,),
        in_specs=[
            pl.BlockSpec((1, M, K), lambda n: (n, 0, 0)),
            pl.BlockSpec((K, Nout), lambda n: (0, 0)),
            pl.BlockSpec((1, Nout), lambda n: (0, 0)),
        ],
        out_specs=pl.BlockSpec((1, M, Nout), lambda n: (n, 0, 0)),
        compiler_params=pltpu.CompilerParams(dimension_semantics=("parallel",)),
    )(x2d, w_bd, b_row)


# ----------------------------------------------------------------------------
# Kernel 2: fused Block3D  (conv1 on lane-fused [up|enc]) -> bn1 -> relu -> conv2 -> bn2 -> relu
# Grid = (batch, D-tiles); each step computes TD depth-planes with a 1-row halo recompute along D.
# ----------------------------------------------------------------------------
def _block3d_kernel(x_ref, w1_ref, s1_ref, b1_ref, w2_ref, s2_ref, b2_ref, o_ref,
                    a1_ref, h1_ref, a2_ref, *, TD, H, Kin, C1lane, C2lane):
    """One (batch, d-tile) grid step.  All spatial dims are the *upsampled* dims.

    x_ref : (1, D+4, H+2, Kin)   bf16  zero-halo'd fused [up|enc] input (lanes = [W*Cu | W*Ce]);
                                       block index is constant over the d-tile axis -> VMEM-resident.
    w1_ref: (9*Kin, C1lane)      bf16  conv1 banded weights, 9 (kd,kh) taps stacked along K.
    w2_ref: (9*C1lane, C2lane)   bf16  conv2 banded weights, 9 taps stacked along K.
    s*/b* : (1, C1lane)/(1, 2*C2lane) f32  folded conv-bias + BatchNorm scale / shift (eval).
    o_ref : (1, TD*H//2, 2*C2lane)     lane-dense output (two h-rows folded into the lane axis).
    a1_ref: ((TD+2)*H, 9*Kin)    bf16  VMEM mini-im2col for conv1 (incl. halo-recompute rows).
    h1_ref: (TD+2, H+2, C1lane)  bf16  VMEM-resident conv1 activation with zero halo ring.
    a2_ref: (TD*H, 9*C1lane)     bf16  VMEM mini-im2col for conv2.
    """
    j = pl.program_id(1)
    base = pl.multiple_of(j * TD, TD)
    Mx = (TD + 2) * H
    M = TD * H

    # ---- conv1 mini-im2col: 9 shifted (kd, kh) slabs of the fused [up|enc] input (128-lane, aligned)
    for td in range(3):
        for th in range(3):
            t = td * 3 + th
            slab = x_ref[0, pl.ds(base + td, TD + 2), th:th + H, :]
            a1_ref[:, t * Kin:(t + 1) * Kin] = slab.reshape(Mx, Kin)

    # ---- conv1 (bias+BN1 folded) + ReLU : ONE bf16 matmul, K = 9*Kin ----
    acc1 = jnp.dot(a1_ref[...], w1_ref[...], preferred_element_type=jnp.float32)
    h1 = jnp.maximum(acc1 * s1_ref[...] + b1_ref[...], 0.0)

    # conv1 activation stays in VMEM; only the halo ring is written with zeros, never a full memset.
    h1_ref[:, 1:H + 1, :] = h1.reshape(TD + 2, H, C1lane).astype(h1_ref.dtype)
    zcol = jnp.zeros((TD + 2, C1lane), h1_ref.dtype)
    h1_ref[:, 0, :] = zcol
    h1_ref[:, H + 1, :] = zcol

    @pl.when(j == 0)
    def _():                                    # d = -1 plane of the volume -> conv 'same' zero pad
        h1_ref[0] = jnp.zeros((H + 2, C1lane), h1_ref.dtype)

    @pl.when(j == pl.num_programs(1) - 1)
    def _():                                    # d = D plane of the volume -> conv 'same' zero pad
        h1_ref[TD + 1] = jnp.zeros((H + 2, C1lane), h1_ref.dtype)

    # ---- conv2 mini-im2col from the VMEM-resident h1 ----
    for td in range(3):
        for th in range(3):
            t = td * 3 + th
            a2_ref[:, t * C1lane:(t + 1) * C1lane] = (
                h1_ref[td:td + TD, th:th + H, :].reshape(M, C1lane))

    # ---- conv2 (bias+BN2 folded) + ReLU : ONE bf16 matmul, K = 9*C1lane ----
    acc2 = jnp.dot(a2_ref[...], w2_ref[...], preferred_element_type=jnp.float32)  # (M, C2lane)
    # fold two h-rows into the lane axis -> 128-lane epilogue and an unmasked, lane-dense store
    acc2 = acc2.reshape(M // 2, 2, C2lane)
    out = jnp.concatenate([acc2[:, 0, :], acc2[:, 1, :]], axis=-1)   # (M//2, 2*C2lane)
    out = jnp.maximum(out * s2_ref[...] + b2_ref[...], 0.0)          # bn2 + relu2 (dropout = eval id)
    o_ref[0] = out.astype(o_ref.dtype)


def block3d(x_pad, w1k, s1, b1, w2k, s2, b2, *, D, H, TD, Kin, C1lane, C2lane, out_dtype):
    N = x_pad.shape[0]
    assert D % TD == 0 and (TD * H) % 2 == 0
    G = D // TD
    kern = functools.partial(_block3d_kernel, TD=TD, H=H, Kin=Kin, C1lane=C1lane, C2lane=C2lane)
    return pl.pallas_call(
        kern,
        out_shape=jax.ShapeDtypeStruct((N, D * H // 2, 2 * C2lane), out_dtype),
        grid=(N, G),
        in_specs=[
            # full-depth input block, constant index over the d-tile axis -> stays resident in VMEM
            pl.BlockSpec((1, D + 4, H + 2, Kin), lambda n, j: (n, 0, 0, 0)),
            pl.BlockSpec((9 * Kin, C1lane), lambda n, j: (0, 0)),
            pl.BlockSpec((1, C1lane), lambda n, j: (0, 0)),
            pl.BlockSpec((1, C1lane), lambda n, j: (0, 0)),
            pl.BlockSpec((9 * C1lane, C2lane), lambda n, j: (0, 0)),
            pl.BlockSpec((1, 2 * C2lane), lambda n, j: (0, 0)),
            pl.BlockSpec((1, 2 * C2lane), lambda n, j: (0, 0)),
        ],
        out_specs=pl.BlockSpec((1, TD * H // 2, 2 * C2lane), lambda n, j: (n, j, 0)),
        scratch_shapes=[
            pltpu.VMEM(((TD + 2) * H, 9 * Kin), jnp.bfloat16),     # conv1 mini-im2col
            pltpu.VMEM((TD + 2, H + 2, C1lane), jnp.bfloat16),     # halo'd conv1 activation
            pltpu.VMEM((TD * H, 9 * C1lane), jnp.bfloat16),        # conv2 mini-im2col
        ],
        # NOTE: at production UNet widths set vmem_limit_bytes here and shrink TD for v7x (64 MiB VMEM).
        compiler_params=pltpu.CompilerParams(dimension_semantics=("parallel", "parallel")),
    )(x_pad, w1k, s1, b1, w2k, s2, b2)


# ----------------------------------------------------------------------------
# Weight / BN preparation (XLA glue, tiny tensors).
# ----------------------------------------------------------------------------
def _bn_fold(bias, gamma, beta, mean, var, eps=1e-5):
    inv = gamma / jnp.sqrt(var + eps)
    return inv, (bias - mean) * inv + beta


def _conv3_banded(w, Wdim):
    # w: (Cout, Cin, 3, 3, 3) PyTorch layout  ->  (9, Wdim*Cin, Wdim*Cout) f32
    # Entry [kd*3+kh] applies the 3 kw taps (with implicit zero-pad along w) to a lane-fused
    # (.., Wdim*Cin) slab:  bd[t, a*Cin+c, b*Cout+k] = sum_tw [a == b+tw-1] w[k, c, kd, kh, tw]
    taps = jnp.transpose(w, (2, 3, 4, 1, 0))                                          # (kd,kh,kw,Cin,Cout)
    shifts = jnp.stack([jnp.eye(Wdim, k=1 - tw, dtype=w.dtype) for tw in range(3)])   # (kw, a, b)
    bd = jnp.einsum('wab,dhwck->dhacbk', shifts, taps)
    Cout, Cin = w.shape[0], w.shape[1]
    return bd.reshape(9, Wdim * Cin, Wdim * Cout)


def _stack_taps_k(parts, dtype):
    # parts: list of (9, Kp, Nn) banded blocks whose input-channel groups sit consecutively on the
    # lane axis (e.g. [up-part, enc-part]).  Per-tap K-blocks are [part0 | part1 | ...] and the 9
    # (kd, kh) taps are stacked along K to match the kernel's mini-im2col column order.
    per_tap = jnp.concatenate(parts, axis=1) if len(parts) > 1 else parts[0]
    t, k, n = per_tap.shape
    return per_tap.reshape(t * k, n).astype(dtype)


def _upconv_bd_weight(w, Wdim, dtype):
    # w: (Cin, Cout, 2, 2, 2) PyTorch ConvTranspose layout -> (Wdim*Cin, 8*Wdim*Cout)
    # block-diagonal kron(I_W, .); output columns ordered (kd, kh, w_out, kw, c_out) so each (kd, kh)
    # column block is already the lane-dense (w2 = 2w+kw, c) layout the Block3D kernel consumes.
    Cin, Cout = w.shape[0], w.shape[1]
    wmat = jnp.transpose(w, (2, 3, 0, 4, 1))                      # (kd, kh, Cin, kw, Cout)
    eye = jnp.eye(Wdim, dtype=w.dtype)
    bd = jnp.einsum('ab,dhcwk->acdhbwk', eye, wmat)               # (a, Cin, kd, kh, b, kw, Cout)
    return bd.reshape(Wdim * Cin, 8 * Wdim * Cout).astype(dtype)


# ----------------------------------------------------------------------------
# F.interpolate(..., mode='trilinear', align_corners=False) — plain-JAX glue.
# (Identity — and skipped — when the skip already has the target spatial size.)
# ----------------------------------------------------------------------------
def _linear_idx_w(out_size, in_size):
    scale = in_size / out_size
    dst = jnp.arange(out_size, dtype=jnp.float32)
    src = jnp.maximum((dst + 0.5) * scale - 0.5, 0.0)   # PyTorch align_corners=False convention
    i0 = jnp.minimum(jnp.floor(src).astype(jnp.int32), in_size - 1)
    i1 = jnp.minimum(i0 + 1, in_size - 1)
    w1 = src - i0.astype(jnp.float32)
    return i0, i1, 1.0 - w1, w1


def trilinear_resize_ndhwc(x, out_dhw):
    for axis, out_size in zip((1, 2, 3), out_dhw):
        i0, i1, w0, w1 = _linear_idx_w(out_size, x.shape[axis])
        x0 = jnp.take(x, i0, axis=axis)
        x1 = jnp.take(x, i1, axis=axis)
        bshape = [1] * x.ndim
        bshape[axis] = out_size
        x = x0 * w0.reshape(bshape) + x1 * w1.reshape(bshape)
    return x


# ----------------------------------------------------------------------------
# Decoder3D forward (eval semantics: BN running stats, Dropout identity).
# ----------------------------------------------------------------------------
def decoder3d_forward(params, x_ncdhw, enc_feats_ncdhw):
    nlev = len(params)
    x = jnp.transpose(x_ncdhw, (0, 2, 3, 4, 1)).astype(jnp.bfloat16)      # NCDHW -> NDHWC, bf16 HBM
    for i, p in enumerate(params):
        N, D, H, W, Cin = x.shape
        Cu = p["up_w"].shape[1]
        D2, H2, W2 = 2 * D, 2 * H, 2 * W

        # ---- ConvTranspose3d(k=2, s=2): one lane-dense bf16 matmul (Pallas) ----
        wup = _upconv_bd_weight(p["up_w"], W, jnp.bfloat16)
        bup = jnp.tile(p["up_b"], 8 * W).reshape(1, 8 * W * Cu).astype(jnp.float32)
        y = upconv(x.reshape(N, D * H, W * Cin), wup, bup)                 # (N, D*H, 8*W*Cu) bf16
        # 2x2x2 interleave (stride == kernel -> taps never overlap): columns are already (kd,kh,w2,c)
        # blocks, so only row dims move and W2*Cu-contiguous runs stay intact on the lane axis.
        up = y.reshape(N, D, H, 2, 2, W2 * Cu)
        up = jnp.transpose(up, (0, 1, 3, 2, 4, 5)).reshape(N, D2, H2, W2 * Cu)

        # ---- encoder skip: trilinear "crop"; identity (skipped) when shapes already match ----
        enc = jnp.transpose(enc_feats_ncdhw[i], (0, 2, 3, 4, 1))
        if enc.shape[1:4] != (D2, H2, W2):
            enc = trilinear_resize_ndhwc(enc, (D2, H2, W2))
        Ce = enc.shape[-1]
        assert p["c1_w"].shape[1] == Cu + Ce

        # ---- torch.cat([x, encFeat], dim=1) fused onto the lane axis: [ (w2,cu) | (w2,ce) ] ----
        enc = enc.astype(jnp.bfloat16).reshape(N, D2, H2, W2 * Ce)
        cat = jnp.concatenate([up, enc], axis=-1)                          # (N, D2, H2, 128) bf16
        # zero halo: D by 2 (1 conv halo + 1 d-tile recompute row), H by 1
        cat = jnp.pad(cat, ((0, 0), (2, 2), (1, 1), (0, 0)))

        # ---- Block3D: conv1(cat) -> bn1 -> relu -> conv2 -> bn2 -> relu, ONE Pallas kernel ----
        C1 = p["c1_w"].shape[0]
        C2 = p["c2_w"].shape[0]
        w1k = _stack_taps_k([_conv3_banded(p["c1_w"][:, :Cu], W2),         # up-channel part of concat
                             _conv3_banded(p["c1_w"][:, Cu:], W2)],        # enc-channel part of concat
                            jnp.bfloat16)                                  # (9*W2*(Cu+Ce), W2*C1)
        w2k = _stack_taps_k([_conv3_banded(p["c2_w"], W2)], jnp.bfloat16)  # (9*W2*C1, W2*C2)
        s1, b1 = _bn_fold(p["c1_b"], p["bn1_g"], p["bn1_b"], p["bn1_m"], p["bn1_v"])
        s2, b2 = _bn_fold(p["c2_b"], p["bn2_g"], p["bn2_b"], p["bn2_m"], p["bn2_v"])
        s1t = jnp.tile(s1, W2).reshape(1, W2 * C1)
        b1t = jnp.tile(b1, W2).reshape(1, W2 * C1)
        s2t = jnp.tile(s2, 2 * W2).reshape(1, 2 * W2 * C2)
        b2t = jnp.tile(b2, 2 * W2).reshape(1, 2 * W2 * C2)

        TD = 4 if D2 % 4 == 0 else D2                                      # d-tile depth (grid axis)
        out_dtype = jnp.float32 if i == nlev - 1 else jnp.bfloat16
        out2d = block3d(cat, w1k, s1t, b1t, w2k, s2t, b2t,
                        D=D2, H=H2, TD=TD, Kin=W2 * (Cu + Ce),
                        C1lane=W2 * C1, C2lane=W2 * C2, out_dtype=out_dtype)
        x = out2d.reshape(N, D2, H2, W2, C2)                               # free row-major reshape
    return jnp.transpose(x, (0, 4, 1, 2, 3)).astype(jnp.float32)           # NDHWC -> NCDHW


def init_params(key, channels=(16, 8, 4)):
    params = []
    for i in range(len(channels) - 1):
        cin, cout = channels[i], channels[i + 1]
        ks = jax.random.split(jax.random.fold_in(key, i), 16)
        p = {
            # ConvTranspose3d(cin, cout, k=2, s=2): weight (Cin, Cout, 2, 2, 2)
            "up_w": 0.1 * jax.random.normal(ks[0], (cin, cout, 2, 2, 2), jnp.float32),
            "up_b": 0.1 * jax.random.normal(ks[1], (cout,), jnp.float32),
            # Block3D(cin, cout)
            "c1_w": 0.1 * jax.random.normal(ks[2], (cout, cin, 3, 3, 3), jnp.float32),
            "c1_b": 0.1 * jax.random.normal(ks[3], (cout,), jnp.float32),
            "bn1_g": 1.0 + 0.1 * jax.random.normal(ks[4], (cout,), jnp.float32),
            "bn1_b": 0.1 * jax.random.normal(ks[5], (cout,), jnp.float32),
            "bn1_m": 0.1 * jax.random.normal(ks[6], (cout,), jnp.float32),
            "bn1_v": jax.random.uniform(ks[7], (cout,), jnp.float32, 0.5, 1.5),
            "c2_w": 0.1 * jax.random.normal(ks[8], (cout, cout, 3, 3, 3), jnp.float32),
            "c2_b": 0.1 * jax.random.normal(ks[9], (cout,), jnp.float32),
            "bn2_g": 1.0 + 0.1 * jax.random.normal(ks[10], (cout,), jnp.float32),
            "bn2_b": 0.1 * jax.random.normal(ks[11], (cout,), jnp.float32),
            "bn2_m": 0.1 * jax.random.normal(ks[12], (cout,), jnp.float32),
            "bn2_v": jax.random.uniform(ks[13], (cout,), jnp.float32, 0.5, 1.5),
        }
        params.append(p)
    return params


if __name__ == "__main__":
    key = jax.random.PRNGKey(0)
    channels = (16, 8, 4)
    params = init_params(key, channels)

    # Bottleneck input: (N=2, C=16, D=H=W=4); encoder skip features at the two decoder levels.
    kx, k0, k1 = jax.random.split(jax.random.fold_in(key, 99), 3)
    x = jax.random.normal(kx, (2, 16, 4, 4, 4), jnp.float32)
    enc_feats = [
        jax.random.normal(k0, (2, 8, 8, 8, 8), jnp.float32),      # level-0 skip (C=8)
        jax.random.normal(k1, (2, 4, 16, 16, 16), jnp.float32),   # level-1 skip (C=4)
    ]

    fwd = jax.jit(decoder3d_forward)
    out = jax.block_until_ready(fwd(params, x, enc_feats))
    assert out.shape == (2, 4, 16, 16, 16), out.shape
    assert bool(jnp.isfinite(out).all())
    print("KERNEL_OK")
</pallas_src>

<mosaic_0001>
module attributes {stable_mosaic.version = 11 : i64} {
  func.func @_upconv_kernel(%arg0: i32, %arg1: memref<1x16x64xbf16, #tpu.memory_space<vmem>>, %arg2: memref<64x256xbf16, #tpu.memory_space<vmem>>, %arg3: memref<1x256xf32, #tpu.memory_space<vmem>>, %arg4: memref<1x16x256xbf16, #tpu.memory_space<vmem>>) attributes {dimension_semantics = [#tpu.dimension_semantics<parallel>], iteration_bounds = array<i64: 2>, scalar_prefetch = 0 : i64, scratch_operands = 0 : i64, tpu.core_type = #tpu.core_type<tc>, window_params = [{transform_indices = @transform_0, window_bounds = array<i64: 1, 16, 64>}, {pipeline_mode = #tpu.pipeline_mode<synchronous>, transform_indices = @transform_1, window_bounds = array<i64: 64, 256>}, {pipeline_mode = #tpu.pipeline_mode<synchronous>, transform_indices = @transform_2, window_bounds = array<i64: 1, 256>}, {transform_indices = @transform_3, window_bounds = array<i64: 1, 16, 256>}]} {
    %c0 = arith.constant 0 : index
    %c0_0 = arith.constant 0 : index
    %c0_1 = arith.constant 0 : index
    %0 = vector.load %arg1[%c0, %c0_0, %c0_1] : memref<1x16x64xbf16, #tpu.memory_space<vmem>>, vector<1x16x64xbf16>
    %1 = vector.shape_cast %0 : vector<1x16x64xbf16> to vector<16x64xbf16>
    %c0_2 = arith.constant 0 : index
    %c0_3 = arith.constant 0 : index
    %2 = vector.load %arg2[%c0_2, %c0_3] : memref<64x256xbf16, #tpu.memory_space<vmem>>, vector<64x256xbf16>
    %cst = arith.constant dense<0.000000e+00> : vector<16x256xf32>
    %3 = tpu.matmul %1, %2, %cst {dimension_numbers = #tpu.dot_dimension_numbers<[1], [0], [0], [1], [0, 0, 1, 1], [], []>} : vector<16x64xbf16>, vector<64x256xbf16>, vector<16x256xf32> -> vector<16x256xf32>
    %c0_4 = arith.constant 0 : index
    %c0_5 = arith.constant 0 : index
    %4 = vector.load %arg3[%c0_4, %c0_5] : memref<1x256xf32, #tpu.memory_space<vmem>>, vector<1x256xf32>
    %5 = vector.broadcast %4 : vector<1x256xf32> to vector<16x256xf32>
    %6 = arith.addf %3, %5 : vector<16x256xf32>
    %7 = arith.truncf %6 : vector<16x256xf32> to vector<16x256xbf16>
    %c0_6 = arith.constant 0 : index
    %c0_7 = arith.constant 0 : index
    %c0_8 = arith.constant 0 : index
    %8 = vector.load %arg4[%c0_6, %c0_7, %c0_8] : memref<1x16x256xbf16, #tpu.memory_space<vmem>>, vector<1x16x256xbf16>
    %9 = vector.shape_cast %8 : vector<1x16x256xbf16> to vector<16x256xbf16>
    %10 = vector.shape_cast %7 : vector<16x256xbf16> to vector<1x16x256xbf16>
    tpu.vector_store %arg4[%c0_6, %c0_7, %c0_8], %10 {strides = array<i32>} : memref<1x16x256xbf16, #tpu.memory_space<vmem>>, vector<1x16x256xbf16>,
    return
  }
  func.func @transform_0(%arg0: i32) -> (i32, i32, i32) {
    %c0_i32 = arith.constant 0 : i32
    %c0_i32_0 = arith.constant 0 : i32
    %c0_i32_1 = arith.constant 0 : i32
    return %arg0, %c0_i32, %c0_i32_0 : i32, i32, i32
  }
  func.func @transform_1(%arg0: i32) -> (i32, i32) {
    %c0_i32 = arith.constant 0 : i32
    %c0_i32_0 = arith.constant 0 : i32
    %c0_i32_1 = arith.constant 0 : i32
    return %c0_i32, %c0_i32_0 : i32, i32
  }
  func.func @transform_2(%arg0: i32) -> (i32, i32) {
    %c0_i32 = arith.constant 0 : i32
    %c0_i32_0 = arith.constant 0 : i32
    %c0_i32_1 = arith.constant 0 : i32
    return %c0_i32, %c0_i32_0 : i32, i32
  }
  func.func @transform_3(%arg0: i32) -> (i32, i32, i32) {
    %c0_i32 = arith.constant 0 : i32
    %c0_i32_0 = arith.constant 0 : i32
    %c0_i32_1 = arith.constant 0 : i32
    return %arg0, %c0_i32, %c0_i32_0 : i32, i32, i32
  }
}

module attributes {stable_mosaic.version = 11 : i64} {
  func.func @_block3d_kernel(%arg0: i32, %arg1: i32, %arg2: memref<1x12x10x128xbf16, #tpu.memory_space<vmem>>, %arg3: memref<1152x64xbf16, #tpu.memory_space<vmem>>, %arg4: memref<1x64xf32, #tpu.memory_space<vmem>>, %arg5: memref<1x64xf32, #tpu.memory_space<vmem>>, %arg6: memref<576x64xbf16, #tpu.memory_space<vmem>>, %arg7: memref<1x128xf32, #tpu.memory_space<vmem>>, %arg8: memref<1x128xf32, #tpu.memory_space<vmem>>, %arg9: memref<1x16x128xbf16, #tpu.memory_space<vmem>>, %arg10: memref<48x1152xbf16, #tpu.memory_space<vmem>>, %arg11: memref<6x10x64xbf16, #tpu.memory_space<vmem>>, %arg12: memref<32x576xbf16, #tpu.memory_space<vmem>>) attributes {dimension_semantics = [#tpu.dimension_semantics<parallel>, #tpu.dimension_semantics<parallel>], iteration_bounds = array<i64: 2, 2>, scalar_prefetch = 0 : i64, scratch_operands = 3 : i64, tpu.core_type = #tpu.core_type<tc>, window_params = [{transform_indices = @transform_0, window_bounds = array<i64: 1, 12, 10, 128>}, {pipeline_mode = #tpu.pipeline_mode<synchronous>, transform_indices = @transform_1, window_bounds = array<i64: 1152, 64>}, {pipeline_mode = #tpu.pipeline_mode<synchronous>, transform_indices = @transform_2, window_bounds = array<i64: 1, 64>}, {pipeline_mode = #tpu.pipeline_mode<synchronous>, transform_indices = @transform_3, window_bounds = array<i64: 1, 64>}, {pipeline_mode = #tpu.pipeline_mode<synchronous>, transform_indices = @transform_4, window_bounds = array<i64: 576, 64>}, {pipeline_mode = #tpu.pipeline_mode<synchronous>, transform_indices = @transform_5, window_bounds = array<i64: 1, 128>}, {pipeline_mode = #tpu.pipeline_mode<synchronous>, transform_indices = @transform_6, window_bounds = array<i64: 1, 128>}, {transform_indices = @transform_7, window_bounds = array<i64: 1, 16, 128>}]} {
    %c4_i32 = arith.constant 4 : i32
    %0 = arith.muli %arg1, %c4_i32 : i32
    %1 = tpu.assume_multiple %0, 4 : i32
    %c0_i32 = arith.constant 0 : i32
    %2 = arith.addi %1, %c0_i32 : i32
    %c0 = arith.constant 0 : index
    %3 = arith.index_cast %2 : i32 to index
    %c0_0 = arith.constant 0 : index
    %c0_1 = arith.constant 0 : index
    %4 = vector.load %arg2[%c0, %3, %c0_0, %c0_1] : memref<1x12x10x128xbf16, #tpu.memory_space<vmem>>, vector<1x6x8x128xbf16>
    %5 = vector.shape_cast %4 : vector<1x6x8x128xbf16> to vector<6x8x128xbf16>
    %6 = vector.shape_cast %5 : vector<6x8x128xbf16> to vector<48x128xbf16>
    %c0_2 = arith.constant 0 : index
    %c0_3 = arith.constant 0 : index
    %7 = vector.load %arg10[%c0_2, %c0_3] : memref<48x1152xbf16, #tpu.memory_space<vmem>>, vector<48x128xbf16>
    tpu.vector_store %arg10[%c0_2, %c0_3], %6 {strides = array<i32>} : memref<48x1152xbf16, #tpu.memory_space<vmem>>, vector<48x128xbf16>,
    %c0_i32_4 = arith.constant 0 : i32
    %8 = arith.addi %1, %c0_i32_4 : i32
    %c0_5 = arith.constant 0 : index
    %9 = arith.index_cast %8 : i32 to index
    %c1 = arith.constant 1 : index
    %c0_6 = arith.constant 0 : index
    %10 = vector.load %arg2[%c0_5, %9, %c1, %c0_6] : memref<1x12x10x128xbf16, #tpu.memory_space<vmem>>, vector<1x6x8x128xbf16>
    %11 = vector.shape_cast %10 : vector<1x6x8x128xbf16> to vector<6x8x128xbf16>
    %12 = vector.shape_cast %11 : vector<6x8x128xbf16> to vector<48x128xbf16>
    %c0_7 = arith.constant 0 : index
    %c128 = arith.constant 128 : index
    %13 = vector.load %arg10[%c0_7, %c128] : memref<48x1152xbf16, #tpu.memory_space<vmem>>, vector<48x128xbf16>
    tpu.vector_store %arg10[%c0_7, %c128], %12 {strides = array<i32>} : memref<48x1152xbf16, #tpu.memory_space<vmem>>, vector<48x128xbf16>,
    %c0_i32_8 = arith.constant 0 : i32
    %14 = arith.addi %1, %c0_i32_8 : i32
    %c0_9 = arith.constant 0 : index
    %15 = arith.index_cast %14 : i32 to index
    %c2 = arith.constant 2 : index
    %c0_10 = arith.constant 0 : index
    %16 = vector.load %arg2[%c0_9, %15, %c2, %c0_10] : memref<1x12x10x128xbf16, #tpu.memory_space<vmem>>, vector<1x6x8x128xbf16>
    %17 = vector.shape_cast %16 : vector<1x6x8x128xbf16> to vector<6x8x128xbf16>
    %18 = vector.shape_cast %17 : vector<6x8x128xbf16> to vector<48x128xbf16>
    %c0_11 = arith.constant 0 : index
    %c256 = arith.constant 256 : index
    %19 = vector.load %arg10[%c0_11, %c256] : memref<48x1152xbf16, #tpu.memory_space<vmem>>, vector<48x128xbf16>
    tpu.vector_store %arg10[%c0_11, %c256], %18 {strides = array<i32>} : memref<48x1152xbf16, #tpu.memory_space<vmem>>, vector<48x128xbf16>,
    %c1_i32 = arith.constant 1 : i32
    %20 = arith.addi %1, %c1_i32 : i32
    %c0_12 = arith.constant 0 : index
    %21 = arith.index_cast %20 : i32 to index
    %c0_13 = arith.constant 0 : index
    %c0_14 = arith.constant 0 : index
    %22 = vector.load %arg2[%c0_12, %21, %c0_13, %c0_14] : memref<1x12x10x128xbf16, #tpu.memory_space<vmem>>, vector<1x6x8x128xbf16>
    %23 = vector.shape_cast %22 : vector<1x6x8x128xbf16> to vector<6x8x128xbf16>
    %24 = vector.shape_cast %23 : vector<6x8x128xbf16> to vector<48x128xbf16>
    %c0_15 = arith.constant 0 : index
    %c384 = arith.constant 384 : index
    %25 = vector.load %arg10[%c0_15, %c384] : memref<48x1152xbf16, #tpu.memory_space<vmem>>, vector<48x128xbf16>
    tpu.vector_store %arg10[%c0_15, %c384], %24 {strides = array<i32>} : memref<48x1152xbf16, #tpu.memory_space<vmem>>, vector<48x128xbf16>,
    %c1_i32_16 = arith.constant 1 : i32
    %26 = arith.addi %1, %c1_i32_16 : i32
    %c0_17 = arith.constant 0 : index
    %27 = arith.index_cast %26 : i32 to index
    %c1_18 = arith.constant 1 : index
    %c0_19 = arith.constant 0 : index
    %28 = vector.load %arg2[%c0_17, %27, %c1_18, %c0_19] : memref<1x12x10x128xbf16, #tpu.memory_space<vmem>>, vector<1x6x8x128xbf16>
    %29 = vector.shape_cast %28 : vector<1x6x8x128xbf16> to vector<6x8x128xbf16>
    %30 = vector.shape_cast %29 : vector<6x8x128xbf16> to vector<48x128xbf16>
    %c0_20 = arith.constant 0 : index
    %c512 = arith.constant 512 : index
    %31 = vector.load %arg10[%c0_20, %c512] : memref<48x1152xbf16, #tpu.memory_space<vmem>>, vector<48x128xbf16>
    tpu.vector_store %arg10[%c0_20, %c512], %30 {strides = array<i32>} : memref<48x1152xbf16, #tpu.memory_space<vmem>>, vector<48x128xbf16>,
    %c1_i32_21 = arith.constant 1 : i32
    %32 = arith.addi %1, %c1_i32_21 : i32
    %c0_22 = arith.constant 0 : index
    %33 = arith.index_cast %32 : i32 to index
    %c2_23 = arith.constant 2 : index
    %c0_24 = arith.constant 0 : index
    %34 = vector.load %arg2[%c0_22, %33, %c2_23, %c0_24] : memref<1x12x10x128xbf16, #tpu.memory_space<vmem>>, vector<1x6x8x128xbf16>
    %35 = vector.shape_cast %34 : vector<1x6x8x128xbf16> to vector<6x8x128xbf16>
    %36 = vector.shape_cast %35 : vector<6x8x128xbf16> to vector<48x128xbf16>
    %c0_25 = arith.constant 0 : index
    %c640 = arith.constant 640 : index
    %37 = vector.load %arg10[%c0_25, %c640] : memref<48x1152xbf16, #tpu.memory_space<vmem>>, vector<48x128xbf16>
    tpu.vector_store %arg10[%c0_25, %c640], %36 {strides = array<i32>} : memref<48x1152xbf16, #tpu.memory_space<vmem>>, vector<48x128xbf16>,
    %c2_i32 = arith.constant 2 : i32
    %38 = arith.addi %1, %c2_i32 : i32
    %c0_26 = arith.constant 0 : index
    %39 = arith.index_cast %38 : i32 to index
    %c0_27 = arith.constant 0 : index
    %c0_28 = arith.constant 0 : index
    %40 = vector.load %arg2[%c0_26, %39, %c0_27, %c0_28] : memref<1x12x10x128xbf16, #tpu.memory_space<vmem>>, vector<1x6x8x128xbf16>
    %41 = vector.shape_cast %40 : vector<1x6x8x128xbf16> to vector<6x8x128xbf16>
    %42 = vector.shape_cast %41 : vector<6x8x128xbf16> to vector<48x128xbf16>
    %c0_29 = arith.constant 0 : index
    %c768 = arith.constant 768 : index
    %43 = vector.load %arg10[%c0_29, %c768] : memref<48x1152xbf16, #tpu.memory_space<vmem>>, vector<48x128xbf16>
    tpu.vector_store %arg10[%c0_29, %c768], %42 {strides = array<i32>} : memref<48x1152xbf16, #tpu.memory_space<vmem>>, vector<48x128xbf16>,
    %c2_i32_30 = arith.constant 2 : i32
    %44 = arith.addi %1, %c2_i32_30 : i32
    %c0_31 = arith.constant 0 : index
    %45 = arith.index_cast %44 : i32 to index
    %c1_32 = arith.constant 1 : index
    %c0_33 = arith.constant 0 : index
    %46 = vector.load %arg2[%c0_31, %45, %c1_32, %c0_33] : memref<1x12x10x128xbf16, #tpu.memory_space<vmem>>, vector<1x6x8x128xbf16>
    %47 = vector.shape_cast %46 : vector<1x6x8x128xbf16> to vector<6x8x128xbf16>
    %48 = vector.shape_cast %47 : vector<6x8x128xbf16> to vector<48x128xbf16>
    %c0_34 = arith.constant 0 : index
    %c896 = arith.constant 896 : index
    %49 = vector.load %arg10[%c0_34, %c896] : memref<48x1152xbf16, #tpu.memory_space<vmem>>, vector<48x128xbf16>
    tpu.vector_store %arg10[%c0_34, %c896], %48 {strides = array<i32>} : memref<48x1152xbf16, #tpu.memory_space<vmem>>, vector<48x128xbf16>,
    %c2_i32_35 = arith.constant 2 : i32
    %50 = arith.addi %1, %c2_i32_35 : i32
    %c0_36 = arith.constant 0 : index
    %51 = arith.index_cast %50 : i32 to index
    %c2_37 = arith.constant 2 : index
    %c0_38 = arith.constant 0 : index
    %52 = vector.load %arg2[%c0_36, %51, %c2_37, %c0_38] : memref<1x12x10x128xbf16, #tpu.memory_space<vmem>>, vector<1x6x8x128xbf16>
    %53 = vector.shape_cast %52 : vector<1x6x8x128xbf16> to vector<6x8x128xbf16>
    %54 = vector.shape_cast %53 : vector<6x8x128xbf16> to vector<48x128xbf16>
    %c0_39 = arith.constant 0 : index
    %c1024 = arith.constant 1024 : index
    %55 = vector.load %arg10[%c0_39, %c1024] : memref<48x1152xbf16, #tpu.memory_space<vmem>>, vector<48x128xbf16>
    tpu.vector_store %arg10[%c0_39, %c1024], %54 {strides = array<i32>} : memref<48x1152xbf16, #tpu.memory_space<vmem>>, vector<48x128xbf16>,
    %c0_40 = arith.constant 0 : index
    %c0_41 = arith.constant 0 : index
    %56 = vector.load %arg10[%c0_40, %c0_41] : memref<48x1152xbf16, #tpu.memory_space<vmem>>, vector<48x1152xbf16>
    %c0_42 = arith.constant 0 : index
    %c0_43 = arith.constant 0 : index
    %57 = vector.load %arg3[%c0_42, %c0_43] : memref<1152x64xbf16, #tpu.memory_space<vmem>>, vector<1152x64xbf16>
    %cst = arith.constant dense<0.000000e+00> : vector<48x64xf32>
    %58 = tpu.matmul %56, %57, %cst {dimension_numbers = #tpu.dot_dimension_numbers<[1], [0], [0], [1], [0, 0, 1, 1], [], []>} : vector<48x1152xbf16>, vector<1152x64xbf16>, vector<48x64xf32> -> vector<48x64xf32>
    %c0_44 = arith.constant 0 : index
    %c0_45 = arith.constant 0 : index
    %59 = vector.load %arg4[%c0_44, %c0_45] : memref<1x64xf32, #tpu.memory_space<vmem>>, vector<1x64xf32>
    %60 = vector.broadcast %59 : vector<1x64xf32> to vector<48x64xf32>
    %61 = arith.mulf %58, %60 : vector<48x64xf32>
    %c0_46 = arith.constant 0 : index
    %c0_47 = arith.constant 0 : index
    %62 = vector.load %arg5[%c0_46, %c0_47] : memref<1x64xf32, #tpu.memory_space<vmem>>, vector<1x64xf32>
    %63 = vector.broadcast %62 : vector<1x64xf32> to vector<48x64xf32>
    %64 = arith.addf %61, %63 : vector<48x64xf32>
    %cst_48 = arith.constant 0.000000e+00 : f32
    %65 = vector.broadcast %cst_48 : f32 to vector<48x64xf32>
    %66 = arith.maximumf %64, %65 : vector<48x64xf32>
    %67 = vector.shape_cast %66 : vector<48x64xf32> to vector<6x8x64xf32>
    %68 = arith.truncf %67 : vector<6x8x64xf32> to vector<6x8x64xbf16>
    %c0_49 = arith.constant 0 : index
    %c1_50 = arith.constant 1 : index
    %c0_51 = arith.constant 0 : index
    %69 = vector.load %arg11[%c0_49, %c1_50, %c0_51] : memref<6x10x64xbf16, #tpu.memory_space<vmem>>, vector<6x8x64xbf16>
    tpu.vector_store %arg11[%c0_49, %c1_50, %c0_51], %68 {strides = array<i32>} : memref<6x10x64xbf16, #tpu.memory_space<vmem>>, vector<6x8x64xbf16>,
    %cst_52 = arith.constant 0.000000e+00 : bf16
    %70 = vector.broadcast %cst_52 : bf16 to vector<6x64xbf16>
    %c0_53 = arith.constant 0 : index
    %c0_54 = arith.constant 0 : index
    %c0_55 = arith.constant 0 : index
    %71 = vector.load %arg11[%c0_53, %c0_54, %c0_55] : memref<6x10x64xbf16, #tpu.memory_space<vmem>>, vector<6x1x64xbf16>
    %72 = vector.shape_cast %71 : vector<6x1x64xbf16> to vector<6x64xbf16>
    %73 = vector.shape_cast %70 : vector<6x64xbf16> to vector<6x1x64xbf16>
    tpu.vector_store %arg11[%c0_53, %c0_54, %c0_55], %73 {strides = array<i32>} : memref<6x10x64xbf16, #tpu.memory_space<vmem>>, vector<6x1x64xbf16>,
    %c0_56 = arith.constant 0 : index
    %c9 = arith.constant 9 : index
    %c0_57 = arith.constant 0 : index
    %74 = vector.load %arg11[%c0_56, %c9, %c0_57] : memref<6x10x64xbf16, #tpu.memory_space<vmem>>, vector<6x1x64xbf16>
    %75 = vector.shape_cast %74 : vector<6x1x64xbf16> to vector<6x64xbf16>
    %76 = vector.shape_cast %70 : vector<6x64xbf16> to vector<6x1x64xbf16>
    tpu.vector_store %arg11[%c0_56, %c9, %c0_57], %76 {strides = array<i32>} : memref<6x10x64xbf16, #tpu.memory_space<vmem>>, vector<6x1x64xbf16>,
    %c0_i32_58 = arith.constant 0 : i32
    %77 = arith.cmpi eq, %arg1, %c0_i32_58 : i32
    %78 = arith.extui %77 : i1 to i32
    %c0_i32_59 = arith.constant 0 : i32
    %79 = arith.cmpi ne, %78, %c0_i32_59 : i32
    scf.if %79 {
      %cst_116 = arith.constant 0.000000e+00 : bf16
      %131 = vector.broadcast %cst_116 : bf16 to vector<10x64xbf16>
      %c0_117 = arith.constant 0 : index
      %c0_118 = arith.constant 0 : index
      %c0_119 = arith.constant 0 : index
      %132 = vector.load %arg11[%c0_117, %c0_118, %c0_119] : memref<6x10x64xbf16, #tpu.memory_space<vmem>>, vector<1x10x64xbf16>
      %133 = vector.shape_cast %132 : vector<1x10x64xbf16> to vector<10x64xbf16>
      %134 = vector.shape_cast %131 : vector<10x64xbf16> to vector<1x10x64xbf16>
      tpu.vector_store %arg11[%c0_117, %c0_118, %c0_119], %134 {strides = array<i32>} : memref<6x10x64xbf16, #tpu.memory_space<vmem>>, vector<1x10x64xbf16>,
    } else {
    }
    %c1_i32_60 = arith.constant 1 : i32
    %80 = arith.cmpi eq, %arg1, %c1_i32_60 : i32
    %81 = arith.extui %80 : i1 to i32
    %c0_i32_61 = arith.constant 0 : i32
    %82 = arith.cmpi ne, %81, %c0_i32_61 : i32
    scf.if %82 {
      %cst_116 = arith.constant 0.000000e+00 : bf16
      %131 = vector.broadcast %cst_116 : bf16 to vector<10x64xbf16>
      %c5 = arith.constant 5 : index
      %c0_117 = arith.constant 0 : index
      %c0_118 = arith.constant 0 : index
      %132 = vector.load %arg11[%c5, %c0_117, %c0_118] : memref<6x10x64xbf16, #tpu.memory_space<vmem>>, vector<1x10x64xbf16>
      %133 = vector.shape_cast %132 : vector<1x10x64xbf16> to vector<10x64xbf16>
      %134 = vector.shape_cast %131 : vector<10x64xbf16> to vector<1x10x64xbf16>
      tpu.vector_store %arg11[%c5, %c0_117, %c0_118], %134 {strides = array<i32>} : memref<6x10x64xbf16, #tpu.memory_space<vmem>>, vector<1x10x64xbf16>,
    } else {
    }
    %c0_62 = arith.constant 0 : index
    %c0_63 = arith.constant 0 : index
    %c0_64 = arith.constant 0 : index
    %83 = vector.load %arg11[%c0_62, %c0_63, %c0_64] : memref<6x10x64xbf16, #tpu.memory_space<vmem>>, vector<4x8x64xbf16>
    %84 = vector.shape_cast %83 : vector<4x8x64xbf16> to vector<32x64xbf16>
    %c0_65 = arith.constant 0 : index
    %c0_66 = arith.constant 0 : index
    %85 = vector.load %arg12[%c0_65, %c0_66] : memref<32x576xbf16, #tpu.memory_space<vmem>>, vector<32x64xbf16>
    tpu.vector_store %arg12[%c0_65, %c0_66], %84 {strides = array<i32>} : memref<32x576xbf16, #tpu.memory_space<vmem>>, vector<32x64xbf16>,
    %c0_67 = arith.constant 0 : index
    %c1_68 = arith.constant 1 : index
    %c0_69 = arith.constant 0 : index
    %86 = vector.load %arg11[%c0_67, %c1_68, %c0_69] : memref<6x10x64xbf16, #tpu.memory_space<vmem>>, vector<4x8x64xbf16>
    %87 = vector.shape_cast %86 : vector<4x8x64xbf16> to vector<32x64xbf16>
    %c0_70 = arith.constant 0 : index
    %c64 = arith.constant 64 : index
    %88 = vector.load %arg12[%c0_70, %c64] : memref<32x576xbf16, #tpu.memory_space<vmem>>, vector<32x64xbf16>
    tpu.vector_store %arg12[%c0_70, %c64], %87 {strides = array<i32>} : memref<32x576xbf16, #tpu.memory_space<vmem>>, vector<32x64xbf16>,
    %c0_71 = arith.constant 0 : index
    %c2_72 = arith.constant 2 : index
    %c0_73 = arith.constant 0 : index
    %89 = vector.load %arg11[%c0_71, %c2_72, %c0_73] : memref<6x10x64xbf16, #tpu.memory_space<vmem>>, vector<4x8x64xbf16>
    %90 = vector.shape_cast %89 : vector<4x8x64xbf16> to vector<32x64xbf16>
    %c0_74 = arith.constant 0 : index
    %c128_75 = arith.constant 128 : index
    %91 = vector.load %arg12[%c0_74, %c128_75] : memref<32x576xbf16, #tpu.memory_space<vmem>>, vector<32x64xbf16>
    tpu.vector_store %arg12[%c0_74, %c128_75], %90 {strides = array<i32>} : memref<32x576xbf16, #tpu.memory_space<vmem>>, vector<32x64xbf16>,
    %c1_76 = arith.constant 1 : index
    %c0_77 = arith.constant 0 : index
    %c0_78 = arith.constant 0 : index
    %92 = vector.load %arg11[%c1_76, %c0_77, %c0_78] : memref<6x10x64xbf16, #tpu.memory_space<vmem>>, vector<4x8x64xbf16>
    %93 = vector.shape_cast %92 : vector<4x8x64xbf16> to vector<32x64xbf16>
    %c0_79 = arith.constant 0 : index
    %c192 = arith.constant 192 : index
    %94 = vector.load %arg12[%c0_79, %c192] : memref<32x576xbf16, #tpu.memory_space<vmem>>, vector<32x64xbf16>
    tpu.vector_store %arg12[%c0_79, %c192], %93 {strides = array<i32>} : memref<32x576xbf16, #tpu.memory_space<vmem>>, vector<32x64xbf16>,
    %c1_80 = arith.constant 1 : index
    %c1_81 = arith.constant 1 : index
    %c0_82 = arith.constant 0 : index
    %95 = vector.load %arg11[%c1_80, %c1_81, %c0_82] : memref<6x10x64xbf16, #tpu.memory_space<vmem>>, vector<4x8x64xbf16>
    %96 = vector.shape_cast %95 : vector<4x8x64xbf16> to vector<32x64xbf16>
    %c0_83 = arith.constant 0 : index
    %c256_84 = arith.constant 256 : index
    %97 = vector.load %arg12[%c0_83, %c256_84] : memref<32x576xbf16, #tpu.memory_space<vmem>>, vector<32x64xbf16>
    tpu.vector_store %arg12[%c0_83, %c256_84], %96 {strides = array<i32>} : memref<32x576xbf16, #tpu.memory_space<vmem>>, vector<32x64xbf16>,
    %c1_85 = arith.constant 1 : index
    %c2_86 = arith.constant 2 : index
    %c0_87 = arith.constant 0 : index
    %98 = vector.load %arg11[%c1_85, %c2_86, %c0_87] : memref<6x10x64xbf16, #tpu.memory_space<vmem>>, vector<4x8x64xbf16>
    %99 = vector.shape_cast %98 : vector<4x8x64xbf16> to vector<32x64xbf16>
    %c0_88 = arith.constant 0 : index
    %c320 = arith.constant 320 : index
    %100 = vector.load %arg12[%c0_88, %c320] : memref<32x576xbf16, #tpu.memory_space<vmem>>, vector<32x64xbf16>
    tpu.vector_store %arg12[%c0_88, %c320], %99 {strides = array<i32>} : memref<32x576xbf16, #tpu.memory_space<vmem>>, vector<32x64xbf16>,
    %c2_89 = arith.constant 2 : index
    %c0_90 = arith.constant 0 : index
    %c0_91 = arith.constant 0 : index
    %101 = vector.load %arg11[%c2_89, %c0_90, %c0_91] : memref<6x10x64xbf16, #tpu.memory_space<vmem>>, vector<4x8x64xbf16>
    %102 = vector.shape_cast %101 : vector<4x8x64xbf16> to vector<32x64xbf16>
    %c0_92 = arith.constant 0 : index
    %c384_93 = arith.constant 384 : index
    %103 = vector.load %arg12[%c0_92, %c384_93] : memref<32x576xbf16, #tpu.memory_space<vmem>>, vector<32x64xbf16>
    tpu.vector_store %arg12[%c0_92, %c384_93], %102 {strides = array<i32>} : memref<32x576xbf16, #tpu.memory_space<vmem>>, vector<32x64xbf16>,
    %c2_94 = arith.constant 2 : index
    %c1_95 = arith.constant 1 : index
    %c0_96 = arith.constant 0 : index
    %104 = vector.load %arg11[%c2_94, %c1_95, %c0_96] : memref<6x10x64xbf16, #tpu.memory_space<vmem>>, vector<4x8x64xbf16>
    %105 = vector.shape_cast %104 : vector<4x8x64xbf16> to vector<32x64xbf16>
    %c0_97 = arith.constant 0 : index
    %c448 = arith.constant 448 : index
    %106 = vector.load %arg12[%c0_97, %c448] : memref<32x576xbf16, #tpu.memory_space<vmem>>, vector<32x64xbf16>
    tpu.vector_store %arg12[%c0_97, %c448], %105 {strides = array<i32>} : memref<32x576xbf16, #tpu.memory_space<vmem>>, vector<32x64xbf16>,
    %c2_98 = arith.constant 2 : index
    %c2_99 = arith.constant 2 : index
    %c0_100 = arith.constant 0 : index
    %107 = vector.load %arg11[%c2_98, %c2_99, %c0_100] : memref<6x10x64xbf16, #tpu.memory_space<vmem>>, vector<4x8x64xbf16>
    %108 = vector.shape_cast %107 : vector<4x8x64xbf16> to vector<32x64xbf16>
    %c0_101 = arith.constant 0 : index
    %c512_102 = arith.constant 512 : index
    %109 = vector.load %arg12[%c0_101, %c512_102] : memref<32x576xbf16, #tpu.memory_space<vmem>>, vector<32x64xbf16>
    tpu.vector_store %arg12[%c0_101, %c512_102], %108 {strides = array<i32>} : memref<32x576xbf16, #tpu.memory_space<vmem>>, vector<32x64xbf16>,
    %c0_103 = arith.constant 0 : index
    %c0_104 = arith.constant 0 : index
    %110 = vector.load %arg12[%c0_103, %c0_104] : memref<32x576xbf16, #tpu.memory_space<vmem>>, vector<32x576xbf16>
    %c0_105 = arith.constant 0 : index
    %c0_106 = arith.constant 0 : index
    %111 = vector.load %arg6[%c0_105, %c0_106] : memref<576x64xbf16, #tpu.memory_space<vmem>>, vector<576x64xbf16>
    %cst_107 = arith.constant dense<0.000000e+00> : vector<32x64xf32>
    %112 = tpu.matmul %110, %111, %cst_107 {dimension_numbers = #tpu.dot_dimension_numbers<[1], [0], [0], [1], [0, 0, 1, 1], [], []>} : vector<32x576xbf16>, vector<576x64xbf16>, vector<32x64xf32> -> vector<32x64xf32>
    %113 = vector.shape_cast %112 : vector<32x64xf32> to vector<16x2x64xf32>
    %114 = vector.extract_strided_slice %113 {offsets = [0, 0, 0], sizes = [16, 1, 64], strides = [1, 1, 1]} : vector<16x2x64xf32> to vector<16x1x64xf32>
    %115 = vector.shape_cast %114 : vector<16x1x64xf32> to vector<16x64xf32>
    %116 = vector.extract_strided_slice %113 {offsets = [0, 1, 0], sizes = [16, 1, 64], strides = [1, 1, 1]} : vector<16x2x64xf32> to vector<16x1x64xf32>
    %117 = vector.shape_cast %116 : vector<16x1x64xf32> to vector<16x64xf32>
    %118 = tpu.concatenate %115, %117 in 1 : vector<16x64xf32>, vector<16x64xf32> -> vector<16x128xf32>
    %c0_108 = arith.constant 0 : index
    %c0_109 = arith.constant 0 : index
    %119 = vector.load %arg7[%c0_108, %c0_109] : memref<1x128xf32, #tpu.memory_space<vmem>>, vector<1x128xf32>
    %120 = vector.broadcast %119 : vector<1x128xf32> to vector<16x128xf32>
    %121 = arith.mulf %118, %120 : vector<16x128xf32>
    %c0_110 = arith.constant 0 : index
    %c0_111 = arith.constant 0 : index
    %122 = vector.load %arg8[%c0_110, %c0_111] : memref<1x128xf32, #tpu.memory_space<vmem>>, vector<1x128xf32>
    %123 = vector.broadcast %122 : vector<1x128xf32> to vector<16x128xf32>
    %124 = arith.addf %121, %123 : vector<16x128xf32>
    %cst_112 = arith.constant 0.000000e+00 : f32
    %125 = vector.broadcast %cst_112 : f32 to vector<16x128xf32>
    %126 = arith.maximumf %124, %125 : vector<16x128xf32>
    %127 = arith.truncf %126 : vector<16x128xf32> to vector<16x128xbf16>
    %c0_113 = arith.constant 0 : index
    %c0_114 = arith.constant 0 : index
    %c0_115 = arith.constant 0 : index
    %128 = vector.load %arg9[%c0_113, %c0_114, %c0_115] : memref<1x16x128xbf16, #tpu.memory_space<vmem>>, vector<1x16x128xbf16>
    %129 = vector.shape_cast %128 : vector<1x16x128xbf16> to vector<16x128xbf16>
    %130 = vector.shape_cast %127 : vector<16x128xbf16> to vector<1x16x128xbf16>
    tpu.vector_store %arg9[%c0_113, %c0_114, %c0_115], %130 {strides = array<i32>} : memref<1x16x128xbf16, #tpu.memory_space<vmem>>, vector<1x16x128xbf16>,
    return
  }
  func.func @transform_0(%arg0: i32, %arg1: i32) -> (i32, i32, i32, i32) {
    %c0_i32 = arith.constant 0 : i32
    %c0_i32_0 = arith.constant 0 : i32
    %c0_i32_1 = arith.constant 0 : i32
    %c0_i32_2 = arith.constant 0 : i32
    return %arg0, %c0_i32, %c0_i32_0, %c0_i32_1 : i32, i32, i32, i32
  }
  func.func @transform_1(%arg0: i32, %arg1: i32) -> (i32, i32) {
    %c0_i32 = arith.constant 0 : i32
    %c0_i32_0 = arith.constant 0 : i32
    %c0_i32_1 = arith.constant 0 : i32
    return %c0_i32, %c0_i32_0 : i32, i32
  }
  func.func @transform_2(%arg0: i32, %arg1: i32) -> (i32, i32) {
    %c0_i32 = arith.constant 0 : i32
    %c0_i32_0 = arith.constant 0 : i32
    %c0_i32_1 = arith.constant 0 : i32
    return %c0_i32, %c0_i32_0 : i32, i32
  }
  func.func @transform_3(%arg0: i32, %arg1: i32) -> (i32, i32) {
    %c0_i32 = arith.constant 0 : i32
    %c0_i32_0 = arith.constant 0 : i32
    %c0_i32_1 = arith.constant 0 : i32
    return %c0_i32, %c0_i32_0 : i32, i32
  }
  func.func @transform_4(%arg0: i32, %arg1: i32) -> (i32, i32) {
    %c0_i32 = arith.constant 0 : i32
    %c0_i32_0 = arith.constant 0 : i32
    %c0_i32_1 = arith.constant 0 : i32
    return %c0_i32, %c0_i32_0 : i32, i32
  }
  func.func @transform_5(%arg0: i32, %arg1: i32) -> (i32, i32) {
    %c0_i32 = arith.constant 0 : i32
    %c0_i32_0 = arith.constant 0 : i32
    %c0_i32_1 = arith.constant 0 : i32
    return %c0_i32, %c0_i32_0 : i32, i32
  }
  func.func @transform_6(%arg0: i32, %arg1: i32) -> (i32, i32) {
    %c0_i32 = arith.constant 0 : i32
    %c0_i32_0 = arith.constant 0 : i32
    %c0_i32_1 = arith.constant 0 : i32
    return %c0_i32, %c0_i32_0 : i32, i32
  }
  func.func @transform_7(%arg0: i32, %arg1: i32) -> (i32, i32, i32) {
    %c0_i32 = arith.constant 0 : i32
    %c0_i32_0 = arith.constant 0 : i32
    return %arg0, %arg1, %c0_i32 : i32, i32, i32
  }
}

module attributes {stable_mosaic.version = 11 : i64} {
  func.func @_upconv_kernel(%arg0: i32, %arg1: memref<1x64x64xbf16, #tpu.memory_space<vmem>>, %arg2: memref<64x256xbf16, #tpu.memory_space<vmem>>, %arg3: memref<1x256xf32, #tpu.memory_space<vmem>>, %arg4: memref<1x64x256xbf16, #tpu.memory_space<vmem>>) attributes {dimension_semantics = [#tpu.dimension_semantics<parallel>], iteration_bounds = array<i64: 2>, scalar_prefetch = 0 : i64, scratch_operands = 0 : i64, tpu.core_type = #tpu.core_type<tc>, window_params = [{transform_indices = @transform_0, window_bounds = array<i64: 1, 64, 64>}, {pipeline_mode = #tpu.pipeline_mode<synchronous>, transform_indices = @transform_1, window_bounds = array<i64: 64, 256>}, {pipeline_mode = #tpu.pipeline_mode<synchronous>, transform_indices = @transform_2, window_bounds = array<i64: 1, 256>}, {transform_indices = @transform_3, window_bounds = array<i64: 1, 64, 256>}]} {
    %c0 = arith.constant 0 : index
    %c0_0 = arith.constant 0 : index
    %c0_1 = arith.constant 0 : index
    %0 = vector.load %arg1[%c0, %c0_0, %c0_1] : memref<1x64x64xbf16, #tpu.memory_space<vmem>>, vector<1x64x64xbf16>
    %1 = vector.shape_cast %0 : vector<1x64x64xbf16> to vector<64x64xbf16>
    %c0_2 = arith.constant 0 : index
    %c0_3 = arith.constant 0 : index
    %2 = vector.load %arg2[%c0_2, %c0_3] : memref<64x256xbf16, #tpu.memory_space<vmem>>, vector<64x256xbf16>
    %cst = arith.constant dense<0.000000e+00> : vector<64x256xf32>
    %3 = tpu.matmul %1, %2, %cst {dimension_numbers = #tpu.dot_dimension_numbers<[1], [0], [0], [1], [0, 0, 1, 1], [], []>} : vector<64x64xbf16>, vector<64x256xbf16>, vector<64x256xf32> -> vector<64x256xf32>
    %c0_4 = arith.constant 0 : index
    %c0_5 = arith.constant 0 : index
    %4 = vector.load %arg3[%c0_4, %c0_5] : memref<1x256xf32, #tpu.memory_space<vmem>>, vector<1x256xf32>
    %5 = vector.broadcast %4 : vector<1x256xf32> to vector<64x256xf32>
    %6 = arith.addf %3, %5 : vector<64x256xf32>
    %7 = arith.truncf %6 : vector<64x256xf32> to vector<64x256xbf16>
    %c0_6 = arith.constant 0 : index
    %c0_7 = arith.constant 0 : index
    %c0_8 = arith.constant 0 : index
    %8 = vector.load %arg4[%c0_6, %c0_7, %c0_8] : memref<1x64x256xbf16, #tpu.memory_space<vmem>>, vector<1x64x256xbf16>
    %9 = vector.shape_cast %8 : vector<1x64x256xbf16> to vector<64x256xbf16>
    %10 = vector.shape_cast %7 : vector<64x256xbf16> to vector<1x64x256xbf16>
    tpu.vector_store %arg4[%c0_6, %c0_7, %c0_8], %10 {strides = array<i32>} : memref<1x64x256xbf16, #tpu.memory_space<vmem>>, vector<1x64x256xbf16>,
    return
  }
  func.func @transform_0(%arg0: i32) -> (i32, i32, i32) {
    %c0_i32 = arith.constant 0 : i32
    %c0_i32_0 = arith.constant 0 : i32
    %c0_i32_1 = arith.constant 0 : i32
    return %arg0, %c0_i32, %c0_i32_0 : i32, i32, i32
  }
  func.func @transform_1(%arg0: i32) -> (i32, i32) {
    %c0_i32 = arith.constant 0 : i32
    %c0_i32_0 = arith.constant 0 : i32
    %c0_i32_1 = arith.constant 0 : i32
    return %c0_i32, %c0_i32_0 : i32, i32
  }
  func.func @transform_2(%arg0: i32) -> (i32, i32) {
    %c0_i32 = arith.constant 0 : i32
    %c0_i32_0 = arith.constant 0 : i32
    %c0_i32_1 = arith.constant 0 : i32
    return %c0_i32, %c0_i32_0 : i32, i32
  }
  func.func @transform_3(%arg0: i32) -> (i32, i32, i32) {
    %c0_i32 = arith.constant 0 : i32
    %c0_i32_0 = arith.constant 0 : i32
    %c0_i32_1 = arith.constant 0 : i32
    return %arg0, %c0_i32, %c0_i32_0 : i32, i32, i32
  }
}

module attributes {stable_mosaic.version = 11 : i64} {
  func.func @_block3d_kernel(%arg0: i32, %arg1: i32, %arg2: memref<1x20x18x128xbf16, #tpu.memory_space<vmem>>, %arg3: memref<1152x64xbf16, #tpu.memory_space<vmem>>, %arg4: memref<1x64xf32, #tpu.memory_space<vmem>>, %arg5: memref<1x64xf32, #tpu.memory_space<vmem>>, %arg6: memref<576x64xbf16, #tpu.memory_space<vmem>>, %arg7: memref<1x128xf32, #tpu.memory_space<vmem>>, %arg8: memref<1x128xf32, #tpu.memory_space<vmem>>, %arg9: memref<1x32x128xf32, #tpu.memory_space<vmem>>, %arg10: memref<96x1152xbf16, #tpu.memory_space<vmem>>, %arg11: memref<6x18x64xbf16, #tpu.memory_space<vmem>>, %arg12: memref<64x576xbf16, #tpu.memory_space<vmem>>) attributes {dimension_semantics = [#tpu.dimension_semantics<parallel>, #tpu.dimension_semantics<parallel>], iteration_bounds = array<i64: 2, 4>, scalar_prefetch = 0 : i64, scratch_operands = 3 : i64, tpu.core_type = #tpu.core_type<tc>, window_params = [{transform_indices = @transform_0, window_bounds = array<i64: 1, 20, 18, 128>}, {pipeline_mode = #tpu.pipeline_mode<synchronous>, transform_indices = @transform_1, window_bounds = array<i64: 1152, 64>}, {pipeline_mode = #tpu.pipeline_mode<synchronous>, transform_indices = @transform_2, window_bounds = array<i64: 1, 64>}, {pipeline_mode = #tpu.pipeline_mode<synchronous>, transform_indices = @transform_3, window_bounds = array<i64: 1, 64>}, {pipeline_mode = #tpu.pipeline_mode<synchronous>, transform_indices = @transform_4, window_bounds = array<i64: 576, 64>}, {pipeline_mode = #tpu.pipeline_mode<synchronous>, transform_indices = @transform_5, window_bounds = array<i64: 1, 128>}, {pipeline_mode = #tpu.pipeline_mode<synchronous>, transform_indices = @transform_6, window_bounds = array<i64: 1, 128>}, {transform_indices = @transform_7, window_bounds = array<i64: 1, 32, 128>}]} {
    %c4_i32 = arith.constant 4 : i32
    %0 = arith.muli %arg1, %c4_i32 : i32
    %1 = tpu.assume_multiple %0, 4 : i32
    %c0_i32 = arith.constant 0 : i32
    %2 = arith.addi %1, %c0_i32 : i32
    %c0 = arith.constant 0 : index
    %3 = arith.index_cast %2 : i32 to index
    %c0_0 = arith.constant 0 : index
    %c0_1 = arith.constant 0 : index
    %4 = vector.load %arg2[%c0, %3, %c0_0, %c0_1] : memref<1x20x18x128xbf16, #tpu.memory_space<vmem>>, vector<1x6x16x128xbf16>
    %5 = vector.shape_cast %4 : vector<1x6x16x128xbf16> to vector<6x16x128xbf16>
    %6 = vector.shape_cast %5 : vector<6x16x128xbf16> to vector<96x128xbf16>
    %c0_2 = arith.constant 0 : index
    %c0_3 = arith.constant 0 : index
    %7 = vector.load %arg10[%c0_2, %c0_3] : memref<96x1152xbf16, #tpu.memory_space<vmem>>, vector<96x128xbf16>
    tpu.vector_store %arg10[%c0_2, %c0_3], %6 {strides = array<i32>} : memref<96x1152xbf16, #tpu.memory_space<vmem>>, vector<96x128xbf16>,
    %c0_i32_4 = arith.constant 0 : i32
    %8 = arith.addi %1, %c0_i32_4 : i32
    %c0_5 = arith.constant 0 : index
    %9 = arith.index_cast %8 : i32 to index
    %c1 = arith.constant 1 : index
    %c0_6 = arith.constant 0 : index
    %10 = vector.load %arg2[%c0_5, %9, %c1, %c0_6] : memref<1x20x18x128xbf16, #tpu.memory_space<vmem>>, vector<1x6x16x128xbf16>
    %11 = vector.shape_cast %10 : vector<1x6x16x128xbf16> to vector<6x16x128xbf16>
    %12 = vector.shape_cast %11 : vector<6x16x128xbf16> to vector<96x128xbf16>
    %c0_7 = arith.constant 0 : index
    %c128 = arith.constant 128 : index
    %13 = vector.load %arg10[%c0_7, %c128] : memref<96x1152xbf16, #tpu.memory_space<vmem>>, vector<96x128xbf16>
    tpu.vector_store %arg10[%c0_7, %c128], %12 {strides = array<i32>} : memref<96x1152xbf16, #tpu.memory_space<vmem>>, vector<96x128xbf16>,
    %c0_i32_8 = arith.constant 0 : i32
    %14 = arith.addi %1, %c0_i32_8 : i32
    %c0_9 = arith.constant 0 : index
    %15 = arith.index_cast %14 : i32 to index
    %c2 = arith.constant 2 : index
    %c0_10 = arith.constant 0 : index
    %16 = vector.load %arg2[%c0_9, %15, %c2, %c0_10] : memref<1x20x18x128xbf16, #tpu.memory_space<vmem>>, vector<1x6x16x128xbf16>
    %17 = vector.shape_cast %16 : vector<1x6x16x128xbf16> to vector<6x16x128xbf16>
    %18 = vector.shape_cast %17 : vector<6x16x128xbf16> to vector<96x128xbf16>
    %c0_11 = arith.constant 0 : index
    %c256 = arith.constant 256 : index
    %19 = vector.load %arg10[%c0_11, %c256] : memref<96x1152xbf16, #tpu.memory_space<vmem>>, vector<96x128xbf16>
    tpu.vector_store %arg10[%c0_11, %c256], %18 {strides = array<i32>} : memref<96x1152xbf16, #tpu.memory_space<vmem>>, vector<96x128xbf16>,
    %c1_i32 = arith.constant 1 : i32
    %20 = arith.addi %1, %c1_i32 : i32
    %c0_12 = arith.constant 0 : index
    %21 = arith.index_cast %20 : i32 to index
    %c0_13 = arith.constant 0 : index
    %c0_14 = arith.constant 0 : index
    %22 = vector.load %arg2[%c0_12, %21, %c0_13, %c0_14] : memref<1x20x18x128xbf16, #tpu.memory_space<vmem>>, vector<1x6x16x128xbf16>
    %23 = vector.shape_cast %22 : vector<1x6x16x128xbf16> to vector<6x16x128xbf16>
    %24 = vector.shape_cast %23 : vector<6x16x128xbf16> to vector<96x128xbf16>
    %c0_15 = arith.constant 0 : index
    %c384 = arith.constant 384 : index
    %25 = vector.load %arg10[%c0_15, %c384] : memref<96x1152xbf16, #tpu.memory_space<vmem>>, vector<96x128xbf16>
    tpu.vector_store %arg10[%c0_15, %c384], %24 {strides = array<i32>} : memref<96x1152xbf16, #tpu.memory_space<vmem>>, vector<96x128xbf16>,
    %c1_i32_16 = arith.constant 1 : i32
    %26 = arith.addi %1, %c1_i32_16 : i32
    %c0_17 = arith.constant 0 : index
    %27 = arith.index_cast %26 : i32 to index
    %c1_18 = arith.constant 1 : index
    %c0_19 = arith.constant 0 : index
    %28 = vector.load %arg2[%c0_17, %27, %c1_18, %c0_19] : memref<1x20x18x128xbf16, #tpu.memory_space<vmem>>, vector<1x6x16x128xbf16>
    %29 = vector.shape_cast %28 : vector<1x6x16x128xbf16> to vector<6x16x128xbf16>
    %30 = vector.shape_cast %29 : vector<6x16x128xbf16> to vector<96x128xbf16>
    %c0_20 = arith.constant 0 : index
    %c512 = arith.constant 512 : index
    %31 = vector.load %arg10[%c0_20, %c512] : memref<96x1152xbf16, #tpu.memory_space<vmem>>, vector<96x128xbf16>
    tpu.vector_store %arg10[%c0_20, %c512], %30 {strides = array<i32>} : memref<96x1152xbf16, #tpu.memory_space<vmem>>, vector<96x128xbf16>,
    %c1_i32_21 = arith.constant 1 : i32
    %32 = arith.addi %1, %c1_i32_21 : i32
    %c0_22 = arith.constant 0 : index
    %33 = arith.index_cast %32 : i32 to index
    %c2_23 = arith.constant 2 : index
    %c0_24 = arith.constant 0 : index
    %34 = vector.load %arg2[%c0_22, %33, %c2_23, %c0_24] : memref<1x20x18x128xbf16, #tpu.memory_space<vmem>>, vector<1x6x16x128xbf16>
    %35 = vector.shape_cast %34 : vector<1x6x16x128xbf16> to vector<6x16x128xbf16>
    %36 = vector.shape_cast %35 : vector<6x16x128xbf16> to vector<96x128xbf16>
    %c0_25 = arith.constant 0 : index
    %c640 = arith.constant 640 : index
    %37 = vector.load %arg10[%c0_25, %c640] : memref<96x1152xbf16, #tpu.memory_space<vmem>>, vector<96x128xbf16>
    tpu.vector_store %arg10[%c0_25, %c640], %36 {strides = array<i32>} : memref<96x1152xbf16, #tpu.memory_space<vmem>>, vector<96x128xbf16>,
    %c2_i32 = arith.constant 2 : i32
    %38 = arith.addi %1, %c2_i32 : i32
    %c0_26 = arith.constant 0 : index
    %39 = arith.index_cast %38 : i32 to index
    %c0_27 = arith.constant 0 : index
    %c0_28 = arith.constant 0 : index
    %40 = vector.load %arg2[%c0_26, %39, %c0_27, %c0_28] : memref<1x20x18x128xbf16, #tpu.memory_space<vmem>>, vector<1x6x16x128xbf16>
    %41 = vector.shape_cast %40 : vector<1x6x16x128xbf16> to vector<6x16x128xbf16>
    %42 = vector.shape_cast %41 : vector<6x16x128xbf16> to vector<96x128xbf16>
    %c0_29 = arith.constant 0 : index
    %c768 = arith.constant 768 : index
    %43 = vector.load %arg10[%c0_29, %c768] : memref<96x1152xbf16, #tpu.memory_space<vmem>>, vector<96x128xbf16>
    tpu.vector_store %arg10[%c0_29, %c768], %42 {strides = array<i32>} : memref<96x1152xbf16, #tpu.memory_space<vmem>>, vector<96x128xbf16>,
    %c2_i32_30 = arith.constant 2 : i32
    %44 = arith.addi %1, %c2_i32_30 : i32
    %c0_31 = arith.constant 0 : index
    %45 = arith.index_cast %44 : i32 to index
    %c1_32 = arith.constant 1 : index
    %c0_33 = arith.constant 0 : index
    %46 = vector.load %arg2[%c0_31, %45, %c1_32, %c0_33] : memref<1x20x18x128xbf16, #tpu.memory_space<vmem>>, vector<1x6x16x128xbf16>
    %47 = vector.shape_cast %46 : vector<1x6x16x128xbf16> to vector<6x16x128xbf16>
    %48 = vector.shape_cast %47 : vector<6x16x128xbf16> to vector<96x128xbf16>
    %c0_34 = arith.constant 0 : index
    %c896 = arith.constant 896 : index
    %49 = vector.load %arg10[%c0_34, %c896] : memref<96x1152xbf16, #tpu.memory_space<vmem>>, vector<96x128xbf16>
    tpu.vector_store %arg10[%c0_34, %c896], %48 {strides = array<i32>} : memref<96x1152xbf16, #tpu.memory_space<vmem>>, vector<96x128xbf16>,
    %c2_i32_35 = arith.constant 2 : i32
    %50 = arith.addi %1, %c2_i32_35 : i32
    %c0_36 = arith.constant 0 : index
    %51 = arith.index_cast %50 : i32 to index
    %c2_37 = arith.constant 2 : index
    %c0_38 = arith.constant 0 : index
    %52 = vector.load %arg2[%c0_36, %51, %c2_37, %c0_38] : memref<1x20x18x128xbf16, #tpu.memory_space<vmem>>, vector<1x6x16x128xbf16>
    %53 = vector.shape_cast %52 : vector<1x6x16x128xbf16> to vector<6x16x128xbf16>
    %54 = vector.shape_cast %53 : vector<6x16x128xbf16> to vector<96x128xbf16>
    %c0_39 = arith.constant 0 : index
    %c1024 = arith.constant 1024 : index
    %55 = vector.load %arg10[%c0_39, %c1024] : memref<96x1152xbf16, #tpu.memory_space<vmem>>, vector<96x128xbf16>
    tpu.vector_store %arg10[%c0_39, %c1024], %54 {strides = array<i32>} : memref<96x1152xbf16, #tpu.memory_space<vmem>>, vector<96x128xbf16>,
    %c0_40 = arith.constant 0 : index
    %c0_41 = arith.constant 0 : index
    %56 = vector.load %arg10[%c0_40, %c0_41] : memref<96x1152xbf16, #tpu.memory_space<vmem>>, vector<96x1152xbf16>
    %c0_42 = arith.constant 0 : index
    %c0_43 = arith.constant 0 : index
    %57 = vector.load %arg3[%c0_42, %c0_43] : memref<1152x64xbf16, #tpu.memory_space<vmem>>, vector<1152x64xbf16>
    %cst = arith.constant dense<0.000000e+00> : vector<96x64xf32>
    %58 = tpu.matmul %56, %57, %cst {dimension_numbers = #tpu.dot_dimension_numbers<[1], [0], [0], [1], [0, 0, 1, 1], [], []>} : vector<96x1152xbf16>, vector<1152x64xbf16>, vector<96x64xf32> -> vector<96x64xf32>
    %c0_44 = arith.constant 0 : index
    %c0_45 = arith.constant 0 : index
    %59 = vector.load %arg4[%c0_44, %c0_45] : memref<1x64xf32, #tpu.memory_space<vmem>>, vector<1x64xf32>
    %60 = vector.broadcast %59 : vector<1x64xf32> to vector<96x64xf32>
    %61 = arith.mulf %58, %60 : vector<96x64xf32>
    %c0_46 = arith.constant 0 : index
    %c0_47 = arith.constant 0 : index
    %62 = vector.load %arg5[%c0_46, %c0_47] : memref<1x64xf32, #tpu.memory_space<vmem>>, vector<1x64xf32>
    %63 = vector.broadcast %62 : vector<1x64xf32> to vector<96x64xf32>
    %64 = arith.addf %61, %63 : vector<96x64xf32>
    %cst_48 = arith.constant 0.000000e+00 : f32
    %65 = vector.broadcast %cst_48 : f32 to vector<96x64xf32>
    %66 = arith.maximumf %64, %65 : vector<96x64xf32>
    %67 = vector.shape_cast %66 : vector<96x64xf32> to vector<6x16x64xf32>
    %68 = arith.truncf %67 : vector<6x16x64xf32> to vector<6x16x64xbf16>
    %c0_49 = arith.constant 0 : index
    %c1_50 = arith.constant 1 : index
    %c0_51 = arith.constant 0 : index
    %69 = vector.load %arg11[%c0_49, %c1_50, %c0_51] : memref<6x18x64xbf16, #tpu.memory_space<vmem>>, vector<6x16x64xbf16>
    tpu.vector_store %arg11[%c0_49, %c1_50, %c0_51], %68 {strides = array<i32>} : memref<6x18x64xbf16, #tpu.memory_space<vmem>>, vector<6x16x64xbf16>,
    %cst_52 = arith.constant 0.000000e+00 : bf16
    %70 = vector.broadcast %cst_52 : bf16 to vector<6x64xbf16>
    %c0_53 = arith.constant 0 : index
    %c0_54 = arith.constant 0 : index
    %c0_55 = arith.constant 0 : index
    %71 = vector.load %arg11[%c0_53, %c0_54, %c0_55] : memref<6x18x64xbf16, #tpu.memory_space<vmem>>, vector<6x1x64xbf16>
    %72 = vector.shape_cast %71 : vector<6x1x64xbf16> to vector<6x64xbf16>
    %73 = vector.shape_cast %70 : vector<6x64xbf16> to vector<6x1x64xbf16>
    tpu.vector_store %arg11[%c0_53, %c0_54, %c0_55], %73 {strides = array<i32>} : memref<6x18x64xbf16, #tpu.memory_space<vmem>>, vector<6x1x64xbf16>,
    %c0_56 = arith.constant 0 : index
    %c17 = arith.constant 17 : index
    %c0_57 = arith.constant 0 : index
    %74 = vector.load %arg11[%c0_56, %c17, %c0_57] : memref<6x18x64xbf16, #tpu.memory_space<vmem>>, vector<6x1x64xbf16>
    %75 = vector.shape_cast %74 : vector<6x1x64xbf16> to vector<6x64xbf16>
    %76 = vector.shape_cast %70 : vector<6x64xbf16> to vector<6x1x64xbf16>
    tpu.vector_store %arg11[%c0_56, %c17, %c0_57], %76 {strides = array<i32>} : memref<6x18x64xbf16, #tpu.memory_space<vmem>>, vector<6x1x64xbf16>,
    %c0_i32_58 = arith.constant 0 : i32
    %77 = arith.cmpi eq, %arg1, %c0_i32_58 : i32
    %78 = arith.extui %77 : i1 to i32
    %c0_i32_59 = arith.constant 0 : i32
    %79 = arith.cmpi ne, %78, %c0_i32_59 : i32
    scf.if %79 {
      %cst_115 = arith.constant 0.000000e+00 : bf16
      %130 = vector.broadcast %cst_115 : bf16 to vector<18x64xbf16>
      %c0_116 = arith.constant 0 : index
      %c0_117 = arith.constant 0 : index
      %c0_118 = arith.constant 0 : index
      %131 = vector.load %arg11[%c0_116, %c0_117, %c0_118] : memref<6x18x64xbf16, #tpu.memory_space<vmem>>, vector<1x18x64xbf16>
      %132 = vector.shape_cast %131 : vector<1x18x64xbf16> to vector<18x64xbf16>
      %133 = vector.shape_cast %130 : vector<18x64xbf16> to vector<1x18x64xbf16>
      tpu.vector_store %arg11[%c0_116, %c0_117, %c0_118], %133 {strides = array<i32>} : memref<6x18x64xbf16, #tpu.memory_space<vmem>>, vector<1x18x64xbf16>,
    } else {
    }
    %c3_i32 = arith.constant 3 : i32
    %80 = arith.cmpi eq, %arg1, %c3_i32 : i32
    %81 = arith.extui %80 : i1 to i32
    %c0_i32_60 = arith.constant 0 : i32
    %82 = arith.cmpi ne, %81, %c0_i32_60 : i32
    scf.if %82 {
      %cst_115 = arith.constant 0.000000e+00 : bf16
      %130 = vector.broadcast %cst_115 : bf16 to vector<18x64xbf16>
      %c5 = arith.constant 5 : index
      %c0_116 = arith.constant 0 : index
      %c0_117 = arith.constant 0 : index
      %131 = vector.load %arg11[%c5, %c0_116, %c0_117] : memref<6x18x64xbf16, #tpu.memory_space<vmem>>, vector<1x18x64xbf16>
      %132 = vector.shape_cast %131 : vector<1x18x64xbf16> to vector<18x64xbf16>
      %133 = vector.shape_cast %130 : vector<18x64xbf16> to vector<1x18x64xbf16>
      tpu.vector_store %arg11[%c5, %c0_116, %c0_117], %133 {strides = array<i32>} : memref<6x18x64xbf16, #tpu.memory_space<vmem>>, vector<1x18x64xbf16>,
    } else {
    }
    %c0_61 = arith.constant 0 : index
    %c0_62 = arith.constant 0 : index
    %c0_63 = arith.constant 0 : index
    %83 = vector.load %arg11[%c0_61, %c0_62, %c0_63] : memref<6x18x64xbf16, #tpu.memory_space<vmem>>, vector<4x16x64xbf16>
    %84 = vector.shape_cast %83 : vector<4x16x64xbf16> to vector<64x64xbf16>
    %c0_64 = arith.constant 0 : index
    %c0_65 = arith.constant 0 : index
    %85 = vector.load %arg12[%c0_64, %c0_65] : memref<64x576xbf16, #tpu.memory_space<vmem>>, vector<64x64xbf16>
    tpu.vector_store %arg12[%c0_64, %c0_65], %84 {strides = array<i32>} : memref<64x576xbf16, #tpu.memory_space<vmem>>, vector<64x64xbf16>,
    %c0_66 = arith.constant 0 : index
    %c1_67 = arith.constant 1 : index
    %c0_68 = arith.constant 0 : index
    %86 = vector.load %arg11[%c0_66, %c1_67, %c0_68] : memref<6x18x64xbf16, #tpu.memory_space<vmem>>, vector<4x16x64xbf16>
    %87 = vector.shape_cast %86 : vector<4x16x64xbf16> to vector<64x64xbf16>
    %c0_69 = arith.constant 0 : index
    %c64 = arith.constant 64 : index
    %88 = vector.load %arg12[%c0_69, %c64] : memref<64x576xbf16, #tpu.memory_space<vmem>>, vector<64x64xbf16>
    tpu.vector_store %arg12[%c0_69, %c64], %87 {strides = array<i32>} : memref<64x576xbf16, #tpu.memory_space<vmem>>, vector<64x64xbf16>,
    %c0_70 = arith.constant 0 : index
    %c2_71 = arith.constant 2 : index
    %c0_72 = arith.constant 0 : index
    %89 = vector.load %arg11[%c0_70, %c2_71, %c0_72] : memref<6x18x64xbf16, #tpu.memory_space<vmem>>, vector<4x16x64xbf16>
    %90 = vector.shape_cast %89 : vector<4x16x64xbf16> to vector<64x64xbf16>
    %c0_73 = arith.constant 0 : index
    %c128_74 = arith.constant 128 : index
    %91 = vector.load %arg12[%c0_73, %c128_74] : memref<64x576xbf16, #tpu.memory_space<vmem>>, vector<64x64xbf16>
    tpu.vector_store %arg12[%c0_73, %c128_74], %90 {strides = array<i32>} : memref<64x576xbf16, #tpu.memory_space<vmem>>, vector<64x64xbf16>,
    %c1_75 = arith.constant 1 : index
    %c0_76 = arith.constant 0 : index
    %c0_77 = arith.constant 0 : index
    %92 = vector.load %arg11[%c1_75, %c0_76, %c0_77] : memref<6x18x64xbf16, #tpu.memory_space<vmem>>, vector<4x16x64xbf16>
    %93 = vector.shape_cast %92 : vector<4x16x64xbf16> to vector<64x64xbf16>
    %c0_78 = arith.constant 0 : index
    %c192 = arith.constant 192 : index
    %94 = vector.load %arg12[%c0_78, %c192] : memref<64x576xbf16, #tpu.memory_space<vmem>>, vector<64x64xbf16>
    tpu.vector_store %arg12[%c0_78, %c192], %93 {strides = array<i32>} : memref<64x576xbf16, #tpu.memory_space<vmem>>, vector<64x64xbf16>,
    %c1_79 = arith.constant 1 : index
    %c1_80 = arith.constant 1 : index
    %c0_81 = arith.constant 0 : index
    %95 = vector.load %arg11[%c1_79, %c1_80, %c0_81] : memref<6x18x64xbf16, #tpu.memory_space<vmem>>, vector<4x16x64xbf16>
    %96 = vector.shape_cast %95 : vector<4x16x64xbf16> to vector<64x64xbf16>
    %c0_82 = arith.constant 0 : index
    %c256_83 = arith.constant 256 : index
    %97 = vector.load %arg12[%c0_82, %c256_83] : memref<64x576xbf16, #tpu.memory_space<vmem>>, vector<64x64xbf16>
    tpu.vector_store %arg12[%c0_82, %c256_83], %96 {strides = array<i32>} : memref<64x576xbf16, #tpu.memory_space<vmem>>, vector<64x64xbf16>,
    %c1_84 = arith.constant 1 : index
    %c2_85 = arith.constant 2 : index
    %c0_86 = arith.constant 0 : index
    %98 = vector.load %arg11[%c1_84, %c2_85, %c0_86] : memref<6x18x64xbf16, #tpu.memory_space<vmem>>, vector<4x16x64xbf16>
    %99 = vector.shape_cast %98 : vector<4x16x64xbf16> to vector<64x64xbf16>
    %c0_87 = arith.constant 0 : index
    %c320 = arith.constant 320 : index
    %100 = vector.load %arg12[%c0_87, %c320] : memref<64x576xbf16, #tpu.memory_space<vmem>>, vector<64x64xbf16>
    tpu.vector_store %arg12[%c0_87, %c320], %99 {strides = array<i32>} : memref<64x576xbf16, #tpu.memory_space<vmem>>, vector<64x64xbf16>,
    %c2_88 = arith.constant 2 : index
    %c0_89 = arith.constant 0 : index
    %c0_90 = arith.constant 0 : index
    %101 = vector.load %arg11[%c2_88, %c0_89, %c0_90] : memref<6x18x64xbf16, #tpu.memory_space<vmem>>, vector<4x16x64xbf16>
    %102 = vector.shape_cast %101 : vector<4x16x64xbf16> to vector<64x64xbf16>
    %c0_91 = arith.constant 0 : index
    %c384_92 = arith.constant 384 : index
    %103 = vector.load %arg12[%c0_91, %c384_92] : memref<64x576xbf16, #tpu.memory_space<vmem>>, vector<64x64xbf16>
    tpu.vector_store %arg12[%c0_91, %c384_92], %102 {strides = array<i32>} : memref<64x576xbf16, #tpu.memory_space<vmem>>, vector<64x64xbf16>,
    %c2_93 = arith.constant 2 : index
    %c1_94 = arith.constant 1 : index
    %c0_95 = arith.constant 0 : index
    %104 = vector.load %arg11[%c2_93, %c1_94, %c0_95] : memref<6x18x64xbf16, #tpu.memory_space<vmem>>, vector<4x16x64xbf16>
    %105 = vector.shape_cast %104 : vector<4x16x64xbf16> to vector<64x64xbf16>
    %c0_96 = arith.constant 0 : index
    %c448 = arith.constant 448 : index
    %106 = vector.load %arg12[%c0_96, %c448] : memref<64x576xbf16, #tpu.memory_space<vmem>>, vector<64x64xbf16>
    tpu.vector_store %arg12[%c0_96, %c448], %105 {strides = array<i32>} : memref<64x576xbf16, #tpu.memory_space<vmem>>, vector<64x64xbf16>,
    %c2_97 = arith.constant 2 : index
    %c2_98 = arith.constant 2 : index
    %c0_99 = arith.constant 0 : index
    %107 = vector.load %arg11[%c2_97, %c2_98, %c0_99] : memref<6x18x64xbf16, #tpu.memory_space<vmem>>, vector<4x16x64xbf16>
    %108 = vector.shape_cast %107 : vector<4x16x64xbf16> to vector<64x64xbf16>
    %c0_100 = arith.constant 0 : index
    %c512_101 = arith.constant 512 : index
    %109 = vector.load %arg12[%c0_100, %c512_101] : memref<64x576xbf16, #tpu.memory_space<vmem>>, vector<64x64xbf16>
    tpu.vector_store %arg12[%c0_100, %c512_101], %108 {strides = array<i32>} : memref<64x576xbf16, #tpu.memory_space<vmem>>, vector<64x64xbf16>,
    %c0_102 = arith.constant 0 : index
    %c0_103 = arith.constant 0 : index
    %110 = vector.load %arg12[%c0_102, %c0_103] : memref<64x576xbf16, #tpu.memory_space<vmem>>, vector<64x576xbf16>
    %c0_104 = arith.constant 0 : index
    %c0_105 = arith.constant 0 : index
    %111 = vector.load %arg6[%c0_104, %c0_105] : memref<576x64xbf16, #tpu.memory_space<vmem>>, vector<576x64xbf16>
    %cst_106 = arith.constant dense<0.000000e+00> : vector<64x64xf32>
    %112 = tpu.matmul %110, %111, %cst_106 {dimension_numbers = #tpu.dot_dimension_numbers<[1], [0], [0], [1], [0, 0, 1, 1], [], []>} : vector<64x576xbf16>, vector<576x64xbf16>, vector<64x64xf32> -> vector<64x64xf32>
    %113 = vector.shape_cast %112 : vector<64x64xf32> to vector<32x2x64xf32>
    %114 = vector.extract_strided_slice %113 {offsets = [0, 0, 0], sizes = [32, 1, 64], strides = [1, 1, 1]} : vector<32x2x64xf32> to vector<32x1x64xf32>
    %115 = vector.shape_cast %114 : vector<32x1x64xf32> to vector<32x64xf32>
    %116 = vector.extract_strided_slice %113 {offsets = [0, 1, 0], sizes = [32, 1, 64], strides = [1, 1, 1]} : vector<32x2x64xf32> to vector<32x1x64xf32>
    %117 = vector.shape_cast %116 : vector<32x1x64xf32> to vector<32x64xf32>
    %118 = tpu.concatenate %115, %117 in 1 : vector<32x64xf32>, vector<32x64xf32> -> vector<32x128xf32>
    %c0_107 = arith.constant 0 : index
    %c0_108 = arith.constant 0 : index
    %119 = vector.load %arg7[%c0_107, %c0_108] : memref<1x128xf32, #tpu.memory_space<vmem>>, vector<1x128xf32>
    %120 = vector.broadcast %119 : vector<1x128xf32> to vector<32x128xf32>
    %121 = arith.mulf %118, %120 : vector<32x128xf32>
    %c0_109 = arith.constant 0 : index
    %c0_110 = arith.constant 0 : index
    %122 = vector.load %arg8[%c0_109, %c0_110] : memref<1x128xf32, #tpu.memory_space<vmem>>, vector<1x128xf32>
    %123 = vector.broadcast %122 : vector<1x128xf32> to vector<32x128xf32>
    %124 = arith.addf %121, %123 : vector<32x128xf32>
    %cst_111 = arith.constant 0.000000e+00 : f32
    %125 = vector.broadcast %cst_111 : f32 to vector<32x128xf32>
    %126 = arith.maximumf %124, %125 : vector<32x128xf32>
    %c0_112 = arith.constant 0 : index
    %c0_113 = arith.constant 0 : index
    %c0_114 = arith.constant 0 : index
    %127 = vector.load %arg9[%c0_112, %c0_113, %c0_114] : memref<1x32x128xf32, #tpu.memory_space<vmem>>, vector<1x32x128xf32>
    %128 = vector.shape_cast %127 : vector<1x32x128xf32> to vector<32x128xf32>
    %129 = vector.shape_cast %126 : vector<32x128xf32> to vector<1x32x128xf32>
    tpu.vector_store %arg9[%c0_112, %c0_113, %c0_114], %129 {strides = array<i32>} : memref<1x32x128xf32, #tpu.memory_space<vmem>>, vector<1x32x128xf32>,
    return
  }
  func.func @transform_0(%arg0: i32, %arg1: i32) -> (i32, i32, i32, i32) {
    %c0_i32 = arith.constant 0 : i32
    %c0_i32_0 = arith.constant 0 : i32
    %c0_i32_1 = arith.constant 0 : i32
    %c0_i32_2 = arith.constant 0 : i32
    return %arg0, %c0_i32, %c0_i32_0, %c0_i32_1 : i32, i32, i32, i32
  }
  func.func @transform_1(%arg0: i32, %arg1: i32) -> (i32, i32) {
    %c0_i32 = arith.constant 0 : i32
    %c0_i32_0 = arith.constant 0 : i32
    %c0_i32_1 = arith.constant 0 : i32
    return %c0_i32, %c0_i32_0 : i32, i32
  }
  func.func @transform_2(%arg0: i32, %arg1: i32) -> (i32, i32) {
    %c0_i32 = arith.constant 0 : i32
    %c0_i32_0 = arith.constant 0 : i32
    %c0_i32_1 = arith.constant 0 : i32
    return %c0_i32, %c0_i32_0 : i32, i32
  }
  func.func @transform_3(%arg0: i32, %arg1: i32) -> (i32, i32) {
    %c0_i32 = arith.constant 0 : i32
    %c0_i32_0 = arith.constant 0 : i32
    %c0_i32_1 = arith.constant 0 : i32
    return %c0_i32, %c0_i32_0 : i32, i32
  }
  func.func @transform_4(%arg0: i32, %arg1: i32) -> (i32, i32) {
    %c0_i32 = arith.constant 0 : i32
    %c0_i32_0 = arith.constant 0 : i32
    %c0_i32_1 = arith.constant 0 : i32
    return %c0_i32, %c0_i32_0 : i32, i32
  }
  func.func @transform_5(%arg0: i32, %arg1: i32) -> (i32, i32) {
    %c0_i32 = arith.constant 0 : i32
    %c0_i32_0 = arith.constant 0 : i32
    %c0_i32_1 = arith.constant 0 : i32
    return %c0_i32, %c0_i32_0 : i32, i32
  }
  func.func @transform_6(%arg0: i32, %arg1: i32) -> (i32, i32) {
    %c0_i32 = arith.constant 0 : i32
    %c0_i32_0 = arith.constant 0 : i32
    %c0_i32_1 = arith.constant 0 : i32
    return %c0_i32, %c0_i32_0 : i32, i32
  }
  func.func @transform_7(%arg0: i32, %arg1: i32) -> (i32, i32, i32) {
    %c0_i32 = arith.constant 0 : i32
    %c0_i32_0 = arith.constant 0 : i32
    return %arg0, %arg1, %c0_i32 : i32, i32, i32
  }
}

</mosaic_0001>

<bundles_post_ra>
// kernel: tile.63
= control target key start
LH: loop header
LB: loop body
LE: loop exit
PB: predicated region body
PF: predicated region fallthrough
CT: control target
= control target key end

     0   :  { %s22_s0 = inlined_call_operand.vmem [shape: f32[8], index: 0, kind: input, shape index: {}]   ;;  %s23_s1 = inlined_call_operand.vmem [shape: f32[8,8], index: 1, kind: output, shape index: {}]  }
   0x1   :  { %v4_v0 = vld [vmem:[%s22_s0] ss:$0 sm:$0xff] }
   0x2   :  { %5 = vst [vmem:[%s23_s1] sm:$0xff] %v4_v0 }

// kernel: tile.64
= control target key start
LH: loop header
LB: loop body
LE: loop exit
PB: predicated region body
PF: predicated region fallthrough
CT: control target
= control target key end

     0   :  { %s67_s10 = smov 56   ;;  %s68_s11 = smov 40   ;;  %vm3_vm0 = vcmask 64512   ;;  %vm9_vm1 = vcmask 523712   ;;  %vm15_vm2 = vcmask 458112   ;;  %vm21_vm3 = vcmask 392512   ;;  %s111_s0 = inlined_call_operand.vmem [shape: f32[8,8], index: 0, kind: input, shape index: {}]   ;;  %s112_s1 = inlined_call_operand.vmem [shape: f32[1,64], index: 1, kind: output, shape index: {}]  }
   0x1   :  { %v53_v0 = vld [vmem:[%s111_s0 + $0x7] sm:$0x1]   ;;  %v55_v1 = vld [vmem:[%s111_s0 + $0x5] sm:$0x1]   ;;  %v54_v2 = vld [vmem:[%s111_s0 + $0x6] sm:$0x1]  }
   0x2   :  { %7 = vrot.lane.b32.xlu0 %v53_v0, %s67_s10  ;;  %19 = vrot.lane.b32.xlu1 %v55_v1, %s68_s11  ;;  %v56_v3 = vld [vmem:[%s111_s0 + $0x4] sm:$0x1]   ;;  %v2_v4 = vld [vmem:[%s111_s0] sm:$0x1]   ;;  %s69_s18 = smov 48   ;;  %s70_s19 = smov 32  }
   0x3   :  { %4 = vst.msk [vmem:[#allocation0] sm:$0x1] %vm3_vm0, %v2_v4   ;;  %v57_v5 = vld [vmem:[%s111_s0 + $0x3] sm:$0x1]   ;;  %v58_v6 = vld [vmem:[%s111_s0 + $0x2] sm:$0x1]  }
   0x4   :  { %s71_s24 = smov 24   ;;  %s72_s25 = smov 16   ;;  %v59_v7 = vld [vmem:[%s111_s0 + $0x1] sm:$0x1]   ;;  %vm27_vm4 = vcmask 326912   ;;  %vm33_vm5 = vcmask 261312  }
   0x5   :  { %s73_s0 = smov 8   ;;  %vm39_vm6 = vcmask 195712   ;;  %vm45_vm7 = vcmask 130112  }
   0x6   :  { %13 = vrot.lane.b32.xlu0 %v54_v2, %s69_s18  ;;  %25 = vrot.lane.b32.xlu1 %v56_v3, %s70_s19 }
   0xa   :  { %31 = vrot.lane.b32.xlu0 %v57_v5, %s71_s24  ;;  %37 = vrot.lane.b32.xlu1 %v58_v6, %s72_s25 }
   0xe   :  { %43 = vrot.lane.b32.xlu0 %v59_v7, %s73_s0 }
  0x74   :  { %v8_v8 = vpop.permute.xlu0 %7   ;;  %v20_v9 = vpop.permute.xlu1 %19  }
  0x75   :  { %10 = vst.msk [vmem:[#allocation0] sm:$0x1] %vm9_vm1, %v8_v8  }
  0x78   :  { %v14_v10 = vpop.permute.xlu0 %13   ;;  %v26_v11 = vpop.permute.xlu1 %25  }
  0x79   :  { %16 = vst.msk [vmem:[#allocation0] sm:$0x1] %vm15_vm2, %v14_v10  }
  0x7a   :  { %22 = vst.msk [vmem:[#allocation0] sm:$0x1] %vm21_vm3, %v20_v9  }
  0x7b   :  { %28 = vst.msk [vmem:[#allocation0] sm:$0x1] %vm27_vm4, %v26_v11  }
  0x7c   :  { %v32_v12 = vpop.permute.xlu0 %31   ;;  %v38_v13 = vpop.permute.xlu1 %37  }
  0x7d   :  { %34 = vst.msk [vmem:[#allocation0] sm:$0x1] %vm33_vm5, %v32_v12  }
  0x7e   :  { %40 = vst.msk [vmem:[#allocation0] sm:$0x1] %vm39_vm6, %v38_v13  }
  0x80   :  { %v44_v14 = vpop.permute.xlu0 %43  }
  0x81   :  { %46 = vst.msk [vmem:[#allocation0] sm:$0x1] %vm45_vm7, %v44_v14  }
  0x88   :  { %v50_v15 = vld [vmem:[#allocation0] sm:$0x1] }
  0x89   :  { %52 = vst [vmem:[%s112_s1] sm:$0x1] %v50_v15 }

// kernel: tile.88
= control target key start
LH: loop header
LB: loop body
LE: loop exit
PB: predicated region body
PF: predicated region fallthrough
CT: control target
= control target key end

     0   :  { %s28_s0 = inlined_call_operand.vmem [shape: f32[4], index: 0, kind: input, shape index: {}]   ;;  %s29_s1 = inlined_call_operand.vmem [shape: f32[16,4], index: 1, kind: output, shape index: {}]  }
   0x1   :  { %v4_v0 = vld [vmem:[%s28_s0] ss:$0 sm:$0xff] }
   0x2   :  { %5 = vst [vmem:[%s29_s1] sm:$0xff] %v4_v0  ;;  %8 = vst [vmem:[%s29_s1 + $0x8] sm:$0xff] %v4_v0 }

// kernel: tile.89
= control target key start
LH: loop header
LB: loop body
LE: loop exit
PB: predicated region body
PF: predicated region fallthrough
CT: control target
= control target key end

     0   :  { %s131_s10 = smov 60   ;;  %s132_s11 = smov 52   ;;  %vm3_vm0 = vcmask 31744   ;;  %vm9_vm1 = vcmask 523744   ;;  %vm15_vm2 = vcmask 490944   ;;  %vm21_vm3 = vcmask 458144   ;;  %s207_s0 = inlined_call_operand.vmem [shape: f32[16,4], index: 0, kind: input, shape index: {}]   ;;  %s208_s1 = inlined_call_operand.vmem [shape: f32[1,64], index: 1, kind: output, shape index: {}]  }
   0x1   :  { %v101_v0 = vld [vmem:[%s207_s0 + $0xf] sm:$0x1]   ;;  %v103_v1 = vld [vmem:[%s207_s0 + $0xd] sm:$0x1]   ;;  %v102_v2 = vld [vmem:[%s207_s0 + $0xe] sm:$0x1]  }
   0x2   :  { %7 = vrot.lane.b32.xlu0 %v101_v0, %s131_s10  ;;  %19 = vrot.lane.b32.xlu1 %v103_v1, %s132_s11  ;;  %v104_v3 = vld [vmem:[%s207_s0 + $0xc] sm:$0x1]   ;;  %s133_s16 = smov 56   ;;  %s134_s17 = smov 48   ;;  %v105_v4 = vld [vmem:[%s207_s0 + $0xb] sm:$0x1]  }
   0x3   :  { %v106_v5 = vld [vmem:[%s207_s0 + $0xa] sm:$0x1]   ;;  %v2_v6 = vld [vmem:[%s207_s0] sm:$0x1]   ;;  %s135_s24 = smov 44   ;;  %s136_s25 = smov 40  }
   0x4   :  { %4 = vst.msk [vmem:[#allocation0] sm:$0x1] %vm3_vm0, %v2_v6   ;;  %v107_v7 = vld [vmem:[%s207_s0 + $0x9] sm:$0x1]   ;;  %v108_v8 = vld [vmem:[%s207_s0 + $0x8] sm:$0x1]  }
   0x5   :  { %s137_s30 = smov 36   ;;  %s138_s2 = smov 32   ;;  %v109_v9 = vld [vmem:[%s207_s0 + $0x7] sm:$0x1]   ;;  %v110_v10 = vld [vmem:[%s207_s0 + $0x6] sm:$0x1]  }
   0x6   :  { %13 = vrot.lane.b32.xlu0 %v102_v2, %s133_s16  ;;  %25 = vrot.lane.b32.xlu1 %v104_v3, %s134_s17  ;;  %s139_s7 = smov 28   ;;  %s140_s8 = smov 24   ;;  %v111_v11 = vld [vmem:[%s207_s0 + $0x5] sm:$0x1]   ;;  %v112_v12 = vld [vmem:[%s207_s0 + $0x4] sm:$0x1]  }
   0x7   :  { %s141_s13 = smov 20   ;;  %s142_s14 = smov 16   ;;  %v113_v13 = vld [vmem:[%s207_s0 + $0x3] sm:$0x1]   ;;  %v114_v14 = vld [vmem:[%s207_s0 + $0x2] sm:$0x1]  }
   0x8   :  { %s143_s19 = smov 12   ;;  %s144_s20 = smov 8   ;;  %v115_v15 = vld [vmem:[%s207_s0 + $0x1] sm:$0x1]   ;;  %vm27_vm4 = vcmask 425344   ;;  %vm33_vm5 = vcmask 392544  }
   0x9   :  { %s145_s0 = smov 4   ;;  %vm39_vm6 = vcmask 359744   ;;  %vm45_vm7 = vcmask 326944   ;;  %vm51_vm8 = vcmask 294144   ;;  %vm57_vm9 = vcmask 261344  }
   0xa   :  { %31 = vrot.lane.b32.xlu0 %v105_v4, %s135_s24  ;;  %37 = vrot.lane.b32.xlu1 %v106_v5, %s136_s25  ;;  %vm63_vm10 = vcmask 228544   ;;  %vm69_vm11 = vcmask 195744   ;;  %vm75_vm12 = vcmask 162944   ;;  %vm81_vm13 = vcmask 130144  }
   0xb   :  { %vm87_vm14 = vcmask 97344   ;;  %vm93_vm15 = vcmask 64544  }
   0xe   :  { %43 = vrot.lane.b32.xlu0 %v107_v7, %s137_s30  ;;  %49 = vrot.lane.b32.xlu1 %v108_v8, %s138_s2 }
  0x12   :  { %55 = vrot.lane.b32.xlu0 %v109_v9, %s139_s7  ;;  %61 = vrot.lane.b32.xlu1 %v110_v10, %s140_s8 }
  0x16   :  { %67 = vrot.lane.b32.xlu0 %v111_v11, %s141_s13  ;;  %73 = vrot.lane.b32.xlu1 %v112_v12, %s142_s14 }
  0x1a   :  { %79 = vrot.lane.b32.xlu0 %v113_v13, %s143_s19  ;;  %85 = vrot.lane.b32.xlu1 %v114_v14, %s144_s20 }
  0x1e   :  { %91 = vrot.lane.b32.xlu0 %v115_v15, %s145_s0 }
  0x74   :  { %v8_v16 = vpop.permute.xlu0 %7   ;;  %v20_v17 = vpop.permute.xlu1 %19  }
  0x75   :  { %10 = vst.msk [vmem:[#allocation0] sm:$0x1] %vm9_vm1, %v8_v16  }
  0x78   :  { %v14_v18 = vpop.permute.xlu0 %13   ;;  %v26_v19 = vpop.permute.xlu1 %25  }
  0x79   :  { %16 = vst.msk [vmem:[#allocation0] sm:$0x1] %vm15_vm2, %v14_v18  }
  0x7a   :  { %22 = vst.msk [vmem:[#allocation0] sm:$0x1] %vm21_vm3, %v20_v17  }
  0x7b   :  { %28 = vst.msk [vmem:[#allocation0] sm:$0x1] %vm27_vm4, %v26_v19  }
  0x7c   :  { %v32_v20 = vpop.permute.xlu0 %31   ;;  %v38_v21 = vpop.permute.xlu1 %37  }
  0x7d   :  { %34 = vst.msk [vmem:[#allocation0] sm:$0x1] %vm33_vm5, %v32_v20  }
  0x7e   :  { %40 = vst.msk [vmem:[#allocation0] sm:$0x1] %vm39_vm6, %v38_v21  }
  0x80   :  { %v44_v22 = vpop.permute.xlu0 %43   ;;  %v50_v23 = vpop.permute.xlu1 %49  }
  0x81   :  { %46 = vst.msk [vmem:[#allocation0] sm:$0x1] %vm45_vm7, %v44_v22  }
  0x82   :  { %52 = vst.msk [vmem:[#allocation0] sm:$0x1] %vm51_vm8, %v50_v23  }
  0x84   :  { %v56_v24 = vpop.permute.xlu0 %55   ;;  %v62_v25 = vpop.permute.xlu1 %61  }
  0x85   :  { %58 = vst.msk [vmem:[#allocation0] sm:$0x1] %vm57_vm9, %v56_v24  }
  0x86   :  { %64 = vst.msk [vmem:[#allocation0] sm:$0x1] %vm63_vm10, %v62_v25  }
  0x88   :  { %v68_v26 = vpop.permute.xlu0 %67   ;;  %v74_v27 = vpop.permute.xlu1 %73  }
  0x89   :  { %70 = vst.msk [vmem:[#allocation0] sm:$0x1] %vm69_vm11, %v68_v26  }
  0x8a   :  { %76 = vst.msk [vmem:[#allocation0] sm:$0x1] %vm75_vm12, %v74_v27  }
  0x8c   :  { %v80_v28 = vpop.permute.xlu0 %79   ;;  %v86_v29 = vpop.permute.xlu1 %85  }
  0x8d   :  { %82 = vst.msk [vmem:[#allocation0] sm:$0x1] %vm81_vm13, %v80_v28  }
  0x8e   :  { %88 = vst.msk [vmem:[#allocation0] sm:$0x1] %vm87_vm14, %v86_v29  }
  0x90   :  { %v92_v30 = vpop.permute.xlu0 %91  }
  0x91   :  { %94 = vst.msk [vmem:[#allocation0] sm:$0x1] %vm93_vm15, %v92_v30  }
  0x98   :  { %v98_v31 = vld [vmem:[#allocation0] sm:$0x1] }
  0x99   :  { %100 = vst [vmem:[%s208_s1] sm:$0x1] %v98_v31 }

// kernel: tile.73
= control target key start
LH: loop header
LB: loop body
LE: loop exit
PB: predicated region body
PF: predicated region fallthrough
CT: control target
= control target key end

     0   :  { %s28_s0 = inlined_call_operand.vmem [shape: f32[8], index: 0, kind: input, shape index: {}]   ;;  %s29_s1 = inlined_call_operand.vmem [shape: f32[16,8], index: 1, kind: output, shape index: {}]  }
   0x1   :  { %v4_v0 = vld [vmem:[%s28_s0] ss:$0 sm:$0xff] }
   0x2   :  { %5 = vst [vmem:[%s29_s1] sm:$0xff] %v4_v0  ;;  %8 = vst [vmem:[%s29_s1 + $0x8] sm:$0xff] %v4_v0 }

// kernel: tile.74
= control target key start
LH: loop header
LB: loop body
LE: loop exit
PB: predicated region body
PF: predicated region fallthrough
CT: control target
= control target key end

     0   :  { %s131_s10 = smov 120   ;;  %s132_s11 = smov 104   ;;  %vm3_vm0 = vcmask 64512   ;;  %vm9_vm1 = vcmask 1048512   ;;  %vm15_vm2 = vcmask 982912   ;;  %vm21_vm3 = vcmask 917312   ;;  %s207_s0 = inlined_call_operand.vmem [shape: f32[16,8], index: 0, kind: input, shape index: {}]   ;;  %s208_s1 = inlined_call_operand.vmem [shape: f32[1,128], index: 1, kind: output, shape index: {}]  }
   0x1   :  { %v101_v0 = vld [vmem:[%s207_s0 + $0xf] sm:$0x1]   ;;  %v103_v1 = vld [vmem:[%s207_s0 + $0xd] sm:$0x1]   ;;  %v102_v2 = vld [vmem:[%s207_s0 + $0xe] sm:$0x1]  }
   0x2   :  { %7 = vrot.lane.b32.xlu0 %v101_v0, %s131_s10  ;;  %19 = vrot.lane.b32.xlu1 %v103_v1, %s132_s11  ;;  %v104_v3 = vld [vmem:[%s207_s0 + $0xc] sm:$0x1]   ;;  %s133_s16 = smov 112   ;;  %s134_s17 = smov 96   ;;  %v105_v4 = vld [vmem:[%s207_s0 + $0xb] sm:$0x1]  }
   0x3   :  { %v106_v5 = vld [vmem:[%s207_s0 + $0xa] sm:$0x1]   ;;  %v2_v6 = vld [vmem:[%s207_s0] sm:$0x1]   ;;  %s135_s24 = smov 88   ;;  %s136_s25 = smov 80  }
   0x4   :  { %4 = vst.msk [vmem:[#allocation0] sm:$0x1] %vm3_vm0, %v2_v6   ;;  %v107_v7 = vld [vmem:[%s207_s0 + $0x9] sm:$0x1]   ;;  %v108_v8 = vld [vmem:[%s207_s0 + $0x8] sm:$0x1]  }
   0x5   :  { %s137_s30 = smov 72   ;;  %s138_s2 = smov 64   ;;  %v109_v9 = vld [vmem:[%s207_s0 + $0x7] sm:$0x1]   ;;  %v110_v10 = vld [vmem:[%s207_s0 + $0x6] sm:$0x1]  }
   0x6   :  { %13 = vrot.lane.b32.xlu0 %v102_v2, %s133_s16  ;;  %25 = vrot.lane.b32.xlu1 %v104_v3, %s134_s17  ;;  %s139_s7 = smov 56   ;;  %s140_s8 = smov 48   ;;  %v111_v11 = vld [vmem:[%s207_s0 + $0x5] sm:$0x1]   ;;  %v112_v12 = vld [vmem:[%s207_s0 + $0x4] sm:$0x1]  }
   0x7   :  { %s141_s13 = smov 40   ;;  %s142_s14 = smov 32   ;;  %v113_v13 = vld [vmem:[%s207_s0 + $0x3] sm:$0x1]   ;;  %v114_v14 = vld [vmem:[%s207_s0 + $0x2] sm:$0x1]  }
   0x8   :  { %s143_s19 = smov 24   ;;  %s144_s20 = smov 16   ;;  %v115_v15 = vld [vmem:[%s207_s0 + $0x1] sm:$0x1]   ;;  %vm27_vm4 = vcmask 851712   ;;  %vm33_vm5 = vcmask 786112  }
   0x9   :  { %s145_s0 = smov 8   ;;  %vm39_vm6 = vcmask 720512   ;;  %vm45_vm7 = vcmask 654912   ;;  %vm51_vm8 = vcmask 589312   ;;  %vm57_vm9 = vcmask 523712  }
   0xa   :  { %31 = vrot.lane.b32.xlu0 %v105_v4, %s135_s24  ;;  %37 = vrot.lane.b32.xlu1 %v106_v5, %s136_s25  ;;  %vm63_vm10 = vcmask 458112   ;;  %vm69_vm11 = vcmask 392512   ;;  %vm75_vm12 = vcmask 326912   ;;  %vm81_vm13 = vcmask 261312  }
   0xb   :  { %vm87_vm14 = vcmask 195712   ;;  %vm93_vm15 = vcmask 130112  }
   0xe   :  { %43 = vrot.lane.b32.xlu0 %v107_v7, %s137_s30  ;;  %49 = vrot.lane.b32.xlu1 %v108_v8, %s138_s2 }
  0x12   :  { %55 = vrot.lane.b32.xlu0 %v109_v9, %s139_s7  ;;  %61 = vrot.lane.b32.xlu1 %v110_v10, %s140_s8 }
  0x16   :  { %67 = vrot.lane.b32.xlu0 %v111_v11, %s141_s13  ;;  %73 = vrot.lane.b32.xlu1 %v112_v12, %s142_s14 }
  0x1a   :  { %79 = vrot.lane.b32.xlu0 %v113_v13, %s143_s19  ;;  %85 = vrot.lane.b32.xlu1 %v114_v14, %s144_s20 }
  0x1e   :  { %91 = vrot.lane.b32.xlu0 %v115_v15, %s145_s0 }
  0x74   :  { %v8_v16 = vpop.permute.xlu0 %7   ;;  %v20_v17 = vpop.permute.xlu1 %19  }
  0x75   :  { %10 = vst.msk [vmem:[#allocation0] sm:$0x1] %vm9_vm1, %v8_v16  }
  0x78   :  { %v14_v18 = vpop.permute.xlu0 %13   ;;  %v26_v19 = vpop.permute.xlu1 %25  }
  0x79   :  { %16 = vst.msk [vmem:[#allocation0] sm:$0x1] %vm15_vm2, %v14_v18  }
  0x7a   :  { %22 = vst.msk [vmem:[#allocation0] sm:$0x1] %vm21_vm3, %v20_v17  }
  0x7b   :  { %28 = vst.msk [vmem:[#allocation0] sm:$0x1] %vm27_vm4, %v26_v19  }
  0x7c   :  { %v32_v20 = vpop.permute.xlu0 %31   ;;  %v38_v21 = vpop.permute.xlu1 %37  }
  0x7d   :  { %34 = vst.msk [vmem:[#allocation0] sm:$0x1] %vm33_vm5, %v32_v20  }
  0x7e   :  { %40 = vst.msk [vmem:[#allocation0] sm:$0x1] %vm39_vm6, %v38_v21  }
  0x80   :  { %v44_v22 = vpop.permute.xlu0 %43   ;;  %v50_v23 = vpop.permute.xlu1 %49  }
  0x81   :  { %46 = vst.msk [vmem:[#allocation0] sm:$0x1] %vm45_vm7, %v44_v22  }
  0x82   :  { %52 = vst.msk [vmem:[#allocation0] sm:$0x1] %vm51_vm8, %v50_v23  }
  0x84   :  { %v56_v24 = vpop.permute.xlu0 %55   ;;  %v62_v25 = vpop.permute.xlu1 %61  }
  0x85   :  { %58 = vst.msk [vmem:[#allocation0] sm:$0x1] %vm57_vm9, %v56_v24  }
  0x86   :  { %64 = vst.msk [vmem:[#allocation0] sm:$0x1] %vm63_vm10, %v62_v25  }
  0x88   :  { %v68_v26 = vpop.permute.xlu0 %67   ;;  %v74_v27 = vpop.permute.xlu1 %73  }
  0x89   :  { %70 = vst.msk [vmem:[#allocation0] sm:$0x1] %vm69_vm11, %v68_v26  }
  0x8a   :  { %76 = vst.msk [vmem:[#allocation0] sm:$0x1] %vm75_vm12, %v74_v27  }
  0x8c   :  { %v80_v28 = vpop.permute.xlu0 %79   ;;  %v86_v29 = vpop.permute.xlu1 %85  }
  0x8d   :  { %82 = vst.msk [vmem:[#allocation0] sm:$0x1] %vm81_vm13, %v80_v28  }
  0x8e   :  { %88 = vst.msk [vmem:[#allocation0] sm:$0x1] %vm87_vm14, %v86_v29  }
  0x90   :  { %v92_v30 = vpop.permute.xlu0 %91  }
  0x91   :  { %94 = vst.msk [vmem:[#allocation0] sm:$0x1] %vm93_vm15, %v92_v30  }
  0x98   :  { %v98_v31 = vld [vmem:[#allocation0] sm:$0x1] }
  0x99   :  { %100 = vst [vmem:[%s208_s1] sm:$0x1] %v98_v31 }

// kernel: tile.98
= control target key start
LH: loop header
LB: loop body
LE: loop exit
PB: predicated region body
PF: predicated region fallthrough
CT: control target
= control target key end

     0   :  { %s40_s0 = inlined_call_operand.vmem [shape: f32[4], index: 0, kind: input, shape index: {}]   ;;  %s41_s1 = inlined_call_operand.vmem [shape: f32[32,4], index: 1, kind: output, shape index: {}]  }
   0x1   :  { %v4_v0 = vld [vmem:[%s40_s0] ss:$0 sm:$0xff] }
   0x2   :  { %5 = vst [vmem:[%s41_s1] sm:$0xff] %v4_v0  ;;  %12 = vst [vmem:[%s41_s1 + $0x8] sm:$0xff] %v4_v0 }
   0x3   :  { %13 = vst [vmem:[%s41_s1 + $0x10] sm:$0xff] %v4_v0  ;;  %14 = vst [vmem:[%s41_s1 + $0x18] sm:$0xff] %v4_v0 }

// kernel: tile.99
= control target key start
LH: loop header
LB: loop body
LE: loop exit
PB: predicated region body
PF: predicated region fallthrough
CT: control target
= control target key end

     0   :  { %s259_s10 = smov 124   ;;  %s260_s11 = smov 116   ;;  %vm3_vm0 = vcmask 31744   ;;  %vm9_vm1 = vcmask 1048544   ;;  %vm15_vm2 = vcmask 1015744   ;;  %vm21_vm3 = vcmask 982944   ;;  %s399_s0 = inlined_call_operand.vmem [shape: f32[32,4], index: 0, kind: input, shape index: {}]   ;;  %s400_s1 = inlined_call_operand.vmem [shape: f32[1,128], index: 1, kind: output, shape index: {}]  }
   0x1   :  { %v197_v0 = vld [vmem:[%s399_s0 + $0x1f] sm:$0x1]   ;;  %v199_v1 = vld [vmem:[%s399_s0 + $0x1d] sm:$0x1]   ;;  %v198_v2 = vld [vmem:[%s399_s0 + $0x1e] sm:$0x1]  }
   0x2   :  { %7 = vrot.lane.b32.xlu0 %v197_v0, %s259_s10  ;;  %19 = vrot.lane.b32.xlu1 %v199_v1, %s260_s11  ;;  %v200_v3 = vld [vmem:[%s399_s0 + $0x1c] sm:$0x1]   ;;  %s261_s16 = smov 120   ;;  %s262_s17 = smov 112   ;;  %v201_v4 = vld [vmem:[%s399_s0 + $0x1b] sm:$0x1]  }
   0x3   :  { %v202_v5 = vld [vmem:[%s399_s0 + $0x1a] sm:$0x1]   ;;  %s263_s22 = smov 108   ;;  %s264_s23 = smov 104   ;;  %v203_v6 = vld [vmem:[%s399_s0 + $0x19] sm:$0x1]  }
   0x4   :  { %v204_v7 = vld [vmem:[%s399_s0 + $0x18] sm:$0x1]   ;;  %s265_s28 = smov 100   ;;  %s266_s29 = smov 96   ;;  %v205_v8 = vld [vmem:[%s399_s0 + $0x17] sm:$0x1]  }
   0x5   :  { %v206_v9 = vld [vmem:[%s399_s0 + $0x16] sm:$0x1]   ;;  %v2_v10 = vld [vmem:[%s399_s0] sm:$0x1]   ;;  %s267_s7 = smov 92   ;;  %s268_s8 = smov 88  }
   0x6   :  { %13 = vrot.lane.b32.xlu0 %v198_v2, %s261_s16  ;;  %25 = vrot.lane.b32.xlu1 %v200_v3, %s262_s17  ;;  %4 = vst.msk [vmem:[#allocation0] sm:$0x1] %vm3_vm0, %v2_v10   ;;  %v207_v11 = vld [vmem:[%s399_s0 + $0x15] sm:$0x1]   ;;  %v208_v12 = vld [vmem:[%s399_s0 + $0x14] sm:$0x1]  }
   0x7   :  { %s269_s13 = smov 84   ;;  %s270_s14 = smov 80   ;;  %v209_v13 = vld [vmem:[%s399_s0 + $0x13] sm:$0x1]   ;;  %v210_v14 = vld [vmem:[%s399_s0 + $0x12] sm:$0x1]  }
   0x8   :  { %s271_s19 = smov 76   ;;  %s272_s20 = smov 72   ;;  %v211_v15 = vld [vmem:[%s399_s0 + $0x11] sm:$0x1]   ;;  %v212_v16 = vld [vmem:[%s399_s0 + $0x10] sm:$0x1]  }
   0x9   :  { %s273_s25 = smov 68   ;;  %s274_s26 = smov 64   ;;  %v213_v17 = vld [vmem:[%s399_s0 + $0xf] sm:$0x1]   ;;  %v214_v18 = vld [vmem:[%s399_s0 + $0xe] sm:$0x1]  }
   0xa   :  { %31 = vrot.lane.b32.xlu0 %v201_v4, %s263_s22  ;;  %37 = vrot.lane.b32.xlu1 %v202_v5, %s264_s23  ;;  %s275_s2 = smov 60   ;;  %s276_s3 = smov 56   ;;  %v215_v19 = vld [vmem:[%s399_s0 + $0xd] sm:$0x1]   ;;  %v216_v20 = vld [vmem:[%s399_s0 + $0xc] sm:$0x1]  }
   0xb   :  { %s278_s9 = smov 48   ;;  %v217_v21 = vld [vmem:[%s399_s0 + $0xb] sm:$0x1]   ;;  %v218_v22 = vld [vmem:[%s399_s0 + $0xa] sm:$0x1]   ;;  %s280_s15 = smov 40  }
   0xc   :  { %v219_v23 = vld [vmem:[%s399_s0 + $0x9] sm:$0x1]   ;;  %v220_v24 = vld [vmem:[%s399_s0 + $0x8] sm:$0x1]   ;;  %s282_s21 = smov 32   ;;  %s284_s27 = smov 24  }
   0xd   :  { %v221_v25 = vld [vmem:[%s399_s0 + $0x7] sm:$0x1]   ;;  %v222_v26 = vld [vmem:[%s399_s0 + $0x6] sm:$0x1]   ;;  %v223_v27 = vld [vmem:[%s399_s0 + $0x5] sm:$0x1]  }
   0xe   :  { %43 = vrot.lane.b32.xlu0 %v203_v6, %s265_s28  ;;  %49 = vrot.lane.b32.xlu1 %v204_v7, %s266_s29  ;;  %v224_v28 = vld [vmem:[%s399_s0 + $0x4] sm:$0x1]   ;;  %s286_s4 = smov 16   ;;  %v225_v29 = vld [vmem:[%s399_s0 + $0x3] sm:$0x1]   ;;  %s288_s10 = smov 8  }
   0xf   :  { %v226_v30 = vld [vmem:[%s399_s0 + $0x2] sm:$0x1]   ;;  %v227_v31 = vld [vmem:[%s399_s0 + $0x1] sm:$0x1]   ;;  %s289_s0 = smov 4   ;;  %vm27_vm4 = vcmask 950144  }
  0x10   :  { %vm33_vm5 = vcmask 917344   ;;  %vm39_vm6 = vcmask 884544   ;;  %vm45_vm7 = vcmask 851744   ;;  %vm51_vm8 = vcmask 818944  }
  0x11   :  { %vm57_vm9 = vcmask 786144   ;;  %vm63_vm10 = vcmask 753344   ;;  %vm69_vm11 = vcmask 720544   ;;  %vm75_vm12 = vcmask 687744  }
  0x12   :  { %55 = vrot.lane.b32.xlu0 %v205_v8, %s267_s7  ;;  %61 = vrot.lane.b32.xlu1 %v206_v9, %s268_s8  ;;  %s277_s8 = smov 52   ;;  %vm81_vm13 = vcmask 654944   ;;  %vm87_vm14 = vcmask 622144   ;;  %vm93_vm15 = vcmask 589344   ;;  %vm99_vm0 = vcmask 556544  }
  0x16   :  { %67 = vrot.lane.b32.xlu0 %v207_v11, %s269_s13  ;;  %73 = vrot.lane.b32.xlu1 %v208_v12, %s270_s14  ;;  %s279_s14 = smov 44  }
  0x1a   :  { %79 = vrot.lane.b32.xlu0 %v209_v13, %s271_s19  ;;  %85 = vrot.lane.b32.xlu1 %v210_v14, %s272_s20  ;;  %s281_s20 = smov 36  }
  0x1e   :  { %91 = vrot.lane.b32.xlu0 %v211_v15, %s273_s25  ;;  %97 = vrot.lane.b32.xlu1 %v212_v16, %s274_s26  ;;  %s283_s26 = smov 28  }
  0x22   :  { %103 = vrot.lane.b32.xlu0 %v213_v17, %s275_s2  ;;  %109 = vrot.lane.b32.xlu1 %v214_v18, %s276_s3  ;;  %s285_s3 = smov 20  }
  0x26   :  { %115 = vrot.lane.b32.xlu0 %v215_v19, %s277_s8  ;;  %121 = vrot.lane.b32.xlu1 %v216_v20, %s278_s9  ;;  %s287_s9 = smov 12  }
  0x2a   :  { %127 = vrot.lane.b32.xlu0 %v217_v21, %s279_s14  ;;  %133 = vrot.lane.b32.xlu1 %v218_v22, %s280_s15 }
  0x2e   :  { %139 = vrot.lane.b32.xlu0 %v219_v23, %s281_s20  ;;  %145 = vrot.lane.b32.xlu1 %v220_v24, %s282_s21 }
  0x32   :  { %151 = vrot.lane.b32.xlu0 %v221_v25, %s283_s26  ;;  %157 = vrot.lane.b32.xlu1 %v222_v26, %s284_s27 }
  0x36   :  { %163 = vrot.lane.b32.xlu0 %v223_v27, %s285_s3  ;;  %169 = vrot.lane.b32.xlu1 %v224_v28, %s286_s4 }
  0x3a   :  { %175 = vrot.lane.b32.xlu0 %v225_v29, %s287_s9  ;;  %181 = vrot.lane.b32.xlu1 %v226_v30, %s288_s10 }
  0x3e   :  { %187 = vrot.lane.b32.xlu0 %v227_v31, %s289_s0 }
  0x74   :  { %v8_v32 = vpop.permute.xlu0 %7   ;;  %v20_v33 = vpop.permute.xlu1 %19  }
  0x75   :  { %10 = vst.msk [vmem:[#allocation0] sm:$0x1] %vm9_vm1, %v8_v32   ;;  %vm105_vm1 = vcmask 523744  }
  0x78   :  { %v14_v34 = vpop.permute.xlu0 %13   ;;  %v26_v35 = vpop.permute.xlu1 %25  }
  0x79   :  { %16 = vst.msk [vmem:[#allocation0] sm:$0x1] %vm15_vm2, %v14_v34   ;;  %vm111_vm2 = vcmask 490944  }
  0x7a   :  { %22 = vst.msk [vmem:[#allocation0] sm:$0x1] %vm21_vm3, %v20_v33   ;;  %vm117_vm3 = vcmask 458144  }
  0x7b   :  { %28 = vst.msk [vmem:[#allocation0] sm:$0x1] %vm27_vm4, %v26_v35   ;;  %vm123_vm4 = vcmask 425344  }
  0x7c   :  { %v32_v36 = vpop.permute.xlu0 %31   ;;  %v38_v37 = vpop.permute.xlu1 %37  }
  0x7d   :  { %34 = vst.msk [vmem:[#allocation0] sm:$0x1] %vm33_vm5, %v32_v36   ;;  %vm129_vm5 = vcmask 392544  }
  0x7e   :  { %40 = vst.msk [vmem:[#allocation0] sm:$0x1] %vm39_vm6, %v38_v37   ;;  %vm135_vm6 = vcmask 359744  }
  0x80   :  { %v44_v38 = vpop.permute.xlu0 %43   ;;  %v50_v39 = vpop.permute.xlu1 %49  }
  0x81   :  { %46 = vst.msk [vmem:[#allocation0] sm:$0x1] %vm45_vm7, %v44_v38   ;;  %vm141_vm7 = vcmask 326944  }
  0x82   :  { %52 = vst.msk [vmem:[#allocation0] sm:$0x1] %vm51_vm8, %v50_v39   ;;  %vm147_vm8 = vcmask 294144  }
  0x84   :  { %v56_v40 = vpop.permute.xlu0 %55   ;;  %v62_v41 = vpop.permute.xlu1 %61  }
  0x85   :  { %58 = vst.msk [vmem:[#allocation0] sm:$0x1] %vm57_vm9, %v56_v40   ;;  %vm153_vm9 = vcmask 261344  }
  0x86   :  { %64 = vst.msk [vmem:[#allocation0] sm:$0x1] %vm63_vm10, %v62_v41   ;;  %vm159_vm10 = vcmask 228544  }
  0x88   :  { %v68_v42 = vpop.permute.xlu0 %67   ;;  %v74_v43 = vpop.permute.xlu1 %73  }
  0x89   :  { %70 = vst.msk [vmem:[#allocation0] sm:$0x1] %vm69_vm11, %v68_v42   ;;  %vm165_vm11 = vcmask 195744  }
  0x8a   :  { %76 = vst.msk [vmem:[#allocation0] sm:$0x1] %vm75_vm12, %v74_v43   ;;  %vm171_vm12 = vcmask 162944  }
  0x8c   :  { %v80_v44 = vpop.permute.xlu0 %79   ;;  %v86_v45 = vpop.permute.xlu1 %85  }
  0x8d   :  { %82 = vst.msk [vmem:[#allocation0] sm:$0x1] %vm81_vm13, %v80_v44   ;;  %vm177_vm13 = vcmask 130144  }
  0x8e   :  { %88 = vst.msk [vmem:[#allocation0] sm:$0x1] %vm87_vm14, %v86_v45   ;;  %vm183_vm14 = vcmask 97344  }
  0x90   :  { %v92_v46 = vpop.permute.xlu0 %91   ;;  %v98_v47 = vpop.permute.xlu1 %97  }
  0x91   :  { %94 = vst.msk [vmem:[#allocation0] sm:$0x1] %vm93_vm15, %v92_v46   ;;  %vm189_vm15 = vcmask 64544  }
  0x92   :  { %100 = vst.msk [vmem:[#allocation0] sm:$0x1] %vm99_vm0, %v98_v47  }
  0x94   :  { %v104_v48 = vpop.permute.xlu0 %103   ;;  %v110_v49 = vpop.permute.xlu1 %109  }
  0x95   :  { %106 = vst.msk [vmem:[#allocation0] sm:$0x1] %vm105_vm1, %v104_v48  }
  0x96   :  { %112 = vst.msk [vmem:[#allocation0] sm:$0x1] %vm111_vm2, %v110_v49  }
  0x98   :  { %v116_v50 = vpop.permute.xlu0 %115   ;;  %v122_v51 = vpop.permute.xlu1 %121  }
  0x99   :  { %118 = vst.msk [vmem:[#allocation0] sm:$0x1] %vm117_vm3, %v116_v50  }
  0x9a   :  { %124 = vst.msk [vmem:[#allocation0] sm:$0x1] %vm123_vm4, %v122_v51  }
  0x9c   :  { %v128_v52 = vpop.permute.xlu0 %127   ;;  %v134_v53 = vpop.permute.xlu1 %133  }
  0x9d   :  { %130 = vst.msk [vmem:[#allocation0] sm:$0x1] %vm129_vm5, %v128_v52  }
  0x9e   :  { %136 = vst.msk [vmem:[#allocation0] sm:$0x1] %vm135_vm6, %v134_v53  }
  0xa0   :  { %v140_v54 = vpop.permute.xlu0 %139   ;;  %v146_v55 = vpop.permute.xlu1 %145  }
  0xa1   :  { %142 = vst.msk [vmem:[#allocation0] sm:$0x1] %vm141_vm7, %v140_v54  }
  0xa2   :  { %148 = vst.msk [vmem:[#allocation0] sm:$0x1] %vm147_vm8, %v146_v55  }
  0xa4   :  { %v152_v56 = vpop.permute.xlu0 %151   ;;  %v158_v57 = vpop.permute.xlu1 %157  }
  0xa5   :  { %154 = vst.msk [vmem:[#allocation0] sm:$0x1] %vm153_vm9, %v152_v56  }
  0xa6   :  { %160 = vst.msk [vmem:[#allocation0] sm:$0x1] %vm159_vm10, %v158_v57  }
  0xa8   :  { %v164_v58 = vpop.permute.xlu0 %163   ;;  %v170_v59 = vpop.permute.xlu1 %169  }
  0xa9   :  { %166 = vst.msk [vmem:[#allocation0] sm:$0x1] %vm165_vm11, %v164_v58  }
  0xaa   :  { %172 = vst.msk [vmem:[#allocation0] sm:$0x1] %vm171_vm12, %v170_v59  }
  0xac   :  { %v176_v60 = vpop.permute.xlu0 %175   ;;  %v182_v61 = vpop.permute.xlu1 %181  }
  0xad   :  { %178 = vst.msk [vmem:[#allocation0] sm:$0x1] %vm177_vm13, %v176_v60  }
  0xae   :  { %184 = vst.msk [vmem:[#allocation0] sm:$0x1] %vm183_vm14, %v182_v61  }
  0xb0   :  { %v188_v62 = vpop.permute.xlu0 %187  }
  0xb1   :  { %190 = vst.msk [vmem:[#allocation0] sm:$0x1] %vm189_vm15, %v188_v62  }
  0xb8   :  { %v194_v63 = vld [vmem:[#allocation0] sm:$0x1] }
  0xb9   :  { %196 = vst [vmem:[%s400_s1] sm:$0x1] %v194_v63 }

// kernel: tile.53
= control target key start
LH: loop header
LB: loop body
LE: loop exit
PB: predicated region body
PF: predicated region fallthrough
CT: control target
= control target key end

     0   :  { %2 = vsyncpa [#allocation1], 0  ;;  %s53_s6 = smov [#allocation0]   ;;  %s88_s0 = inlined_call_operand.hbm [shape: f32[8], index: 0, kind: input, shape index: {}]   ;;  %s89_s1 = inlined_call_operand.vmem [shape: f32[32,8], index: 1, kind: output, shape index: {}]  }
   0x1   :  { %s9_s7 = sshll.u32 %s53_s6, 4  ;;  %s29_s10 = scalar_lea.hbm %s88_s0, 16  ;;  %s10_s7 = int_to_ptr.vmem [resolvable:$true] %s9_s7 }
   0x2   :  { %p30_p0 = scmp.ne.s32.totalorder %s88_s0, %s29_s10  ;;  %p33_p1 = scmp.lt.u32.totalorder %s29_s10, %s88_s0 }
   0x4   :  { %p35_p2 = pnand %p33_p1, %p30_p0 }
   0x6   :  { %38 = shalt.err (!%p35_p2)
}
   0x7   :  { %s39_s15 = scalar_lea.vmem %s10_s7, 16  ;;  %s43_s16 = scalar_lea.vmem %s10_s7, 32 }
   0x8   :  { %p40_p3 = scmp.ne.s32.totalorder %s10_s7, %s39_s15  ;;  %p44_p4 = scmp.lt.s32.totalorder %s10_s7, %s10_s7 }
   0x9   :  { %p45_p5 = scmp.lt.s32.totalorder %s43_s16, %s39_s15 }
   0xb   :  { %p46_p6 = por %p45_p5, %p44_p4 }
   0xd   :  { %p47_p7 = pnand %p46_p6, %p40_p3 }
   0xf   :  { %50 = shalt.err (!%p47_p7)
}
  0x10   :  { %12 = dma.hbm_to_vmem [thread:$0]  %s88_s0, 16, %s10_s7, [#allocation1]  }
  0x11   :  { %51 = dma.done.wait [#allocation1], 16  }
  0x12   :  { %52 = vsyncadd [#allocation1], 4294967280  ;;  %v16_v0 = vld [vmem:[#allocation0] ss:$0 sm:$0xff] }
  0x13   :  { %17 = vst [vmem:[%s89_s1] sm:$0xff] %v16_v0  ;;  %25 = vst [vmem:[%s89_s1 + $0x8] sm:$0xff] %v16_v0 }
  0x14   :  { %26 = vst [vmem:[%s89_s1 + $0x10] sm:$0xff] %v16_v0  ;;  %27 = vst [vmem:[%s89_s1 + $0x18] sm:$0xff] %v16_v0 }
  0x15   :  { %24 = vsyncpa [#allocation1], 1 }

// kernel: tile.54
= control target key start
LH: loop header
LB: loop body
LE: loop exit
PB: predicated region body
PF: predicated region fallthrough
CT: control target
= control target key end

     0   :  { %s7_s6 = smov 3  ;;  %s21_s9 = smov 3  ;;  %vm4_vm0 = vcmask 64512   ;;  %vm11_vm1 = vcmask 1048512   ;;  %vm18_vm2 = vcmask 982912   ;;  %vm25_vm3 = vcmask 917312   ;;  %s232_s0 = inlined_call_operand.vmem [shape: f32[32,8], index: 0, kind: input, shape index: {}]   ;;  %s233_s1 = inlined_call_operand.vmem [shape: f32[1,256], index: 1, kind: output, shape index: {}]  }
   0x1   :  { %v122_v0 = vld [vmem:[%s232_s0 + $0xf] ss:$16 sm:%s7_s6]   ;;  %s153_s10 = smov 120   ;;  %v124_v1 = vld [vmem:[%s232_s0 + $0xd] ss:$16 sm:%s21_s9]   ;;  %s14_s13 = smov 3 }
   0x2   :  { %9 = vrot.lane.b32.xlu0 %v122_v0, %s153_s10  ;;  %s154_s14 = smov 104   ;;  %v123_v2 = vld [vmem:[%s232_s0 + $0xe] ss:$16 sm:%s14_s13]   ;;  %s28_s17 = smov 3  ;;  %vm32_vm4 = vcmask 851712   ;;  %vm39_vm5 = vcmask 786112  }
   0x3   :  { %23 = vrot.lane.b32.xlu1 %v124_v1, %s154_s14  ;;  %v125_v3 = vld [vmem:[%s232_s0 + $0xc] ss:$16 sm:%s28_s17]   ;;  %s35_s20 = smov 3  ;;  %s42_s21 = smov 3  ;;  %vm46_vm6 = vcmask 720512   ;;  %vm53_vm7 = vcmask 654912  }
   0x4   :  { %s155_s22 = smov 112   ;;  %s156_s23 = smov 96   ;;  %v126_v4 = vld [vmem:[%s232_s0 + $0xb] ss:$16 sm:%s35_s20]   ;;  %v127_v5 = vld [vmem:[%s232_s0 + $0xa] ss:$16 sm:%s42_s21]  }
   0x5   :  { %s49_s28 = smov 3  ;;  %s56_s29 = smov 3  ;;  %vm60_vm8 = vcmask 589312   ;;  %vm67_vm9 = vcmask 523712   ;;  %vm74_vm10 = vcmask 458112   ;;  %vm81_vm11 = vcmask 392512  }
   0x6   :  { %16 = vrot.lane.b32.xlu0 %v123_v2, %s155_s22  ;;  %s157_s30 = smov 88   ;;  %s158_s2 = smov 80   ;;  %v128_v6 = vld [vmem:[%s232_s0 + $0x9] ss:$16 sm:%s49_s28]   ;;  %vm88_vm12 = vcmask 326912   ;;  %vm95_vm13 = vcmask 261312  }
   0x7   :  { %30 = vrot.lane.b32.xlu1 %v125_v3, %s156_s23  ;;  %v129_v7 = vld [vmem:[%s232_s0 + $0x8] ss:$16 sm:%s56_s29]   ;;  %s63_s7 = smov 3  ;;  %s70_s8 = smov 3  ;;  %vm102_vm14 = vcmask 195712   ;;  %vm109_vm15 = vcmask 130112  }
   0x8   :  { %s159_s9 = smov 72   ;;  %s160_s10 = smov 64   ;;  %v130_v8 = vld [vmem:[%s232_s0 + $0x7] ss:$16 sm:%s63_s7]   ;;  %v131_v9 = vld [vmem:[%s232_s0 + $0x6] ss:$16 sm:%s70_s8]  }
   0x9   :  { %s2_s13 = smov 3  ;;  %s77_s16 = smov 3 }
   0xa   :  { %37 = vrot.lane.b32.xlu0 %v126_v4, %s157_s30  ;;  %v3_v10 = vld [vmem:[%s232_s0] ss:$16 sm:%s2_s13]   ;;  %s84_s19 = smov 3  ;;  %s161_s20 = smov 56  }
   0xb   :  { %44 = vrot.lane.b32.xlu1 %v127_v5, %s158_s2  ;;  %5 = vst.msk [vmem:[#allocation0] ss:$8 sm:$0x3] %vm4_vm0, %v3_v10   ;;  %s162_s21 = smov 48   ;;  %v132_v11 = vld [vmem:[%s232_s0 + $0x5] ss:$16 sm:%s77_s16]  }
   0xc   :  { %v133_v12 = vld [vmem:[%s232_s0 + $0x4] ss:$16 sm:%s84_s19]   ;;  %s91_s26 = smov 3  ;;  %s98_s27 = smov 3 }
   0xd   :  { %s163_s28 = smov 40   ;;  %s164_s29 = smov 32   ;;  %v134_v13 = vld [vmem:[%s232_s0 + $0x3] ss:$16 sm:%s91_s26]   ;;  %v135_v14 = vld [vmem:[%s232_s0 + $0x2] ss:$16 sm:%s98_s27]  }
   0xe   :  { %51 = vrot.lane.b32.xlu0 %v128_v6, %s159_s9  ;;  %s105_s5 = smov 3  ;;  %s165_s6 = smov 24  }
   0xf   :  { %58 = vrot.lane.b32.xlu1 %v129_v7, %s160_s10  ;;  %s166_s7 = smov 16   ;;  %v136_v15 = vld [vmem:[%s232_s0 + $0x1] ss:$16 sm:%s105_s5]   ;;  %s167_s0 = smov 8  }
  0x12   :  { %65 = vrot.lane.b32.xlu0 %v130_v8, %s161_s20 }
  0x13   :  { %72 = vrot.lane.b32.xlu1 %v131_v9, %s162_s21 }
  0x16   :  { %79 = vrot.lane.b32.xlu0 %v132_v11, %s163_s28 }
  0x17   :  { %86 = vrot.lane.b32.xlu1 %v133_v12, %s164_s29 }
  0x1a   :  { %93 = vrot.lane.b32.xlu0 %v134_v13, %s165_s6 }
  0x1b   :  { %100 = vrot.lane.b32.xlu1 %v135_v14, %s166_s7 }
  0x1e   :  { %107 = vrot.lane.b32.xlu0 %v136_v15, %s167_s0 }
  0x74   :  { %v10_v16 = vpop.permute.xlu0 %9  }
  0x75   :  { %12 = vst.msk [vmem:[#allocation0] ss:$8 sm:$0x3] %vm11_vm1, %v10_v16   ;;  %v24_v17 = vpop.permute.xlu1 %23  }
  0x78   :  { %v17_v18 = vpop.permute.xlu0 %16  }
  0x79   :  { %19 = vst.msk [vmem:[#allocation0] ss:$8 sm:$0x3] %vm18_vm2, %v17_v18   ;;  %v31_v19 = vpop.permute.xlu1 %30  }
  0x7a   :  { %26 = vst.msk [vmem:[#allocation0] ss:$8 sm:$0x3] %vm25_vm3, %v24_v17  }
  0x7b   :  { %33 = vst.msk [vmem:[#allocation0] ss:$8 sm:$0x3] %vm32_vm4, %v31_v19  }
  0x7c   :  { %v38_v20 = vpop.permute.xlu0 %37  }
  0x7d   :  { %40 = vst.msk [vmem:[#allocation0] ss:$8 sm:$0x3] %vm39_vm5, %v38_v20   ;;  %v45_v21 = vpop.permute.xlu1 %44  }
  0x7e   :  { %47 = vst.msk [vmem:[#allocation0] ss:$8 sm:$0x3] %vm46_vm6, %v45_v21  }
  0x80   :  { %v52_v22 = vpop.permute.xlu0 %51  }
  0x81   :  { %54 = vst.msk [vmem:[#allocation0] ss:$8 sm:$0x3] %vm53_vm7, %v52_v22   ;;  %v59_v23 = vpop.permute.xlu1 %58  }
  0x82   :  { %61 = vst.msk [vmem:[#allocation0] ss:$8 sm:$0x3] %vm60_vm8, %v59_v23  }
  0x84   :  { %v66_v24 = vpop.permute.xlu0 %65  }
  0x85   :  { %68 = vst.msk [vmem:[#allocation0] ss:$8 sm:$0x3] %vm67_vm9, %v66_v24   ;;  %v73_v25 = vpop.permute.xlu1 %72  }
  0x86   :  { %75 = vst.msk [vmem:[#allocation0] ss:$8 sm:$0x3] %vm74_vm10, %v73_v25  }
  0x88   :  { %v80_v26 = vpop.permute.xlu0 %79  }
  0x89   :  { %82 = vst.msk [vmem:[#allocation0] ss:$8 sm:$0x3] %vm81_vm11, %v80_v26   ;;  %v87_v27 = vpop.permute.xlu1 %86  }
  0x8a   :  { %89 = vst.msk [vmem:[#allocation0] ss:$8 sm:$0x3] %vm88_vm12, %v87_v27  }
  0x8c   :  { %v94_v28 = vpop.permute.xlu0 %93  }
  0x8d   :  { %96 = vst.msk [vmem:[#allocation0] ss:$8 sm:$0x3] %vm95_vm13, %v94_v28   ;;  %v101_v29 = vpop.permute.xlu1 %100  }
  0x8e   :  { %103 = vst.msk [vmem:[#allocation0] ss:$8 sm:$0x3] %vm102_vm14, %v101_v29  }
  0x90   :  { %v108_v30 = vpop.permute.xlu0 %107  }
  0x91   :  { %110 = vst.msk [vmem:[#allocation0] ss:$8 sm:$0x3] %vm109_vm15, %v108_v30  }
  0x98   :  { %v114_v31 = vld [vmem:[#allocation0] sm:$0x1]  ;;  %v118_v32 = vld [vmem:[#allocation0 + $0x8] sm:$0x1] }
  0x99   :  { %116 = vst [vmem:[%s233_s1] sm:$0x1] %v114_v31  ;;  %137 = vst [vmem:[%s233_s1 + $0x1] sm:$0x1] %v118_v32 }

// kernel: tile.78
= control target key start
LH: loop header
LB: loop body
LE: loop exit
PB: predicated region body
PF: predicated region fallthrough
CT: control target
= control target key end

     0   :  { %2 = vsyncpa [#allocation1], 0  ;;  %s65_s6 = smov [#allocation0]   ;;  %s112_s0 = inlined_call_operand.hbm [shape: f32[4], index: 0, kind: input, shape index: {}]   ;;  %s113_s1 = inlined_call_operand.vmem [shape: f32[64,4], index: 1, kind: output, shape index: {}]  }
   0x1   :  { %s9_s7 = sshll.u32 %s65_s6, 4  ;;  %s41_s10 = scalar_lea.hbm %s112_s0, 16  ;;  %s10_s7 = int_to_ptr.vmem [resolvable:$true] %s9_s7 }
   0x2   :  { %p42_p0 = scmp.ne.s32.totalorder %s112_s0, %s41_s10  ;;  %p45_p1 = scmp.lt.u32.totalorder %s41_s10, %s112_s0 }
   0x4   :  { %p47_p2 = pnand %p45_p1, %p42_p0 }
   0x6   :  { %50 = shalt.err (!%p47_p2)
}
   0x7   :  { %s51_s15 = scalar_lea.vmem %s10_s7, 16  ;;  %s55_s16 = scalar_lea.vmem %s10_s7, 32 }
   0x8   :  { %p52_p3 = scmp.ne.s32.totalorder %s10_s7, %s51_s15  ;;  %p56_p4 = scmp.lt.s32.totalorder %s10_s7, %s10_s7 }
   0x9   :  { %p57_p5 = scmp.lt.s32.totalorder %s55_s16, %s51_s15 }
   0xb   :  { %p58_p6 = por %p57_p5, %p56_p4 }
   0xd   :  { %p59_p7 = pnand %p58_p6, %p52_p3 }
   0xf   :  { %62 = shalt.err (!%p59_p7)
}
  0x10   :  { %12 = dma.hbm_to_vmem [thread:$0]  %s112_s0, 16, %s10_s7, [#allocation1]  }
  0x11   :  { %63 = dma.done.wait [#allocation1], 16  }
  0x12   :  { %64 = vsyncadd [#allocation1], 4294967280  ;;  %v16_v0 = vld [vmem:[#allocation0] ss:$0 sm:$0xff] }
  0x13   :  { %17 = vst [vmem:[%s113_s1] sm:$0xff] %v16_v0  ;;  %33 = vst [vmem:[%s113_s1 + $0x8] sm:$0xff] %v16_v0 }
  0x14   :  { %34 = vst [vmem:[%s113_s1 + $0x10] sm:$0xff] %v16_v0  ;;  %35 = vst [vmem:[%s113_s1 + $0x18] sm:$0xff] %v16_v0 }
  0x15   :  { %36 = vst [vmem:[%s113_s1 + $0x20] sm:$0xff] %v16_v0  ;;  %37 = vst [vmem:[%s113_s1 + $0x28] sm:$0xff] %v16_v0 }
  0x16   :  { %38 = vst [vmem:[%s113_s1 + $0x30] sm:$0xff] %v16_v0  ;;  %39 = vst [vmem:[%s113_s1 + $0x38] sm:$0xff] %v16_v0 }
  0x17   :  { %32 = vsyncpa [#allocation1], 1 }

// kernel: tile.79
= control target key start
LH: loop header
LB: loop body
LE: loop exit
PB: predicated region body
PF: predicated region fallthrough
CT: control target
= control target key end

     0   :  { %vm5_vm0 = vcmask 1041409   ;;  %s425_s14 = smov 124   ;;  %s426_s21 = smov 116   ;;  %vm7_vm1 = vcmask 31744   ;;  %vm17_vm2 = vcmask 1048544   ;;  %vm27_vm3 = vcmask 1015744   ;;  %s696_s0 = inlined_call_operand.vmem [shape: f32[64,4], index: 0, kind: input, shape index: {}]   ;;  %s697_s1 = inlined_call_operand.vmem [shape: f32[1,256], index: 1, kind: output, shape index: {}]  }
   0x1   :  { %v331_v0 = vld [vmem:[%s696_s0 + $0x1f] sm:$0x1]   ;;  %v335_v3 = vld [vmem:[%s696_s0 + $0x1d] sm:$0x1]   ;;  %v333_v6 = vld [vmem:[%s696_s0 + $0x1e] sm:$0x1]  }
   0x2   :  { %v332_v1 = vld [vmem:[%s696_s0 + $0x3e] sm:$0x2]   ;;  %v336_v4 = vld [vmem:[%s696_s0 + $0x3c] sm:$0x2]   ;;  %v334_v7 = vld [vmem:[%s696_s0 + $0x3d] sm:$0x2]  }
   0x3   :  { %v14_v2 = vsel %vm5_vm0, %v332_v1, %v331_v0  ;;  %v34_v5 = vsel %vm5_vm0, %v336_v4, %v335_v3  ;;  %v337_v8 = vld [vmem:[%s696_s0 + $0x1c] sm:$0x1]   ;;  %v24_v9 = vsel %vm5_vm0, %v334_v7, %v333_v6  ;;  %v339_v12 = vld [vmem:[%s696_s0 + $0x1b] sm:$0x1]   ;;  %v341_v14 = vld [vmem:[%s696_s0 + $0x1a] sm:$0x1]  }
   0x4   :  { %15 = vrot.lane.b32.xlu0 %v14_v2, %s425_s14  ;;  %35 = vrot.lane.b32.xlu1 %v34_v5, %s426_s21  ;;  %v338_v10 = vld [vmem:[%s696_s0 + $0x3b] sm:$0x2]   ;;  %v340_v13 = vld [vmem:[%s696_s0 + $0x3a] sm:$0x2]   ;;  %s427_s3 = smov 120   ;;  %s428_s4 = smov 112  }
   0x5   :  { %v44_v11 = vsel %vm5_vm0, %v338_v10, %v337_v8  ;;  %v342_v15 = vld [vmem:[%s696_s0 + $0x39] sm:$0x2]   ;;  %v54_v16 = vsel %vm5_vm0, %v340_v13, %v339_v12  ;;  %v343_v18 = vld [vmem:[%s696_s0 + $0x19] sm:$0x1]   ;;  %v345_v20 = vld [vmem:[%s696_s0 + $0x18] sm:$0x1]  }
   0x6   :  { %v64_v17 = vsel %vm5_vm0, %v342_v15, %v341_v14  ;;  %v344_v19 = vld [vmem:[%s696_s0 + $0x38] sm:$0x2]   ;;  %v346_v21 = vld [vmem:[%s696_s0 + $0x37] sm:$0x2]   ;;  %s429_s13 = smov 108   ;;  %s430_s14 = smov 104  }
   0x7   :  { %v74_v22 = vsel %vm5_vm0, %v344_v19, %v343_v18  ;;  %v84_v23 = vsel %vm5_vm0, %v346_v21, %v345_v20  ;;  %v347_v24 = vld [vmem:[%s696_s0 + $0x17] sm:$0x1]   ;;  %v349_v26 = vld [vmem:[%s696_s0 + $0x16] sm:$0x1]   ;;  %s431_s23 = smov 100   ;;  %s432_s24 = smov 96  }
   0x8   :  { %25 = vrot.lane.b32.xlu0 %v24_v9, %s427_s3  ;;  %45 = vrot.lane.b32.xlu1 %v44_v11, %s428_s4  ;;  %v348_v25 = vld [vmem:[%s696_s0 + $0x36] sm:$0x2]   ;;  %v350_v27 = vld [vmem:[%s696_s0 + $0x35] sm:$0x2]   ;;  %s433_s4 = smov 92   ;;  %s434_s5 = smov 88  }
   0x9   :  { %v94_v28 = vsel %vm5_vm0, %v348_v25, %v347_v24  ;;  %v104_v29 = vsel %vm5_vm0, %v350_v27, %v349_v26  ;;  %v351_v30 = vld [vmem:[%s696_s0 + $0x15] sm:$0x1]   ;;  %v353_v32 = vld [vmem:[%s696_s0 + $0x14] sm:$0x1]   ;;  %v355_v36 = vld [vmem:[%s696_s0 + $0x13] sm:$0x1]  }
   0xa   :  { %v352_v31 = vld [vmem:[%s696_s0 + $0x34] sm:$0x2]   ;;  %v354_v33 = vld [vmem:[%s696_s0 + $0x33] sm:$0x2]   ;;  %v356_v37 = vld [vmem:[%s696_s0 + $0x32] sm:$0x2]  }
   0xb   :  { %v114_v34 = vsel %vm5_vm0, %v352_v31, %v351_v30  ;;  %v124_v35 = vsel %vm5_vm0, %v354_v33, %v353_v32  ;;  %v357_v38 = vld [vmem:[%s696_s0 + $0x12] sm:$0x1]   ;;  %s436_s15 = smov 80   ;;  %v134_v40 = vsel %vm5_vm0, %v356_v37, %v355_v36  ;;  %v359_v42 = vld [vmem:[%s696_s0 + $0x11] sm:$0x1]   ;;  %s438_s29 = smov 72  }
   0xc   :  { %55 = vrot.lane.b32.xlu0 %v54_v16, %s429_s13  ;;  %65 = vrot.lane.b32.xlu1 %v64_v17, %s430_s14  ;;  %v358_v39 = vld [vmem:[%s696_s0 + $0x31] sm:$0x2]   ;;  %s435_s14 = smov 84   ;;  %v360_v43 = vld [vmem:[%s696_s0 + $0x30] sm:$0x2]   ;;  %s439_s9 = smov 68  }
   0xd   :  { %v144_v41 = vsel %vm5_vm0, %v358_v39, %v357_v38  ;;  %v361_v44 = vld [vmem:[%s696_s0 + $0x10] sm:$0x1]   ;;  %v2_v46 = vld [vmem:[%s696_s0] sm:$0x1]   ;;  %v154_v48 = vsel %vm5_vm0, %v360_v43, %v359_v42  ;;  %v363_v51 = vld [vmem:[%s696_s0 + $0xf] sm:$0x1]  }
   0xe   :  { %v362_v45 = vld [vmem:[%s696_s0 + $0x2f] sm:$0x2]   ;;  %v330_v47 = vld [vmem:[%s696_s0 + $0x1f] sm:$0x2]   ;;  %v364_v52 = vld [vmem:[%s696_s0 + $0x2e] sm:$0x2]  }
   0xf   :  { %v6_v49 = vsel %vm5_vm0, %v330_v47, %v2_v46  ;;  %v164_v50 = vsel %vm5_vm0, %v362_v45, %v361_v44  ;;  %v365_v53 = vld [vmem:[%s696_s0 + $0xe] sm:$0x1]   ;;  %s440_s10 = smov 64   ;;  %v174_v55 = vsel %vm5_vm0, %v364_v52, %v363_v51  ;;  %v367_v57 = vld [vmem:[%s696_s0 + $0xd] sm:$0x1]   ;;  %s441_s19 = smov 60  }
  0x10   :  { %75 = vrot.lane.b32.xlu0 %v74_v22, %s431_s23  ;;  %85 = vrot.lane.b32.xlu1 %v84_v23, %s432_s24  ;;  %s437_s24 = smov 76   ;;  %8 = vst.msk [vmem:[#allocation0] ss:$8 sm:$0x3] %vm7_vm1, %v6_v49   ;;  %v366_v54 = vld [vmem:[%s696_s0 + $0x2d] sm:$0x2]  }
  0x11   :  { %v184_v56 = vsel %vm5_vm0, %v366_v54, %v365_v53  ;;  %v368_v58 = vld [vmem:[%s696_s0 + $0x2c] sm:$0x2]   ;;  %v369_v59 = vld [vmem:[%s696_s0 + $0xc] sm:$0x1]   ;;  %s442_s20 = smov 56   ;;  %s444_s30 = smov 48  }
  0x12   :  { %v370_v60 = vld [vmem:[%s696_s0 + $0x2b] sm:$0x2]   ;;  %v194_v61 = vsel %vm5_vm0, %v368_v58, %v367_v57  ;;  %v371_v63 = vld [vmem:[%s696_s0 + $0xb] sm:$0x1]   ;;  %v373_v1 = vld [vmem:[%s696_s0 + $0xa] sm:$0x1]  }
  0x13   :  { %v204_v62 = vsel %vm5_vm0, %v370_v60, %v369_v59  ;;  %v372_v0 = vld [vmem:[%s696_s0 + $0x2a] sm:$0x2]   ;;  %v374_v2 = vld [vmem:[%s696_s0 + $0x29] sm:$0x2]   ;;  %v375_v5 = vld [vmem:[%s696_s0 + $0x9] sm:$0x1]  }
  0x14   :  { %95 = vrot.lane.b32.xlu0 %v94_v28, %s433_s4  ;;  %105 = vrot.lane.b32.xlu1 %v104_v29, %s434_s5  ;;  %v214_v3 = vsel %vm5_vm0, %v372_v0, %v371_v63  ;;  %v224_v4 = vsel %vm5_vm0, %v374_v2, %v373_v1  ;;  %v376_v6 = vld [vmem:[%s696_s0 + $0x28] sm:$0x2]   ;;  %v377_v7 = vld [vmem:[%s696_s0 + $0x8] sm:$0x1]   ;;  %s446_s11 = smov 40   ;;  %s448_s21 = smov 32  }
  0x15   :  { %v378_v8 = vld [vmem:[%s696_s0 + $0x27] sm:$0x2]   ;;  %v234_v9 = vsel %vm5_vm0, %v376_v6, %v375_v5  ;;  %v379_v11 = vld [vmem:[%s696_s0 + $0x7] sm:$0x1]   ;;  %v381_v13 = vld [vmem:[%s696_s0 + $0x6] sm:$0x1]  }
  0x16   :  { %v244_v10 = vsel %vm5_vm0, %v378_v8, %v377_v7  ;;  %v380_v12 = vld [vmem:[%s696_s0 + $0x26] sm:$0x2]   ;;  %v382_v14 = vld [vmem:[%s696_s0 + $0x25] sm:$0x2]   ;;  %v383_v17 = vld [vmem:[%s696_s0 + $0x5] sm:$0x1]  }
  0x17   :  { %v254_v15 = vsel %vm5_vm0, %v380_v12, %v379_v11  ;;  %v264_v16 = vsel %vm5_vm0, %v382_v14, %v381_v13  ;;  %v384_v18 = vld [vmem:[%s696_s0 + $0x24] sm:$0x2]   ;;  %v385_v19 = vld [vmem:[%s696_s0 + $0x4] sm:$0x1]   ;;  %s450_s2 = smov 24   ;;  %s452_s12 = smov 16  }
  0x18   :  { %115 = vrot.lane.b32.xlu0 %v114_v34, %s435_s14  ;;  %125 = vrot.lane.b32.xlu1 %v124_v35, %s436_s15  ;;  %v386_v20 = vld [vmem:[%s696_s0 + $0x23] sm:$0x2]   ;;  %v274_v21 = vsel %vm5_vm0, %v384_v18, %v383_v17  ;;  %v387_v23 = vld [vmem:[%s696_s0 + $0x3] sm:$0x1]   ;;  %s454_s17 = smov 8   ;;  %s455_s18 = smov 4  }
  0x19   :  { %v284_v22 = vsel %vm5_vm0, %v386_v20, %v385_v19  ;;  %v388_v24 = vld [vmem:[%s696_s0 + $0x22] sm:$0x2]   ;;  %v389_v25 = vld [vmem:[%s696_s0 + $0x2] sm:$0x1]   ;;  %v391_v29 = vld [vmem:[%s696_s0 + $0x1] sm:$0x1]  }
  0x1a   :  { %v390_v26 = vld [vmem:[%s696_s0 + $0x21] sm:$0x2]   ;;  %v294_v27 = vsel %vm5_vm0, %v388_v24, %v387_v23  ;;  %v392_v30 = vld [vmem:[%s696_s0 + $0x20] sm:$0x2]   ;;  %s453_s0 = smov 12   ;;  %vm37_vm4 = vcmask 982944  }
  0x1b   :  { %v304_v28 = vsel %vm5_vm0, %v390_v26, %v389_v25  ;;  %v314_v31 = vsel %vm5_vm0, %v392_v30, %v391_v29  ;;  %vm47_vm5 = vcmask 950144   ;;  %vm57_vm6 = vcmask 917344  }
  0x1c   :  { %135 = vrot.lane.b32.xlu0 %v134_v40, %s437_s24  ;;  %145 = vrot.lane.b32.xlu1 %v144_v41, %s438_s29  ;;  %s443_s29 = smov 52   ;;  %vm67_vm7 = vcmask 884544   ;;  %vm77_vm8 = vcmask 851744   ;;  %vm87_vm9 = vcmask 818944   ;;  %vm97_vm10 = vcmask 786144  }
  0x1d   :  { %vm107_vm11 = vcmask 753344   ;;  %vm117_vm12 = vcmask 720544   ;;  %vm127_vm13 = vcmask 687744   ;;  %vm137_vm14 = vcmask 654944  }
  0x1e   :  { %vm147_vm15 = vcmask 622144   ;;  %vm157_vm0 = vcmask 589344   ;;  %vm167_vm1 = vcmask 556544  }
  0x20   :  { %155 = vrot.lane.b32.xlu0 %v154_v48, %s439_s9  ;;  %165 = vrot.lane.b32.xlu1 %v164_v50, %s440_s10  ;;  %s445_s10 = smov 44  }
  0x24   :  { %175 = vrot.lane.b32.xlu0 %v174_v55, %s441_s19  ;;  %185 = vrot.lane.b32.xlu1 %v184_v56, %s442_s20  ;;  %s447_s20 = smov 36  }
  0x28   :  { %195 = vrot.lane.b32.xlu0 %v194_v61, %s443_s29  ;;  %205 = vrot.lane.b32.xlu1 %v204_v62, %s444_s30  ;;  %s449_s30 = smov 28  }
  0x2c   :  { %215 = vrot.lane.b32.xlu0 %v214_v3, %s445_s10  ;;  %225 = vrot.lane.b32.xlu1 %v224_v4, %s446_s11  ;;  %s451_s11 = smov 20  }
  0x30   :  { %235 = vrot.lane.b32.xlu0 %v234_v9, %s447_s20  ;;  %245 = vrot.lane.b32.xlu1 %v244_v10, %s448_s21 }
  0x34   :  { %255 = vrot.lane.b32.xlu0 %v254_v15, %s449_s30  ;;  %265 = vrot.lane.b32.xlu1 %v264_v16, %s450_s2 }
  0x38   :  { %275 = vrot.lane.b32.xlu0 %v274_v21, %s451_s11  ;;  %285 = vrot.lane.b32.xlu1 %v284_v22, %s452_s12 }
  0x3c   :  { %295 = vrot.lane.b32.xlu0 %v294_v27, %s453_s0  ;;  %305 = vrot.lane.b32.xlu1 %v304_v28, %s454_s17 }
  0x40   :  { %315 = vrot.lane.b32.xlu0 %v314_v31, %s455_s18 }
  0x76   :  { %v16_v32 = vpop.permute.xlu0 %15   ;;  %v36_v33 = vpop.permute.xlu1 %35  }
  0x77   :  { %18 = vst.msk [vmem:[#allocation0] ss:$8 sm:$0x3] %vm17_vm2, %v16_v32   ;;  %vm177_vm2 = vcmask 523744  }
  0x7a   :  { %v26_v34 = vpop.permute.xlu0 %25   ;;  %v46_v35 = vpop.permute.xlu1 %45  }
  0x7b   :  { %28 = vst.msk [vmem:[#allocation0] ss:$8 sm:$0x3] %vm27_vm3, %v26_v34   ;;  %vm187_vm3 = vcmask 490944  }
  0x7c   :  { %38 = vst.msk [vmem:[#allocation0] ss:$8 sm:$0x3] %vm37_vm4, %v36_v33   ;;  %vm197_vm4 = vcmask 458144  }
  0x7d   :  { %48 = vst.msk [vmem:[#allocation0] ss:$8 sm:$0x3] %vm47_vm5, %v46_v35   ;;  %vm207_vm5 = vcmask 425344  }
  0x7e   :  { %v56_v36 = vpop.permute.xlu0 %55   ;;  %v66_v37 = vpop.permute.xlu1 %65  }
  0x7f   :  { %58 = vst.msk [vmem:[#allocation0] ss:$8 sm:$0x3] %vm57_vm6, %v56_v36   ;;  %vm217_vm6 = vcmask 392544  }
  0x80   :  { %68 = vst.msk [vmem:[#allocation0] ss:$8 sm:$0x3] %vm67_vm7, %v66_v37   ;;  %vm227_vm7 = vcmask 359744  }
  0x82   :  { %v76_v38 = vpop.permute.xlu0 %75   ;;  %v86_v39 = vpop.permute.xlu1 %85  }
  0x83   :  { %78 = vst.msk [vmem:[#allocation0] ss:$8 sm:$0x3] %vm77_vm8, %v76_v38   ;;  %vm237_vm8 = vcmask 326944  }
  0x84   :  { %88 = vst.msk [vmem:[#allocation0] ss:$8 sm:$0x3] %vm87_vm9, %v86_v39   ;;  %vm247_vm9 = vcmask 294144  }
  0x86   :  { %v96_v40 = vpop.permute.xlu0 %95   ;;  %v106_v41 = vpop.permute.xlu1 %105  }
  0x87   :  { %98 = vst.msk [vmem:[#allocation0] ss:$8 sm:$0x3] %vm97_vm10, %v96_v40   ;;  %vm257_vm10 = vcmask 261344  }
  0x88   :  { %108 = vst.msk [vmem:[#allocation0] ss:$8 sm:$0x3] %vm107_vm11, %v106_v41   ;;  %vm267_vm11 = vcmask 228544  }
  0x8a   :  { %v116_v42 = vpop.permute.xlu0 %115   ;;  %v126_v43 = vpop.permute.xlu1 %125  }
  0x8b   :  { %118 = vst.msk [vmem:[#allocation0] ss:$8 sm:$0x3] %vm117_vm12, %v116_v42   ;;  %vm277_vm12 = vcmask 195744  }
  0x8c   :  { %128 = vst.msk [vmem:[#allocation0] ss:$8 sm:$0x3] %vm127_vm13, %v126_v43   ;;  %vm287_vm13 = vcmask 162944  }
  0x8e   :  { %v136_v44 = vpop.permute.xlu0 %135   ;;  %v146_v45 = vpop.permute.xlu1 %145  }
  0x8f   :  { %138 = vst.msk [vmem:[#allocation0] ss:$8 sm:$0x3] %vm137_vm14, %v136_v44   ;;  %vm297_vm14 = vcmask 130144  }
  0x90   :  { %148 = vst.msk [vmem:[#allocation0] ss:$8 sm:$0x3] %vm147_vm15, %v146_v45   ;;  %vm307_vm15 = vcmask 97344  }
  0x92   :  { %v156_v46 = vpop.permute.xlu0 %155   ;;  %v166_v47 = vpop.permute.xlu1 %165  }
  0x93   :  { %158 = vst.msk [vmem:[#allocation0] ss:$8 sm:$0x3] %vm157_vm0, %v156_v46   ;;  %vm317_vm0 = vcmask 64544  }
  0x94   :  { %168 = vst.msk [vmem:[#allocation0] ss:$8 sm:$0x3] %vm167_vm1, %v166_v47  }
  0x96   :  { %v176_v48 = vpop.permute.xlu0 %175   ;;  %v186_v49 = vpop.permute.xlu1 %185  }
  0x97   :  { %178 = vst.msk [vmem:[#allocation0] ss:$8 sm:$0x3] %vm177_vm2, %v176_v48  }
  0x98   :  { %188 = vst.msk [vmem:[#allocation0] ss:$8 sm:$0x3] %vm187_vm3, %v186_v49  }
  0x9a   :  { %v196_v50 = vpop.permute.xlu0 %195   ;;  %v206_v51 = vpop.permute.xlu1 %205  }
  0x9b   :  { %198 = vst.msk [vmem:[#allocation0] ss:$8 sm:$0x3] %vm197_vm4, %v196_v50  }
  0x9c   :  { %208 = vst.msk [vmem:[#allocation0] ss:$8 sm:$0x3] %vm207_vm5, %v206_v51  }
  0x9e   :  { %v216_v52 = vpop.permute.xlu0 %215   ;;  %v226_v53 = vpop.permute.xlu1 %225  }
  0x9f   :  { %218 = vst.msk [vmem:[#allocation0] ss:$8 sm:$0x3] %vm217_vm6, %v216_v52  }
  0xa0   :  { %228 = vst.msk [vmem:[#allocation0] ss:$8 sm:$0x3] %vm227_vm7, %v226_v53  }
  0xa2   :  { %v236_v54 = vpop.permute.xlu0 %235   ;;  %v246_v55 = vpop.permute.xlu1 %245  }
  0xa3   :  { %238 = vst.msk [vmem:[#allocation0] ss:$8 sm:$0x3] %vm237_vm8, %v236_v54  }
  0xa4   :  { %248 = vst.msk [vmem:[#allocation0] ss:$8 sm:$0x3] %vm247_vm9, %v246_v55  }
  0xa6   :  { %v256_v56 = vpop.permute.xlu0 %255   ;;  %v266_v57 = vpop.permute.xlu1 %265  }
  0xa7   :  { %258 = vst.msk [vmem:[#allocation0] ss:$8 sm:$0x3] %vm257_vm10, %v256_v56  }
  0xa8   :  { %268 = vst.msk [vmem:[#allocation0] ss:$8 sm:$0x3] %vm267_vm11, %v266_v57  }
  0xaa   :  { %v276_v58 = vpop.permute.xlu0 %275   ;;  %v286_v59 = vpop.permute.xlu1 %285  }
  0xab   :  { %278 = vst.msk [vmem:[#allocation0] ss:$8 sm:$0x3] %vm277_vm12, %v276_v58  }
  0xac   :  { %288 = vst.msk [vmem:[#allocation0] ss:$8 sm:$0x3] %vm287_vm13, %v286_v59  }
  0xae   :  { %v296_v60 = vpop.permute.xlu0 %295   ;;  %v306_v61 = vpop.permute.xlu1 %305  }
  0xaf   :  { %298 = vst.msk [vmem:[#allocation0] ss:$8 sm:$0x3] %vm297_vm14, %v296_v60  }
  0xb0   :  { %308 = vst.msk [vmem:[#allocation0] ss:$8 sm:$0x3] %vm307_vm15, %v306_v61  }
  0xb2   :  { %v316_v62 = vpop.permute.xlu0 %315  }
  0xb3   :  { %318 = vst.msk [vmem:[#allocation0] ss:$8 sm:$0x3] %vm317_vm0, %v316_v62  }
  0xba   :  { %v322_v63 = vld [vmem:[#allocation0] sm:$0x1]  ;;  %v326_v0 = vld [vmem:[#allocation0 + $0x8] sm:$0x1] }
  0xbb   :  { %324 = vst [vmem:[%s697_s1] sm:$0x1] %v322_v63  ;;  %393 = vst [vmem:[%s697_s1 + $0x1] sm:$0x1] %v326_v0 }

// kernel: decoder3d_forward.4
= control target key start
LH: loop header
LB: loop body
LE: loop exit
PB: predicated region body
PF: predicated region fallthrough
CT: control target
= control target key end

     0   :  { %s433_s12 = smov 0   ;;  %s481_s0 = inlined_call_operand.vmem [shape: bf16[2,16,64], index: 0, kind: input, shape index: {}]   ;;  %s482_s1 = inlined_call_operand.vmem [shape: bf16[64,256], index: 1, kind: input, shape index: {}]   ;;  %s483_s2 = inlined_call_operand.vmem [shape: f32[1,256], index: 2, kind: input, shape index: {}]   ;;  %s484_s3 = inlined_call_operand.vmem [shape: bf16[2,16,256], index: 3, kind: output, shape index: {}]  }
   0x1 LB: > { %s355_s13 = sadd.s32 4294967295, %s410_s12   ;;  %p359_p0 = scmp.ge.s32.totalorder %s410_s12, 1  ;;  %s410_s12 = sphi %s433_s12, %s13_s12  }
   0x2   : > { %p137_p1 = scmp.lt.s32.totalorder %s410_s12, 3 }
   0x4   : > { %p138_p2 = pnand %p359_p0, %p137_p1 }
   0x5   : > { %v391_v0 = vld [vmem:[%s482_s1 + $0x4] ss:$8 sps:$4 sm:$0xff] (!%p138_p2)   ;;  %p161_p3 = scmp.lt.s32.totalorder (!%p138_p2), %s355_s13, 1  ;;  %v393_v1 = vld [vmem:[%s482_s1] ss:$8 sps:$4 sm:$0xff] (!%p138_p2)   ;;  %v412_v2 = vmov (!%p138_p2), 0   ;;  %v184_v10 = vlaneseq (!%p138_p2) }
   0x6   : > { %141 = sbr.rel (%p138_p2) target bundleno = 242 (0xf2), region = 32  ;;  %275 = vmatprep.mubr.bf16.mxu0 (!%p138_p2), %v412_v2  ;;  %243 = vmatprep.subr.bf16.mxu0 (!%p138_p2), %v391_v0  ;;  %v394_v3 = vld [vmem:[%s482_s1 + $0x14] ss:$8 sps:$4 sm:$0xff] (!%p138_p2)   ;;  %v396_v4 = vld [vmem:[%s482_s1 + $0x10] ss:$8 sps:$4 sm:$0xff] (!%p138_p2)   ;;  %vm239_vm0 = vcmask (!%p138_p2), 523264  }
   0x7   : > { %244 = vmatpush1.bf16.msra.mxu0 (!%p138_p2), %v393_v1  ;;  %v397_v5 = vld [vmem:[%s482_s1 + $0x24] ss:$8 sps:$4 sm:$0xff] (!%p138_p2)   ;;  %v399_v6 = vld [vmem:[%s482_s1 + $0x20] ss:$8 sps:$4 sm:$0xff] (!%p138_p2)   ;;  %v400_v7 = vld [vmem:[%s482_s1 + $0x34] ss:$8 sps:$4 sm:$0xff] (!%p138_p2)  }
   0x8   : > { %245 = vmatprep.subr.bf16.mxu0 (!%p138_p2), %v394_v3  ;;  %v402_v8 = vld [vmem:[%s482_s1 + $0x30] ss:$8 sps:$4 sm:$0xff] (!%p138_p2)   ;;  %v185_v11 = vshrl.u32 (!%p138_p2), %v184_v10, 7  ;;  %v182_v13 = vld [vmem:[%s483_s2] sm:$0x3] (!%p138_p2) }
   0xa   : > { %v186_v12 = vsub.s32 (!%p138_p2), 0, %v185_v11  ;;  %v190_v14 = vsub.s32 (!%p138_p2), 1, %v185_v11 }
   0xb   : > { %246 = vmatpush1.bf16.msra.mxu0 (!%p138_p2), %v396_v4 }
   0xc   : > { %247 = vmatprep.subr.bf16.mxu0 (!%p138_p2), %v397_v5  ;;  %v187_v15 = vrot.slane (!%p138_p2), %v182_v13, %v186_v12  ;;  %v191_v16 = vrot.slane (!%p138_p2), %v182_v13, %v190_v14 }
   0xd   : > { %s486_s13 = smov (!%p161_p3, %s355_s13), 1 }
   0xe   : > { %s378_s24 = sshll.u32 %s486_s13, 3  ;;  %s379_s9 = sshll.u32 %s486_s13, 4 }
   0xf   : > { %s165_s27 = scalar_lea.vmem %s481_s0, %s378_s24  ;;  %248 = vmatpush1.bf16.msra.mxu0 %v399_v6  ;;  %s170_s14 = scalar_lea.vmem %s484_s3, %s379_s9 }
  0x10   : > { %249 = vmatprep.subr.bf16.mxu0 %v400_v7  ;;  %v403_v9 = vld [vmem:[%s165_s27] sm:$0xff]  }
  0x13   : > { %250 = vmatpush1.bf16.msra.mxu0 %v402_v8 }
  0x16   : > { %373 = vmatmul.mubr.msk.bf16.vlgmr.msra.gmra.mrb[0].mxu0 %vm239_vm0, %v403_v9 }
  0xe9   : > { %v277_v17 = vpop.f32.mrb[0].mxu0 }
  0xea   : > { %v278_v18 = vadd.f32 %v277_v17, %v187_v15  ;;  %v279_v19 = vpop.f32.mrb[1].mxu0 }
  0xeb   : > { %v280_v20 = vadd.f32 %v279_v19, %v191_v16  ;;  %v281_v21 = vpop.f32.mrb[2].mxu0 }
  0xec   : > { %v282_v22 = vadd.f32 %v281_v21, %v187_v15  ;;  %v283_v23 = vpop.f32.mrb[3].mxu0 }
  0xed   : > { %v380_v24 = vpack.c.bf16 %v280_v20, %v278_v18  ;;  %v284_v25 = vadd.f32 %v283_v23, %v191_v16 }
  0xef   : > { %298 = vst [vmem:[%s170_s14] sm:$0xff] %v380_v24  ;;  %v381_v26 = vpack.c.bf16 %v284_v25, %v282_v22 }
  0xf1   : > { %299 = vst [vmem:[%s170_s14 + $0x8] sm:$0xff] %v381_v26 }
  0xf2 PF: > { %s13_s12 = sadd.s32 1, %s410_s12  }
  0xf3   : > { %p10_p4 = scmp.ge.s32.totalorder %s13_s12, 4  }
  0xf5   :  { %12 = sbr.rel (!%p10_p4) target bundleno = 1 (0x1), region = 62 }

// kernel: decoder3d_forward.5
= control target key start
LH: loop header
LB: loop body
LE: loop exit
PB: predicated region body
PF: predicated region fallthrough
CT: control target
= control target key end

     0   :  { %s4065_s24 = smov 0   ;;  %s4067_s25 = smov 0   ;;  %s4883_s0 = inlined_call_operand.vmem [shape: bf16[2,12,10,128], index: 0, kind: input, shape index: {}]   ;;  %s4884_s1 = inlined_call_operand.vmem [shape: bf16[1152,64], index: 1, kind: input, shape index: {}]   ;;  %s4885_s2 = inlined_call_operand.vmem [shape: f32[1,64], index: 2, kind: input, shape index: {}]   ;;  %s4886_s3 = inlined_call_operand.vmem [shape: f32[1,64], index: 3, kind: input, shape index: {}]   ;;  %s4887_s4 = inlined_call_operand.vmem [shape: bf16[576,64], index: 4, kind: input, shape index: {}]   ;;  %s4888_s5 = inlined_call_operand.vmem [shape: f32[1,128], index: 5, kind: input, shape index: {}]   ;;  %s4889_s6 = inlined_call_operand.vmem [shape: f32[1,128], index: 6, kind: input, shape index: {}]   ;;  %s4890_s7 = inlined_call_operand.vmem [shape: bf16[2,32,128], index: 7, kind: output, shape index: {}]  }
   0x1   :  { %s4069_s26 = smov 0   ;;  %s4071_s27 = smov 0  }
   0x2   :  { %s4073_s28 = smov 0  }
   0x3 LB: > { %s26_s29 = sadd.s32 1, %s4009_s26  ;;  %s29_s30 = sadd.s32 1, %s4013_s27  ;;  %s4017_s28 = sphi %s4073_s28, %s17_s28   ;;  %s4013_s27 = sphi %s4071_s27, %s4904_s27   ;;  %s4009_s26 = sphi %s4069_s26, %s4903_s26   ;;  %s4005_s25 = sphi %s4067_s25, %s4902_s25   ;;  %s4001_s24 = sphi %s4065_s24, %s4901_s24  }
   0x4   : > { %p27_p0 = scmp.ge.s32.totalorder %s26_s29, 2  ;;  %p3270_p1 = scmp.ge.s32.totalorder %s4017_s28, 1 }
   0x5   : > { %p251_p2 = scmp.lt.s32.totalorder %s4017_s28, 5 }
   0x6   : > { %s4906_s29 = smov (%p27_p0, %s26_s29), 0  ;;  %s4908_s30 = smov (!%p27_p0, %s29_s30), %s4013_s27 }
   0x7   : > { %p252_p3 = pnand %p3270_p1, %p251_p2  ;;  %p31_p4 = scmp.ge.s32.totalorder %s4908_s30, 2 }
   0x8   : > { %v3856_v0 = vld [vmem:[%s4884_s1 + $0x40] sm:$0xff] (!%p252_p3)   ;;  %p287_p5 = scmp.lt.s32.totalorder (!%p252_p3), %s4005_s25, 1  ;;  %s3272_s12 = sshll.u32 (!%p252_p3), %s4001_s24, 1  ;;  %v3860_v4 = vld [vmem:[%s4884_s1 + $0x48] sm:$0xff] (!%p252_p3)   ;;  %v3864_v8 = vld [vmem:[%s4884_s1 + $0x50] sm:$0xff] (!%p252_p3)   ;;  %vm472_vm0 = vcmask (!%p252_p3), 1042432  }
   0x9   : > { %s4910_s30 = smov (%p31_p4, %s4908_s30), 0  ;;  %255 = sbr.rel (%p252_p3) target bundleno = 894 (0x37e), region = 48 }
   0xa   : > { %v3857_v1 = vld [vmem:[%s4884_s1 + $0xc0] sm:$0xff] (!%p252_p3)   ;;  %3560 = vmatprep.subr.bf16.mxu0 (!%p252_p3), %v3856_v0  ;;  %p295_p6 = scmp.lt.s32.totalorder (!%p252_p3), %s3272_s12, 3  ;;  %v3861_v5 = vld [vmem:[%s4884_s1 + $0xc8] sm:$0xff] (!%p252_p3)   ;;  %v3865_v9 = vld [vmem:[%s4884_s1 + $0xd0] sm:$0xff] (!%p252_p3)   ;;  %vm473_vm1 = vcmask (!%p252_p3), 1046532   ;;  %vm4020_vm6 = vmmov (!%p252_p3), 0  }
   0xb   : > { %v3858_v2 = vld [vmem:[%s4884_s1] sm:$0xff] (!%p252_p3)   ;;  %3594 = vmatprep.subr.bf16.mxu1 (!%p252_p3), %v3857_v1  ;;  %v3862_v6 = vld [vmem:[%s4884_s1 + $0x8] sm:$0xff] (!%p252_p3)   ;;  %v3866_v10 = vld [vmem:[%s4884_s1 + $0x10] sm:$0xff] (!%p252_p3)   ;;  %vm346_vm2 = vsmask.f32 (!%p252_p3), 3328  ;;  %vm1928_vm7 = vcmask (!%p252_p3), 519168  }
   0xc   : > { %v3859_v3 = vld [vmem:[%s4884_s1 + $0x80] sm:$0xff] (!%p252_p3)   ;;  %3561 = vmatpush3.bf16.msra.mxu0 (!%p252_p3), %v3858_v2  ;;  %v3863_v7 = vld [vmem:[%s4884_s1 + $0x88] sm:$0xff] (!%p252_p3)   ;;  %v3867_v11 = vld [vmem:[%s4884_s1 + $0x90] sm:$0xff] (!%p252_p3)   ;;  %vm347_vm3 = vsmask.f32 (!%p252_p3), 7440  ;;  %vm1934_vm9 = vcmask (!%p252_p3), 516096  }
   0xd   : > { %3595 = vmatpush3.bf16.msra.mxu1 (!%p252_p3), %v3859_v3  ;;  %3562 = vmatprep.subr.bf16.mxu0 (!%p252_p3), %v3860_v4  ;;  %v3868_v12 = vld [vmem:[%s4884_s1 + $0x58] sm:$0xff] (!%p252_p3)   ;;  %v3872_v16 = vld [vmem:[%s4884_s1 + $0x60] sm:$0xff] (!%p252_p3)   ;;  %v3876_v20 = vld [vmem:[%s4884_s1 + $0x68] sm:$0xff] (!%p252_p3)   ;;  %vm1929_vm8 = vsmask.f32 (!%p252_p3), 7938  ;;  %p3467_p7 = scmp.ne.s32.totalorder (!%p252_p3), %s4001_s24, 0 }
   0xe   : > { %3596 = vmatprep.subr.bf16.mxu1 (!%p252_p3), %v3861_v5  ;;  %v3869_v13 = vld [vmem:[%s4884_s1 + $0xd8] sm:$0xff] (!%p252_p3)   ;;  %v3873_v17 = vld [vmem:[%s4884_s1 + $0xe0] sm:$0xff] (!%p252_p3)   ;;  %v3877_v21 = vld [vmem:[%s4884_s1 + $0xe8] sm:$0xff] (!%p252_p3)   ;;  %vm1935_vm10 = vsmask.f32 (!%p252_p3), 256 }
   0xf   : > { %v3870_v14 = vld [vmem:[%s4884_s1 + $0x18] sm:$0xff] (!%p252_p3)   ;;  %v3874_v18 = vld [vmem:[%s4884_s1 + $0x20] sm:$0xff] (!%p252_p3)   ;;  %v3878_v22 = vld [vmem:[%s4884_s1 + $0x28] sm:$0xff] (!%p252_p3)  }
  0x10   : > { %s4912_s25 = smov (!%p287_p5, %s4005_s25), 1  ;;  %s4914_s12 = smov (!%p295_p6, %s3272_s12), 3  ;;  %3563 = vmatpush3.bf16.msra.mxu0 %v3862_v6  ;;  %v3871_v15 = vld [vmem:[%s4884_s1 + $0x98] sm:$0xff]   ;;  %v3875_v19 = vld [vmem:[%s4884_s1 + $0xa0] sm:$0xff]   ;;  %v3879_v23 = vld [vmem:[%s4884_s1 + $0xa8] sm:$0xff]  }
  0x11   : > { %s3273_s23 = sshll.u32 %s4912_s25, 2  ;;  %3597 = vmatpush3.bf16.msra.mxu1 %v3863_v7  ;;  %3564 = vmatprep.subr.bf16.mxu0 %v3864_v8  ;;  %s3809_s15 = smul.u32 96, %s4912_s25  ;;  %v3880_v24 = vld [vmem:[%s4884_s1 + $0x70] sm:$0xff]   ;;  %v3884_v28 = vld [vmem:[%s4884_s1 + $0x78] sm:$0xff]   ;;  %vm4216_vm4 = vmor %vm472_vm0, %vm473_vm1 }
  0x12   : > { %s298_s10 = sadd.s32 %s3273_s23, %s4914_s12  ;;  %3598 = vmatprep.subr.bf16.mxu1 %v3865_v9  ;;  %v3881_v25 = vld [vmem:[%s4884_s1 + $0xf0] sm:$0xff]   ;;  %v3885_v29 = vld [vmem:[%s4884_s1 + $0xf8] sm:$0xff]   ;;  %vm4225_vm5 = vmor %vm346_vm2, %vm347_vm3 }
  0x13   : > { %s3274_s14 = sshll.u32 %s298_s10, 2  ;;  %v3882_v26 = vld [vmem:[%s4884_s1 + $0x30] sm:$0xff]   ;;  %s291_s9 = scalar_lea.vmem %s4883_s0, %s3809_s15  ;;  %v3886_v30 = vld [vmem:[%s4884_s1 + $0x38] sm:$0xff]   ;;  %v3890_v60 = vld [vmem:[%s4884_s1 + $0x140] sm:$0xff]  }
  0x14   : > { %s4134_s19 = scalar_lea.vmem %s4890_s7, %s3274_s14  ;;  %3565 = vmatpush3.bf16.msra.mxu0 %v3866_v10  ;;  %s3544_s10 = sshll.u32 %s4001_s24, 5  ;;  %v3883_v27 = vld [vmem:[%s4884_s1 + $0xb0] sm:$0xff]   ;;  %v3887_v31 = vld [vmem:[%s4884_s1 + $0xb8] sm:$0xff]   ;;  %v3892_v4 = vld [vmem:[%s4884_s1 + $0x1c0] sm:$0xff]  }
  0x15   : > { %3599 = vmatpush3.bf16.msra.mxu1 %v3867_v11  ;;  %3566 = vmatprep.subr.bf16.mxu0 %v3868_v12  ;;  %s4201_s20 = scalar_lea.vmem %s291_s9, %s3544_s10  ;;  %v3893_v7 = vld [vmem:[%s4884_s1 + $0x180] sm:$0xff]   ;;  %v3894_v10 = vld [vmem:[%s4884_s1 + $0x148] sm:$0xff]   ;;  %vm4525_vm11 = vmand %vm1928_vm7, %vm1929_vm8 }
  0x16   : > { %3600 = vmatprep.subr.bf16.mxu1 %v3869_v13  ;;  %v334_v32 = vld [vmem:[%s4201_s20] sm:$0xf]  ;;  %v335_v33 = vld [vmem:[%s4201_s20 + $0x4] sm:$0x1]  ;;  %v336_v34 = vld [vmem:[%s4201_s20 + $0x8] sm:$0xf] }
  0x17   : > { %v337_v35 = vld [vmem:[%s4201_s20 + $0xc] sm:$0x1]  ;;  %v350_v36 = vshrl.u32 %v334_v32, 16  ;;  %v353_v37 = vshll.u32 %v334_v32, 16  ;;  %v359_v38 = vshll.u32 %v335_v33, 16  ;;  %v364_v39 = vshrl.u32 %v336_v34, 16  ;;  %vm4531_vm12 = vmand %vm1934_vm9, %vm1935_vm10 }
  0x18   : > { %3567 = vmatpush3.bf16.msra.mxu0 %v3870_v14  ;;  %v367_v40 = vshll.u32 %v336_v34, 16  ;;  %v373_v41 = vshll.u32 %v337_v35, 16  ;;  %v3888_v42 = vld [vmem:[%s4201_s20 + $0x8] ss:$8 sps:$4 sm:$0xff]   ;;  %v448_v51 = vld [vmem:[%s4201_s20] sm:$0xe]  ;;  %vm4550_vm13 = vmand %vm1934_vm9, %vm1929_vm8 }
  0x19   : > { %3601 = vmatpush3.bf16.msra.mxu1 %v3871_v15  ;;  %3568 = vmatprep.subr.bf16.mxu0 %v3872_v16  ;;  %v352_v43 = vrot.slane %v350_v36, 4  ;;  %v355_v44 = vrot.slane %v353_v37, 5  ;;  %v366_v45 = vrot.slane %v364_v39, 4  ;;  %v361_v46 = vrot.slane %v359_v38, 5  ;;  %v449_v52 = vld [vmem:[%s4201_s20 + $0x4] sm:$0x1] }
  0x1a   : > { %3602 = vmatprep.subr.bf16.mxu1 %v3873_v17  ;;  %v369_v47 = vrot.slane %v367_v40, 5  ;;  %v375_v48 = vrot.slane %v373_v41, 5  ;;  %1616 = vmatprep.mubr.bf16.mxu1 %v3888_v42  ;;  %v450_v53 = vld [vmem:[%s4201_s20 + $0x8] sm:$0xe]  ;;  %v451_v56 = vld [vmem:[%s4201_s20 + $0xc] sm:$0x1] }
  0x1b   : > { %v356_v50 = vor.u32 %v355_v44, %v352_v43  ;;  %v3284_v57 = vrot.slane %v448_v51, 9  ;;  %v477_v58 = vrot.slane %v449_v52, 5  ;;  %v3285_v59 = vrot.slane %v450_v53, 9  ;;  %v3889_v0 = vld [vmem:[%s4201_s20] ss:$8 sps:$4 sm:$0xff]   ;;  %v3898_v14 = vld [vmem:[%s4884_s1 + $0x150] sm:$0xff]  }
  0x1c   : > { %3569 = vmatpush3.bf16.msra.mxu0 %v3874_v18  ;;  %v370_v55 = vor.u32 %v369_v47, %v366_v45  ;;  %v481_v62 = vrot.slane %v451_v56, 5  ;;  %v3891_v9 = vld [vmem:[%s4884_s1 + $0x100] sm:$0xff]   ;;  %v3896_v11 = vld [vmem:[%s4884_s1 + $0x1c8] sm:$0xff]   ;;  %v3899_v15 = vld [vmem:[%s4884_s1 + $0x110] sm:$0xff]  }
  0x1d   : > { %3603 = vmatpush3.bf16.msra.mxu1 %v3875_v19  ;;  %3570 = vmatprep.subr.bf16.mxu0 %v3876_v20  ;;  %v357_v61 = vrot.slane %v356_v50, 4  ;;  %v478_v1 = vsel %vm4216_vm4, %v3284_v57, %v477_v58  ;;  %v3897_v12 = vld [vmem:[%s4884_s1 + $0x188] sm:$0xff]   ;;  %v3900_v16 = vld [vmem:[%s4884_s1 + $0x1d0] sm:$0xff]   ;;  %v3902_v18 = vld [vmem:[%s4884_s1 + $0x158] sm:$0xff]  }
  0x1e   : > { %3604 = vmatprep.subr.bf16.mxu1 %v3877_v21  ;;  %v371_v63 = vrot.slane %v370_v55, 4  ;;  %v482_v3 = vsel %vm4216_vm4, %v3285_v59, %v481_v62  ;;  %v3895_v13 = vld [vmem:[%s4884_s1 + $0x108] sm:$0xff]   ;;  %v3901_v17 = vld [vmem:[%s4884_s1 + $0x190] sm:$0xff]   ;;  %v340_v21 = vld [vmem:[%s4201_s20 + $0x18] sm:$0xf] }
  0x1f   : > { %v362_v2 = vsel %vm4225_vm5, %v357_v61, %v361_v46  ;;  %v3290_v6 = vcombine.low %v478_v1, %v482_v3  ;;  %v338_v19 = vld [vmem:[%s4201_s20 + $0x10] sm:$0xf]  ;;  %v339_v20 = vld [vmem:[%s4201_s20 + $0x14] sm:$0x1]  ;;  %v3903_v32 = vld [vmem:[%s4201_s20 + $0x18] ss:$8 sps:$4 sm:$0xff]  }
  0x20   : > { %3571 = vmatpush3.bf16.msra.mxu0 %v3878_v22  ;;  %v376_v5 = vsel %vm4225_vm5, %v371_v63, %v375_v48  ;;  %v341_v22 = vld [vmem:[%s4201_s20 + $0x1c] sm:$0x1]  ;;  %v452_v39 = vld [vmem:[%s4201_s20 + $0x10] sm:$0xe]  ;;  %v453_v40 = vld [vmem:[%s4201_s20 + $0x14] sm:$0x1] }
  0x21   : > { %3605 = vmatpush3.bf16.msra.mxu1 %v3879_v23  ;;  %3572 = vmatprep.subr.bf16.mxu0 %v3880_v24  ;;  %v3281_v8 = vcombine.low %v362_v2, %v376_v5  ;;  %v378_v23 = vshrl.u32 %v338_v19, 16  ;;  %v381_v24 = vshll.u32 %v338_v19, 16  ;;  %v3904_v36 = vld [vmem:[%s4884_s1 + $0x118] sm:$0xff]   ;;  %v3286_v44 = vrot.slane %v452_v39, 9  ;;  %v3909_v61 = vld [vmem:[%s4884_s1 + $0x120] sm:$0xff]  }
  0x22   : > { %3606 = vmatprep.subr.bf16.mxu1 %v3881_v25  ;;  %v387_v25 = vshll.u32 %v339_v20, 16  ;;  %v454_v42 = vld [vmem:[%s4201_s20 + $0x18] sm:$0xe]  ;;  %v455_v43 = vld [vmem:[%s4201_s20 + $0x1c] sm:$0x1]  ;;  %v485_v47 = vrot.slane %v453_v40, 5 }
  0x23   : > { %1559 = vmatprep.mubr.bf16.mxu0 %v3281_v8  ;;  %v3905_v46 = vld [vmem:[%s4201_s20 + $0x10] ss:$8 sps:$4 sm:$0xff]   ;;  %v3287_v48 = vrot.slane %v454_v42, 9  ;;  %v489_v50 = vrot.slane %v455_v43, 5  ;;  %v3910_v62 = vld [vmem:[%s4884_s1 + $0x1e0] sm:$0xff]  }
  0x24   : > { %3573 = vmatpush3.bf16.msra.mxu0 %v3882_v26  ;;  %v392_v26 = vshrl.u32 %v340_v21, 16  ;;  %v389_v35 = vrot.slane %v387_v25, 5  ;;  %v3906_v52 = vld [vmem:[%s4884_s1 + $0x1d8] sm:$0xff]   ;;  %v486_v55 = vsel %vm4216_vm4, %v3286_v44, %v485_v47  ;;  %v3911_v63 = vld [vmem:[%s4884_s1 + $0x1a0] sm:$0xff]   ;;  %v344_v3 = vld [vmem:[%s4201_s20 + $0x28] sm:$0xf] }
  0x25   : > { %3607 = vmatpush3.bf16.msra.mxu1 %v3883_v27  ;;  %3574 = vmatprep.subr.bf16.mxu0 %v3884_v28  ;;  %v395_v27 = vshll.u32 %v340_v21, 16  ;;  %v401_v28 = vshll.u32 %v341_v22, 16  ;;  %v490_v56 = vsel %vm4216_vm4, %v3287_v48, %v489_v50  ;;  %v3907_v57 = vld [vmem:[%s4884_s1 + $0x198] sm:$0xff]   ;;  %v342_v1 = vld [vmem:[%s4201_s20 + $0x20] sm:$0xf]  ;;  %v420_v8 = vshrl.u32 %v344_v3, 16 }
  0x26   : > { %3608 = vmatprep.subr.bf16.mxu1 %v3885_v29  ;;  %v380_v29 = vrot.slane %v378_v23, 4  ;;  %v3291_v59 = vcombine.low %v486_v55, %v490_v56  ;;  %v343_v2 = vld [vmem:[%s4201_s20 + $0x24] sm:$0x1]  ;;  %v406_v5 = vshrl.u32 %v342_v1, 16  ;;  %v456_v22 = vld [vmem:[%s4201_s20 + $0x20] sm:$0xe] }
  0x27   : > { %v397_v33 = vrot.slane %v395_v27, 5  ;;  %v403_v38 = vrot.slane %v401_v28, 5  ;;  %v457_v23 = vld [vmem:[%s4201_s20 + $0x24] sm:$0x1]  ;;  %v3288_v27 = vrot.slane %v456_v22, 9  ;;  %v3920_v42 = vld [vmem:[%s4884_s1 + $0x1f0] sm:$0xff]  }
  0x28   : > { %3575 = vmatpush3.bf16.msra.mxu0 %v3886_v30  ;;  %v383_v30 = vrot.slane %v381_v24, 5  ;;  %v458_v24 = vld [vmem:[%s4201_s20 + $0x28] sm:$0xe]  ;;  %v493_v28 = vrot.slane %v457_v23, 5  ;;  %v3921_v43 = vld [vmem:[%s4884_s1 + $0x1b0] sm:$0xff]   ;;  %v3922_v44 = vld [vmem:[%s4884_s1 + $0x178] sm:$0xff]  }
  0x29   : > { %3609 = vmatpush3.bf16.msra.mxu1 %v3887_v31  ;;  %3628 = vmatprep.subr.bf16.mxu0 %v3890_v60  ;;  %v394_v31 = vrot.slane %v392_v26, 4  ;;  %v3908_v60 = vld [vmem:[%s4884_s1 + $0x160] sm:$0xff]   ;;  %v459_v26 = vld [vmem:[%s4201_s20 + $0x2c] sm:$0x1]  ;;  %v3319_v47 = vld [vmem:[%s4201_s20 + $0x8] sm:$0xe] }
  0x2a   : > { %3662 = vmatprep.subr.bf16.mxu1 %v3892_v4  ;;  %v384_v34 = vor.u32 %v383_v30, %v380_v29  ;;  %v345_v4 = vld [vmem:[%s4201_s20 + $0x2c] sm:$0x1]  ;;  %v3289_v29 = vrot.slane %v458_v24, 9  ;;  %v3321_v50 = vld [vmem:[%s4201_s20 + $0x10] sm:$0xe]  ;;  %v3925_v56 = vld [vmem:[%s4884_s1 + $0x1b8] sm:$0xff]  }
  0x2b   : > { %1560 = vmatmul.mubr.bf16.vlgmr.msra.gmra.mrb[0].mxu0 %v3889_v0  ;;  %v398_v37 = vor.u32 %v397_v33, %v394_v31  ;;  %v3912_v0 = vld [vmem:[%s4884_s1 + $0x168] sm:$0xff]   ;;  %v3332_v55 = vrot.slane %v3321_v50, 9 }
  0x2c   : > { %1617 = vmatmul.mubr.bf16.vlgmr.msra.gmra.mrb[0].mxu1 %v3290_v6  ;;  %3629 = vmatpush3.bf16.msra.mxu0 %v3891_v9  ;;  %v385_v41 = vrot.slane %v384_v34, 4  ;;  %v409_v6 = vshll.u32 %v342_v1, 16  ;;  %v423_v9 = vshll.u32 %v344_v3, 16  ;;  %v3915_v31 = vld [vmem:[%s4201_s20 + $0x20] ss:$8 sps:$4 sm:$0xff]   ;;  %v494_v34 = vsel %vm4216_vm4, %v3288_v27, %v493_v28 }
  0x2d   : > { %3663 = vmatpush3.bf16.msra.mxu1 %v3893_v7  ;;  %3630 = vmatprep.subr.bf16.mxu0 %v3894_v10  ;;  %v399_v45 = vrot.slane %v398_v37, 4  ;;  %v415_v7 = vshll.u32 %v343_v2, 16  ;;  %v429_v10 = vshll.u32 %v345_v4, 16  ;;  %v3320_v48 = vld [vmem:[%s4201_s20 + $0xc] sm:$0x1] }
  0x2e   : > { %3664 = vmatprep.subr.bf16.mxu1 %v3896_v11  ;;  %1624 = vmatprep.mubr.bf16.mxu1 %v3903_v32  ;;  %v390_v51 = vsel %vm4225_vm5, %v385_v41, %v389_v35  ;;  %v3913_v11 = vld [vmem:[%s4201_s20 + $0x28] ss:$8 sps:$4 sm:$0xff]   ;;  %v497_v32 = vrot.slane %v459_v26, 5 }
  0x2f   : > { %v404_v53 = vsel %vm4225_vm5, %v399_v45, %v403_v38  ;;  %v417_v19 = vrot.slane %v415_v7, 5  ;;  %v431_v20 = vrot.slane %v429_v10, 5  ;;  %v3917_v35 = vld [vmem:[%s4884_s1 + $0x1a8] sm:$0xff]   ;;  %v3918_v38 = vld [vmem:[%s4884_s1 + $0x170] sm:$0xff]   ;;  %v3923_v45 = vld [vmem:[%s4884_s1 + $0x138] sm:$0xff]  }
  0x30   : > { %3631 = vmatpush3.bf16.msra.mxu0 %v3895_v13  ;;  %v3282_v58 = vcombine.low %v390_v51, %v404_v53  ;;  %v411_v13 = vrot.slane %v409_v6, 5  ;;  %v498_v37 = vsel %vm4216_vm4, %v3289_v29, %v497_v32  ;;  %v3919_v41 = vld [vmem:[%s4884_s1 + $0x130] sm:$0xff]   ;;  %v682_v53 = vrot.slane %v3320_v48, 5  ;;  %v3928_v48 = vld [vmem:[%s4884_s1 + $0x208] sm:$0xff]  }
  0x31   : > { %3665 = vmatpush3.bf16.msra.mxu1 %v3897_v12  ;;  %3632 = vmatprep.subr.bf16.mxu0 %v3898_v14  ;;  %v408_v12 = vrot.slane %v406_v5, 4  ;;  %v422_v14 = vrot.slane %v420_v8, 4  ;;  %v3292_v40 = vcombine.low %v494_v34, %v498_v37  ;;  %v3322_v51 = vld [vmem:[%s4201_s20 + $0x14] sm:$0x1]  ;;  %v3351_v8 = vld [vmem:[%s4201_s20 + $0x10] sm:$0xf] }
  0x32   : > { %3666 = vmatprep.subr.bf16.mxu1 %v3900_v16  ;;  %1567 = vmatprep.mubr.bf16.mxu0 %v3282_v58  ;;  %v3914_v16 = vld [vmem:[%s4884_s1 + $0x128] sm:$0xff]  }
  0x33   : > { %1568 = vmatmul.mubr.bf16.gmra.mrb[4].mxu0 %v3905_v46  ;;  %v3924_v46 = vld [vmem:[%s4884_s1 + $0x1f8] sm:$0xff]  }
  0x34   : > { %3633 = vmatpush3.bf16.msra.mxu0 %v3899_v15  ;;  %1625 = vmatmul.mubr.bf16.gmra.mrb[4].mxu1 %v3291_v59  ;;  %v425_v15 = vrot.slane %v423_v9, 5  ;;  %v3304_v59 = vld [vmem:[%s4201_s20 + $0x8] sm:$0xf] }
  0x35   : > { %3667 = vmatpush3.bf16.msra.mxu1 %v3901_v17  ;;  %3634 = vmatprep.subr.bf16.mxu0 %v3902_v18  ;;  %v3916_v17 = vld [vmem:[%s4884_s1 + $0x1e8] sm:$0xff]   ;;  %v412_v18 = vor.u32 %v411_v13, %v408_v12  ;;  %v558_v1 = vshrl.u32 %v3304_v59, 16  ;;  %v561_v2 = vshll.u32 %v3304_v59, 16  ;;  %v3352_v12 = vld [vmem:[%s4201_s20 + $0x14] sm:$0x1]  ;;  %v763_v13 = vshrl.u32 %v3351_v8, 16 }
  0x36   : > { %3668 = vmatprep.subr.bf16.mxu1 %v3906_v52  ;;  %1632 = vmatprep.mubr.bf16.mxu1 %v3913_v11  ;;  %v426_v21 = vor.u32 %v425_v15, %v422_v14  ;;  %v3331_v52 = vrot.slane %v3319_v47, 9  ;;  %v772_v22 = vshll.u32 %v3352_v12, 16  ;;  %v3927_v47 = vld [vmem:[%s4201_s20 + $0x10] ss:$8 sps:$4 sm:$0xff]  }
  0x37   : > { %v413_v25 = vrot.slane %v412_v18, 4  ;;  %v560_v9 = vrot.slane %v558_v1, 4  ;;  %v563_v10 = vrot.slane %v561_v2, 5  ;;  %v766_v18 = vshll.u32 %v3351_v8, 16 }
  0x38   : > { %3635 = vmatpush3.bf16.msra.mxu0 %v3904_v36  ;;  %v427_v30 = vrot.slane %v426_v21, 4  ;;  %v683_v58 = vsel %vm4216_vm4, %v3331_v52, %v682_v53  ;;  %v765_v21 = vrot.slane %v763_v13, 4  ;;  %v774_v32 = vrot.slane %v772_v22, 5  ;;  %v3308_v52 = vld [vmem:[%s4201_s20 + $0x18] sm:$0xf] }
  0x39   : > { %3669 = vmatpush3.bf16.msra.mxu1 %v3907_v57  ;;  %3636 = vmatprep.subr.bf16.mxu0 %v3908_v60  ;;  %v418_v33 = vsel %vm4225_vm5, %v413_v25, %v417_v19  ;;  %v686_v57 = vrot.slane %v3322_v51, 5  ;;  %v3305_v60 = vld [vmem:[%s4201_s20 + $0xc] sm:$0x1]  ;;  %v564_v19 = vor.u32 %v563_v10, %v560_v9  ;;  %v768_v25 = vrot.slane %v766_v18, 5 }
  0x3a   : > { %3670 = vmatprep.subr.bf16.mxu1 %v3910_v62  ;;  %v432_v36 = vsel %vm4225_vm5, %v427_v30, %v431_v20  ;;  %v4019_v62 = vmov 0.0   ;;  %v567_v3 = vshll.u32 %v3305_v60, 16  ;;  %v3354_v20 = vld [vmem:[%s4201_s20 + $0x1c] sm:$0x1]  ;;  %v3311_v60 = vld [vmem:[%s4201_s20 + $0x24] sm:$0x1] }
  0x3b   : > { %v3283_v39 = vcombine.low %v418_v33, %v432_v36  ;;  %v786_v27 = vshll.u32 %v3354_v20, 16  ;;  %v565_v28 = vrot.slane %v564_v19, 4  ;;  %v3929_v20 = vld [vmem:[%s4884_s1 + $0x210] sm:$0xff]  }
  0x3c   : > { %3637 = vmatpush3.bf16.msra.mxu0 %v3909_v61  ;;  %1633 = vmatmul.mubr.bf16.gmra.mrb[8].mxu1 %v3292_v40  ;;  %v3306_v61 = vld [vmem:[%s4201_s20 + $0x10] sm:$0xf]  ;;  %v569_v11 = vrot.slane %v567_v3, 5  ;;  %v3323_v40 = vld [vmem:[%s4201_s20 + $0x18] sm:$0xe] }
  0x3d   : > { %3671 = vmatpush3.bf16.msra.mxu1 %v3911_v63  ;;  %3638 = vmatprep.subr.bf16.mxu0 %v3912_v0  ;;  %v687_v63 = vsel %vm4216_vm4, %v3332_v55, %v686_v57  ;;  %v3307_v0 = vld [vmem:[%s4201_s20 + $0x14] sm:$0x1]  ;;  %v572_v5 = vshrl.u32 %v3306_v61, 16  ;;  %v575_v6 = vshll.u32 %v3306_v61, 16  ;;  %v3333_v50 = vrot.slane %v3323_v40, 9 }
  0x3e   : > { %3672 = vmatprep.subr.bf16.mxu1 %v3916_v17  ;;  %1575 = vmatprep.mubr.bf16.mxu0 %v3283_v39  ;;  %v3337_v4 = vcombine.low %v683_v58, %v687_v63  ;;  %v581_v7 = vshll.u32 %v3307_v0, 16  ;;  %v3353_v17 = vld [vmem:[%s4201_s20 + $0x18] sm:$0xf]  ;;  %v570_v34 = vsel %vm4225_vm5, %v565_v28, %v569_v11  ;;  %v788_v39 = vrot.slane %v786_v27, 5  ;;  %v3310_v57 = vld [vmem:[%s4201_s20 + $0x20] sm:$0xf] }
  0x3f   : > { %1576 = vmatmul.mubr.bf16.gmra.mrb[8].mxu0 %v3915_v31  ;;  %v574_v14 = vrot.slane %v572_v5, 4  ;;  %v577_v15 = vrot.slane %v575_v6, 5  ;;  %v777_v23 = vshrl.u32 %v3353_v17, 16  ;;  %v780_v26 = vshll.u32 %v3353_v17, 16  ;;  %v3355_v0 = vld [vmem:[%s4201_s20 + $0x20] sm:$0xf] }
  0x40   : > { %3639 = vmatpush3.bf16.msra.mxu0 %v3914_v16  ;;  %1673 = vmatprep.mubr.bf16.mxu0 %v3337_v4  ;;  %v583_v16 = vrot.slane %v581_v7, 5  ;;  %v769_v31 = vor.u32 %v768_v25, %v765_v21  ;;  %v586_v61 = vshrl.u32 %v3308_v52, 16  ;;  %v589_v63 = vshll.u32 %v3308_v52, 16  ;;  %v3356_v5 = vld [vmem:[%s4201_s20 + $0x24] sm:$0x1] }
  0x41   : > { %3673 = vmatpush3.bf16.msra.mxu1 %v3917_v35  ;;  %3640 = vmatprep.subr.bf16.mxu0 %v3918_v38  ;;  %v578_v24 = vor.u32 %v577_v15, %v574_v14  ;;  %v779_v29 = vrot.slane %v777_v23, 4  ;;  %v782_v33 = vrot.slane %v780_v26, 5  ;;  %v3926_v35 = vld [vmem:[%s4884_s1 + $0x200] sm:$0xff]   ;;  %v600_v4 = vshrl.u32 %v3310_v57, 16  ;;  %v3357_v6 = vld [vmem:[%s4201_s20 + $0x28] sm:$0xf] }
  0x42   : > { %3674 = vmatprep.subr.bf16.mxu1 %v3920_v42  ;;  %v770_v37 = vrot.slane %v769_v31, 4  ;;  %v3324_v42 = vld [vmem:[%s4201_s20 + $0x1c] sm:$0x1]  ;;  %v588_v8 = vrot.slane %v586_v61, 4  ;;  %v591_v9 = vrot.slane %v589_v63, 5  ;;  %v603_v10 = vshll.u32 %v3310_v57, 16 }
  0x43   : > { %v579_v30 = vrot.slane %v578_v24, 4  ;;  %v783_v38 = vor.u32 %v782_v33, %v779_v29  ;;  %v690_v51 = vrot.slane %v3324_v42, 5  ;;  %v3358_v11 = vld [vmem:[%s4201_s20 + $0x2c] sm:$0x1]  ;;  %v602_v13 = vrot.slane %v600_v4, 4  ;;  %v3931_v31 = vld [vmem:[%s4884_s1 + $0x218] sm:$0xff]  }
  0x44   : > { %3641 = vmatpush3.bf16.msra.mxu0 %v3919_v41  ;;  %v609_v14 = vshll.u32 %v3311_v60, 16  ;;  %v791_v15 = vshrl.u32 %v3355_v0, 16  ;;  %v605_v17 = vrot.slane %v603_v10, 5  ;;  %v794_v18 = vshll.u32 %v3355_v0, 16  ;;  %v3329_v42 = vld [vmem:[%s4201_s20 + $0x30] sm:$0xe] }
  0x45   : > { %3675 = vmatpush3.bf16.msra.mxu1 %v3921_v43  ;;  %3642 = vmatprep.subr.bf16.mxu0 %v3922_v44  ;;  %v584_v36 = vsel %vm4225_vm5, %v579_v30, %v583_v16  ;;  %v3325_v43 = vld [vmem:[%s4201_s20 + $0x20] sm:$0xe]  ;;  %v3326_v44 = vld [vmem:[%s4201_s20 + $0x24] sm:$0x1]  ;;  %v691_v59 = vsel %vm4216_vm4, %v3333_v50, %v690_v51  ;;  %v592_v16 = vor.u32 %v591_v9, %v588_v8  ;;  %v800_v19 = vshll.u32 %v3356_v5, 16 }
  0x46   : > { %3676 = vmatprep.subr.bf16.mxu1 %v3924_v46  ;;  %v3316_v41 = vcombine.low %v570_v34, %v584_v36  ;;  %v784_v46 = vrot.slane %v783_v38, 4  ;;  %v3334_v53 = vrot.slane %v3325_v43, 9  ;;  %v694_v55 = vrot.slane %v3326_v44, 5  ;;  %v3327_v38 = vld [vmem:[%s4201_s20 + $0x28] sm:$0xe]  ;;  %v3932_v52 = vld [vmem:[%s4884_s1 + $0x220] sm:$0xff]  }
  0x47   : > { %v793_v21 = vrot.slane %v791_v15, 4  ;;  %v805_v22 = vshrl.u32 %v3357_v6, 16  ;;  %v808_v23 = vshll.u32 %v3357_v6, 16  ;;  %v593_v24 = vrot.slane %v592_v16, 4  ;;  %v3330_v43 = vld [vmem:[%s4201_s20 + $0x34] sm:$0x1] }
  0x48   : > { %3643 = vmatpush3.bf16.msra.mxu0 %v3923_v45  ;;  %v775_v45 = vsel %vm4225_vm5, %v770_v37, %v774_v32  ;;  %v789_v58 = vsel %vm4225_vm5, %v784_v46, %v788_v39  ;;  %v695_v2 = vsel %vm4216_vm4, %v3334_v53, %v694_v55  ;;  %v606_v25 = vor.u32 %v605_v17, %v602_v13  ;;  %v3328_v39 = vld [vmem:[%s4201_s20 + $0x2c] sm:$0x1]  ;;  %v3312_v51 = vld [vmem:[%s4201_s20 + $0x28] sm:$0xf]  ;;  %v3314_v57 = vld [vmem:[%s4201_s20 + $0x30] sm:$0xf] }
  0x49   : > { %3677 = vmatpush3.bf16.msra.mxu1 %v3925_v56  ;;  %3769 = vmatprep.subr.bf16.mxu0 %v4019_v62  ;;  %v3309_v56 = vld [vmem:[%s4201_s20 + $0x1c] sm:$0x1]  ;;  %v3363_v1 = vcombine.low %v775_v45, %v789_v58  ;;  %v3338_v7 = vcombine.low %v691_v59, %v695_v2  ;;  %v611_v26 = vrot.slane %v609_v14, 5  ;;  %v796_v27 = vrot.slane %v794_v18, 5  ;;  %v3315_v61 = vld [vmem:[%s4201_s20 + $0x34] sm:$0x1] }
  0x4a   : > { %v595_v3 = vshll.u32 %v3309_v56, 16  ;;  %v807_v28 = vrot.slane %v805_v22, 4  ;;  %v810_v29 = vrot.slane %v808_v23, 5  ;;  %v814_v30 = vshll.u32 %v3358_v11, 16  ;;  %v3313_v56 = vld [vmem:[%s4201_s20 + $0x2c] sm:$0x1] }
  0x4b   : > { %1674 = vmatmul.mubr.bf16.vlgmr.msra.gmra.mrb[12].mxu0 %v3316_v41  ;;  %1730 = vmatprep.mubr.bf16.mxu1 %v3363_v1  ;;  %v607_v33 = vrot.slane %v606_v25, 4  ;;  %v797_v34 = vor.u32 %v796_v27, %v793_v21  ;;  %v3335_v44 = vrot.slane %v3327_v38, 9  ;;  %v3336_v50 = vrot.slane %v3329_v42, 9  ;;  %v3359_v1 = vld [vmem:[%s4201_s20 + $0x30] sm:$0xf]  ;;  %v3934_v13 = vld [vmem:[%s4884_s1 + $0x228] sm:$0xff]  }
  0x4c   : > { %3770 = vmatpush3.bf16.msra.mxu0 %v3926_v35  ;;  %v597_v12 = vrot.slane %v595_v3, 5  ;;  %1731 = vmatmul.mubr.bf16.vlgmr.msra.gmra.mrb[12].mxu1 %v3927_v47  ;;  %v802_v35 = vrot.slane %v800_v19, 5  ;;  %v811_v36 = vor.u32 %v810_v29, %v807_v28  ;;  %v816_v37 = vrot.slane %v814_v30, 5  ;;  %v3930_v47 = vld [vmem:[%s4201_s20 + $0x20] ss:$8 sps:$4 sm:$0xff]  }
  0x4d   : > { %3771 = vmatprep.subr.bf16.mxu0 %v4019_v62  ;;  %1681 = vmatprep.mubr.bf16.mxu0 %v3338_v7  ;;  %v612_v40 = vsel %vm4225_vm5, %v607_v33, %v611_v26  ;;  %v798_v41 = vrot.slane %v797_v34, 4  ;;  %v702_v55 = vrot.slane %v3330_v43, 5  ;;  %v614_v58 = vshrl.u32 %v3312_v51, 16  ;;  %v3360_v6 = vld [vmem:[%s4201_s20 + $0x34] sm:$0x1] }
  0x4e   : > { %v598_v32 = vsel %vm4225_vm5, %v593_v24, %v597_v12  ;;  %v812_v46 = vrot.slane %v811_v36, 4  ;;  %v617_v63 = vshll.u32 %v3312_v51, 16  ;;  %v623_v0 = vshll.u32 %v3313_v56, 16  ;;  %v3361_v7 = vld [vmem:[%s4201_s20 + $0x38] sm:$0xf]  ;;  %v3935_v33 = vld [vmem:[%s4884_s1 + $0x230] sm:$0xff]  }
  0x4f   : > { %v3317_v45 = vcombine.low %v598_v32, %v612_v40  ;;  %v803_v53 = vsel %vm4225_vm5, %v798_v41, %v802_v35  ;;  %v703_v3 = vsel %vm4216_vm4, %v3336_v50, %v702_v55  ;;  %v616_v4 = vrot.slane %v614_v58, 4  ;;  %v3362_v12 = vld [vmem:[%s4201_s20 + $0x3c] sm:$0x1]  ;;  %v3366_v41 = vld [vmem:[%s4201_s20 + $0x10] sm:$0xe] }
  0x50   : > { %3772 = vmatpush3.bf16.msra.mxu0 %v3928_v48  ;;  %v698_v48 = vrot.slane %v3328_v39, 5  ;;  %v817_v59 = vsel %vm4225_vm5, %v812_v46, %v816_v37  ;;  %v628_v5 = vshrl.u32 %v3314_v57, 16  ;;  %v619_v9 = vrot.slane %v617_v63, 5  ;;  %v3936_v39 = vld [vmem:[%s4884_s1 + $0x238] sm:$0xff]   ;;  %v3367_v42 = vld [vmem:[%s4201_s20 + $0x14] sm:$0x1] }
  0x51   : > { %3773 = vmatprep.subr.bf16.mxu0 %v4019_v62  ;;  %v3364_v2 = vcombine.low %v803_v53, %v817_v59  ;;  %v625_v10 = vrot.slane %v623_v0, 5  ;;  %v631_v11 = vshll.u32 %v3314_v57, 16  ;;  %v637_v15 = vshll.u32 %v3315_v61, 16  ;;  %v3368_v46 = vld [vmem:[%s4201_s20 + $0x18] sm:$0xe] }
  0x52   : > { %v699_v60 = vsel %vm4216_vm4, %v3335_v44, %v698_v48  ;;  %v630_v14 = vrot.slane %v628_v5, 4  ;;  %v819_v16 = vshrl.u32 %v3359_v1, 16  ;;  %v822_v17 = vshll.u32 %v3359_v1, 16  ;;  %v3933_v55 = vld [vmem:[%s4201_s20 + $0x30] ss:$8 sps:$4 sm:$0xff]  }
  0x53   : > { %1682 = vmatmul.mubr.bf16.gmra.mrb[16].mxu0 %v3317_v45  ;;  %v3339_v8 = vcombine.low %v699_v60, %v703_v3  ;;  %1738 = vmatprep.mubr.bf16.mxu1 %v3364_v2  ;;  %v620_v18 = vor.u32 %v619_v9, %v616_v4  ;;  %v633_v19 = vrot.slane %v631_v11, 5  ;;  %v833_v21 = vshrl.u32 %v3361_v7, 16  ;;  %v3370_v59 = vld [vmem:[%s4201_s20 + $0x20] sm:$0xe]  ;;  %v3371_v60 = vld [vmem:[%s4201_s20 + $0x24] sm:$0x1] }
  0x54   : > { %3774 = vmatpush3.bf16.msra.mxu0 %v3929_v20  ;;  %1739 = vmatmul.mubr.bf16.gmra.mrb[16].mxu1 %v3930_v47  ;;  %v828_v20 = vshll.u32 %v3360_v6, 16  ;;  %v821_v22 = vrot.slane %v819_v16, 4  ;;  %v824_v23 = vrot.slane %v822_v17, 5  ;;  %v836_v24 = vshll.u32 %v3361_v7, 16  ;;  %v3369_v47 = vld [vmem:[%s4201_s20 + $0x1c] sm:$0x1] }
  0x55   : > { %3775 = vmatprep.subr.bf16.mxu0 %v4019_v62  ;;  %1689 = vmatprep.mubr.bf16.mxu0 %v3339_v8  ;;  %v621_v25 = vrot.slane %v620_v18, 4  ;;  %v634_v26 = vor.u32 %v633_v19, %v630_v14  ;;  %v639_v27 = vrot.slane %v637_v15, 5  ;;  %v835_v28 = vrot.slane %v833_v21, 4  ;;  %v3372_v61 = vld [vmem:[%s4201_s20 + $0x28] sm:$0xe] }
  0x56   : > { %v825_v29 = vor.u32 %v824_v23, %v821_v22  ;;  %v830_v30 = vrot.slane %v828_v20, 5  ;;  %v842_v32 = vshll.u32 %v3362_v12, 16  ;;  %v3378_v48 = vrot.slane %v3366_v41, 9  ;;  %v3373_v63 = vld [vmem:[%s4201_s20 + $0x2c] sm:$0x1] }
  0x57   : > { %v626_v34 = vsel %vm4225_vm5, %v621_v25, %v625_v10  ;;  %v635_v35 = vrot.slane %v634_v26, 4  ;;  %v887_v50 = vrot.slane %v3367_v42, 5  ;;  %v3379_v51 = vrot.slane %v3368_v46, 9  ;;  %v3374_v7 = vld [vmem:[%s4201_s20 + $0x30] sm:$0xe] }
  0x58   : > { %3776 = vmatpush3.bf16.msra.mxu0 %v3931_v31  ;;  %v838_v31 = vrot.slane %v836_v24, 5  ;;  %v826_v36 = vrot.slane %v825_v29, 4  ;;  %v844_v38 = vrot.slane %v842_v32, 5  ;;  %v3380_v1 = vrot.slane %v3370_v59, 9  ;;  %v3375_v8 = vld [vmem:[%s4201_s20 + $0x34] sm:$0x1] }
  0x59   : > { %3777 = vmatprep.subr.bf16.mxu0 %v4019_v62  ;;  %v640_v40 = vsel %vm4225_vm5, %v635_v35, %v639_v27  ;;  %v888_v57 = vsel %vm4216_vm4, %v3378_v48, %v887_v50  ;;  %v895_v2 = vrot.slane %v3371_v60, 5  ;;  %v3381_v3 = vrot.slane %v3372_v61, 9  ;;  %v3376_v9 = vld [vmem:[%s4201_s20 + $0x38] sm:$0xe]  ;;  %v3377_v10 = vld [vmem:[%s4201_s20 + $0x3c] sm:$0x1] }
  0x5a   : > { %v839_v37 = vor.u32 %v838_v31, %v835_v28  ;;  %v3318_v43 = vcombine.low %v626_v34, %v640_v40  ;;  %v831_v44 = vsel %vm4225_vm5, %v826_v36, %v830_v30  ;;  %v899_v4 = vrot.slane %v3373_v63, 5 }
  0x5b   : > { %v896_v5 = vsel %vm4216_vm4, %v3380_v1, %v895_v2  ;;  %v3382_v12 = vrot.slane %v3374_v7, 9  ;;  %v3383_v14 = vrot.slane %v3376_v9, 9  ;;  %v907_v15 = vrot.slane %v3377_v10, 5 }
  0x5c   : > { %3778 = vmatpush3.bf16.msra.mxu0 %v3932_v52  ;;  %v840_v45 = vrot.slane %v839_v37, 4  ;;  %v891_v52 = vrot.slane %v3369_v47, 5  ;;  %v900_v6 = vsel %vm4216_vm4, %v3381_v3, %v899_v4 }
  0x5d   : > { %3779 = vmatprep.subr.bf16.mxu0 %v4019_v62  ;;  %1690 = vmatmul.mubr.bf16.gmra.mrb[20].mxu0 %v3318_v43  ;;  %v3385_v11 = vcombine.low %v896_v5, %v900_v6  ;;  %v908_v17 = vsel %vm4216_vm4, %v3383_v14, %v907_v15 }
  0x5e   : > { %v845_v53 = vsel %vm4225_vm5, %v840_v45, %v844_v38  ;;  %3785 = vmatprep.mubr.msk.bf16.mxu0 %vm4020_vm6, %v4019_v62  ;;  %v892_v58 = vsel %vm4216_vm4, %v3379_v51, %v891_v52 }
  0x5f   : > { %v3365_v56 = vcombine.low %v831_v44, %v845_v53  ;;  %v3384_v0 = vcombine.low %v888_v57, %v892_v58 }
  0x60   : > { %3780 = vmatpush3.bf16.msra.mxu0 %v3934_v13  ;;  %v903_v13 = vrot.slane %v3375_v8, 5 }
  0x61   : > { %3781 = vmatprep.subr.bf16.mxu0 %v4019_v62  ;;  %1746 = vmatprep.mubr.bf16.mxu1 %v3365_v56 }
  0x62   : > { %1747 = vmatmul.mubr.bf16.gmra.mrb[20].mxu1 %v3933_v55  ;;  %v904_v16 = vsel %vm4216_vm4, %v3382_v12, %v903_v13 }
  0x63   : > { %v3386_v18 = vcombine.low %v904_v16, %v908_v17 }
  0x64   : > { %3782 = vmatpush3.bf16.msra.mxu0 %v3935_v33 }
  0x65   : > { %3783 = vmatprep.subr.bf16.mxu0 %v4019_v62 }
  0x68   : > { %3784 = vmatpush3.bf16.msra.mxu0 %v3936_v39 }
  0x6b   : > { %3786 = vmatmul.mubr.bf16.vlgmr.msra.gmra.mrb[24].mxu0 %v3384_v0 }
  0x6c   : > { %3789 = vmatprep.mubr.msk.bf16.mxu0 %vm4020_vm6, %v4019_v62 }
  0x73   : > { %3790 = vmatmul.mubr.bf16.gmra.mrb[28].mxu0 %v3385_v11 }
  0x74   : > { %3793 = vmatprep.mubr.msk.bf16.mxu0 %vm4020_vm6, %v4019_v62 }
  0x7b   : > { %3794 = vmatmul.mubr.bf16.gmra.mrb[32].mxu0 %v3386_v18 }
  0xfe   : > { %v3576_v21 = vpop.f32.mrb[0].mxu0 }
  0xff   : > { %v3610_v19 = vpop.f32.mrb[0].mxu1  ;;  %v3577_v24 = vpop.f32.mrb[1].mxu0 }
 0x100   : > { %v3611_v20 = vpop.f32.mrb[1].mxu1  ;;  %v3578_v26 = vadd.f32 %v3577_v24, %v3576_v21  ;;  %v3579_v27 = vpop.f32.mrb[2].mxu0 }
 0x101   : > { %v3612_v22 = vadd.f32 %v3611_v20, %v3610_v19  ;;  %v3613_v23 = vpop.f32.mrb[2].mxu1  ;;  %v3580_v29 = vpop.f32.mrb[3].mxu0 }
 0x102   : > { %v3614_v25 = vpop.f32.mrb[3].mxu1  ;;  %v3581_v30 = vadd.f32 %v3580_v29, %v3579_v27 }
 0x103   : > { %v3615_v28 = vadd.f32 %v3614_v25, %v3613_v23  ;;  %v1619_v62 = vadd.f32 %v3612_v22, %v3578_v26 }
 0x105   : > { %v1622_v31 = vadd.f32 %v3615_v28, %v3581_v30 }
 0x106   : > { %v3582_v33 = vpop.f32.mrb[4].mxu0 }
 0x107   : > { %v3616_v32 = vpop.f32.mrb[4].mxu1  ;;  %v3583_v35 = vpop.f32.mrb[5].mxu0 }
 0x108   : > { %v3617_v34 = vpop.f32.mrb[5].mxu1  ;;  %v3584_v38 = vadd.f32 %v3583_v35, %v3582_v33  ;;  %v3585_v39 = vpop.f32.mrb[6].mxu0 }
 0x109   : > { %v3618_v36 = vadd.f32 %v3617_v34, %v3616_v32  ;;  %v3619_v37 = vpop.f32.mrb[6].mxu1  ;;  %v3586_v41 = vpop.f32.mrb[7].mxu0 }
 0x10a   : > { %v3620_v40 = vpop.f32.mrb[7].mxu1  ;;  %v3587_v44 = vadd.f32 %v3586_v41, %v3585_v39 }
 0x10b   : > { %v3621_v42 = vadd.f32 %v3620_v40, %v3619_v37  ;;  %v1627_v43 = vadd.f32 %v3618_v36, %v3584_v38 }
 0x10d   : > { %v1630_v45 = vadd.f32 %v3621_v42, %v3587_v44 }
 0x10f   : > { %v3622_v46 = vpop.f32.mrb[8].mxu1 }
 0x110   : > { %v3623_v48 = vpop.f32.mrb[9].mxu1 }
 0x111   : > { %v3624_v51 = vadd.f32 %v3623_v48, %v3622_v46  ;;  %v3625_v52 = vpop.f32.mrb[10].mxu1 }
 0x112   : > { %v3588_v47 = vpop.f32.mrb[8].mxu0  ;;  %v3626_v56 = vpop.f32.mrb[11].mxu1 }
 0x113   : > { %v3589_v50 = vpop.f32.mrb[9].mxu0  ;;  %v3627_v58 = vadd.f32 %v3626_v56, %v3625_v52 }
 0x114   : > { %v3590_v53 = vadd.f32 %v3589_v50, %v3588_v47  ;;  %v3591_v55 = vpop.f32.mrb[10].mxu0  ;;  %v4516_v50 = vld [vmem:[%s4886_s3] ss:$0 sm:$0xff] }
 0x115   : > { %v3592_v57 = vpop.f32.mrb[11].mxu0 }
 0x116   : > { %v1635_v59 = vadd.f32 %v3624_v51, %v3590_v53  ;;  %v3593_v60 = vadd.f32 %v3592_v57, %v3591_v55 }
 0x118   : > { %v1638_v61 = vadd.f32 %v3627_v58, %v3593_v60 }
 0x11e   : > { %v3644_v63 = vpop.f32.mrb[12].mxu0 }
 0x11f   : > { %v3645_v0 = vpop.f32.mrb[13].mxu0  ;;  %v3678_v6 = vpop.f32.mrb[12].mxu1 }
 0x120   : > { %v3646_v1 = vadd.f32 %v3645_v0, %v3644_v63  ;;  %v3647_v2 = vpop.f32.mrb[14].mxu0  ;;  %v3679_v8 = vpop.f32.mrb[13].mxu1 }
 0x121   : > { %v3648_v3 = vpop.f32.mrb[15].mxu0  ;;  %v3680_v9 = vadd.f32 %v3679_v8, %v3678_v6  ;;  %v3681_v10 = vpop.f32.mrb[14].mxu1 }
 0x122   : > { %v1676_v4 = vadd.f32 %v3646_v1, %v1619_v62  ;;  %v3649_v5 = vadd.f32 %v3648_v3, %v3647_v2  ;;  %v3682_v11 = vpop.f32.mrb[15].mxu1 }
 0x123   : > { %v3683_v12 = vadd.f32 %v3682_v11, %v3681_v10 }
 0x124   : > { %v1679_v7 = vadd.f32 %v3649_v5, %v1622_v31  ;;  %v1733_v13 = vadd.f32 %v3680_v9, %v1676_v4 }
 0x126   : > { %v1736_v14 = vadd.f32 %v3683_v12, %v1679_v7  ;;  %v3650_v15 = vpop.f32.mrb[16].mxu0 }
 0x127   : > { %v3651_v16 = vpop.f32.mrb[17].mxu0  ;;  %v3684_v21 = vpop.f32.mrb[16].mxu1 }
 0x128   : > { %v3652_v17 = vadd.f32 %v3651_v16, %v3650_v15  ;;  %v3653_v18 = vpop.f32.mrb[18].mxu0  ;;  %v3685_v23 = vpop.f32.mrb[17].mxu1  ;;  %v1937_v16 = vld [vmem:[#allocation3 + $0x4] sm:$0x1] }
 0x129   : > { %v3654_v19 = vpop.f32.mrb[19].mxu0  ;;  %v3686_v25 = vadd.f32 %v3685_v23, %v3684_v21  ;;  %v3687_v26 = vpop.f32.mrb[18].mxu1  ;;  %v1940_v23 = vld [vmem:[#allocation3 + $0x8] sm:$0xf] }
 0x12a   : > { %v1684_v20 = vadd.f32 %v3652_v17, %v1627_v43  ;;  %v3655_v22 = vadd.f32 %v3654_v19, %v3653_v18  ;;  %v3688_v27 = vpop.f32.mrb[19].mxu1 }
 0x12b   : > { %v3689_v28 = vadd.f32 %v3688_v27, %v3687_v26 }
 0x12c   : > { %v1687_v24 = vadd.f32 %v3655_v22, %v1630_v45  ;;  %v1741_v29 = vadd.f32 %v3686_v25, %v1684_v20  ;;  %v4511_v45 = vld [vmem:[%s4885_s2] ss:$0 sm:$0xff] }
 0x12e   : > { %v1744_v62 = vadd.f32 %v3689_v28, %v1687_v24  ;;  %v1943_v24 = vld [vmem:[#allocation3 + $0xc] sm:$0x1] }
 0x130   : > { %v3656_v30 = vpop.f32.mrb[20].mxu0 }
 0x131   : > { %v3657_v31 = vpop.f32.mrb[21].mxu0 }
 0x132   : > { %v3658_v32 = vadd.f32 %v3657_v31, %v3656_v30  ;;  %v3659_v33 = vpop.f32.mrb[22].mxu0 }
 0x133   : > { %v3660_v34 = vpop.f32.mrb[23].mxu0 }
 0x134   : > { %v1692_v35 = vadd.f32 %v3658_v32, %v1635_v59  ;;  %v3661_v37 = vadd.f32 %v3660_v34, %v3659_v33 }
 0x135   : > { %v3690_v36 = vpop.f32.mrb[20].mxu1 }
 0x136   : > { %v3691_v38 = vpop.f32.mrb[21].mxu1  ;;  %v1695_v39 = vadd.f32 %v3661_v37, %v1638_v61 }
 0x137   : > { %v3692_v40 = vadd.f32 %v3691_v38, %v3690_v36  ;;  %v3693_v41 = vpop.f32.mrb[22].mxu1 }
 0x138   : > { %v3694_v42 = vpop.f32.mrb[23].mxu1 }
 0x139   : > { %v3695_v43 = vadd.f32 %v3694_v42, %v3693_v41  ;;  %v1749_v46 = vadd.f32 %v3692_v40, %v1692_v35 }
 0x13b   : > { %v1752_v52 = vadd.f32 %v3695_v43, %v1695_v39 }
 0x13e   : > { %v1789_v44 = vpop.f32.mrb[24].mxu0 }
 0x13f   : > { %v1790_v47 = vadd.f32 %v1789_v44, %v1733_v13  ;;  %v3787_v48 = vpop.f32.mrb[25].mxu0 }
 0x140   : > { %v1792_v51 = vpop.f32.mrb[26].mxu0 }
 0x141   : > { %v1819_v53 = vmul.f32 %v4511_v45, %v1790_v47  ;;  %v1793_v55 = vadd.f32 %v1792_v51, %v1736_v14  ;;  %v3788_v56 = vpop.f32.mrb[27].mxu0  ;;  %v1931_v14 = vld [vmem:[#allocation3] sm:$0xf]  ;;  %v1946_v51 = vld [vmem:[#allocation3 + $0x10] sm:$0xf] }
 0x143   : > { %v1832_v57 = vadd.f32 %v4516_v50, %v1819_v53  ;;  %v1820_v58 = vmul.f32 %v4511_v45, %v1793_v55 }
 0x145   : > { %v1838_v59 = vmax.f32 %v1832_v57, 0.0  ;;  %v1833_v60 = vadd.f32 %v4516_v50, %v1820_v58 }
 0x146   : > { %v1797_v61 = vpop.f32.mrb[28].mxu0 }
 0x147   : > { %v3547_v63 = vpack.c.bf16 %v1838_v59, %v1838_v59  ;;  %v1839_v0 = vmax.f32 %v1833_v60, 0.0  ;;  %v1798_v1 = vadd.f32 %v1797_v61, %v1741_v29  ;;  %v3791_v2 = vpop.f32.mrb[29].mxu0 }
 0x148   : > { %v1800_v3 = vpop.f32.mrb[30].mxu0  ;;  %v1952_v2 = vld [vmem:[#allocation3 + $0x18] sm:$0xf] }
 0x149   : > { %v1869_v4 = vshrl.u32 %v3547_v63, 16  ;;  %v3548_v5 = vpack.c.bf16 %v1839_v0, %v1839_v0  ;;  %v1821_v6 = vmul.f32 %v4511_v45, %v1798_v1  ;;  %v3792_v7 = vpop.f32.mrb[31].mxu0  ;;  %v1801_v8 = vadd.f32 %v1800_v3, %v1744_v62  ;;  %v1955_v3 = vld [vmem:[#allocation3 + $0x1c] sm:$0x1] }
 0x14a   : > { %v1872_v10 = vshll.u32 %v3547_v63, 16 }
 0x14b   : > { %v1871_v9 = vrot.slane %v1869_v4, 7  ;;  %v1877_v12 = vshrl.u32 %v3548_v5, 16  ;;  %v1834_v13 = vadd.f32 %v4516_v50, %v1821_v6  ;;  %v1880_v17 = vshll.u32 %v3548_v5, 16 }
 0x14c   : > { %v1822_v18 = vmul.f32 %v4511_v45, %v1801_v8 }
 0x14d   : > { %v1874_v19 = vor.u32 %v1872_v10, %v1871_v9  ;;  %v1875_v20 = vrot.slane %v1871_v9, 4  ;;  %v1879_v21 = vrot.slane %v1877_v12, 7  ;;  %v1840_v22 = vmax.f32 %v1834_v13, 0.0 }
 0x14e   : > { %v1835_v25 = vadd.f32 %v4516_v50, %v1822_v18  ;;  %v1805_v26 = vpop.f32.mrb[32].mxu0 }
 0x14f   : > { %v1932_v27 = vsel %vm4525_vm11, %v1874_v19, %v1931_v14  ;;  %v1938_v28 = vsel %vm4531_vm12, %v1875_v20, %v1937_v16  ;;  %v1882_v29 = vor.u32 %v1880_v17, %v1879_v21  ;;  %v1883_v62 = vrot.slane %v1879_v21, 4  ;;  %v3795_v30 = vpop.f32.mrb[33].mxu0  ;;  %v1958_v20 = vld [vmem:[#allocation3 + $0x20] sm:$0xf]  ;;  %v1961_v21 = vld [vmem:[#allocation3 + $0x24] sm:$0x1] }
 0x150   : > { %1933 = vst [vmem:[#allocation3] sm:$0xf] %v1932_v27  ;;  %1939 = vst [vmem:[#allocation3 + $0x4] sm:$0x1] %v1938_v28  ;;  %v3549_v31 = vpack.c.bf16 %v1840_v22, %v1840_v22  ;;  %v1841_v32 = vmax.f32 %v1835_v25, 0.0  ;;  %v1806_v33 = vadd.f32 %v1805_v26, %v1749_v46  ;;  %v1808_v34 = vpop.f32.mrb[34].mxu0 }
 0x151   : > { %v1941_v35 = vsel %vm4525_vm11, %v1882_v29, %v1940_v23  ;;  %v1944_v36 = vsel %vm4531_vm12, %v1883_v62, %v1943_v24  ;;  %v1809_v37 = vadd.f32 %v1808_v34, %v1752_v52  ;;  %v3796_v38 = vpop.f32.mrb[35].mxu0  ;;  %v1949_v52 = vld [vmem:[#allocation3 + $0x14] sm:$0x1]  ;;  %v1964_v26 = vld [vmem:[#allocation3 + $0x28] sm:$0xf] }
 0x152   : > { %1942 = vst [vmem:[#allocation3 + $0x8] sm:$0xf] %v1941_v35  ;;  %1945 = vst [vmem:[#allocation3 + $0xc] sm:$0x1] %v1944_v36  ;;  %v1885_v39 = vshrl.u32 %v3549_v31, 16  ;;  %v3550_v40 = vpack.c.bf16 %v1841_v32, %v1841_v32  ;;  %v1823_v41 = vmul.f32 %v4511_v45, %v1806_v33  ;;  %v1888_v44 = vshll.u32 %v3549_v31, 16 }
 0x153   : > { %v1824_v42 = vmul.f32 %v4511_v45, %v1809_v37  ;;  %v1967_v27 = vld [vmem:[#allocation3 + $0x2c] sm:$0x1] }
 0x154   : > { %v1887_v43 = vrot.slane %v1885_v39, 7  ;;  %v1893_v46 = vshrl.u32 %v3550_v40, 16  ;;  %v1836_v47 = vadd.f32 %v4516_v50, %v1823_v41  ;;  %v1896_v60 = vshll.u32 %v3550_v40, 16 }
 0x155   : > { %v1837_v53 = vadd.f32 %v4516_v50, %v1824_v42 }
 0x156   : > { %v1890_v55 = vor.u32 %v1888_v44, %v1887_v43  ;;  %v1891_v56 = vrot.slane %v1887_v43, 4  ;;  %v1895_v57 = vrot.slane %v1893_v46, 7  ;;  %v1842_v58 = vmax.f32 %v1836_v47, 0.0 }
 0x157   : > { %v1970_v45 = vld [vmem:[#allocation3] sm:$0x1]  ;;  %v1989_v59 = vld [vmem:[#allocation3 + $0x4] sm:$0x1]  ;;  %v1843_v61 = vmax.f32 %v1837_v53, 0.0 }
 0x158   : > { %v1971_v63 = vsel %vm4531_vm12, 0, %v1970_v45  ;;  %v1990_v0 = vsel %vm4550_vm13, 0, %v1989_v59  ;;  %v1947_v1 = vsel %vm4525_vm11, %v1890_v55, %v1946_v51  ;;  %v1950_v50 = vsel %vm4531_vm12, %v1891_v56, %v1949_v52 }
 0x159   : > { %1972 = vst [vmem:[#allocation3] sm:$0x1] %v1971_v63  ;;  %1991 = vst [vmem:[#allocation3 + $0x4] sm:$0x1] %v1990_v0  ;;  %v1973_v4 = vld [vmem:[#allocation3 + $0x8] sm:$0x1]  ;;  %v1898_v6 = vor.u32 %v1896_v60, %v1895_v57  ;;  %v3551_v8 = vpack.c.bf16 %v1842_v58, %v1842_v58  ;;  %v3552_v9 = vpack.c.bf16 %v1843_v61, %v1843_v61 }
 0x15a   : > { %v1992_v5 = vld [vmem:[#allocation3 + $0xc] sm:$0x1]  ;;  %1948 = vst [vmem:[#allocation3 + $0x10] sm:$0xf] %v1947_v1  ;;  %1951 = vst [vmem:[#allocation3 + $0x14] sm:$0x1] %v1950_v50 }
 0x15b   : > { %v1899_v7 = vrot.slane %v1895_v57, 4  ;;  %v1974_v10 = vsel %vm4531_vm12, 0, %v1973_v4  ;;  %v1993_v12 = vsel %vm4550_vm13, 0, %v1992_v5  ;;  %v1953_v13 = vsel %vm4525_vm11, %v1898_v6, %v1952_v2 }
 0x15c   : > { %1975 = vst [vmem:[#allocation3 + $0x8] sm:$0x1] %v1974_v10  ;;  %1994 = vst [vmem:[#allocation3 + $0xc] sm:$0x1] %v1993_v12  ;;  %v1901_v16 = vshrl.u32 %v3551_v8, 16  ;;  %v1909_v17 = vshrl.u32 %v3552_v9, 16 }
 0x15d   : > { %v1956_v14 = vsel %vm4531_vm12, %v1899_v7, %v1955_v3  ;;  %1954 = vst [vmem:[#allocation3 + $0x18] sm:$0xf] %v1953_v13  ;;  %v1904_v19 = vshll.u32 %v3551_v8, 16  ;;  %v1912_v23 = vshll.u32 %v3552_v9, 16  ;;  %v4021_v52 = vmov (!%p3467_p7), 0  }
 0x15e   : > { %1957 = vst [vmem:[#allocation3 + $0x1c] sm:$0x1] %v1956_v14  ;;  %v1903_v18 = vrot.slane %v1901_v16, 7  ;;  %v1911_v22 = vrot.slane %v1909_v17, 7  ;;  %2012 = vst.msk [vmem:[#allocation3] sm:$0xf] (!%p3467_p7), %vm1928_vm7, %v4021_v52 }
 0x15f   : > { %2014 = vst.msk [vmem:[#allocation3 + $0x4] sm:$0x1] (!%p3467_p7), %vm1934_vm9, %v4021_v52 }
 0x160   : > { %v1906_v24 = vor.u32 %v1904_v19, %v1903_v18  ;;  %v1907_v25 = vrot.slane %v1903_v18, 4  ;;  %v1914_v62 = vor.u32 %v1912_v23, %v1911_v22  ;;  %v1915_v30 = vrot.slane %v1911_v22, 4 }
 0x161   : > { %v1976_v28 = vld [vmem:[#allocation3 + $0x10] sm:$0x1]  ;;  %v1995_v29 = vld [vmem:[#allocation3 + $0x14] sm:$0x1] }
 0x162   : > { %v1977_v31 = vsel %vm4531_vm12, 0, %v1976_v28  ;;  %v1996_v32 = vsel %vm4550_vm13, 0, %v1995_v29  ;;  %v1959_v33 = vsel %vm4525_vm11, %v1906_v24, %v1958_v20  ;;  %v1962_v34 = vsel %vm4531_vm12, %v1907_v25, %v1961_v21 }
 0x163   : > { %1978 = vst [vmem:[#allocation3 + $0x10] sm:$0x1] %v1977_v31  ;;  %1997 = vst [vmem:[#allocation3 + $0x14] sm:$0x1] %v1996_v32  ;;  %v1965_v35 = vsel %vm4525_vm11, %v1914_v62, %v1964_v26  ;;  %v1968_v36 = vsel %vm4531_vm12, %v1915_v30, %v1967_v27 }
 0x164   : > { %1960 = vst [vmem:[#allocation3 + $0x20] sm:$0xf] %v1959_v33  ;;  %1963 = vst [vmem:[#allocation3 + $0x24] sm:$0x1] %v1962_v34  ;;  %v1979_v37 = vld [vmem:[#allocation3 + $0x18] sm:$0x1] }
 0x165   : > { %v1998_v38 = vld [vmem:[#allocation3 + $0x1c] sm:$0x1]  ;;  %1966 = vst [vmem:[#allocation3 + $0x28] sm:$0xf] %v1965_v35  ;;  %1969 = vst [vmem:[#allocation3 + $0x2c] sm:$0x1] %v1968_v36 }
 0x166   : > { %v1980_v39 = vsel %vm4531_vm12, 0, %v1979_v37  ;;  %v1999_v40 = vsel %vm4550_vm13, 0, %v1998_v38 }
 0x167   : > { %1981 = vst [vmem:[#allocation3 + $0x18] sm:$0x1] %v1980_v39  ;;  %2000 = vst [vmem:[#allocation3 + $0x1c] sm:$0x1] %v1999_v40 }
 0x168   : > { %2010 = sbr.rel (%p3467_p7) target bundleno = 367 (0x16f), region = 52 }
 0x16b   : > { %v1982_v41 = vld [vmem:[#allocation3 + $0x20] sm:$0x1]  ;;  %v2001_v42 = vld [vmem:[#allocation3 + $0x24] sm:$0x1] }
 0x16c   : > { %v1983_v11 = vsel %vm4531_vm12, 0, %v1982_v41  ;;  %v2002_v43 = vsel %vm4550_vm13, 0, %v2001_v42  ;;  %v1985_v44 = vld [vmem:[#allocation3 + $0x28] sm:$0x1]  ;;  %v2004_v46 = vld [vmem:[#allocation3 + $0x2c] sm:$0x1] }
 0x16d   : > { %1984 = vst [vmem:[#allocation3 + $0x20] sm:$0x1] %v1983_v11  ;;  %2003 = vst [vmem:[#allocation3 + $0x24] sm:$0x1] %v2002_v43  ;;  %v1986_v47 = vsel %vm4531_vm12, 0, %v1985_v44  ;;  %v2005_v51 = vsel %vm4550_vm13, 0, %v2004_v46 }
 0x16e   : > { %1987 = vst [vmem:[#allocation3 + $0x28] sm:$0x1] %v1986_v47  ;;  %2006 = vst [vmem:[#allocation3 + $0x2c] sm:$0x1] %v2005_v51 }
 0x16f PF: > { %p3468_p8 = scmp.ne.s32.totalorder %s4001_s24, 1 }
 0x170   : > { %v4022_v53 = vmov (!%p3468_p8), 0  }
 0x171   : > { %2018 = sbr.rel (%p3468_p8) target bundleno = 376 (0x178), region = 56  ;;  %2021 = vst.msk [vmem:[#allocation3 + $0x28] sm:$0xf] (!%p3468_p8), %vm1928_vm7, %v4022_v53 }
 0x172   : > { %2023 = vst.msk [vmem:[#allocation3 + $0x2c] sm:$0x1] (!%p3468_p8), %vm1934_vm9, %v4022_v53 }
 0x178 PF: > { %v3939_v15 = vld [vmem:[%s4887_s4 + $0x40] sm:$0xff]   ;;  %v3937_v48 = vld [vmem:[#allocation3 + $0x8] ss:$8 sps:$4 sm:$0xff]   ;;  %v2327_v56 = vld [vmem:[#allocation3 + $0x14] sm:$0x1]  ;;  %s4023_s24 = smov 64  }
 0x179   : > { %v2326_v55 = vld [vmem:[#allocation3 + $0x10] sm:$0xf]  ;;  %v2328_v57 = vld [vmem:[#allocation3 + $0x18] sm:$0xf]  ;;  %v2329_v58 = vld [vmem:[#allocation3 + $0x1c] sm:$0x1]  ;;  %3707 = vmatprep.subr.bf16.mxu1 %v3939_v15  ;;  %2179 = vrot.lane.b32.xlu0 %v3937_v48, %s4023_s24 }
 0x17a   : > { %v2335_v45 = vshrl.u32 %v2326_v55, 16  ;;  %v2338_v59 = vshll.u32 %v2326_v55, 16  ;;  %v2344_v60 = vshll.u32 %v2327_v56, 16  ;;  %v2349_v61 = vshrl.u32 %v2328_v57, 16  ;;  %v2043_v1 = vld [vmem:[#allocation3] sm:$0xf] }
 0x17b   : > { %v2352_v63 = vshll.u32 %v2328_v57, 16  ;;  %v2358_v0 = vshll.u32 %v2329_v58, 16  ;;  %v2044_v3 = vld [vmem:[#allocation3 + $0x4] sm:$0x1]  ;;  %v2045_v4 = vld [vmem:[#allocation3 + $0x8] sm:$0xf] }
 0x17c   : > { %v2337_v50 = vrot.slane %v2335_v45, 4  ;;  %v2340_v2 = vrot.slane %v2338_v59, 5  ;;  %v2346_v5 = vrot.slane %v2344_v60, 5  ;;  %v2351_v6 = vrot.slane %v2349_v61, 4  ;;  %v2046_v9 = vld [vmem:[#allocation3 + $0xc] sm:$0x1] }
 0x17d   : > { %v2354_v7 = vrot.slane %v2352_v63, 5  ;;  %v2360_v8 = vrot.slane %v2358_v0, 5  ;;  %v2052_v12 = vshrl.u32 %v2043_v1, 16  ;;  %v2055_v13 = vshll.u32 %v2043_v1, 16  ;;  %v2261_v16 = vld [vmem:[#allocation3 + $0x8] sm:$0xe] }
 0x17e   : > { %v2341_v10 = vor.u32 %v2340_v2, %v2337_v50  ;;  %v2061_v14 = vshll.u32 %v2044_v3, 16  ;;  %v3940_v17 = vld [vmem:[%s4887_s4] sm:$0xff]   ;;  %v2066_v19 = vshrl.u32 %v2045_v4, 16  ;;  %v2069_v20 = vshll.u32 %v2045_v4, 16  ;;  %v2262_v22 = vld [vmem:[#allocation3 + $0xc] sm:$0x1] }
 0x17f   : > { %v2355_v18 = vor.u32 %v2354_v7, %v2351_v6  ;;  %v2075_v21 = vshll.u32 %v2046_v9, 16  ;;  %v3941_v23 = vld [vmem:[%s4887_s4 + $0x48] sm:$0xff]   ;;  %v2054_v25 = vrot.slane %v2052_v12, 4  ;;  %v2057_v26 = vrot.slane %v2055_v13, 5  ;;  %v2263_v28 = vld [vmem:[#allocation3 + $0x10] sm:$0xe]  ;;  %3708 = vmatpush3.bf16.msra.mxu1 %v3940_v17 }
 0x180   : > { %v2342_v24 = vrot.slane %v2341_v10, 4  ;;  %v2063_v27 = vrot.slane %v2061_v14, 5  ;;  %v2068_v62 = vrot.slane %v2066_v19, 4  ;;  %v2071_v30 = vrot.slane %v2069_v20, 5  ;;  %v2264_v32 = vld [vmem:[#allocation3 + $0x14] sm:$0x1]  ;;  %3709 = vmatprep.subr.bf16.mxu1 %v3941_v23 }
 0x181   : > { %v2356_v29 = vrot.slane %v2355_v18, 4  ;;  %v2077_v31 = vrot.slane %v2075_v21, 5  ;;  %v2058_v34 = vor.u32 %v2057_v26, %v2054_v25  ;;  %v3483_v35 = vrot.slane %v2261_v16, 9  ;;  %v2047_v41 = vld [vmem:[#allocation3 + $0x10] sm:$0xf]  ;;  %v3942_v55 = vld [vmem:[%s4887_s4 + $0x8] sm:$0xff]  }
 0x182   : > { %v2347_v33 = vsel %vm4225_vm5, %v2342_v24, %v2346_v5  ;;  %v2279_v36 = vrot.slane %v2262_v22, 5  ;;  %v2072_v38 = vor.u32 %v2071_v30, %v2068_v62  ;;  %v3484_v39 = vrot.slane %v2263_v28, 9  ;;  %v2048_v44 = vld [vmem:[#allocation3 + $0x14] sm:$0x1]  ;;  %v2049_v46 = vld [vmem:[#allocation3 + $0x18] sm:$0xf] }
 0x183   : > { %v2361_v37 = vsel %vm4225_vm5, %v2356_v29, %v2360_v8  ;;  %v2283_v40 = vrot.slane %v2264_v32, 5  ;;  %v2059_v11 = vrot.slane %v2058_v34, 4  ;;  %v2080_v47 = vshrl.u32 %v2047_v41, 16  ;;  %v2050_v53 = vld [vmem:[#allocation3 + $0x1c] sm:$0x1]  ;;  %3710 = vmatpush3.bf16.msra.mxu1 %v3942_v55  ;;  %v3943_v2 = vld [vmem:[%s4887_s4 + $0xc0] sm:$0xff]  }
 0x184   : > { %v3491_v42 = vcombine.low %v2347_v33, %v2361_v37  ;;  %v2280_v43 = vsel %vm4216_vm4, %v3483_v35, %v2279_v36  ;;  %v2073_v51 = vrot.slane %v2072_v38, 4  ;;  %v2083_v15 = vshll.u32 %v2047_v41, 16  ;;  %v2330_v59 = vld [vmem:[#allocation3 + $0x20] sm:$0xf]  ;;  %v2331_v60 = vld [vmem:[#allocation3 + $0x24] sm:$0x1]  ;;  %3735 = vmatprep.subr.bf16.mxu0 %v3943_v2 }
 0x185   : > { %v2284_v52 = vsel %vm4216_vm4, %v3484_v39, %v2283_v40  ;;  %v2089_v48 = vshll.u32 %v2048_v44, 16  ;;  %v2064_v56 = vsel %vm4225_vm5, %v2059_v11, %v2063_v27  ;;  %v2082_v58 = vrot.slane %v2080_v47, 4  ;;  %v2332_v50 = vld [vmem:[#allocation3 + $0x28] sm:$0xf]  ;;  %v3938_v4 = vld [vmem:[#allocation3 + $0x18] ss:$8 sps:$4 sm:$0xff]  }
 0x186   : > { %2396 = vrot.lane.b32.xlu1 %v3491_v42, %s4023_s24  ;;  %v3487_v57 = vcombine.low %v2280_v43, %v2284_v52  ;;  %v2094_v45 = vshrl.u32 %v2049_v46, 16  ;;  %v2078_v61 = vsel %vm4225_vm5, %v2073_v51, %v2077_v31  ;;  %v2085_v63 = vrot.slane %v2083_v15, 5  ;;  %v2333_v7 = vld [vmem:[#allocation3 + $0x2c] sm:$0x1]  ;;  %v3944_v9 = vld [vmem:[%s4887_s4 + $0x80] sm:$0xff]   ;;  %v3945_v17 = vld [vmem:[%s4887_s4 + $0x50] sm:$0xff]  }
 0x187   : > { %v2091_v0 = vrot.slane %v2089_v48, 5  ;;  %v2097_v1 = vshll.u32 %v2049_v46, 16  ;;  %v3471_v3 = vcombine.low %v2064_v56, %v2078_v61  ;;  %v2103_v6 = vshll.u32 %v2050_v53, 16  ;;  %v2265_v16 = vld [vmem:[#allocation3 + $0x18] sm:$0xe]  ;;  %3736 = vmatpush3.bf16.msra.mxu0 %v3944_v9  ;;  %3711 = vmatprep.subr.bf16.mxu1 %v3945_v17  ;;  %v3946_v28 = vld [vmem:[%s4887_s4 + $0x10] sm:$0xff]  }
 0x188   : > { %v2096_v5 = vrot.slane %v2094_v45, 4  ;;  %v2363_v8 = vshrl.u32 %v2330_v59, 16  ;;  %v2086_v10 = vor.u32 %v2085_v63, %v2082_v58  ;;  %v2366_v13 = vshll.u32 %v2330_v59, 16  ;;  %v2266_v22 = vld [vmem:[#allocation3 + $0x1c] sm:$0x1]  ;;  %3712 = vmatpush3.bf16.msra.mxu1 %v3946_v28  ;;  %v3947_v41 = vld [vmem:[%s4887_s4 + $0xc8] sm:$0xff]  }
 0x189   : > { %v2099_v12 = vrot.slane %v2097_v1, 5  ;;  %v2372_v14 = vshll.u32 %v2331_v60, 16  ;;  %2113 = vrot.lane.b32.xlu0 %v3471_v3, %s4023_s24  ;;  %v2105_v18 = vrot.slane %v2103_v6, 5  ;;  %v2377_v20 = vshrl.u32 %v2332_v50, 16  ;;  %v2267_v27 = vld [vmem:[#allocation3 + $0x20] sm:$0xe]  ;;  %3737 = vmatprep.subr.bf16.mxu0 %v3947_v41 }
 0x18a   : > { %2299 = vrot.lane.b32.xlu1 %v3487_v57, %s4023_s24  ;;  %v2365_v19 = vrot.slane %v2363_v8, 4  ;;  %v2380_v21 = vshll.u32 %v2332_v50, 16  ;;  %v2087_v23 = vrot.slane %v2086_v10, 4  ;;  %v2368_v25 = vrot.slane %v2366_v13, 5  ;;  %v2268_v31 = vld [vmem:[#allocation3 + $0x24] sm:$0x1] }
 0x18b   : > { %v2100_v24 = vor.u32 %v2099_v12, %v2096_v5  ;;  %v2374_v26 = vrot.slane %v2372_v14, 5  ;;  %v2379_v29 = vrot.slane %v2377_v20, 4  ;;  %v2386_v30 = vshll.u32 %v2333_v7, 16  ;;  %v3948_v44 = vld [vmem:[%s4887_s4 + $0x88] sm:$0xff]   ;;  %v3949_v52 = vld [vmem:[%s4887_s4 + $0x58] sm:$0xff]   ;;  %v3951_v57 = vld [vmem:[%s4887_s4 + $0xd0] sm:$0xff]  }
 0x18c   : > { %v2382_v62 = vrot.slane %v2380_v21, 5  ;;  %v3485_v32 = vrot.slane %v2265_v16, 9  ;;  %v2092_v33 = vsel %vm4225_vm5, %v2087_v23, %v2091_v0  ;;  %v2369_v35 = vor.u32 %v2368_v25, %v2365_v19  ;;  %3738 = vmatpush3.bf16.msra.mxu0 %v3948_v44  ;;  %3713 = vmatprep.subr.bf16.mxu1 %v3949_v52  ;;  %v3950_v56 = vld [vmem:[%s4887_s4 + $0x18] sm:$0xff]   ;;  %v3952_v58 = vld [vmem:[%s4887_s4 + $0x90] sm:$0xff]   ;;  %v3953_v45 = vld [vmem:[%s4887_s4 + $0x60] sm:$0xff]  }
 0x18d   : > { %v2101_v34 = vrot.slane %v2100_v24, 4  ;;  %v2287_v36 = vrot.slane %v2266_v22, 5  ;;  %2181 = vrot.lane.b32.xlu0 %v3938_v4, %s4023_s24  ;;  %v2388_v38 = vrot.slane %v2386_v30, 5  ;;  %v3486_v39 = vrot.slane %v2267_v27, 9  ;;  %3714 = vmatpush3.bf16.msra.mxu1 %v3950_v56  ;;  %v3954_v59 = vld [vmem:[%s4887_s4 + $0x20] sm:$0xff]   ;;  %v3955_v60 = vld [vmem:[%s4887_s4 + $0xd8] sm:$0xff]  }
 0x18e   : > { %v2383_v37 = vor.u32 %v2382_v62, %v2379_v29  ;;  %v2291_v40 = vrot.slane %v2268_v31, 5  ;;  %v2370_v11 = vrot.slane %v2369_v35, 4  ;;  %3739 = vmatprep.subr.bf16.mxu0 %v3951_v57  ;;  %3715 = vmatprep.subr.bf16.mxu1 %v3953_v45  ;;  %v3956_v61 = vld [vmem:[%s4887_s4 + $0x98] sm:$0xff]   ;;  %v3957_v63 = vld [vmem:[%s4887_s4 + $0x68] sm:$0xff]   ;;  %v2122_v0 = vld [vmem:[#allocation3] sm:$0xe] }
 0x18f   : > { %v2106_v42 = vsel %vm4225_vm5, %v2101_v34, %v2105_v18  ;;  %v2288_v43 = vsel %vm4216_vm4, %v3485_v32, %v2287_v36  ;;  %v2123_v1 = vld [vmem:[#allocation3 + $0x4] sm:$0x1]  ;;  %v2124_v50 = vld [vmem:[#allocation3 + $0x8] sm:$0xe]  ;;  %v2125_v2 = vld [vmem:[#allocation3 + $0xc] sm:$0x1] }
 0x190   : > { %v3472_v46 = vcombine.low %v2092_v33, %v2106_v42  ;;  %v2384_v47 = vrot.slane %v2383_v37, 4  ;;  %v2292_v51 = vsel %vm4216_vm4, %v3486_v39, %v2291_v40  ;;  %v2375_v53 = vsel %vm4225_vm5, %v2370_v11, %v2374_v26  ;;  %3740 = vmatpush3.bf16.msra.mxu0 %v3952_v58  ;;  %v3958_v6 = vld [vmem:[%s4887_s4 + $0x28] sm:$0xff]   ;;  %v3959_v8 = vld [vmem:[%s4887_s4 + $0xe0] sm:$0xff]   ;;  %v3961_v14 = vld [vmem:[%s4887_s4 + $0x70] sm:$0xff]  }
 0x191   : > { %v3488_v48 = vcombine.low %v2288_v43, %v2292_v51  ;;  %3716 = vmatpush3.bf16.msra.mxu1 %v3954_v59  ;;  %3741 = vmatprep.subr.bf16.mxu0 %v3955_v60  ;;  %v3473_v3 = vrot.slane %v2122_v0, 9  ;;  %v2140_v4 = vrot.slane %v2123_v1, 5  ;;  %v3474_v5 = vrot.slane %v2124_v50, 9  ;;  %v3960_v12 = vld [vmem:[%s4887_s4 + $0xa0] sm:$0xff]   ;;  %v3962_v16 = vld [vmem:[#allocation3 + $0x10] ss:$8 sps:$4 sm:$0xff]  }
 0x192   : > { %2115 = vrot.lane.b32.xlu1 %v3472_v46, %s4023_s24  ;;  %v2389_v15 = vsel %vm4225_vm5, %v2384_v47, %v2388_v38  ;;  %3717 = vmatprep.subr.bf16.mxu1 %v3957_v63  ;;  %v2144_v7 = vrot.slane %v2125_v2, 5  ;;  %vm2040_vm14 = vcmask 523264   ;;  %v3963_v17 = vld [vmem:[#allocation3] ss:$8 sps:$4 sm:$0xff]   ;;  %v3964_v18 = vld [vmem:[%s4887_s4 + $0x30] sm:$0xff]   ;;  %v3967_v21 = vld [vmem:[%s4887_s4 + $0x78] sm:$0xff]  }
 0x193   : > { %v3492_v55 = vcombine.low %v2375_v53, %v2389_v15  ;;  %v2141_v9 = vsel %vm4216_vm4, %v3473_v3, %v2140_v4  ;;  %2324 = vst.msk [vmem:[#allocation4 + $0x18] sm:$0xff] %vm2040_vm14, %v3962_v16  ;;  %2041 = vst.msk [vmem:[#allocation4] sm:$0xff] %vm2040_vm14, %v3963_v17  ;;  %v3965_v19 = vld [vmem:[%s4887_s4 + $0xe8] sm:$0xff]   ;;  %v2189_v24 = vld [vmem:[#allocation3 + $0x10] sm:$0xf]  ;;  %vm2119_vm15 = vcmask 1048064  }
 0x194   : > { %3742 = vmatpush3.bf16.msra.mxu0 %v3956_v61  ;;  %v2145_v10 = vsel %vm4216_vm4, %v3474_v5, %v2144_v7  ;;  %v3966_v20 = vld [vmem:[%s4887_s4 + $0xa8] sm:$0xff]   ;;  %v2190_v25 = vld [vmem:[#allocation3 + $0x14] sm:$0x1]  ;;  %v2210_v29 = vshrl.u32 %v2189_v24, 16  ;;  %v2213_v62 = vshll.u32 %v2189_v24, 16  ;;  %v3968_v31 = vld [vmem:[%s4887_s4 + $0x38] sm:$0xff]  }
 0x195   : > { %2398 = vrot.lane.b32.xlu0 %v3492_v55, %s4023_s24  ;;  %3718 = vmatpush3.bf16.msra.mxu1 %v3958_v6  ;;  %v3477_v13 = vcombine.low %v2141_v9, %v2145_v10  ;;  %v2187_v22 = vld [vmem:[#allocation3 + $0x8] sm:$0xf]  ;;  %v2188_v23 = vld [vmem:[#allocation3 + $0xc] sm:$0x1]  ;;  %v2219_v30 = vshll.u32 %v2190_v25, 16  ;;  %v3969_v32 = vld [vmem:[%s4887_s4 + $0xf0] sm:$0xff]  }
 0x196   : > { %2301 = vrot.lane.b32.xlu1 %v3488_v48, %s4023_s24  ;;  %3743 = vmatprep.subr.bf16.mxu0 %v3959_v8  ;;  %v2196_v26 = vshrl.u32 %v2187_v22, 16  ;;  %v2199_v27 = vshll.u32 %v2187_v22, 16  ;;  %v2205_v28 = vshll.u32 %v2188_v23, 16  ;;  %v2212_v35 = vrot.slane %v2210_v29, 4  ;;  %v3970_v40 = vld [vmem:[%s4887_s4 + $0xb0] sm:$0xff]   ;;  %v4733_v48 = vld [vmem:[%s4887_s4 + $0x100] sm:$0xff]  }
 0x197   : > { %2162 = vst.msk [vmem:[#allocation4 + $0x8] sm:$0xff] %vm2040_vm14, %v3477_v13  ;;  %3719 = vmatprep.subr.bf16.mxu1 %v3961_v14  ;;  %v2215_v37 = vrot.slane %v2213_v62, 5  ;;  %v2221_v39 = vrot.slane %v2219_v30, 5  ;;  %v2126_v41 = vld [vmem:[#allocation3 + $0x10] sm:$0xe]  ;;  %v3973_v55 = vld [vmem:[%s4887_s4 + $0xf8] sm:$0xff]  }
 0x198   : > { %3744 = vmatpush3.bf16.msra.mxu0 %v3960_v12  ;;  %v2198_v33 = vrot.slane %v2196_v26, 4  ;;  %v2201_v34 = vrot.slane %v2199_v27, 5  ;;  %v2207_v36 = vrot.slane %v2205_v28, 5  ;;  %v2127_v11 = vld [vmem:[#allocation3 + $0x14] sm:$0x1]  ;;  %v3475_v47 = vrot.slane %v2126_v41, 9 }
 0x199   : > { %3720 = vmatpush3.bf16.msra.mxu1 %v3964_v18  ;;  %3745 = vmatprep.subr.bf16.mxu0 %v3965_v19  ;;  %v2216_v42 = vor.u32 %v2215_v37, %v2212_v35  ;;  %v2128_v43 = vld [vmem:[#allocation3 + $0x18] sm:$0xe]  ;;  %v2129_v44 = vld [vmem:[#allocation3 + $0x1c] sm:$0x1]  ;;  %v2148_v51 = vrot.slane %v2127_v11, 5  ;;  %vm3033_vm0 = vcmask 1041409  }
 0x19a   : > { %3721 = vmatprep.subr.bf16.mxu1 %v3967_v21  ;;  %v2202_v38 = vor.u32 %v2201_v34, %v2198_v33  ;;  %v3476_v52 = vrot.slane %v2128_v43, 9  ;;  %v2152_v15 = vrot.slane %v2129_v44, 5  ;;  %v3972_v58 = vld [vmem:[#allocation3 + $0x10] ss:$8 sps:$4 sm:$0xff]   ;;  %v3975_v0 = vld [vmem:[#allocation3 + $0x20] ss:$8 sps:$4 sm:$0xff]  }
 0x19b   : > { %v2217_v53 = vrot.slane %v2216_v42, 4  ;;  %v2149_v57 = vsel %vm4216_vm4, %v3475_v47, %v2148_v51  ;;  %2042 = vst.msk [vmem:[#allocation4 + $0x28] sm:$0xff] %vm2040_vm14, %v3972_v58  ;;  %v3974_v63 = vld [vmem:[%s4887_s4 + $0xb8] sm:$0xff]   ;;  %v2193_v2 = vld [vmem:[#allocation3 + $0x20] sm:$0xf]  ;;  %2325 = vst.msk [vmem:[#allocation4 + $0x40] sm:$0xff] %vm2040_vm14, %v3975_v0 }
 0x19c   : > { %3746 = vmatpush3.bf16.msra.mxu0 %v3966_v20  ;;  %v2203_v46 = vrot.slane %v2202_v38, 4  ;;  %v2153_v59 = vsel %vm4216_vm4, %v3476_v52, %v2152_v15  ;;  %v2191_v1 = vld [vmem:[#allocation3 + $0x18] sm:$0xf]  ;;  %v2192_v50 = vld [vmem:[#allocation3 + $0x1c] sm:$0x1]  ;;  %v2238_v7 = vshrl.u32 %v2193_v2, 16 }
 0x19d   : > { %3722 = vmatpush3.bf16.msra.mxu1 %v3968_v31  ;;  %3747 = vmatprep.subr.bf16.mxu0 %v3969_v32  ;;  %v2222_v45 = vsel %vm4225_vm5, %v2217_v53, %v2221_v39  ;;  %v3478_v61 = vcombine.low %v2149_v57, %v2153_v59  ;;  %v2194_v3 = vld [vmem:[#allocation3 + $0x24] sm:$0x1]  ;;  %v2224_v4 = vshrl.u32 %v2191_v1, 16  ;;  %v2227_v5 = vshll.u32 %v2191_v1, 16  ;;  %v2404_v19 = vld [vmem:[#allocation3 + $0x10] sm:$0xe] }
 0x19e   : > { %v2208_v56 = vsel %vm4225_vm5, %v2203_v46, %v2207_v36  ;;  %3797 = vmatprep.subr.bf16.mxu1 %v4733_v48  ;;  %v2233_v6 = vshll.u32 %v2192_v50, 16  ;;  %v2241_v8 = vshll.u32 %v2193_v2, 16  ;;  %v2247_v9 = vshll.u32 %v2194_v3, 16  ;;  %v2405_v21 = vld [vmem:[#allocation3 + $0x14] sm:$0x1]  ;;  %v3976_v15 = vld [vmem:[%s4887_s4 + $0x108] sm:$0xff]  }
 0x19f   : > { %v3481_v60 = vcombine.low %v2208_v56, %v2222_v45  ;;  %2163 = vst.msk [vmem:[#allocation4 + $0x30] sm:$0xff] %vm2040_vm14, %v3478_v61  ;;  %v2226_v10 = vrot.slane %v2224_v4, 4  ;;  %v2229_v12 = vrot.slane %v2227_v5, 5  ;;  %v2240_v13 = vrot.slane %v2238_v7, 4  ;;  %v2406_v22 = vld [vmem:[#allocation3 + $0x18] sm:$0xe] }
 0x1a0   : > { %3748 = vmatpush3.bf16.msra.mxu0 %v3970_v40  ;;  %v2243_v14 = vrot.slane %v2241_v8, 5  ;;  %v2235_v17 = vrot.slane %v2233_v6, 5  ;;  %v2249_v18 = vrot.slane %v2247_v9, 5  ;;  %v2407_v23 = vld [vmem:[#allocation3 + $0x1c] sm:$0x1]  ;;  %v3493_v25 = vrot.slane %v2404_v19, 9 }
 0x1a1   : > { %3749 = vmatprep.subr.bf16.mxu0 %v3973_v55  ;;  %2259 = vst.msk [vmem:[#allocation4 + $0x10] sm:$0xff] %vm2040_vm14, %v3481_v60  ;;  %v2230_v16 = vor.u32 %v2229_v12, %v2226_v10  ;;  %v2422_v26 = vrot.slane %v2405_v21, 5  ;;  %v3494_v27 = vrot.slane %v2406_v22, 9  ;;  %v2408_v28 = vld [vmem:[#allocation3 + $0x20] sm:$0xe]  ;;  %v2426_v62 = vrot.slane %v2407_v23, 5 }
 0x1a2   : > { %v2244_v20 = vor.u32 %v2243_v14, %v2240_v13  ;;  %v2409_v30 = vld [vmem:[#allocation3 + $0x24] sm:$0x1]  ;;  %v2410_v31 = vld [vmem:[#allocation3 + $0x28] sm:$0xe]  ;;  %v2411_v34 = vld [vmem:[#allocation3 + $0x2c] sm:$0x1]  ;;  %v2905_v21 = vlaneseq }
 0x1a3   : > { %v2231_v24 = vrot.slane %v2230_v16, 4  ;;  %v2423_v33 = vsel %vm4216_vm4, %v3493_v25, %v2422_v26  ;;  %v3495_v35 = vrot.slane %v2408_v28, 9  ;;  %v2430_v36 = vrot.slane %v2409_v30, 5  ;;  %v3977_v45 = vld [vmem:[%s4887_s4 + $0x110] sm:$0xff]   ;;  %v3978_v61 = vld [vmem:[%s4887_s4 + $0x118] sm:$0xff]  }
 0x1a4   : > { %3750 = vmatpush3.bf16.msra.mxu0 %v3974_v63  ;;  %v2245_v29 = vrot.slane %v2244_v20, 4  ;;  %v2427_v38 = vsel %vm4216_vm4, %v3494_v27, %v2426_v62  ;;  %v3496_v39 = vrot.slane %v2410_v31, 9  ;;  %v2434_v40 = vrot.slane %v2411_v34, 5 }
 0x1a5   : > { %v2236_v32 = vsel %vm4225_vm5, %v2231_v24, %v2235_v17  ;;  %v3497_v42 = vcombine.low %v2423_v33, %v2427_v38  ;;  %v2431_v11 = vsel %vm4216_vm4, %v3495_v35, %v2430_v36  ;;  %v4024_v19 = vmov 1983009808  }
 0x1a6   : > { %v2250_v37 = vsel %vm4225_vm5, %v2245_v29, %v2249_v18  ;;  %v2435_v43 = vsel %vm4216_vm4, %v3496_v39, %v2434_v40  ;;  %v2903_v20 = vunpack.c.l.s4 %v4024_v19  ;;  %v2906_v29 = vshrl.u32 %v2905_v21, 7 }
 0x1a7   : > { %v3482_v41 = vcombine.low %v2236_v32, %v2250_v37  ;;  %2444 = vst.msk [vmem:[#allocation4 + $0x20] sm:$0xff] %vm2040_vm14, %v3497_v42  ;;  %v3498_v44 = vcombine.low %v2431_v11, %v2435_v43  ;;  %vm3035_vm1 = vcmask 1042434   ;;  %vm3037_vm2 = vcmask 1043459  }
 0x1a8   : > { %v2904_v28 = vunpack.c.0.s8 %v2903_v20  ;;  %v4789_v37 = vsub.s32 0, %v2906_v29  ;;  %v4791_v40 = vsub.s32 1, %v2906_v29  ;;  %vm3039_vm3 = vcmask 1044484  }
 0x1a9   : > { %2260 = vst.msk [vmem:[#allocation4 + $0x38] sm:$0xff] %vm2040_vm14, %v3482_v41  ;;  %2445 = vst.msk [vmem:[#allocation4 + $0x48] sm:$0xff] %vm2040_vm14, %v3498_v44  ;;  %vm3041_vm4 = vcmask 1045509   ;;  %vm3043_vm5 = vcmask 1046534   ;;  %vm3045_vm6 = vcmask 1047559  }
 0x1aa   : > { %v2907_v36 = vsub.s32 %v2904_v28, %v2906_v29 }
 0x1b0   : > { %v2455_v50 = vld [vmem:[#allocation4 + $0x48] sm:$0xff] }
 0x1eb   : > { %v2180_v54 = vpop.permute.xlu0 %2179 }
 0x1ec   : > { %2185 = vst.msk [vmem:[#allocation4 + $0x8] sm:$0xff] %vm2119_vm15, %v2180_v54 }
 0x1f3   : > { %v2447_v46 = vld [vmem:[#allocation4 + $0x8] sm:$0xff] }
 0x1f4   : > { %2782 = vmatprep.mubr.bf16.mxu1 %v2447_v46 }
 0x1f8   : > { %v2397_v47 = vpop.permute.xlu1 %2396 }
 0x1f9   : > { %2402 = vst.msk [vmem:[#allocation4 + $0x18] sm:$0xff] %vm2119_vm15, %v2397_v47 }
 0x1fb   : > { %v2114_v51 = vpop.permute.xlu0 %2113 }
 0x1fc   : > { %v2300_v52 = vpop.permute.xlu1 %2299  ;;  %2120 = vst.msk [vmem:[#allocation4] sm:$0xff] %vm2119_vm15, %v2114_v51 }
 0x1fd   : > { %2305 = vst.msk [vmem:[#allocation4 + $0x10] sm:$0xff] %vm2119_vm15, %v2300_v52 }
 0x1ff   : > { %v2182_v49 = vpop.permute.xlu0 %2181 }
 0x200   : > { %v2449_v53 = vld [vmem:[#allocation4 + $0x18] sm:$0xff]  ;;  %2186 = vst.msk [vmem:[#allocation4 + $0x30] sm:$0xff] %vm2119_vm15, %v2182_v49 }
 0x201   : > { %2831 = vmatprep.mubr.bf16.mxu0 %v2449_v53 }
 0x203   : > { %v2446_v56 = vld [vmem:[#allocation4] sm:$0xff] }
 0x204   : > { %v2116_v55 = vpop.permute.xlu1 %2115  ;;  %v2448_v57 = vld [vmem:[#allocation4 + $0x10] sm:$0xff]  ;;  %2783 = vmatmul.mubr.bf16.vlgmr.msra.gmra.mrb[24].mxu1 %v2446_v56 }
 0x205   : > { %2121 = vst.msk [vmem:[#allocation4 + $0x28] sm:$0xff] %vm2119_vm15, %v2116_v55  ;;  %2832 = vmatmul.mubr.bf16.vlgmr.msra.gmra.mrb[36].mxu0 %v2448_v57  ;;  %3798 = vmatpush3.bf16.msra.mxu1 %v4733_v48  ;;  %v2450_v48 = vld [vmem:[#allocation4 + $0x20] sm:$0xff] }
 0x206   : > { %3799 = vmatprep.subr.bf16.mxu1 %v3976_v15 }
 0x207   : > { %v2399_v58 = vpop.permute.xlu0 %2398  ;;  %v2452_v60 = vld [vmem:[#allocation4 + $0x30] sm:$0xff] }
 0x208   : > { %2403 = vst.msk [vmem:[#allocation4 + $0x40] sm:$0xff] %vm2119_vm15, %v2399_v58  ;;  %v2302_v59 = vpop.permute.xlu1 %2301  ;;  %2790 = vmatprep.mubr.bf16.mxu1 %v2452_v60 }
 0x209   : > { %2306 = vst.msk [vmem:[#allocation4 + $0x38] sm:$0xff] %vm2119_vm15, %v2302_v59  ;;  %3800 = vmatpush3.bf16.msra.mxu1 %v3976_v15 }
 0x20a   : > { %3801 = vmatprep.subr.bf16.mxu1 %v3977_v45 }
 0x20c   : > { %v2451_v63 = vld [vmem:[#allocation4 + $0x28] sm:$0xff] }
 0x20d   : > { %2791 = vmatmul.mubr.bf16.gmra.mrb[28].mxu1 %v2451_v63 }
 0x20e   : > { %3802 = vmatpush3.bf16.msra.mxu1 %v3977_v45  ;;  %3805 = vmatprep.mubr.msk.bf16.mxu1 %vm2040_vm14, %v2450_v48 }
 0x20f   : > { %v2454_v0 = vld [vmem:[#allocation4 + $0x40] sm:$0xff]  ;;  %3803 = vmatprep.subr.bf16.mxu1 %v3978_v61 }
 0x210   : > { %2839 = vmatprep.mubr.bf16.mxu0 %v2454_v0  ;;  %v2453_v1 = vld [vmem:[#allocation4 + $0x38] sm:$0xff] }
 0x211   : > { %2840 = vmatmul.mubr.bf16.gmra.mrb[40].mxu0 %v2453_v1 }
 0x212   : > { %3804 = vmatpush3.bf16.msra.mxu1 %v3978_v61 }
 0x215   : > { %3806 = vmatmul.mubr.msk.bf16.vlgmr.msra.gmra.mrb[32].mxu1 %vm2040_vm14, %v2455_v50 }
 0x2d7   : > { %v3723_v2 = vpop.f32.mrb[24].mxu1 }
 0x2d8   : > { %v3751_v3 = vpop.f32.mrb[36].mxu0  ;;  %v3724_v4 = vpop.f32.mrb[25].mxu1 }
 0x2d9   : > { %v3752_v5 = vpop.f32.mrb[37].mxu0  ;;  %v3725_v6 = vadd.f32 %v3724_v4, %v3723_v2  ;;  %v3726_v7 = vpop.f32.mrb[26].mxu1 }
 0x2da   : > { %v3753_v8 = vadd.f32 %v3752_v5, %v3751_v3  ;;  %v3754_v9 = vpop.f32.mrb[38].mxu0  ;;  %v3727_v10 = vpop.f32.mrb[27].mxu1 }
 0x2db   : > { %v3755_v12 = vpop.f32.mrb[39].mxu0  ;;  %v3728_v13 = vadd.f32 %v3727_v10, %v3726_v7 }
 0x2dc   : > { %v3756_v14 = vadd.f32 %v3755_v12, %v3754_v9  ;;  %v2834_v16 = vadd.f32 %v3753_v8, %v3725_v6 }
 0x2de   : > { %v2837_v17 = vadd.f32 %v3756_v14, %v3728_v13 }
 0x2e0   : > { %v3729_v18 = vpop.f32.mrb[28].mxu1 }
 0x2e1   : > { %v3730_v22 = vpop.f32.mrb[29].mxu1 }
 0x2e2   : > { %v3731_v23 = vadd.f32 %v3730_v22, %v3729_v18  ;;  %v3732_v24 = vpop.f32.mrb[30].mxu1 }
 0x2e3   : > { %v3733_v25 = vpop.f32.mrb[31].mxu1 }
 0x2e4   : > { %v3734_v26 = vadd.f32 %v3733_v25, %v3732_v24  ;;  %v3757_v27 = vpop.f32.mrb[40].mxu0 }
 0x2e5   : > { %v3758_v62 = vpop.f32.mrb[41].mxu0 }
 0x2e6   : > { %v3759_v30 = vadd.f32 %v3758_v62, %v3757_v27  ;;  %v3760_v31 = vpop.f32.mrb[42].mxu0 }
 0x2e7   : > { %v3761_v32 = vpop.f32.mrb[43].mxu0 }
 0x2e8   : > { %v3762_v33 = vadd.f32 %v3761_v32, %v3760_v31  ;;  %v2842_v34 = vadd.f32 %v3759_v30, %v3731_v23  ;;  %v3807_v35 = vpop.f32.mrb[32].mxu1 }
 0x2e9   : > { %v2882_v38 = vpop.f32.mrb[33].mxu1 }
 0x2ea   : > { %v2891_v39 = vadd.f32 %v3807_v35, %v2842_v34  ;;  %v2883_v41 = vadd.f32 %v2882_v38, %v2834_v16  ;;  %v2845_v42 = vadd.f32 %v3762_v33, %v3734_v26  ;;  %v3808_v11 = vpop.f32.mrb[34].mxu1 }
 0x2eb   : > { %v2885_v43 = vpop.f32.mrb[35].mxu1 }
 0x2ec   : > { %v2935_v44 = vcombine.high %v2891_v39, %v2891_v39  ;;  %v2942_v54 = vrot.slane %v2891_v39, %v2907_v36  ;;  %v2901_v46 = vcombine.high %v2883_v41, %v2883_v41  ;;  %v2908_v47 = vrot.slane %v2883_v41, %v2907_v36 }
 0x2ed   : > { %v2894_v51 = vadd.f32 %v3808_v11, %v2845_v42  ;;  %v2886_v52 = vadd.f32 %v2885_v43, %v2837_v17 }
 0x2ee   : > { %v2949_v49 = vrot.slane %v2935_v44, %v2907_v36  ;;  %v2950_v53 = vcombine.high %v2942_v54, %v2942_v54  ;;  %v3004_v15 = vrot.slane %v2942_v54, %v4789_v37  ;;  %v3091_v55 = vrot.slane %v2942_v54, %v4791_v40 }
 0x2ef   : > { %v2915_v56 = vrot.slane %v2901_v46, %v2907_v36  ;;  %v2916_v57 = vcombine.high %v2908_v47, %v2908_v47  ;;  %v2972_v58 = vrot.slane %v2908_v47, %v4789_v37  ;;  %v3059_v45 = vrot.slane %v2908_v47, %v4791_v40 }
 0x2f0   : > { %v2951_v59 = vcombine.high %v2949_v49, %v2949_v49  ;;  %v3008_v60 = vrot.slane %v2950_v53, %v4789_v37  ;;  %v3012_v61 = vrot.slane %v2949_v49, %v4789_v37  ;;  %v3095_v48 = vrot.slane %v2950_v53, %v4791_v40 }
 0x2f1   : > { %v3099_v63 = vrot.slane %v2949_v49, %v4791_v40  ;;  %v4801_v0 = vcombine.high %v2915_v56, %v2915_v56  ;;  %v2976_v1 = vrot.slane %v2916_v57, %v4789_v37  ;;  %v2980_v50 = vrot.slane %v2915_v56, %v4789_v37 }
 0x2f2   : > { %v3016_v2 = vrot.slane %v2951_v59, %v4789_v37  ;;  %v3047_v3 = vsel %vm3033_vm0, %v3008_v60, %v3004_v15  ;;  %v3103_v4 = vrot.slane %v2951_v59, %v4791_v40  ;;  %v3127_v5 = vsel %vm3033_vm0, %v3095_v48, %v3091_v55 }
 0x2f3   : > { %v3048_v6 = vsel %vm3035_vm1, %v3012_v61, %v3047_v3  ;;  %v2984_v7 = vrot.slane %v4801_v0, %v4789_v37  ;;  %v3034_v8 = vsel %vm3033_vm0, %v2976_v1, %v2972_v58  ;;  %v3063_v9 = vrot.slane %v2916_v57, %v4791_v40  ;;  %v3538_v1 = vld [vmem:[%s4889_s6] ss:$0 sm:$0xff] }
 0x2f4   : > { %v3036_v10 = vsel %vm3035_vm1, %v2980_v50, %v3034_v8  ;;  %v3067_v12 = vrot.slane %v2915_v56, %v4791_v40  ;;  %v3071_v13 = vrot.slane %v4801_v0, %v4791_v40  ;;  %v2952_v14 = vcombine.high %v2894_v51, %v2894_v51 }
 0x2f5   : > { %v3120_v16 = vsel %vm3033_vm0, %v3063_v9, %v3059_v45  ;;  %v2959_v17 = vrot.slane %v2894_v51, %v2907_v36  ;;  %v2918_v18 = vcombine.high %v2886_v52, %v2886_v52  ;;  %v2925_v19 = vrot.slane %v2886_v52, %v2907_v36 }
 0x2f6   : > { %v2966_v20 = vrot.slane %v2952_v14, %v2907_v36  ;;  %v3128_v21 = vsel %vm3035_vm1, %v3099_v63, %v3127_v5  ;;  %v3121_v22 = vsel %vm3035_vm1, %v3067_v12, %v3120_v16  ;;  %v3049_v23 = vsel %vm3037_vm2, %v3016_v2, %v3048_v6  ;;  %v3537_v63 = vld [vmem:[%s4888_s5] ss:$0 sm:$0xff] }
 0x2f7   : > { %v2967_v24 = vcombine.high %v2959_v17, %v2959_v17  ;;  %v3020_v25 = vrot.slane %v2959_v17, %v4789_v37  ;;  %v3107_v26 = vrot.slane %v2959_v17, %v4791_v40  ;;  %v2932_v27 = vrot.slane %v2918_v18, %v2907_v36 }
 0x2f8   : > { %v3028_v28 = vrot.slane %v2966_v20, %v4789_v37  ;;  %v2933_v29 = vcombine.high %v2925_v19, %v2925_v19  ;;  %v2988_v62 = vrot.slane %v2925_v19, %v4789_v37  ;;  %v3075_v30 = vrot.slane %v2925_v19, %v4791_v40 }
 0x2f9   : > { %v3024_v31 = vrot.slane %v2967_v24, %v4789_v37  ;;  %v3111_v32 = vrot.slane %v2967_v24, %v4791_v40  ;;  %v2996_v33 = vrot.slane %v2932_v27, %v4789_v37  ;;  %v2968_v34 = vcombine.high %v2966_v20, %v2966_v20 }
 0x2fa   : > { %v2992_v35 = vrot.slane %v2933_v29, %v4789_v37  ;;  %v3079_v38 = vrot.slane %v2933_v29, %v4791_v40  ;;  %v3115_v36 = vrot.slane %v2966_v20, %v4791_v40  ;;  %v3129_v39 = vsel %vm3037_vm2, %v3103_v4, %v3128_v21 }
 0x2fb   : > { %v3119_v41 = vrot.slane %v2968_v34, %v4791_v40  ;;  %v3130_v42 = vsel %vm3039_vm3, %v3107_v26, %v3129_v39  ;;  %v2934_v11 = vcombine.high %v2932_v27, %v2932_v27  ;;  %v3083_v43 = vrot.slane %v2932_v27, %v4791_v40 }
 0x2fc   : > { %v3131_v44 = vsel %vm3041_vm4, %v3111_v32, %v3130_v42  ;;  %v3122_v54 = vsel %vm3037_vm2, %v3071_v13, %v3121_v22  ;;  %v3032_v46 = vrot.slane %v2968_v34, %v4789_v37  ;;  %v3050_v47 = vsel %vm3039_vm3, %v3020_v25, %v3049_v23 }
 0x2fd   : > { %v3132_v51 = vsel %vm3043_vm5, %v3115_v36, %v3131_v44  ;;  %v3087_v52 = vrot.slane %v2934_v11, %v4791_v40  ;;  %v3123_v49 = vsel %vm3039_vm3, %v3075_v30, %v3122_v54  ;;  %v3051_v53 = vsel %vm3041_vm4, %v3024_v31, %v3050_v47 }
 0x2fe   : > { %v3133_v15 = vsel %vm3045_vm6, %v3119_v41, %v3132_v51  ;;  %v3124_v55 = vsel %vm3041_vm4, %v3079_v38, %v3123_v49  ;;  %v3052_v56 = vsel %vm3043_vm5, %v3028_v28, %v3051_v53  ;;  %v3000_v57 = vrot.slane %v2934_v11, %v4789_v37 }
 0x2ff   : > { %3136 = vrot.lane.b32.xlu1 %v3133_v15, %s4023_s24  ;;  %v3125_v58 = vsel %vm3043_vm5, %v3083_v43, %v3124_v55  ;;  %v3053_v45 = vsel %vm3045_vm6, %v3032_v46, %v3052_v56  ;;  %v3038_v40 = vsel %vm3037_vm2, %v2984_v7, %v3036_v10 }
 0x300   : > { %v3126_v59 = vsel %vm3045_vm6, %v3087_v52, %v3125_v58  ;;  %v3040_v60 = vsel %vm3039_vm3, %v2988_v62, %v3038_v40 }
 0x301   : > { %3134 = vrot.lane.b32.xlu0 %v3126_v59, %s4023_s24  ;;  %v3042_v61 = vsel %vm3041_vm4, %v2992_v35, %v3040_v60 }
 0x302   : > { %v3044_v48 = vsel %vm3043_vm5, %v2996_v33, %v3042_v61 }
 0x303   : > { %v3046_v37 = vsel %vm3045_vm6, %v3000_v57, %v3044_v48 }
 0x371   : > { %v3137_v0 = vpop.permute.xlu1 %3136 }
 0x372   : > { %v3141_v50 = vsel %vm2040_vm14, %v3053_v45, %v3137_v0 }
 0x373   : > { %v3150_v2 = vmul.f32 %v3537_v63, %v3141_v50  ;;  %v3135_v3 = vpop.permute.xlu0 %3134 }
 0x374   : > { %v3140_v4 = vsel %vm2040_vm14, %v3046_v37, %v3135_v3 }
 0x375   : > { %v3159_v5 = vadd.f32 %v3538_v1, %v3150_v2  ;;  %v3149_v6 = vmul.f32 %v3537_v63, %v3140_v4 }
 0x377   : > { %v3161_v7 = vmax.f32 %v3159_v5, 0.0  ;;  %v3158_v8 = vadd.f32 %v3538_v1, %v3149_v6 }
 0x379   : > { %v3160_v9 = vmax.f32 %v3158_v8, 0.0 }
 0x37b   : > { %v3558_v10 = vpack.c.bf16 %v3161_v7, %v3160_v9 }
 0x37d   : > { %3559 = vst [vmem:[%s4134_s19] sm:$0xff] %v3558_v10  }
 0x37e PF: > { %s17_s28 = sadd.s32 1, %s4017_s28   ;;  %s4901_s24 = smov %s4009_s26 }
 0x37f   : > { %p14_p9 = scmp.ge.s32.totalorder %s17_s28, 6   ;;  %s4902_s25 = smov %s4013_s27 }
 0x380   : > { %s4903_s26 = smov %s4906_s29  ;;  %s4904_s27 = smov %s4910_s30 }
 0x381   :  { %16 = sbr.rel (!%p14_p9) target bundleno = 3 (0x3), region = 92 }

// kernel: decoder3d_forward.6
= control target key start
LH: loop header
LB: loop body
LE: loop exit
PB: predicated region body
PF: predicated region fallthrough
CT: control target
= control target key end

     0   :  { %s564_s12 = smov 0   ;;  %s622_s0 = inlined_call_operand.vmem [shape: bf16[2,64,64], index: 0, kind: input, shape index: {}]   ;;  %s623_s1 = inlined_call_operand.vmem [shape: bf16[64,256], index: 1, kind: input, shape index: {}]   ;;  %s624_s2 = inlined_call_operand.vmem [shape: f32[1,256], index: 2, kind: input, shape index: {}]   ;;  %s625_s3 = inlined_call_operand.vmem [shape: bf16[2,64,256], index: 3, kind: output, shape index: {}]  }
   0x1 LB: > { %s457_s13 = sadd.s32 4294967295, %s541_s12   ;;  %p461_p0 = scmp.ge.s32.totalorder %s541_s12, 1  ;;  %s541_s12 = sphi %s564_s12, %s13_s12  }
   0x2   : > { %p137_p1 = scmp.lt.s32.totalorder %s541_s12, 3 }
   0x4   : > { %p138_p2 = pnand %p461_p0, %p137_p1 }
   0x5   : > { %v519_v0 = vld [vmem:[%s623_s1 + $0x4] ss:$8 sps:$4 sm:$0xff] (!%p138_p2)   ;;  %p161_p3 = scmp.lt.s32.totalorder (!%p138_p2), %s457_s13, 1  ;;  %v521_v1 = vld [vmem:[%s623_s1] ss:$8 sps:$4 sm:$0xff] (!%p138_p2)   ;;  %v543_v2 = vmov (!%p138_p2), 0   ;;  %v190_v13 = vlaneseq (!%p138_p2) }
   0x6   : > { %141 = sbr.rel (%p138_p2) target bundleno = 251 (0xfb), region = 32  ;;  %305 = vmatprep.mubr.bf16.mxu0 (!%p138_p2), %v543_v2  ;;  %325 = vmatprep.mubr.bf16.mxu1 (!%p138_p2), %v543_v2  ;;  %v522_v3 = vld [vmem:[%s623_s1 + $0x14] ss:$8 sps:$4 sm:$0xff] (!%p138_p2)   ;;  %v524_v4 = vld [vmem:[%s623_s1 + $0x10] ss:$8 sps:$4 sm:$0xff] (!%p138_p2)   ;;  %vm260_vm0 = vcmask (!%p138_p2), 523264  }
   0x7   : > { %273 = vmatprep.subr.bf16.mxu0 (!%p138_p2), %v519_v0  ;;  %502 = vmatprep.subr.bf16.mxu1 (!%p138_p2), %v519_v0  ;;  %v525_v5 = vld [vmem:[%s623_s1 + $0x24] ss:$8 sps:$4 sm:$0xff] (!%p138_p2)   ;;  %v527_v6 = vld [vmem:[%s623_s1 + $0x20] ss:$8 sps:$4 sm:$0xff] (!%p138_p2)   ;;  %v528_v7 = vld [vmem:[%s623_s1 + $0x34] ss:$8 sps:$4 sm:$0xff] (!%p138_p2)  }
   0x8   : > { %274 = vmatpush1.bf16.msra.mxu0 (!%p138_p2), %v521_v1  ;;  %506 = vmatpush1.bf16.msra.mxu1 (!%p138_p2), %v521_v1  ;;  %v530_v8 = vld [vmem:[%s623_s1 + $0x30] ss:$8 sps:$4 sm:$0xff] (!%p138_p2)   ;;  %v191_v14 = vshrl.u32 (!%p138_p2), %v190_v13, 7  ;;  %v188_v16 = vld [vmem:[%s624_s2] sm:$0x3] (!%p138_p2) }
   0x9   : > { %275 = vmatprep.subr.bf16.mxu0 (!%p138_p2), %v522_v3  ;;  %503 = vmatprep.subr.bf16.mxu1 (!%p138_p2), %v522_v3 }
   0xa   : > { %v192_v15 = vsub.s32 (!%p138_p2), 0, %v191_v14  ;;  %v196_v17 = vsub.s32 (!%p138_p2), 1, %v191_v14 }
   0xc   : > { %276 = vmatpush1.bf16.msra.mxu0 (!%p138_p2), %v524_v4  ;;  %507 = vmatpush1.bf16.msra.mxu1 (!%p138_p2), %v524_v4  ;;  %v193_v18 = vrot.slane (!%p138_p2), %v188_v16, %v192_v15  ;;  %v197_v19 = vrot.slane (!%p138_p2), %v188_v16, %v196_v17 }
   0xd   : > { %s627_s13 = smov (!%p161_p3, %s457_s13), 1  ;;  %277 = vmatprep.subr.bf16.mxu0 %v525_v5  ;;  %504 = vmatprep.subr.bf16.mxu1 %v525_v5 }
   0xe   : > { %s492_s24 = sshll.u32 %s627_s13, 5  ;;  %s493_s9 = sshll.u32 %s627_s13, 6 }
   0xf   : > { %s165_s27 = scalar_lea.vmem %s622_s0, %s492_s24  ;;  %s609_s14 = scalar_lea.vmem %s625_s3, %s493_s9 }
  0x10   : > { %278 = vmatpush1.bf16.msra.mxu0 %v527_v6  ;;  %508 = vmatpush1.bf16.msra.mxu1 %v527_v6  ;;  %v531_v9 = vld [vmem:[%s165_s27] sm:$0xff]   ;;  %v532_v10 = vld [vmem:[%s165_s27 + $0x10] sm:$0xff]   ;;  %v533_v11 = vld [vmem:[%s165_s27 + $0x8] sm:$0xff]  }
  0x11   : > { %279 = vmatprep.subr.bf16.mxu0 %v528_v7  ;;  %505 = vmatprep.subr.bf16.mxu1 %v528_v7  ;;  %v534_v12 = vld [vmem:[%s165_s27 + $0x18] sm:$0xff]  }
  0x14   : > { %280 = vmatpush1.bf16.msra.mxu0 %v530_v8  ;;  %509 = vmatpush1.bf16.msra.mxu1 %v530_v8 }
  0x17   : > { %478 = vmatmul.mubr.msk.bf16.vlgmr.msra.gmra.mrb[0].mxu0 %vm260_vm0, %v531_v9  ;;  %480 = vmatmul.mubr.msk.bf16.vlgmr.msra.gmra.mrb[0].mxu1 %vm260_vm0, %v532_v10 }
  0x18   : > { %315 = vmatprep.mubr.bf16.mxu0 %v543_v2  ;;  %335 = vmatprep.mubr.bf16.mxu1 %v543_v2 }
  0x1f   : > { %479 = vmatmul.mubr.msk.bf16.gmra.mrb[4].mxu0 %vm260_vm0, %v533_v11  ;;  %481 = vmatmul.mubr.msk.bf16.gmra.mrb[4].mxu1 %vm260_vm0, %v534_v12 }
  0xea   : > { %v307_v20 = vpop.f32.mrb[0].mxu0  ;;  %v327_v21 = vpop.f32.mrb[0].mxu1 }
  0xeb   : > { %v308_v22 = vadd.f32 %v307_v20, %v193_v18  ;;  %v328_v23 = vadd.f32 %v327_v21, %v193_v18  ;;  %v309_v24 = vpop.f32.mrb[1].mxu0  ;;  %v329_v25 = vpop.f32.mrb[1].mxu1 }
  0xec   : > { %v310_v26 = vadd.f32 %v309_v24, %v197_v19  ;;  %v330_v27 = vadd.f32 %v329_v25, %v197_v19  ;;  %v311_v28 = vpop.f32.mrb[2].mxu0  ;;  %v331_v29 = vpop.f32.mrb[2].mxu1 }
  0xed   : > { %v312_v30 = vadd.f32 %v311_v28, %v193_v18  ;;  %v332_v31 = vadd.f32 %v331_v29, %v193_v18  ;;  %v313_v32 = vpop.f32.mrb[3].mxu0  ;;  %v333_v33 = vpop.f32.mrb[3].mxu1 }
  0xee   : > { %v494_v34 = vpack.c.bf16 %v310_v26, %v308_v22  ;;  %v498_v35 = vpack.c.bf16 %v330_v27, %v328_v23  ;;  %v314_v36 = vadd.f32 %v313_v32, %v197_v19  ;;  %v334_v37 = vadd.f32 %v333_v33, %v197_v19 }
  0xf0   : > { %394 = vst [vmem:[%s609_s14] sm:$0xff] %v494_v34  ;;  %398 = vst [vmem:[%s609_s14 + $0x20] sm:$0xff] %v498_v35  ;;  %v495_v38 = vpack.c.bf16 %v314_v36, %v312_v30  ;;  %v499_v39 = vpack.c.bf16 %v334_v37, %v332_v31 }
  0xf2   : > { %395 = vst [vmem:[%s609_s14 + $0x8] sm:$0xff] %v495_v38  ;;  %399 = vst [vmem:[%s609_s14 + $0x28] sm:$0xff] %v499_v39  ;;  %v317_v40 = vpop.f32.mrb[4].mxu0  ;;  %v337_v41 = vpop.f32.mrb[4].mxu1 }
  0xf3   : > { %v318_v42 = vadd.f32 %v317_v40, %v193_v18  ;;  %v338_v43 = vadd.f32 %v337_v41, %v193_v18  ;;  %v319_v44 = vpop.f32.mrb[5].mxu0  ;;  %v339_v45 = vpop.f32.mrb[5].mxu1 }
  0xf4   : > { %v320_v46 = vadd.f32 %v319_v44, %v197_v19  ;;  %v340_v47 = vadd.f32 %v339_v45, %v197_v19  ;;  %v321_v48 = vpop.f32.mrb[6].mxu0  ;;  %v341_v49 = vpop.f32.mrb[6].mxu1 }
  0xf5   : > { %v322_v50 = vadd.f32 %v321_v48, %v193_v18  ;;  %v342_v51 = vadd.f32 %v341_v49, %v193_v18  ;;  %v323_v52 = vpop.f32.mrb[7].mxu0  ;;  %v343_v53 = vpop.f32.mrb[7].mxu1 }
  0xf6   : > { %v496_v54 = vpack.c.bf16 %v320_v46, %v318_v42  ;;  %v500_v55 = vpack.c.bf16 %v340_v47, %v338_v43  ;;  %v324_v56 = vadd.f32 %v323_v52, %v197_v19  ;;  %v344_v57 = vadd.f32 %v343_v53, %v197_v19 }
  0xf8   : > { %396 = vst [vmem:[%s609_s14 + $0x10] sm:$0xff] %v496_v54  ;;  %400 = vst [vmem:[%s609_s14 + $0x30] sm:$0xff] %v500_v55  ;;  %v497_v58 = vpack.c.bf16 %v324_v56, %v322_v50  ;;  %v501_v59 = vpack.c.bf16 %v344_v57, %v342_v51 }
  0xfa   : > { %397 = vst [vmem:[%s609_s14 + $0x18] sm:$0xff] %v497_v58  ;;  %401 = vst [vmem:[%s609_s14 + $0x38] sm:$0xff] %v501_v59 }
  0xfb PF: > { %s13_s12 = sadd.s32 1, %s541_s12  }
  0xfc   : > { %p10_p4 = scmp.ge.s32.totalorder %s13_s12, 4  }
  0xfe   :  { %12 = sbr.rel (!%p10_p4) target bundleno = 1 (0x1), region = 62 }

// kernel: decoder3d_forward.7
= control target key start
LH: loop header
LB: loop body
LE: loop exit
PB: predicated region body
PF: predicated region fallthrough
CT: control target
= control target key end

     0   :  { %s5593_s24 = smov 0   ;;  %s5595_s25 = smov 0   ;;  %s6978_s0 = inlined_call_operand.vmem [shape: bf16[2,20,18,128], index: 0, kind: input, shape index: {}]   ;;  %s6979_s1 = inlined_call_operand.vmem [shape: bf16[1152,64], index: 1, kind: input, shape index: {}]   ;;  %s6980_s2 = inlined_call_operand.vmem [shape: f32[1,64], index: 2, kind: input, shape index: {}]   ;;  %s6981_s3 = inlined_call_operand.vmem [shape: f32[1,64], index: 3, kind: input, shape index: {}]   ;;  %s6982_s4 = inlined_call_operand.vmem [shape: bf16[576,64], index: 4, kind: input, shape index: {}]   ;;  %s6983_s5 = inlined_call_operand.vmem [shape: f32[1,128], index: 5, kind: input, shape index: {}]   ;;  %s6984_s6 = inlined_call_operand.vmem [shape: f32[1,128], index: 6, kind: input, shape index: {}]   ;;  %s6985_s7 = inlined_call_operand.vmem [shape: f32[2,128,128], index: 7, kind: output, shape index: {}]  }
   0x1   :  { %s5597_s26 = smov 0   ;;  %s5599_s27 = smov 0  }
   0x2   :  { %s5601_s28 = smov 0  }
   0x3 LB: > { %s26_s29 = sadd.s32 1, %s5539_s26  ;;  %s29_s30 = sadd.s32 1, %s5543_s27  ;;  %s5547_s28 = sphi %s5601_s28, %s17_s28   ;;  %s5543_s27 = sphi %s5599_s27, %s7001_s27   ;;  %s5539_s26 = sphi %s5597_s26, %s7000_s26   ;;  %s5535_s25 = sphi %s5595_s25, %s6999_s25   ;;  %s5531_s24 = sphi %s5593_s24, %s6998_s24  }
   0x4   : > { %p27_p0 = scmp.ge.s32.totalorder %s26_s29, 4  ;;  %p4599_p1 = scmp.ge.s32.totalorder %s5547_s28, 1 }
   0x5   : > { %p251_p2 = scmp.lt.s32.totalorder %s5547_s28, 9 }
   0x6   : > { %s7003_s29 = smov (%p27_p0, %s26_s29), 0  ;;  %s7005_s30 = smov (!%p27_p0, %s29_s30), %s5543_s27 }
   0x7   : > { %p252_p3 = pnand %p4599_p1, %p251_p2  ;;  %p31_p4 = scmp.ge.s32.totalorder %s7005_s30, 2 }
   0x8   : > { %v5371_v0 = vld [vmem:[%s6979_s1 + $0x40] sm:$0xff] (!%p252_p3)   ;;  %p287_p5 = scmp.lt.s32.totalorder (!%p252_p3), %s5535_s25, 1  ;;  %s4601_s12 = sshll.u32 (!%p252_p3), %s5531_s24, 2  ;;  %v5375_v4 = vld [vmem:[%s6979_s1 + $0x48] sm:$0xff] (!%p252_p3)   ;;  %v5379_v8 = vld [vmem:[%s6979_s1 + $0x50] sm:$0xff] (!%p252_p3)   ;;  %vm592_vm0 = vcmask (!%p252_p3), 1042432  }
   0x9   : > { %s7007_s30 = smov (%p31_p4, %s7005_s30), 0  ;;  %255 = sbr.rel (%p252_p3) target bundleno = 966 (0x3c6), region = 48 }
   0xa   : > { %v5372_v1 = vld [vmem:[%s6979_s1 + $0xc0] sm:$0xff] (!%p252_p3)   ;;  %4972 = vmatprep.subr.bf16.mxu0 (!%p252_p3), %v5371_v0  ;;  %p295_p6 = scmp.lt.s32.totalorder (!%p252_p3), %s4601_s12, 15  ;;  %v5376_v5 = vld [vmem:[%s6979_s1 + $0xc8] sm:$0xff] (!%p252_p3)   ;;  %v5380_v9 = vld [vmem:[%s6979_s1 + $0xd0] sm:$0xff] (!%p252_p3)   ;;  %s4959_s22 = smul.u32 (!%p252_p3), 48, %s5531_s24  ;;  %vm593_vm1 = vcmask (!%p252_p3), 1046532  }
   0xb   : > { %v5373_v2 = vld [vmem:[%s6979_s1] sm:$0xff] (!%p252_p3)   ;;  %5024 = vmatprep.subr.bf16.mxu1 (!%p252_p3), %v5372_v1  ;;  %v5377_v6 = vld [vmem:[%s6979_s1 + $0x8] sm:$0xff] (!%p252_p3)   ;;  %v5381_v10 = vld [vmem:[%s6979_s1 + $0x10] sm:$0xff] (!%p252_p3)   ;;  %vm379_vm2 = vsmask.f32 (!%p252_p3), 3328  ;;  %vm2627_vm7 = vcmask (!%p252_p3), 519168  }
   0xc   : > { %v5374_v3 = vld [vmem:[%s6979_s1 + $0x80] sm:$0xff] (!%p252_p3)   ;;  %4973 = vmatpush3.bf16.msra.mxu0 (!%p252_p3), %v5373_v2  ;;  %v5378_v7 = vld [vmem:[%s6979_s1 + $0x88] sm:$0xff] (!%p252_p3)   ;;  %v5382_v11 = vld [vmem:[%s6979_s1 + $0x90] sm:$0xff] (!%p252_p3)   ;;  %vm380_vm3 = vsmask.f32 (!%p252_p3), 7440  ;;  %vm2635_vm9 = vcmask (!%p252_p3), 516096  }
   0xd   : > { %5025 = vmatpush3.bf16.msra.mxu1 (!%p252_p3), %v5374_v3  ;;  %4974 = vmatprep.subr.bf16.mxu0 (!%p252_p3), %v5375_v4  ;;  %v5383_v12 = vld [vmem:[%s6979_s1 + $0x58] sm:$0xff] (!%p252_p3)   ;;  %v5387_v16 = vld [vmem:[%s6979_s1 + $0x60] sm:$0xff] (!%p252_p3)   ;;  %v5391_v20 = vld [vmem:[%s6979_s1 + $0x68] sm:$0xff] (!%p252_p3)   ;;  %vm2504_vm6 = vsmask.f32 (!%p252_p3), 256  ;;  %p4865_p7 = scmp.ne.s32.totalorder (!%p252_p3), %s5531_s24, 0 }
   0xe   : > { %5026 = vmatprep.subr.bf16.mxu1 (!%p252_p3), %v5376_v5  ;;  %v5384_v13 = vld [vmem:[%s6979_s1 + $0xd8] sm:$0xff] (!%p252_p3)   ;;  %v5388_v17 = vld [vmem:[%s6979_s1 + $0xe0] sm:$0xff] (!%p252_p3)   ;;  %v5392_v21 = vld [vmem:[%s6979_s1 + $0xe8] sm:$0xff] (!%p252_p3)   ;;  %vm2628_vm8 = vsmask.f32 (!%p252_p3), 7938 }
   0xf   : > { %v5385_v14 = vld [vmem:[%s6979_s1 + $0x18] sm:$0xff] (!%p252_p3)   ;;  %v5389_v18 = vld [vmem:[%s6979_s1 + $0x20] sm:$0xff] (!%p252_p3)   ;;  %v5393_v22 = vld [vmem:[%s6979_s1 + $0x28] sm:$0xff] (!%p252_p3)   ;;  %vm2505_vm10 = vsmask.f32 (!%p252_p3), 4368 }
  0x10   : > { %s7009_s25 = smov (!%p287_p5, %s5535_s25), 1  ;;  %s7011_s12 = smov (!%p295_p6, %s4601_s12), 15  ;;  %4975 = vmatpush3.bf16.msra.mxu0 %v5377_v6  ;;  %v5386_v15 = vld [vmem:[%s6979_s1 + $0x98] sm:$0xff]   ;;  %v5390_v19 = vld [vmem:[%s6979_s1 + $0xa0] sm:$0xff]   ;;  %v5394_v23 = vld [vmem:[%s6979_s1 + $0xa8] sm:$0xff]  }
  0x11   : > { %s4602_s23 = sshll.u32 %s7009_s25, 4  ;;  %5027 = vmatpush3.bf16.msra.mxu1 %v5378_v7  ;;  %4976 = vmatprep.subr.bf16.mxu0 %v5379_v8  ;;  %s5326_s15 = smul.u32 240, %s7009_s25  ;;  %v5395_v24 = vld [vmem:[%s6979_s1 + $0x70] sm:$0xff]   ;;  %v5399_v28 = vld [vmem:[%s6979_s1 + $0x78] sm:$0xff]   ;;  %vm5743_vm4 = vmor %vm592_vm0, %vm593_vm1 }
  0x12   : > { %s298_s10 = sadd.s32 %s4602_s23, %s7011_s12  ;;  %5028 = vmatprep.subr.bf16.mxu1 %v5380_v9  ;;  %v5396_v25 = vld [vmem:[%s6979_s1 + $0xf0] sm:$0xff]   ;;  %v5400_v29 = vld [vmem:[%s6979_s1 + $0xf8] sm:$0xff]   ;;  %vm5752_vm5 = vmor %vm379_vm2, %vm380_vm3 }
  0x13   : > { %s4603_s14 = sshll.u32 %s298_s10, 3  ;;  %v5397_v26 = vld [vmem:[%s6979_s1 + $0x30] sm:$0xff]   ;;  %s291_s10 = scalar_lea.vmem %s6978_s0, %s5326_s15  ;;  %v5401_v30 = vld [vmem:[%s6979_s1 + $0x38] sm:$0xff]   ;;  %v5405_v56 = vld [vmem:[%s6979_s1 + $0x140] sm:$0xff]  }
  0x14   : > { %s5662_s19 = scalar_lea.vmem %s6985_s7, %s4603_s14  ;;  %4977 = vmatpush3.bf16.msra.mxu0 %v5381_v10  ;;  %v5398_v27 = vld [vmem:[%s6979_s1 + $0xb0] sm:$0xff]   ;;  %s5729_s20 = scalar_lea.vmem %s291_s10, %s4959_s22  ;;  %v5402_v31 = vld [vmem:[%s6979_s1 + $0xb8] sm:$0xff]   ;;  %v5406_v63 = vld [vmem:[%s6979_s1 + $0x100] sm:$0xff]  }
  0x15   : > { %5029 = vmatpush3.bf16.msra.mxu1 %v5382_v11  ;;  %4978 = vmatprep.subr.bf16.mxu0 %v5383_v12  ;;  %v361_v32 = vld [vmem:[%s5729_s20] sm:$0xf]  ;;  %v362_v33 = vld [vmem:[%s5729_s20 + $0x4] sm:$0xf]  ;;  %v363_v34 = vld [vmem:[%s5729_s20 + $0x8] sm:$0x1] }
  0x16   : > { %5030 = vmatprep.subr.bf16.mxu1 %v5384_v13  ;;  %v383_v35 = vshrl.u32 %v361_v32, 16  ;;  %v386_v36 = vshll.u32 %v361_v32, 16  ;;  %v392_v37 = vshll.u32 %v362_v33, 16  ;;  %v396_v38 = vshrl.u32 %v362_v33, 16  ;;  %v5403_v40 = vld [vmem:[%s5729_s20 + $0xc] sm:$0xff]   ;;  %v5404_v59 = vld [vmem:[%s5729_s20] sm:$0xff]   ;;  %vm6225_vm11 = vmand %vm2627_vm7, %vm2628_vm8 }
  0x17   : > { %v402_v39 = vshll.u32 %v363_v34, 16  ;;  %2126 = vmatprep.mubr.bf16.mxu1 %v5403_v40  ;;  %v556_v48 = vld [vmem:[%s5729_s20] sm:$0xe]  ;;  %v557_v49 = vld [vmem:[%s5729_s20 + $0x4] sm:$0xf]  ;;  %v5407_v3 = vld [vmem:[%s6979_s1 + $0x148] sm:$0xff]  }
  0x18   : > { %4979 = vmatpush3.bf16.msra.mxu0 %v5385_v14  ;;  %v385_v41 = vrot.slane %v383_v35, 4  ;;  %v388_v42 = vrot.slane %v386_v36, 5  ;;  %v394_v43 = vrot.slane %v392_v37, 5  ;;  %v398_v44 = vrot.slane %v396_v38, 4  ;;  %v558_v50 = vld [vmem:[%s5729_s20 + $0x8] sm:$0x1]  ;;  %vm6232_vm12 = vmand %vm2635_vm9, %vm2504_vm6 }
  0x19   : > { %5031 = vmatpush3.bf16.msra.mxu1 %v5386_v15  ;;  %4980 = vmatprep.subr.bf16.mxu0 %v5387_v16  ;;  %v404_v45 = vrot.slane %v402_v39, 5  ;;  %v4619_v53 = vrot.slane %v556_v48, 9  ;;  %v597_v54 = vrot.slane %v557_v49, 5  ;;  %v600_v55 = vrot.slane %v558_v50, 5  ;;  %v364_v0 = vld [vmem:[%s5729_s20 + $0xc] sm:$0xf]  ;;  %vm6238_vm13 = vmor %vm2504_vm6, %vm2505_vm10 }
  0x1a   : > { %5032 = vmatprep.subr.bf16.mxu1 %v5388_v17  ;;  %v389_v47 = vor.u32 %v388_v42, %v385_v41  ;;  %v399_v52 = vor.u32 %v398_v44, %v394_v43  ;;  %v365_v4 = vld [vmem:[%s5729_s20 + $0x10] sm:$0xf]  ;;  %v366_v5 = vld [vmem:[%s5729_s20 + $0x14] sm:$0x1]  ;;  %v407_v6 = vshrl.u32 %v364_v0, 16  ;;  %v410_v7 = vshll.u32 %v364_v0, 16  ;;  %vm6274_vm14 = vmand %vm2635_vm9, %vm2628_vm8 }
  0x1b   : > { %v598_v60 = vsel %vm5743_vm4, %v4619_v53, %v597_v54  ;;  %v599_v61 = vrot.slane %v597_v54, 4  ;;  %v416_v10 = vshll.u32 %v365_v4, 16  ;;  %v420_v11 = vshrl.u32 %v365_v4, 16  ;;  %v5408_v15 = vld [vmem:[%s5729_s20 + $0x18] sm:$0xff]   ;;  %v5412_v35 = vld [vmem:[%s6979_s1 + $0x110] sm:$0xff]   ;;  %v5413_v37 = vld [vmem:[%s5729_s20 + $0x24] sm:$0xff]  }
  0x1c   : > { %4981 = vmatpush3.bf16.msra.mxu0 %v5389_v18  ;;  %v390_v57 = vrot.slane %v389_v47, 4  ;;  %v400_v58 = vrot.slane %v399_v52, 4  ;;  %v409_v12 = vrot.slane %v407_v6, 4  ;;  %v412_v13 = vrot.slane %v410_v7, 5  ;;  %v5409_v18 = vld [vmem:[%s6979_s1 + $0x108] sm:$0xff]   ;;  %v5416_v6 = vld [vmem:[%s6979_s1 + $0x1c0] sm:$0xff]  }
  0x1d   : > { %5033 = vmatpush3.bf16.msra.mxu1 %v5390_v19  ;;  %4982 = vmatprep.subr.bf16.mxu0 %v5391_v20  ;;  %v601_v2 = vsel %vm5743_vm4, %v599_v61, %v600_v55  ;;  %v426_v14 = vshll.u32 %v366_v5, 16  ;;  %v418_v16 = vrot.slane %v416_v10, 5  ;;  %v422_v17 = vrot.slane %v420_v11, 4  ;;  %v367_v36 = vld [vmem:[%s5729_s20 + $0x18] sm:$0xf]  ;;  %v5418_v11 = vld [vmem:[%s6979_s1 + $0x180] sm:$0xff]  }
  0x1e   : > { %5034 = vmatprep.subr.bf16.mxu1 %v5392_v21  ;;  %v395_v62 = vsel %vm5752_vm5, %v390_v57, %v394_v43  ;;  %v405_v1 = vsel %vm5752_vm5, %v400_v58, %v404_v45  ;;  %v4625_v9 = vcombine.low %v598_v60, %v601_v2  ;;  %v413_v19 = vor.u32 %v412_v13, %v409_v12  ;;  %v5411_v21 = vld [vmem:[%s6979_s1 + $0x150] sm:$0xff]   ;;  %v368_v39 = vld [vmem:[%s5729_s20 + $0x1c] sm:$0xf]  ;;  %v369_v40 = vld [vmem:[%s5729_s20 + $0x20] sm:$0x1] }
  0x1f   : > { %v4613_v8 = vcombine.low %v395_v62, %v405_v1  ;;  %v428_v20 = vrot.slane %v426_v14, 5  ;;  %v431_v41 = vshrl.u32 %v367_v36, 16  ;;  %v434_v42 = vshll.u32 %v367_v36, 16  ;;  %v562_v55 = vld [vmem:[%s5729_s20 + $0x18] sm:$0xe]  ;;  %v5419_v14 = vld [vmem:[%s6979_s1 + $0x1c8] sm:$0xff]  }
  0x20   : > { %4983 = vmatpush3.bf16.msra.mxu0 %v5393_v22  ;;  %v423_v22 = vor.u32 %v422_v17, %v418_v16  ;;  %v440_v45 = vshll.u32 %v368_v39, 16  ;;  %v444_v47 = vshrl.u32 %v368_v39, 16  ;;  %v450_v52 = vshll.u32 %v369_v40, 16  ;;  %v563_v58 = vld [vmem:[%s5729_s20 + $0x1c] sm:$0xf]  ;;  %v5423_v36 = vld [vmem:[%s6979_s1 + $0x160] sm:$0xff]  }
  0x21   : > { %5035 = vmatpush3.bf16.msra.mxu1 %v5394_v23  ;;  %4984 = vmatprep.subr.bf16.mxu0 %v5395_v24  ;;  %v559_v23 = vld [vmem:[%s5729_s20 + $0xc] sm:$0xe]  ;;  %v560_v24 = vld [vmem:[%s5729_s20 + $0x10] sm:$0xf]  ;;  %v433_v49 = vrot.slane %v431_v41, 4  ;;  %v436_v50 = vrot.slane %v434_v42, 5 }
  0x22   : > { %5036 = vmatprep.subr.bf16.mxu1 %v5396_v25  ;;  %2045 = vmatprep.mubr.bf16.mxu0 %v4613_v8  ;;  %v561_v25 = vld [vmem:[%s5729_s20 + $0x14] sm:$0x1]  ;;  %v442_v53 = vrot.slane %v440_v45, 5  ;;  %v446_v54 = vrot.slane %v444_v47, 4  ;;  %v452_v57 = vrot.slane %v450_v52, 5  ;;  %v4621_v60 = vrot.slane %v562_v55, 9 }
  0x23   : > { %v611_v62 = vrot.slane %v563_v58, 5  ;;  %v5415_v1 = vld [vmem:[%s6979_s1 + $0x158] sm:$0xff]   ;;  %v372_v17 = vld [vmem:[%s5729_s20 + $0x2c] sm:$0x1]  ;;  %v5422_v39 = vld [vmem:[%s5729_s20 + $0x24] sm:$0xff]  }
  0x24   : > { %4985 = vmatpush3.bf16.msra.mxu0 %v5397_v26  ;;  %v414_v26 = vrot.slane %v413_v19, 4  ;;  %v447_v61 = vor.u32 %v446_v54, %v442_v53  ;;  %v5417_v7 = vld [vmem:[%s6979_s1 + $0x118] sm:$0xff]   ;;  %v5424_v47 = vld [vmem:[%s6979_s1 + $0x120] sm:$0xff]   ;;  %v5426_v52 = vld [vmem:[%s6979_s1 + $0x190] sm:$0xff]  }
  0x25   : > { %5037 = vmatpush3.bf16.msra.mxu1 %v5398_v27  ;;  %4986 = vmatprep.subr.bf16.mxu0 %v5399_v28  ;;  %v4620_v27 = vrot.slane %v559_v23, 9  ;;  %v604_v28 = vrot.slane %v560_v24, 5  ;;  %v612_v4 = vsel %vm5743_vm4, %v4621_v60, %v611_v62  ;;  %v613_v5 = vrot.slane %v611_v62, 4  ;;  %v5420_v23 = vld [vmem:[%s5729_s20 + $0x30] sm:$0xff]   ;;  %v5427_v54 = vld [vmem:[%s6979_s1 + $0x168] sm:$0xff]   ;;  %v5428_v55 = vld [vmem:[%s6979_s1 + $0x1d8] sm:$0xff]  }
  0x26   : > { %5038 = vmatprep.subr.bf16.mxu1 %v5400_v29  ;;  %v607_v29 = vrot.slane %v561_v25, 5  ;;  %v419_v32 = vsel %vm5752_vm5, %v414_v26, %v418_v16  ;;  %v448_v2 = vrot.slane %v447_v61, 4  ;;  %v371_v16 = vld [vmem:[%s5729_s20 + $0x28] sm:$0xf]  ;;  %v375_v58 = vld [vmem:[%s5729_s20 + $0x38] sm:$0x1] }
  0x27   : > { %v605_v33 = vsel %vm5743_vm4, %v4620_v27, %v604_v28  ;;  %v606_v34 = vrot.slane %v604_v28, 4  ;;  %v5421_v28 = vld [vmem:[%s6979_s1 + $0x188] sm:$0xff]  }
  0x28   : > { %4987 = vmatpush3.bf16.msra.mxu0 %v5401_v30  ;;  %v424_v30 = vrot.slane %v423_v22, 4  ;;  %v474_v22 = vshll.u32 %v372_v17, 16 }
  0x29   : > { %5039 = vmatpush3.bf16.msra.mxu1 %v5402_v31  ;;  %5076 = vmatprep.subr.bf16.mxu0 %v5405_v56  ;;  %v5410_v31 = vld [vmem:[%s5729_s20 + $0xc] sm:$0xff]   ;;  %v608_v44 = vsel %vm5743_vm4, %v606_v34, %v607_v29  ;;  %v437_v56 = vor.u32 %v436_v50, %v433_v49 }
  0x2a   : > { %v429_v38 = vsel %vm5752_vm5, %v424_v30, %v428_v20  ;;  %v4626_v48 = vcombine.low %v605_v33, %v608_v44  ;;  %5128 = vmatprep.subr.bf16.mxu1 %v5416_v6  ;;  %v464_v20 = vshll.u32 %v371_v16, 16  ;;  %v566_v33 = vld [vmem:[%s5729_s20 + $0x28] sm:$0xf]  ;;  %v567_v34 = vld [vmem:[%s5729_s20 + $0x2c] sm:$0x1]  ;;  %v5425_v49 = vld [vmem:[%s6979_s1 + $0x1d0] sm:$0xff]  }
  0x2b   : > { %2046 = vmatmul.mubr.bf16.vlgmr.msra.gmra.mrb[0].mxu0 %v5404_v59  ;;  %v4614_v43 = vcombine.low %v419_v32, %v429_v38  ;;  %v564_v59 = vld [vmem:[%s5729_s20 + $0x20] sm:$0x1]  ;;  %v438_v0 = vrot.slane %v437_v56, 4  ;;  %v565_v32 = vld [vmem:[%s5729_s20 + $0x24] sm:$0xe]  ;;  %v618_v40 = vrot.slane %v566_v33, 5 }
  0x2c   : > { %2127 = vmatmul.mubr.bf16.vlgmr.msra.gmra.mrb[0].mxu1 %v4625_v9  ;;  %5077 = vmatpush3.bf16.msra.mxu0 %v5406_v63  ;;  %v614_v63 = vrot.slane %v564_v59, 5  ;;  %v453_v9 = vsel %vm5752_vm5, %v448_v2, %v452_v57  ;;  %v466_v26 = vrot.slane %v464_v20, 5  ;;  %v621_v41 = vrot.slane %v567_v34, 5  ;;  %v373_v56 = vld [vmem:[%s5729_s20 + $0x30] sm:$0xf] }
  0x2d   : > { %2134 = vmatprep.mubr.bf16.mxu1 %v5408_v15  ;;  %5078 = vmatprep.subr.bf16.mxu0 %v5407_v3  ;;  %v5414_v3 = vld [vmem:[%s5729_s20 + $0x18] sm:$0xff]   ;;  %v443_v8 = vsel %vm5752_vm5, %v438_v0, %v442_v53  ;;  %v370_v15 = vld [vmem:[%s5729_s20 + $0x24] sm:$0xf]  ;;  %v620_v45 = vrot.slane %v618_v40, 4  ;;  %v374_v57 = vld [vmem:[%s5729_s20 + $0x34] sm:$0xf] }
  0x2e   : > { %2053 = vmatprep.mubr.bf16.mxu0 %v4614_v43  ;;  %v615_v10 = vsel %vm5743_vm4, %v613_v5, %v614_v63  ;;  %v4615_v12 = vcombine.low %v443_v8, %v453_v9  ;;  %5129 = vmatpush3.bf16.msra.mxu1 %v5418_v11  ;;  %v458_v19 = vshll.u32 %v370_v15, 16  ;;  %v479_v59 = vshrl.u32 %v373_v56, 16  ;;  %v5429_v0 = vld [vmem:[%s5729_s20 + $0x3c] sm:$0xff]   ;;  %v5430_v5 = vld [vmem:[%s6979_s1 + $0x128] sm:$0xff]   ;;  %v378_v33 = vld [vmem:[%s5729_s20 + $0x44] sm:$0x1] }
  0x2f   : > { %v4627_v13 = vcombine.low %v612_v4, %v615_v10  ;;  %5130 = vmatprep.subr.bf16.mxu1 %v5419_v14  ;;  %v622_v50 = vsel %vm5743_vm4, %v620_v45, %v621_v41  ;;  %v482_v60 = vshll.u32 %v373_v56, 16  ;;  %v488_v61 = vshll.u32 %v374_v57, 16  ;;  %v5431_v9 = vld [vmem:[%s6979_s1 + $0x198] sm:$0xff]   ;;  %v568_v10 = vld [vmem:[%s5729_s20 + $0x30] sm:$0xe] }
  0x30   : > { %5079 = vmatpush3.bf16.msra.mxu0 %v5409_v18  ;;  %v455_v18 = vshrl.u32 %v370_v15, 16  ;;  %v460_v25 = vrot.slane %v458_v19, 5  ;;  %v492_v62 = vshrl.u32 %v374_v57, 16  ;;  %v498_v63 = vshll.u32 %v375_v58, 16  ;;  %v569_v14 = vld [vmem:[%s5729_s20 + $0x34] sm:$0xf] }
  0x31   : > { %5080 = vmatprep.subr.bf16.mxu0 %v5411_v21  ;;  %v468_v21 = vshrl.u32 %v371_v16, 16  ;;  %v484_v2 = vrot.slane %v482_v60, 5  ;;  %v570_v15 = vld [vmem:[%s5729_s20 + $0x38] sm:$0x1]  ;;  %v4623_v16 = vrot.slane %v568_v10, 9  ;;  %v625_v17 = vrot.slane %v569_v14, 5 }
  0x32   : > { %v457_v24 = vrot.slane %v455_v18, 4  ;;  %5131 = vmatpush3.bf16.msra.mxu1 %v5421_v28  ;;  %v494_v4 = vrot.slane %v492_v62, 4  ;;  %v500_v8 = vrot.slane %v498_v63, 5  ;;  %v628_v18 = vrot.slane %v570_v15, 5  ;;  %v5433_v19 = vld [vmem:[%s6979_s1 + $0x1e0] sm:$0xff]   ;;  %v5436_v28 = vld [vmem:[%s6979_s1 + $0x130] sm:$0xff]  }
  0x33   : > { %2054 = vmatmul.mubr.bf16.gmra.mrb[4].mxu0 %v5410_v31  ;;  %v470_v27 = vrot.slane %v468_v21, 4  ;;  %v476_v31 = vrot.slane %v474_v22, 5  ;;  %5132 = vmatprep.subr.bf16.mxu1 %v5425_v49  ;;  %v571_v49 = vld [vmem:[%s5729_s20 + $0x3c] sm:$0xe]  ;;  %v4651_v14 = vld [vmem:[%s5729_s20 + $0xc] sm:$0xf] }
  0x34   : > { %2135 = vmatmul.mubr.bf16.gmra.mrb[4].mxu1 %v4626_v48  ;;  %5081 = vmatpush3.bf16.msra.mxu0 %v5412_v35  ;;  %v461_v29 = vor.u32 %v460_v25, %v457_v24  ;;  %v4622_v35 = vrot.slane %v565_v32, 9  ;;  %v627_v24 = vrot.slane %v625_v17, 4  ;;  %v5434_v25 = vld [vmem:[%s6979_s1 + $0x1a0] sm:$0xff]  }
  0x35   : > { %2142 = vmatprep.mubr.bf16.mxu1 %v5413_v37  ;;  %5082 = vmatprep.subr.bf16.mxu0 %v5415_v1  ;;  %v471_v30 = vor.u32 %v470_v27, %v466_v26  ;;  %v481_v1 = vrot.slane %v479_v59, 4  ;;  %v377_v32 = vld [vmem:[%s5729_s20 + $0x40] sm:$0xf] }
  0x36   : > { %2061 = vmatprep.mubr.bf16.mxu0 %v4615_v12  ;;  %v462_v37 = vrot.slane %v461_v29, 4  ;;  %v619_v44 = vsel %vm5743_vm4, %v4622_v35, %v618_v40  ;;  %5133 = vmatpush3.bf16.msra.mxu1 %v5426_v52  ;;  %v629_v27 = vsel %vm5743_vm4, %v627_v24, %v628_v18  ;;  %v573_v52 = vld [vmem:[%s5729_s20 + $0x44] sm:$0x1]  ;;  %v5440_v57 = vld [vmem:[%s5729_s20 + $0x3c] sm:$0xff]   ;;  %v4653_v18 = vld [vmem:[%s5729_s20 + $0x14] sm:$0x1] }
  0x37   : > { %v472_v38 = vrot.slane %v471_v30, 4  ;;  %v4628_v53 = vcombine.low %v619_v44, %v622_v50  ;;  %5134 = vmatprep.subr.bf16.mxu1 %v5428_v55  ;;  %v485_v6 = vor.u32 %v484_v2, %v481_v1  ;;  %v5437_v30 = vld [vmem:[%s6979_s1 + $0x1e8] sm:$0xff]   ;;  %v572_v50 = vld [vmem:[%s5729_s20 + $0x40] sm:$0xf]  ;;  %v635_v59 = vrot.slane %v573_v52, 5  ;;  %v5443_v2 = vld [vmem:[%s6979_s1 + $0x138] sm:$0xff]  }
  0x38   : > { %5083 = vmatpush3.bf16.msra.mxu0 %v5417_v7  ;;  %v467_v42 = vsel %vm5752_vm5, %v462_v37, %v466_v26  ;;  %v5435_v26 = vld [vmem:[%s6979_s1 + $0x170] sm:$0xff]   ;;  %v516_v37 = vshrl.u32 %v377_v32, 16  ;;  %v5439_v44 = vld [vmem:[%s6979_s1 + $0x1a8] sm:$0xff]   ;;  %v632_v58 = vrot.slane %v572_v50, 5  ;;  %v4678_v52 = vld [vmem:[%s5729_s20 + $0x18] sm:$0xe] }
  0x39   : > { %5084 = vmatprep.subr.bf16.mxu0 %v5423_v36  ;;  %v477_v43 = vsel %vm5752_vm5, %v472_v38, %v476_v31  ;;  %v486_v11 = vrot.slane %v485_v6, 4  ;;  %v376_v31 = vld [vmem:[%s5729_s20 + $0x3c] sm:$0xf]  ;;  %v512_v36 = vshll.u32 %v377_v32, 16  ;;  %v522_v38 = vshll.u32 %v378_v33, 16 }
  0x3a   : > { %v4616_v48 = vcombine.low %v467_v42, %v477_v43  ;;  %5135 = vmatpush3.bf16.msra.mxu1 %v5431_v9  ;;  %v503_v34 = vshrl.u32 %v376_v31, 16  ;;  %v506_v35 = vshll.u32 %v376_v31, 16  ;;  %v518_v43 = vrot.slane %v516_v37, 4  ;;  %v5445_v6 = vld [vmem:[%s6979_s1 + $0x1f8] sm:$0xff]   ;;  %v4677_v9 = vld [vmem:[%s5729_s20 + $0x14] sm:$0x1] }
  0x3b   : > { %2062 = vmatmul.mubr.bf16.gmra.mrb[8].mxu0 %v5414_v3  ;;  %v490_v3 = vrot.slane %v488_v61, 5  ;;  %5136 = vmatprep.subr.bf16.mxu1 %v5433_v19  ;;  %v514_v42 = vrot.slane %v512_v36, 5  ;;  %v634_v63 = vrot.slane %v632_v58, 4  ;;  %v744_v19 = vshrl.u32 %v4651_v14, 16  ;;  %v4726_v32 = vld [vmem:[%s5729_s20 + $0x1c] sm:$0xf] }
  0x3c   : > { %2143 = vmatmul.mubr.bf16.gmra.mrb[8].mxu1 %v4627_v13  ;;  %5085 = vmatpush3.bf16.msra.mxu0 %v5424_v47  ;;  %v5432_v13 = vld [vmem:[%s5729_s20 + $0x30] sm:$0xff]   ;;  %v505_v40 = vrot.slane %v503_v34, 4  ;;  %v508_v41 = vrot.slane %v506_v35, 5  ;;  %v4727_v34 = vld [vmem:[%s5729_s20 + $0x20] sm:$0x1]  ;;  %v1111_v37 = vshll.u32 %v4726_v32, 16 }
  0x3d   : > { %2150 = vmatprep.mubr.bf16.mxu1 %v5420_v23  ;;  %2069 = vmatprep.mubr.bf16.mxu0 %v4616_v48  ;;  %v495_v7 = vor.u32 %v494_v4, %v490_v3  ;;  %v491_v20 = vsel %vm5752_vm5, %v486_v11, %v490_v3  ;;  %v626_v23 = vsel %vm5743_vm4, %v4623_v16, %v625_v17  ;;  %v524_v48 = vrot.slane %v522_v38, 5  ;;  %v5444_v4 = vld [vmem:[%s6979_s1 + $0x1b0] sm:$0xff]  }
  0x3e   : > { %5086 = vmatprep.subr.bf16.mxu0 %v5427_v54  ;;  %5137 = vmatpush3.bf16.msra.mxu1 %v5434_v25  ;;  %v4629_v29 = vcombine.low %v626_v23, %v629_v27  ;;  %v509_v45 = vor.u32 %v508_v41, %v505_v40  ;;  %v519_v47 = vor.u32 %v518_v43, %v514_v42  ;;  %v5441_v54 = vld [vmem:[%s6979_s1 + $0x178] sm:$0xff]   ;;  %v4652_v17 = vld [vmem:[%s5729_s20 + $0x10] sm:$0xf]  ;;  %v763_v23 = vshll.u32 %v4653_v18, 16 }
  0x3f   : > { %v496_v12 = vrot.slane %v495_v7, 4  ;;  %5138 = vmatprep.subr.bf16.mxu1 %v5437_v30  ;;  %v636_v3 = vsel %vm5743_vm4, %v634_v63, %v635_v59  ;;  %v4675_v7 = vld [vmem:[%s5729_s20 + $0xc] sm:$0xe]  ;;  %v746_v25 = vrot.slane %v744_v19, 4  ;;  %v4725_v27 = vld [vmem:[%s5729_s20 + $0x18] sm:$0xf] }
  0x40   : > { %5087 = vmatpush3.bf16.msra.mxu0 %v5430_v5  ;;  %v510_v55 = vrot.slane %v509_v45, 4  ;;  %v520_v56 = vrot.slane %v519_v47, 4  ;;  %v4693_v10 = vrot.slane %v4675_v7, 9  ;;  %v765_v33 = vrot.slane %v763_v23, 5  ;;  %v4654_v59 = vld [vmem:[%s5729_s20 + $0x18] sm:$0xf] }
  0x41   : > { %v501_v21 = vsel %vm5752_vm5, %v496_v12, %v500_v8  ;;  %5088 = vmatprep.subr.bf16.mxu0 %v5435_v26  ;;  %v4676_v8 = vld [vmem:[%s5729_s20 + $0x10] sm:$0xf]  ;;  %v958_v12 = vrot.slane %v4677_v9, 5  ;;  %v5447_v26 = vld [vmem:[%s6979_s1 + $0x200] sm:$0xff]   ;;  %v1102_v35 = vshrl.u32 %v4725_v27, 16  ;;  %v1105_v36 = vshll.u32 %v4725_v27, 16 }
  0x42   : > { %v4617_v22 = vcombine.low %v491_v20, %v501_v21  ;;  %5139 = vmatpush3.bf16.msra.mxu1 %v5439_v44  ;;  %v515_v60 = vsel %vm5752_vm5, %v510_v55, %v514_v42  ;;  %v525_v61 = vsel %vm5752_vm5, %v520_v56, %v524_v48  ;;  %v955_v11 = vrot.slane %v4676_v8, 5  ;;  %v5449_v63 = vld [vmem:[%s6979_s1 + $0x208] sm:$0xff]   ;;  %v4728_v8 = vld [vmem:[%s5729_s20 + $0x24] sm:$0xf]  ;;  %v5451_v19 = vld [vmem:[%s6979_s1 + $0x210] sm:$0xff]  }
  0x43   : > { %2070 = vmatmul.mubr.bf16.gmra.mrb[12].mxu0 %v5422_v39  ;;  %v5438_v39 = vld [vmem:[%s5729_s20 + $0x48] sm:$0xff]   ;;  %v4618_v1 = vcombine.low %v515_v60, %v525_v61  ;;  %v747_v20 = vshll.u32 %v4651_v14, 16  ;;  %v753_v21 = vshll.u32 %v4652_v17, 16  ;;  %v1115_v40 = vshrl.u32 %v4726_v32, 16  ;;  %v4655_v60 = vld [vmem:[%s5729_s20 + $0x1c] sm:$0xf] }
  0x44   : > { %2151 = vmatmul.mubr.bf16.gmra.mrb[12].mxu1 %v4628_v53  ;;  %2077 = vmatprep.mubr.bf16.mxu0 %v4617_v22  ;;  %v4624_v53 = vrot.slane %v571_v49, 9  ;;  %v956_v15 = vsel %vm5743_vm4, %v4693_v10, %v955_v11  ;;  %v957_v16 = vrot.slane %v955_v11, 4  ;;  %v757_v22 = vshrl.u32 %v4652_v17, 16  ;;  %v4730_v14 = vld [vmem:[%s5729_s20 + $0x2c] sm:$0x1] }
  0x45   : > { %2158 = vmatprep.mubr.bf16.mxu1 %v5429_v0  ;;  %5089 = vmatpush3.bf16.msra.mxu0 %v5436_v28  ;;  %v5442_v0 = vld [vmem:[%s6979_s1 + $0x1f0] sm:$0xff]   ;;  %v755_v30 = vrot.slane %v753_v21, 5  ;;  %v1121_v41 = vshll.u32 %v4727_v34, 16  ;;  %v1104_v42 = vrot.slane %v1102_v35, 4  ;;  %v1107_v43 = vrot.slane %v1105_v36, 5 }
  0x46   : > { %5090 = vmatprep.subr.bf16.mxu0 %v5441_v54  ;;  %v633_v62 = vsel %vm5743_vm4, %v4624_v53, %v632_v58  ;;  %5140 = vmatprep.subr.bf16.mxu1 %v5442_v0  ;;  %v959_v24 = vsel %vm5743_vm4, %v957_v16, %v958_v12  ;;  %v759_v31 = vrot.slane %v757_v22, 4  ;;  %v1113_v44 = vrot.slane %v1111_v37, 5  ;;  %v4679_v53 = vld [vmem:[%s5729_s20 + $0x1c] sm:$0xf]  ;;  %v4680_v54 = vld [vmem:[%s5729_s20 + $0x20] sm:$0x1] }
  0x47   : > { %v4630_v5 = vcombine.low %v633_v62, %v636_v3  ;;  %5141 = vmatpush3.bf16.msra.mxu1 %v5444_v4  ;;  %v4699_v28 = vcombine.low %v956_v15, %v959_v24  ;;  %v1117_v48 = vrot.slane %v1115_v40, 4  ;;  %v1123_v49 = vrot.slane %v1121_v41, 5  ;;  %v5448_v4 = vld [vmem:[%s5729_s20 + $0x18] sm:$0xff]  }
  0x48   : > { %5142 = vmatprep.subr.bf16.mxu1 %v5445_v6  ;;  %v1108_v50 = vor.u32 %v1107_v43, %v1104_v42  ;;  %v4694_v58 = vrot.slane %v4678_v52, 9  ;;  %v962_v0 = vrot.slane %v4679_v53, 5  ;;  %v771_v6 = vshll.u32 %v4654_v59, 16  ;;  %v4657_v43 = vld [vmem:[%s5729_s20 + $0x24] sm:$0xf] }
  0x49   : > { %5091 = vmatpush3.bf16.msra.mxu0 %v5443_v2  ;;  %v4656_v2 = vld [vmem:[%s5729_s20 + $0x20] sm:$0x1]  ;;  %v777_v7 = vshll.u32 %v4655_v60, 16  ;;  %v781_v12 = vshrl.u32 %v4655_v60, 16  ;;  %v1126_v27 = vshrl.u32 %v4728_v8, 16  ;;  %v1145_v37 = vshll.u32 %v4730_v14, 16 }
  0x4a   : > { %5282 = vmatprep.subr.bf16.mxu0 %v5447_v26  ;;  %v1109_v62 = vrot.slane %v1108_v50, 4  ;;  %v963_v10 = vsel %vm5743_vm4, %v4694_v58, %v962_v0  ;;  %v964_v11 = vrot.slane %v962_v0, 4  ;;  %v773_v17 = vrot.slane %v771_v6, 5  ;;  %v5453_v50 = vld [vmem:[%s6979_s1 + $0x218] sm:$0xff]   ;;  %v5450_v0 = vld [vmem:[%s5729_s20 + $0x24] sm:$0xff]  }
  0x4b   : > { %2078 = vmatmul.mubr.bf16.gmra.mrb[16].mxu0 %v5432_v13  ;;  %v5446_v13 = vld [vmem:[%s6979_s1 + $0x1b8] sm:$0xff]   ;;  %v779_v18 = vrot.slane %v777_v7, 5  ;;  %v783_v22 = vrot.slane %v781_v12, 4  ;;  %v787_v23 = vshll.u32 %v4656_v2, 16  ;;  %v1128_v35 = vrot.slane %v1126_v27, 4 }
  0x4c   : > { %2159 = vmatmul.mubr.bf16.gmra.mrb[16].mxu1 %v4629_v29  ;;  %2085 = vmatprep.mubr.bf16.mxu0 %v4618_v1  ;;  %v749_v29 = vrot.slane %v747_v20, 5  ;;  %v965_v1 = vrot.slane %v4680_v54, 5  ;;  %v1114_v9 = vsel %vm5752_vm5, %v1109_v62, %v1113_v44  ;;  %v4732_v62 = vld [vmem:[%s5729_s20 + $0x34] sm:$0xf]  ;;  %v795_v2 = vshll.u32 %v4657_v43, 16 }
  0x4d   : > { %2166 = vmatprep.mubr.bf16.mxu1 %v5438_v39  ;;  %5143 = vmatpush3.bf16.msra.mxu1 %v5446_v13  ;;  %v760_v39 = vor.u32 %v759_v31, %v755_v30  ;;  %v4729_v13 = vld [vmem:[%s5729_s20 + $0x28] sm:$0xf]  ;;  %v4733_v12 = vld [vmem:[%s5729_s20 + $0x38] sm:$0x1] }
  0x4e   : > { %v750_v38 = vor.u32 %v749_v29, %v746_v25  ;;  %v966_v21 = vsel %vm5743_vm4, %v964_v11, %v965_v1  ;;  %v784_v29 = vor.u32 %v783_v22, %v779_v18  ;;  %v1135_v31 = vshll.u32 %v4729_v13, 16 }
  0x4f   : > { %v761_v47 = vrot.slane %v760_v39, 4  ;;  %v4700_v24 = vcombine.low %v963_v10, %v966_v21  ;;  %v1139_v32 = vshrl.u32 %v4729_v13, 16  ;;  %v797_v10 = vrot.slane %v795_v2, 5  ;;  %v4684_v13 = vld [vmem:[%s5729_s20 + $0x30] sm:$0xe] }
  0x50   : > { %v751_v45 = vrot.slane %v750_v38, 4  ;;  %v4683_v38 = vld [vmem:[%s5729_s20 + $0x2c] sm:$0x1]  ;;  %v785_v39 = vrot.slane %v784_v29, 4  ;;  %v1137_v40 = vrot.slane %v1135_v31, 5  ;;  %v1159_v22 = vshll.u32 %v4732_v62, 16 }
  0x51   : > { %v766_v56 = vsel %vm5752_vm5, %v761_v47, %v765_v33  ;;  %v4682_v33 = vld [vmem:[%s5729_s20 + $0x28] sm:$0xf]  ;;  %v1141_v41 = vrot.slane %v1139_v32, 4  ;;  %v1147_v47 = vrot.slane %v1145_v37, 5  ;;  %v972_v54 = vrot.slane %v4683_v38, 5 }
  0x52   : > { %v756_v55 = vsel %vm5752_vm5, %v751_v45, %v755_v30  ;;  %v789_v30 = vrot.slane %v787_v23, 5  ;;  %v1163_v23 = vshrl.u32 %v4732_v62, 16  ;;  %v4660_v29 = vld [vmem:[%s5729_s20 + $0x30] sm:$0xf] }
  0x53   : > { %2086 = vmatmul.mubr.bf16.gmra.mrb[20].mxu0 %v5440_v57  ;;  %v1118_v57 = vor.u32 %v1117_v48, %v1113_v44  ;;  %v4669_v61 = vcombine.low %v756_v55, %v766_v56  ;;  %v969_v48 = vrot.slane %v4682_v33, 5  ;;  %v1142_v53 = vor.u32 %v1141_v41, %v1137_v40  ;;  %v4659_v55 = vld [vmem:[%s5729_s20 + $0x2c] sm:$0x1] }
  0x54   : > { %2167 = vmatmul.mubr.bf16.gmra.mrb[20].mxu1 %v4630_v5  ;;  %2207 = vmatprep.mubr.bf16.mxu0 %v4699_v28  ;;  %v768_v5 = vshrl.u32 %v4654_v59, 16  ;;  %v4681_v28 = vld [vmem:[%s5729_s20 + $0x24] sm:$0xe]  ;;  %v790_v52 = vsel %vm5752_vm5, %v785_v39, %v789_v30  ;;  %v792_v56 = vshrl.u32 %v4657_v43, 16  ;;  %v811_v7 = vshll.u32 %v4659_v55, 16  ;;  %v5456_v30 = vld [vmem:[%s6979_s1 + $0x228] sm:$0xff]  }
  0x55   : > { %v1119_v3 = vrot.slane %v1118_v57, 4  ;;  %v4695_v42 = vrot.slane %v4681_v28, 9  ;;  %v4731_v57 = vld [vmem:[%s5729_s20 + $0x30] sm:$0xf]  ;;  %v4696_v28 = vrot.slane %v4684_v13, 9  ;;  %v1161_v33 = vrot.slane %v1159_v22, 5 }
  0x56   : > { %v770_v16 = vrot.slane %v768_v5, 4  ;;  %v794_v1 = vrot.slane %v792_v56, 4  ;;  %v1153_v21 = vshll.u32 %v4731_v57, 16  ;;  %v4662_v43 = vld [vmem:[%s5729_s20 + $0x38] sm:$0x1] }
  0x57   : > { %v1124_v15 = vsel %vm5752_vm5, %v1119_v3, %v1123_v49  ;;  %v4658_v49 = vld [vmem:[%s5729_s20 + $0x28] sm:$0xf]  ;;  %v970_v60 = vsel %vm5743_vm4, %v4695_v42, %v969_v48 }
  0x58   : > { %v4743_v20 = vcombine.low %v1114_v9, %v1124_v15  ;;  %v774_v25 = vor.u32 %v773_v17, %v770_v16  ;;  %v801_v3 = vshll.u32 %v4658_v49, 16  ;;  %v805_v6 = vshrl.u32 %v4658_v49, 16 }
  0x59   : > { %v813_v16 = vrot.slane %v811_v7, 5  ;;  %v1150_v17 = vshrl.u32 %v4731_v57, 16  ;;  %v1155_v32 = vrot.slane %v1153_v21, 5  ;;  %v819_v49 = vshll.u32 %v4660_v29, 16  ;;  %v4736_v57 = vld [vmem:[%s5729_s20 + $0x44] sm:$0x1] }
  0x5a   : > { %2288 = vmatprep.mubr.bf16.mxu1 %v4743_v20  ;;  %v775_v34 = vrot.slane %v774_v25, 4  ;;  %v803_v11 = vrot.slane %v801_v3, 5  ;;  %v807_v15 = vrot.slane %v805_v6, 4  ;;  %v798_v20 = vor.u32 %v797_v10, %v794_v1  ;;  %v4688_v10 = vld [vmem:[%s5729_s20 + $0x40] sm:$0xf] }
  0x5b   : > { %2208 = vmatmul.mubr.bf16.vlgmr.msra.gmra.mrb[24].mxu0 %v4669_v61  ;;  %v971_v61 = vrot.slane %v969_v48, 4  ;;  %v1152_v27 = vrot.slane %v1150_v17, 4  ;;  %v835_v3 = vshll.u32 %v4662_v43, 16 }
  0x5c   : > { %5283 = vmatpush3.bf16.msra.mxu0 %v5447_v26  ;;  %v1129_v26 = vshll.u32 %v4728_v8, 16  ;;  %2289 = vmatmul.mubr.bf16.vlgmr.msra.gmra.mrb[24].mxu1 %v5448_v4  ;;  %v780_v44 = vsel %vm5752_vm5, %v775_v34, %v779_v18  ;;  %v4685_v18 = vld [vmem:[%s5729_s20 + $0x34] sm:$0xf]  ;;  %v808_v25 = vor.u32 %v807_v15, %v803_v11  ;;  %v799_v31 = vrot.slane %v798_v20, 4  ;;  %v4689_v15 = vld [vmem:[%s5729_s20 + $0x44] sm:$0x1] }
  0x5d   : > { %5284 = vmatprep.subr.bf16.mxu0 %v5449_v63  ;;  %2215 = vmatprep.mubr.bf16.mxu0 %v4700_v24  ;;  %v4670_v58 = vcombine.low %v780_v44, %v790_v52  ;;  %v973_v5 = vsel %vm5743_vm4, %v971_v61, %v972_v54  ;;  %v4686_v24 = vld [vmem:[%s5729_s20 + $0x38] sm:$0x1]  ;;  %v1165_v34 = vrot.slane %v1163_v23, 4  ;;  %v976_v38 = vrot.slane %v4685_v18, 5  ;;  %v4735_v52 = vld [vmem:[%s5729_s20 + $0x40] sm:$0xf] }
  0x5e   : > { %v1131_v36 = vrot.slane %v1129_v26, 5  ;;  %v4701_v9 = vcombine.low %v970_v60, %v973_v5  ;;  %v1169_v26 = vshll.u32 %v4733_v12, 16  ;;  %v979_v39 = vrot.slane %v4686_v24, 5  ;;  %v4663_v20 = vld [vmem:[%s5729_s20 + $0x3c] sm:$0xf] }
  0x5f   : > { %v1156_v41 = vor.u32 %v1155_v32, %v1152_v27  ;;  %v1166_v42 = vor.u32 %v1165_v34, %v1161_v33  ;;  %v816_v44 = vshrl.u32 %v4660_v29, 16  ;;  %v978_v48 = vrot.slane %v976_v38, 4 }
  0x60   : > { %5285 = vmatpush3.bf16.msra.mxu0 %v5449_v63  ;;  %v1132_v45 = vor.u32 %v1131_v36, %v1128_v35  ;;  %v1143_v63 = vrot.slane %v1142_v53, 4  ;;  %v4661_v35 = vld [vmem:[%s5729_s20 + $0x34] sm:$0xf]  ;;  %v809_v36 = vrot.slane %v808_v25, 4  ;;  %v1171_v37 = vrot.slane %v1169_v26, 5 }
  0x61   : > { %5286 = vmatprep.subr.bf16.mxu0 %v5451_v19  ;;  %v1157_v54 = vrot.slane %v1156_v41, 4  ;;  %v1167_v55 = vrot.slane %v1166_v42, 4  ;;  %v818_v56 = vrot.slane %v816_v44, 4  ;;  %v980_v60 = vsel %vm5743_vm4, %v978_v48, %v979_v39  ;;  %v4664_v25 = vld [vmem:[%s5729_s20 + $0x40] sm:$0xf] }
  0x62   : > { %v1133_v59 = vrot.slane %v1132_v45, 4  ;;  %v1148_v8 = vsel %vm5752_vm5, %v1143_v63, %v1147_v47  ;;  %v814_v45 = vsel %vm5752_vm5, %v809_v36, %v813_v16  ;;  %v977_v47 = vsel %vm5743_vm4, %v4696_v28, %v976_v38  ;;  %v4665_v36 = vld [vmem:[%s5729_s20 + $0x44] sm:$0x1]  ;;  %v4737_v39 = vld [vmem:[%s5729_s20 + $0x48] sm:$0xf] }
  0x63   : > { %2216 = vmatmul.mubr.bf16.gmra.mrb[28].mxu0 %v4670_v58  ;;  %v5458_v58 = vld [vmem:[%s6979_s1 + $0x230] sm:$0xff]   ;;  %v821_v61 = vrot.slane %v819_v49, 5  ;;  %v825_v62 = vshll.u32 %v4661_v35, 16  ;;  %v829_v63 = vshrl.u32 %v4661_v35, 16  ;;  %v1172_v1 = vsel %vm5752_vm5, %v1167_v55, %v1171_v37 }
  0x64   : > { %5287 = vmatpush3.bf16.msra.mxu0 %v5451_v19  ;;  %v1138_v4 = vsel %vm5752_vm5, %v1133_v59, %v1137_v40  ;;  %v5454_v19 = vld [vmem:[%s6979_s1 + $0x220] sm:$0xff]   ;;  %2223 = vmatprep.mubr.bf16.mxu0 %v4701_v9  ;;  %v804_v40 = vsel %vm5752_vm5, %v799_v31, %v803_v11  ;;  %v5452_v59 = vld [vmem:[%s5729_s20 + $0x30] sm:$0xff]   ;;  %v4702_v2 = vcombine.low %v977_v47, %v980_v60  ;;  %v4687_v9 = vld [vmem:[%s5729_s20 + $0x3c] sm:$0xe]  ;;  %v837_v11 = vrot.slane %v835_v3, 5 }
  0x65   : > { %5288 = vmatprep.subr.bf16.mxu0 %v5453_v50  ;;  %v4744_v14 = vcombine.low %v1138_v4, %v1148_v8  ;;  %v4671_v53 = vcombine.low %v804_v40, %v814_v45  ;;  %v5460_v4 = vld [vmem:[%s6979_s1 + $0x238] sm:$0xff]   ;;  %v822_v6 = vor.u32 %v821_v61, %v818_v56  ;;  %v827_v7 = vrot.slane %v825_v62, 5  ;;  %v4690_v61 = vld [vmem:[%s5729_s20 + $0x48] sm:$0xe] }
  0x66   : > { %v831_v8 = vrot.slane %v829_v63, 4  ;;  %v1187_v18 = vshrl.u32 %v4735_v52, 16  ;;  %v4697_v24 = vrot.slane %v4687_v9, 9  ;;  %v983_v31 = vrot.slane %v4688_v10, 5  ;;  %v5455_v56 = vld [vmem:[%s5729_s20 + $0x3c] sm:$0xff]  }
  0x67   : > { %2296 = vmatprep.mubr.bf16.mxu1 %v4744_v14  ;;  %v1183_v14 = vshll.u32 %v4735_v52, 16  ;;  %v823_v16 = vrot.slane %v822_v6, 4  ;;  %v986_v32 = vrot.slane %v4689_v15, 5  ;;  %v843_v37 = vshll.u32 %v4663_v20, 16 }
  0x68   : > { %5289 = vmatpush3.bf16.msra.mxu0 %v5453_v50  ;;  %2297 = vmatmul.mubr.bf16.gmra.mrb[28].mxu1 %v5450_v0  ;;  %v4734_v50 = vld [vmem:[%s5729_s20 + $0x3c] sm:$0xf]  ;;  %v1162_v0 = vsel %vm5752_vm5, %v1157_v54, %v1161_v33  ;;  %v832_v17 = vor.u32 %v831_v8, %v827_v7  ;;  %v1189_v28 = vrot.slane %v1187_v18, 4  ;;  %v840_v33 = vshrl.u32 %v4663_v20, 16  ;;  %v4738_v54 = vld [vmem:[%s5729_s20 + $0x4c] sm:$0xf] }
  0x69   : > { %5290 = vmatprep.subr.bf16.mxu0 %v5454_v19  ;;  %v4745_v5 = vcombine.low %v1162_v0, %v1172_v1  ;;  %v1174_v12 = vshrl.u32 %v4734_v50, 16  ;;  %v1177_v13 = vshll.u32 %v4734_v50, 16  ;;  %v1185_v23 = vrot.slane %v1183_v14, 5 }
  0x6a   : > { %v828_v27 = vsel %vm5752_vm5, %v823_v16, %v827_v7  ;;  %v833_v26 = vrot.slane %v832_v17, 4  ;;  %v849_v38 = vshll.u32 %v4664_v25, 16  ;;  %v984_v42 = vsel %vm5743_vm4, %v4697_v24, %v983_v31  ;;  %v4692_v7 = vld [vmem:[%s5729_s20 + $0x50] sm:$0x1]  ;;  %v4667_v17 = vld [vmem:[%s5729_s20 + $0x4c] sm:$0xf] }
  0x6b   : > { %2224 = vmatmul.mubr.bf16.gmra.mrb[32].mxu0 %v4671_v53  ;;  %2304 = vmatprep.mubr.bf16.mxu1 %v4745_v5  ;;  %v1176_v21 = vrot.slane %v1174_v12, 4  ;;  %v1179_v22 = vrot.slane %v1177_v13, 5  ;;  %v1190_v35 = vor.u32 %v1189_v28, %v1185_v23  ;;  %v985_v43 = vrot.slane %v983_v31, 4  ;;  %v4666_v12 = vld [vmem:[%s5729_s20 + $0x48] sm:$0xf] }
  0x6c   : > { %5291 = vmatpush3.bf16.msra.mxu0 %v5454_v19  ;;  %2231 = vmatprep.mubr.bf16.mxu0 %v4702_v2  ;;  %v1193_v19 = vshll.u32 %v4736_v57, 16  ;;  %v838_v34 = vsel %vm5752_vm5, %v833_v26, %v837_v11  ;;  %v842_v45 = vrot.slane %v840_v33, 4  ;;  %v845_v47 = vrot.slane %v843_v37, 5  ;;  %v4691_v2 = vld [vmem:[%s5729_s20 + $0x4c] sm:$0xf] }
  0x6d   : > { %5292 = vmatprep.subr.bf16.mxu0 %v5456_v30  ;;  %v4672_v40 = vcombine.low %v828_v27, %v838_v34  ;;  %v1191_v44 = vrot.slane %v1190_v35, 4  ;;  %v851_v48 = vrot.slane %v849_v38, 5  ;;  %v987_v50 = vsel %vm5743_vm4, %v985_v43, %v986_v32  ;;  %v4741_v28 = vld [vmem:[%s5729_s20 + $0x58] sm:$0xf] }
  0x6e   : > { %v1195_v29 = vrot.slane %v1193_v19, 5  ;;  %v853_v52 = vshrl.u32 %v4664_v25, 16  ;;  %v859_v53 = vshll.u32 %v4665_v36, 16  ;;  %v4703_v57 = vcombine.low %v984_v42, %v987_v50  ;;  %v5457_v42 = vld [vmem:[%s5729_s20 + $0x48] sm:$0xff]  }
  0x6f   : > { %v1198_v60 = vshrl.u32 %v4737_v39, 16  ;;  %v1201_v1 = vshll.u32 %v4737_v39, 16  ;;  %v1207_v5 = vshll.u32 %v4738_v54, 16  ;;  %v1211_v6 = vshrl.u32 %v4738_v54, 16  ;;  %v4750_v54 = vld [vmem:[%s5729_s20 + $0x1c] sm:$0xf] }
  0x70   : > { %5293 = vmatpush3.bf16.msra.mxu0 %v5456_v30  ;;  %2305 = vmatmul.mubr.bf16.gmra.mrb[32].mxu1 %v5452_v59  ;;  %v1180_v30 = vor.u32 %v1179_v22, %v1176_v21  ;;  %v1196_v55 = vsel %vm5752_vm5, %v1191_v44, %v1195_v29  ;;  %v4739_v59 = vld [vmem:[%s5729_s20 + $0x50] sm:$0x1]  ;;  %v855_v63 = vrot.slane %v853_v52, 4  ;;  %v861_v0 = vrot.slane %v859_v53, 5  ;;  %v4749_v53 = vld [vmem:[%s5729_s20 + $0x18] sm:$0xe] }
  0x71   : > { %5294 = vmatprep.subr.bf16.mxu0 %v5458_v58  ;;  %v1203_v9 = vrot.slane %v1201_v1, 5  ;;  %v1217_v10 = vshll.u32 %v4739_v59, 16  ;;  %v4698_v11 = vrot.slane %v4690_v61, 9  ;;  %v1209_v14 = vrot.slane %v1207_v5, 5  ;;  %v4668_v22 = vld [vmem:[%s5729_s20 + $0x50] sm:$0x1] }
  0x72   : > { %v1181_v41 = vrot.slane %v1180_v30, 4  ;;  %v856_v8 = vor.u32 %v855_v63, %v851_v48  ;;  %v1213_v15 = vrot.slane %v1211_v6, 4  ;;  %v990_v16 = vrot.slane %v4691_v2, 5  ;;  %v4751_v59 = vld [vmem:[%s5729_s20 + $0x20] sm:$0x1] }
  0x73   : > { %2232 = vmatmul.mubr.bf16.gmra.mrb[36].mxu0 %v4672_v40  ;;  %v1219_v20 = vrot.slane %v1217_v10, 5  ;;  %v993_v21 = vrot.slane %v4692_v7, 5  ;;  %v864_v26 = vshrl.u32 %v4666_v12, 16  ;;  %v867_v31 = vshll.u32 %v4666_v12, 16  ;;  %v4753_v5 = vld [vmem:[%s5729_s20 + $0x28] sm:$0xf] }
  0x74   : > { %5295 = vmatpush3.bf16.msra.mxu0 %v5458_v58  ;;  %v1186_v49 = vsel %vm5752_vm5, %v1181_v41, %v1185_v23  ;;  %v846_v58 = vor.u32 %v845_v47, %v842_v45  ;;  %2239 = vmatprep.mubr.bf16.mxu0 %v4703_v57  ;;  %v857_v18 = vrot.slane %v856_v8, 4  ;;  %v4740_v23 = vld [vmem:[%s5729_s20 + $0x54] sm:$0xf]  ;;  %v1214_v24 = vor.u32 %v1213_v15, %v1209_v14  ;;  %v4742_v45 = vld [vmem:[%s5729_s20 + $0x5c] sm:$0x1] }
  0x75   : > { %5296 = vmatprep.subr.bf16.mxu0 %v5460_v4  ;;  %v4746_v62 = vcombine.low %v1186_v49, %v1196_v55  ;;  %v991_v25 = vsel %vm5743_vm4, %v4698_v11, %v990_v16  ;;  %v992_v27 = vrot.slane %v990_v16, 4  ;;  %v873_v32 = vshll.u32 %v4667_v17, 16  ;;  %v4754_v10 = vld [vmem:[%s5729_s20 + $0x2c] sm:$0x1]  ;;  %v4755_v15 = vld [vmem:[%s5729_s20 + $0x30] sm:$0xe] }
  0x76   : > { %v847_v3 = vrot.slane %v846_v58, 4  ;;  %v862_v29 = vsel %vm5752_vm5, %v857_v18, %v861_v0  ;;  %v1215_v34 = vrot.slane %v1214_v24, 4  ;;  %v866_v36 = vrot.slane %v864_v26, 4  ;;  %v4752_v0 = vld [vmem:[%s5729_s20 + $0x24] sm:$0xe] }
  0x77   : > { %2312 = vmatprep.mubr.bf16.mxu1 %v4746_v62  ;;  %v994_v35 = vsel %vm5743_vm4, %v992_v27, %v993_v21  ;;  %v869_v39 = vrot.slane %v867_v31, 5  ;;  %v875_v40 = vrot.slane %v873_v32, 5  ;;  %v877_v43 = vshrl.u32 %v4667_v17, 16  ;;  %v4756_v16 = vld [vmem:[%s5729_s20 + $0x34] sm:$0xf] }
  0x78   : > { %5297 = vmatpush3.bf16.msra.mxu0 %v5460_v4  ;;  %v1200_v4 = vrot.slane %v1198_v60, 4  ;;  %2313 = vmatmul.mubr.bf16.gmra.mrb[36].mxu1 %v5455_v56  ;;  %v852_v13 = vsel %vm5752_vm5, %v847_v3, %v851_v48  ;;  %v4704_v38 = vcombine.low %v991_v25, %v994_v35  ;;  %v1220_v41 = vsel %vm5752_vm5, %v1215_v34, %v1219_v20  ;;  %v4757_v20 = vld [vmem:[%s5729_s20 + $0x38] sm:$0x1]  ;;  %v4762_v35 = vld [vmem:[%s5729_s20 + $0x4c] sm:$0xf] }
  0x79   : > { %v4673_v33 = vcombine.low %v852_v13, %v862_v29  ;;  %v883_v44 = vshll.u32 %v4668_v22, 16  ;;  %v1222_v47 = vshrl.u32 %v4740_v23, 16  ;;  %v870_v49 = vor.u32 %v869_v39, %v866_v36  ;;  %v4759_v29 = vld [vmem:[%s5729_s20 + $0x40] sm:$0xf]  ;;  %v5459_v31 = vld [vmem:[%s5729_s20 + $0x54] sm:$0xff]  }
  0x7a   : > { %v1204_v19 = vor.u32 %v1203_v9, %v1200_v4  ;;  %v1225_v50 = vshll.u32 %v4740_v23, 16  ;;  %v1231_v52 = vshll.u32 %v4741_v28, 16  ;;  %v879_v55 = vrot.slane %v877_v43, 4  ;;  %v4760_v43 = vld [vmem:[%s5729_s20 + $0x44] sm:$0x1] }
  0x7b   : > { %2240 = vmatmul.mubr.bf16.gmra.mrb[40].mxu0 %v4673_v33  ;;  %v885_v56 = vrot.slane %v883_v44, 5  ;;  %v1224_v57 = vrot.slane %v1222_v47, 4  ;;  %v1235_v58 = vshrl.u32 %v4741_v28, 16  ;;  %v871_v60 = vrot.slane %v870_v49, 4  ;;  %v4761_v47 = vld [vmem:[%s5729_s20 + $0x48] sm:$0xe] }
  0x7c   : > { %v1205_v30 = vrot.slane %v1204_v19, 4  ;;  %2247 = vmatprep.mubr.bf16.mxu0 %v4704_v38  ;;  %v1227_v61 = vrot.slane %v1225_v50, 5  ;;  %v1233_v62 = vrot.slane %v1231_v52, 5  ;;  %v1241_v63 = vshll.u32 %v4742_v45, 16 }
  0x7d   : > { %v880_v1 = vor.u32 %v879_v55, %v875_v40  ;;  %v1237_v2 = vrot.slane %v1235_v58, 4  ;;  %v4767_v3 = vrot.slane %v4749_v53, 9  ;;  %v1313_v4 = vrot.slane %v4750_v54, 5  ;;  %v4765_v58 = vld [vmem:[%s5729_s20 + $0x58] sm:$0xf] }
  0x7e   : > { %v1210_v37 = vsel %vm5752_vm5, %v1205_v30, %v1209_v14  ;;  %v876_v6 = vsel %vm5752_vm5, %v871_v60, %v875_v40  ;;  %v1228_v7 = vor.u32 %v1227_v61, %v1224_v57  ;;  %v1243_v8 = vrot.slane %v1241_v63, 5 }
  0x7f   : > { %v4747_v48 = vcombine.low %v1210_v37, %v1220_v41  ;;  %v1316_v9 = vrot.slane %v4751_v59, 5  ;;  %v881_v11 = vrot.slane %v880_v1, 4  ;;  %v1238_v12 = vor.u32 %v1237_v2, %v1233_v62  ;;  %v4766_v1 = vld [vmem:[%s5729_s20 + $0x5c] sm:$0x1] }
  0x80   : > { %v1314_v13 = vsel %vm5743_vm4, %v4767_v3, %v1313_v4  ;;  %v1315_v14 = vrot.slane %v1313_v4, 4  ;;  %v1229_v17 = vrot.slane %v1228_v7, 4  ;;  %v4768_v18 = vrot.slane %v4752_v0, 9  ;;  %v4764_v0 = vld [vmem:[%s5729_s20 + $0x54] sm:$0xe] }
  0x81   : > { %2320 = vmatprep.mubr.bf16.mxu1 %v4747_v48  ;;  %v1320_v19 = vrot.slane %v4753_v5, 5  ;;  %v886_v21 = vsel %vm5752_vm5, %v881_v11, %v885_v56  ;;  %v1239_v22 = vrot.slane %v1238_v12, 4  ;;  %v1323_v24 = vrot.slane %v4754_v10, 5  ;;  %v4763_v48 = vld [vmem:[%s5729_s20 + $0x50] sm:$0x1] }
  0x82   : > { %2321 = vmatmul.mubr.bf16.gmra.mrb[40].mxu1 %v5457_v42  ;;  %v1317_v23 = vsel %vm5743_vm4, %v1315_v14, %v1316_v9  ;;  %v4674_v25 = vcombine.low %v876_v6, %v886_v21  ;;  %v1234_v27 = vsel %vm5752_vm5, %v1229_v17, %v1233_v62  ;;  %v4769_v28 = vrot.slane %v4755_v15, 9  ;;  %v4758_v42 = vld [vmem:[%s5729_s20 + $0x3c] sm:$0xe] }
  0x83   : > { %v4773_v26 = vcombine.low %v1314_v13, %v1317_v23  ;;  %v1244_v30 = vsel %vm5752_vm5, %v1239_v22, %v1243_v8  ;;  %v1322_v32 = vrot.slane %v1320_v19, 4  ;;  %v1327_v33 = vrot.slane %v4756_v16, 5 }
  0x84   : > { %v1330_v34 = vrot.slane %v4757_v20, 5  ;;  %2248 = vmatmul.mubr.bf16.gmra.mrb[44].mxu0 %v4674_v25  ;;  %v4748_v36 = vcombine.low %v1234_v27, %v1244_v30  ;;  %v1321_v37 = vsel %vm5743_vm4, %v4768_v18, %v1320_v19  ;;  %v1334_v40 = vrot.slane %v4759_v29, 5 }
  0x85   : > { %5298 = vmatprep.mubr.bf16.mxu0 %v4773_v26  ;;  %v1324_v38 = vsel %vm5743_vm4, %v1322_v32, %v1323_v24  ;;  %v1329_v39 = vrot.slane %v1327_v33, 4  ;;  %v1328_v41 = vsel %vm5743_vm4, %v4769_v28, %v1327_v33  ;;  %v1341_v44 = vrot.slane %v4762_v35, 5 }
  0x86   : > { %2328 = vmatprep.mubr.bf16.mxu1 %v4748_v36  ;;  %v4774_v49 = vcombine.low %v1321_v37, %v1324_v38  ;;  %v4770_v52 = vrot.slane %v4758_v42, 9  ;;  %v1336_v53 = vrot.slane %v1334_v40, 4  ;;  %v1337_v54 = vrot.slane %v4760_v43, 5 }
  0x87   : > { %v1331_v45 = vsel %vm5743_vm4, %v1329_v39, %v1330_v34  ;;  %v4771_v55 = vrot.slane %v4761_v47, 9  ;;  %v1343_v56 = vrot.slane %v1341_v44, 4  ;;  %v1344_v57 = vrot.slane %v4763_v48, 5 }
  0x88   : > { %v4775_v50 = vcombine.low %v1328_v41, %v1331_v45  ;;  %v1335_v59 = vsel %vm5743_vm4, %v4770_v52, %v1334_v40  ;;  %v1338_v60 = vsel %vm5743_vm4, %v1336_v53, %v1337_v54  ;;  %v1348_v61 = vrot.slane %v4765_v58, 5 }
  0x89   : > { %v1342_v62 = vsel %vm5743_vm4, %v4771_v55, %v1341_v44  ;;  %v1345_v63 = vsel %vm5743_vm4, %v1343_v56, %v1344_v57  ;;  %v4776_v2 = vcombine.low %v1335_v59, %v1338_v60  ;;  %v4772_v4 = vrot.slane %v4764_v0, 9 }
  0x8a   : > { %2329 = vmatmul.mubr.bf16.gmra.mrb[44].mxu1 %v5459_v31  ;;  %v4777_v3 = vcombine.low %v1342_v62, %v1345_v63  ;;  %v1350_v5 = vrot.slane %v1348_v61, 4  ;;  %v1351_v6 = vrot.slane %v4766_v1, 5 }
  0x8b   : > { %v1349_v7 = vsel %vm5743_vm4, %v4772_v4, %v1348_v61 }
  0x8c   : > { %5299 = vmatmul.mubr.bf16.vlgmr.msra.gmra.mrb[48].mxu0 %v4774_v49  ;;  %v1352_v8 = vsel %vm5743_vm4, %v1350_v5, %v1351_v6 }
  0x8d   : > { %5302 = vmatprep.mubr.bf16.mxu0 %v4775_v50  ;;  %v4778_v9 = vcombine.low %v1349_v7, %v1352_v8 }
  0x94   : > { %5303 = vmatmul.mubr.bf16.gmra.mrb[52].mxu0 %v4776_v2 }
  0x95   : > { %5306 = vmatprep.mubr.bf16.mxu0 %v4777_v3 }
  0x9c   : > { %5307 = vmatmul.mubr.bf16.gmra.mrb[56].mxu0 %v4778_v9 }
  0xfe   : > { %v4988_v11 = vpop.f32.mrb[0].mxu0 }
  0xff   : > { %v5040_v10 = vpop.f32.mrb[0].mxu1  ;;  %v4989_v13 = vpop.f32.mrb[1].mxu0 }
 0x100   : > { %v5041_v12 = vpop.f32.mrb[1].mxu1  ;;  %v4990_v16 = vadd.f32 %v4989_v13, %v4988_v11  ;;  %v4991_v17 = vpop.f32.mrb[2].mxu0 }
 0x101   : > { %v5042_v14 = vadd.f32 %v5041_v12, %v5040_v10  ;;  %v5043_v15 = vpop.f32.mrb[2].mxu1  ;;  %v4992_v19 = vpop.f32.mrb[3].mxu0 }
 0x102   : > { %v5044_v18 = vpop.f32.mrb[3].mxu1  ;;  %v4993_v22 = vadd.f32 %v4992_v19, %v4991_v17 }
 0x103   : > { %v5045_v20 = vadd.f32 %v5044_v18, %v5043_v15  ;;  %v6139_v21 = vadd.f32 %v5042_v14, %v4990_v16 }
 0x105   : > { %v6141_v23 = vadd.f32 %v5045_v20, %v4993_v22 }
 0x106   : > { %v4994_v24 = vpop.f32.mrb[4].mxu0 }
 0x107   : > { %v5046_v25 = vpop.f32.mrb[4].mxu1  ;;  %v4995_v27 = vpop.f32.mrb[5].mxu0 }
 0x108   : > { %v5047_v26 = vpop.f32.mrb[5].mxu1  ;;  %v4996_v28 = vadd.f32 %v4995_v27, %v4994_v24  ;;  %v4997_v30 = vpop.f32.mrb[6].mxu0 }
 0x109   : > { %v5048_v29 = vadd.f32 %v5047_v26, %v5046_v25  ;;  %v5049_v31 = vpop.f32.mrb[6].mxu1  ;;  %v4998_v32 = vpop.f32.mrb[7].mxu0 }
 0x10a   : > { %v5050_v33 = vpop.f32.mrb[7].mxu1  ;;  %v4999_v35 = vadd.f32 %v4998_v32, %v4997_v30 }
 0x10b   : > { %v6143_v34 = vadd.f32 %v5048_v29, %v4996_v28  ;;  %v5051_v36 = vadd.f32 %v5050_v33, %v5049_v31 }
 0x10d   : > { %v6145_v37 = vadd.f32 %v5051_v36, %v4999_v35 }
 0x10e   : > { %v5000_v39 = vpop.f32.mrb[8].mxu0 }
 0x10f   : > { %v5052_v38 = vpop.f32.mrb[8].mxu1  ;;  %v5001_v41 = vpop.f32.mrb[9].mxu0 }
 0x110   : > { %v5053_v40 = vpop.f32.mrb[9].mxu1  ;;  %v5002_v44 = vadd.f32 %v5001_v41, %v5000_v39  ;;  %v5003_v45 = vpop.f32.mrb[10].mxu0 }
 0x111   : > { %v5054_v42 = vadd.f32 %v5053_v40, %v5052_v38  ;;  %v5055_v43 = vpop.f32.mrb[10].mxu1  ;;  %v5004_v48 = vpop.f32.mrb[11].mxu0 }
 0x112   : > { %v5056_v47 = vpop.f32.mrb[11].mxu1  ;;  %v5005_v52 = vadd.f32 %v5004_v48, %v5003_v45 }
 0x113   : > { %v5057_v49 = vadd.f32 %v5056_v47, %v5055_v43  ;;  %v6147_v50 = vadd.f32 %v5054_v42, %v5002_v44 }
 0x115   : > { %v6149_v53 = vadd.f32 %v5057_v49, %v5005_v52 }
 0x116   : > { %v5006_v54 = vpop.f32.mrb[12].mxu0 }
 0x117   : > { %v5058_v55 = vpop.f32.mrb[12].mxu1  ;;  %v5007_v56 = vpop.f32.mrb[13].mxu0 }
 0x118   : > { %v5008_v57 = vadd.f32 %v5007_v56, %v5006_v54  ;;  %v5059_v58 = vpop.f32.mrb[13].mxu1  ;;  %v5009_v59 = vpop.f32.mrb[14].mxu0 }
 0x119   : > { %v5060_v60 = vadd.f32 %v5059_v58, %v5058_v55  ;;  %v5061_v61 = vpop.f32.mrb[14].mxu1  ;;  %v5010_v62 = vpop.f32.mrb[15].mxu0 }
 0x11a   : > { %v5011_v63 = vadd.f32 %v5010_v62, %v5009_v59  ;;  %v5062_v0 = vpop.f32.mrb[15].mxu1 }
 0x11b   : > { %v6151_v1 = vadd.f32 %v5060_v60, %v5008_v57  ;;  %v5063_v2 = vadd.f32 %v5062_v0, %v5061_v61 }
 0x11d   : > { %v6153_v3 = vadd.f32 %v5063_v2, %v5011_v63 }
 0x11e   : > { %v5012_v4 = vpop.f32.mrb[16].mxu0 }
 0x11f   : > { %v5013_v5 = vpop.f32.mrb[17].mxu0  ;;  %v5064_v6 = vpop.f32.mrb[16].mxu1 }
 0x120   : > { %v5014_v7 = vadd.f32 %v5013_v5, %v5012_v4  ;;  %v5015_v8 = vpop.f32.mrb[18].mxu0  ;;  %v5065_v9 = vpop.f32.mrb[17].mxu1 }
 0x121   : > { %v5016_v10 = vpop.f32.mrb[19].mxu0  ;;  %v5066_v11 = vadd.f32 %v5065_v9, %v5064_v6  ;;  %v5067_v12 = vpop.f32.mrb[18].mxu1 }
 0x122   : > { %v5017_v13 = vadd.f32 %v5016_v10, %v5015_v8  ;;  %v5068_v14 = vpop.f32.mrb[19].mxu1 }
 0x123   : > { %v6155_v15 = vadd.f32 %v5066_v11, %v5014_v7  ;;  %v5069_v16 = vadd.f32 %v5068_v14, %v5067_v12 }
 0x125   : > { %v6157_v17 = vadd.f32 %v5069_v16, %v5017_v13 }
 0x126   : > { %v5018_v18 = vpop.f32.mrb[20].mxu0 }
 0x127   : > { %v5070_v19 = vpop.f32.mrb[20].mxu1  ;;  %v5019_v20 = vpop.f32.mrb[21].mxu0 }
 0x128   : > { %v5020_v22 = vadd.f32 %v5019_v20, %v5018_v18  ;;  %v5071_v24 = vpop.f32.mrb[21].mxu1  ;;  %v5021_v25 = vpop.f32.mrb[22].mxu0 }
 0x129   : > { %v5072_v27 = vadd.f32 %v5071_v24, %v5070_v19  ;;  %v5073_v26 = vpop.f32.mrb[22].mxu1  ;;  %v5022_v28 = vpop.f32.mrb[23].mxu0 }
 0x12a   : > { %v5023_v29 = vadd.f32 %v5022_v28, %v5021_v25  ;;  %v5074_v30 = vpop.f32.mrb[23].mxu1 }
 0x12b   : > { %v6159_v31 = vadd.f32 %v5072_v27, %v5020_v22  ;;  %v5075_v32 = vadd.f32 %v5074_v30, %v5073_v26 }
 0x12d   : > { %v6161_v33 = vadd.f32 %v5075_v32, %v5023_v29 }
 0x12e   : > { %v5092_v35 = vpop.f32.mrb[24].mxu0 }
 0x12f   : > { %v5093_v36 = vpop.f32.mrb[25].mxu0  ;;  %v5144_v43 = vpop.f32.mrb[24].mxu1 }
 0x130   : > { %v5094_v38 = vadd.f32 %v5093_v36, %v5092_v35  ;;  %v5095_v39 = vpop.f32.mrb[26].mxu0  ;;  %v5145_v45 = vpop.f32.mrb[25].mxu1 }
 0x131   : > { %v5096_v40 = vpop.f32.mrb[27].mxu0  ;;  %v5146_v47 = vadd.f32 %v5145_v45, %v5144_v43  ;;  %v5147_v48 = vpop.f32.mrb[26].mxu1 }
 0x132   : > { %v2210_v41 = vadd.f32 %v5094_v38, %v6139_v21  ;;  %v5097_v42 = vadd.f32 %v5096_v40, %v5095_v39  ;;  %v5148_v49 = vpop.f32.mrb[27].mxu1 }
 0x133   : > { %v5149_v52 = vadd.f32 %v5148_v49, %v5147_v48 }
 0x134   : > { %v2213_v44 = vadd.f32 %v5097_v42, %v6141_v23  ;;  %v6165_v54 = vadd.f32 %v5146_v47, %v2210_v41 }
 0x136   : > { %v5098_v55 = vpop.f32.mrb[28].mxu0  ;;  %v6167_v56 = vadd.f32 %v5149_v52, %v2213_v44 }
 0x137   : > { %v5099_v57 = vpop.f32.mrb[29].mxu0 }
 0x138   : > { %v5100_v58 = vadd.f32 %v5099_v57, %v5098_v55  ;;  %v5101_v59 = vpop.f32.mrb[30].mxu0 }
 0x139   : > { %v5102_v60 = vpop.f32.mrb[31].mxu0 }
 0x13a   : > { %v2218_v21 = vadd.f32 %v5100_v58, %v6143_v34  ;;  %v5103_v61 = vadd.f32 %v5102_v60, %v5101_v59 }
 0x13b   : > { %v5150_v62 = vpop.f32.mrb[28].mxu1 }
 0x13c   : > { %v2221_v23 = vadd.f32 %v5103_v61, %v6145_v37  ;;  %v5151_v63 = vpop.f32.mrb[29].mxu1 }
 0x13d   : > { %v5152_v0 = vadd.f32 %v5151_v63, %v5150_v62  ;;  %v5153_v2 = vpop.f32.mrb[30].mxu1 }
 0x13e   : > { %v5154_v4 = vpop.f32.mrb[31].mxu1  ;;  %v5104_v7 = vpop.f32.mrb[32].mxu0 }
 0x13f   : > { %v5155_v5 = vadd.f32 %v5154_v4, %v5153_v2  ;;  %v6171_v6 = vadd.f32 %v5152_v0, %v2218_v21  ;;  %v5105_v9 = vpop.f32.mrb[33].mxu0 }
 0x140   : > { %v5106_v10 = vadd.f32 %v5105_v9, %v5104_v7  ;;  %v5107_v11 = vpop.f32.mrb[34].mxu0 }
 0x141   : > { %v6173_v8 = vadd.f32 %v5155_v5, %v2221_v23  ;;  %v5108_v12 = vpop.f32.mrb[35].mxu0 }
 0x142   : > { %v2226_v34 = vadd.f32 %v5106_v10, %v6147_v50  ;;  %v5109_v14 = vadd.f32 %v5108_v12, %v5107_v11 }
 0x143   : > { %v5156_v13 = vpop.f32.mrb[32].mxu1 }
 0x144   : > { %v5157_v16 = vpop.f32.mrb[33].mxu1  ;;  %v2229_v37 = vadd.f32 %v5109_v14, %v6149_v53 }
 0x145   : > { %v5158_v18 = vadd.f32 %v5157_v16, %v5156_v13  ;;  %v5159_v19 = vpop.f32.mrb[34].mxu1  ;;  %v6198_v16 = vld [vmem:[%s6980_s2] ss:$0 sm:$0xff] }
 0x146   : > { %v5160_v20 = vpop.f32.mrb[35].mxu1  ;;  %v5110_v25 = vpop.f32.mrb[36].mxu0 }
 0x147   : > { %v5161_v22 = vadd.f32 %v5160_v20, %v5159_v19  ;;  %v6177_v24 = vadd.f32 %v5158_v18, %v2226_v34  ;;  %v5111_v26 = vpop.f32.mrb[37].mxu0  ;;  %v6206_v19 = vld [vmem:[%s6981_s3] ss:$0 sm:$0xff] }
 0x148   : > { %v5112_v28 = vadd.f32 %v5111_v26, %v5110_v25  ;;  %v5113_v29 = vpop.f32.mrb[38].mxu0 }
 0x149   : > { %v6179_v27 = vadd.f32 %v5161_v22, %v2229_v37  ;;  %v5114_v30 = vpop.f32.mrb[39].mxu0 }
 0x14a   : > { %v2234_v50 = vadd.f32 %v5112_v28, %v6151_v1  ;;  %v5115_v32 = vadd.f32 %v5114_v30, %v5113_v29 }
 0x14b   : > { %v5162_v35 = vpop.f32.mrb[36].mxu1 }
 0x14c   : > { %v2237_v36 = vadd.f32 %v5115_v32, %v6153_v3  ;;  %v5163_v53 = vpop.f32.mrb[37].mxu1 }
 0x14d   : > { %v5164_v38 = vadd.f32 %v5163_v53, %v5162_v35  ;;  %v5165_v39 = vpop.f32.mrb[38].mxu1 }
 0x14e   : > { %v5166_v40 = vpop.f32.mrb[39].mxu1  ;;  %v5116_v43 = vpop.f32.mrb[40].mxu0 }
 0x14f   : > { %v5167_v41 = vadd.f32 %v5166_v40, %v5165_v39  ;;  %v2315_v42 = vadd.f32 %v5164_v38, %v2234_v50  ;;  %v5117_v45 = vpop.f32.mrb[41].mxu0 }
 0x150   : > { %v5118_v47 = vadd.f32 %v5117_v45, %v5116_v43  ;;  %v5119_v48 = vpop.f32.mrb[42].mxu0 }
 0x151   : > { %v6183_v44 = vadd.f32 %v5167_v41, %v2237_v36  ;;  %v5120_v49 = vpop.f32.mrb[43].mxu0 }
 0x152   : > { %v2242_v52 = vadd.f32 %v5118_v47, %v6155_v15  ;;  %v5121_v55 = vadd.f32 %v5120_v49, %v5119_v48 }
 0x154   : > { %v2245_v3 = vadd.f32 %v5121_v55, %v6157_v17 }
 0x155   : > { %v5168_v1 = vpop.f32.mrb[40].mxu1 }
 0x156   : > { %v5169_v57 = vpop.f32.mrb[41].mxu1 }
 0x157   : > { %v5170_v58 = vadd.f32 %v5169_v57, %v5168_v1  ;;  %v5171_v59 = vpop.f32.mrb[42].mxu1  ;;  %v5122_v23 = vpop.f32.mrb[44].mxu0 }
 0x158   : > { %v5172_v60 = vpop.f32.mrb[43].mxu1  ;;  %v5123_v63 = vpop.f32.mrb[45].mxu0 }
 0x159   : > { %v5173_v21 = vadd.f32 %v5172_v60, %v5171_v59  ;;  %v6187_v61 = vadd.f32 %v5170_v58, %v2242_v52  ;;  %v5124_v0 = vadd.f32 %v5123_v63, %v5122_v23  ;;  %v5125_v2 = vpop.f32.mrb[46].mxu0  ;;  %v2640_v63 = vld [vmem:[#allocation3 + $0xc] sm:$0xf] }
 0x15a   : > { %v5126_v5 = vpop.f32.mrb[47].mxu0 }
 0x15b   : > { %v6189_v62 = vadd.f32 %v5173_v21, %v2245_v3  ;;  %v2250_v15 = vadd.f32 %v5124_v0, %v6159_v31  ;;  %v5127_v7 = vadd.f32 %v5126_v5, %v5125_v2 }
 0x15d   : > { %v5174_v4 = vpop.f32.mrb[44].mxu1  ;;  %v2253_v11 = vadd.f32 %v5127_v7, %v6161_v33 }
 0x15e   : > { %v5175_v9 = vpop.f32.mrb[45].mxu1 }
 0x15f   : > { %v5176_v10 = vadd.f32 %v5175_v9, %v5174_v4  ;;  %v5177_v17 = vpop.f32.mrb[46].mxu1  ;;  %v5300_v14 = vpop.f32.mrb[48].mxu0 }
 0x160   : > { %v5178_v12 = vpop.f32.mrb[47].mxu1  ;;  %v2380_v37 = vadd.f32 %v5300_v14, %v6171_v6  ;;  %v2371_v18 = vpop.f32.mrb[49].mxu0 }
 0x161   : > { %v5179_v34 = vadd.f32 %v5178_v12, %v5177_v17  ;;  %v6193_v13 = vadd.f32 %v5176_v10, %v2250_v15  ;;  %v2372_v33 = vadd.f32 %v2371_v18, %v6165_v54  ;;  %v5301_v20 = vpop.f32.mrb[50].mxu0  ;;  %v2630_v10 = vld [vmem:[#allocation3] sm:$0xf] }
 0x162   : > { %v2427_v22 = vmul.f32 %v6198_v16, %v2380_v37  ;;  %v2383_v25 = vadd.f32 %v5301_v20, %v6173_v8  ;;  %v2374_v26 = vpop.f32.mrb[51].mxu0  ;;  %v2644_v37 = vld [vmem:[#allocation3 + $0x14] sm:$0x1] }
 0x163   : > { %v6201_v31 = vadd.f32 %v5179_v34, %v2253_v11  ;;  %v2425_v28 = vmul.f32 %v6198_v16, %v2372_v33  ;;  %v2375_v6 = vadd.f32 %v2374_v26, %v6167_v56 }
 0x164   : > { %v2446_v29 = vadd.f32 %v6206_v19, %v2427_v22  ;;  %v2428_v30 = vmul.f32 %v6198_v16, %v2383_v25 }
 0x165   : > { %v2444_v50 = vadd.f32 %v6206_v19, %v2425_v28  ;;  %v2426_v32 = vmul.f32 %v6198_v16, %v2375_v6  ;;  %v2637_v28 = vld [vmem:[#allocation3 + $0x8] sm:$0x1] }
 0x166   : > { %v2458_v35 = vmax.f32 %v2446_v29, 0.0  ;;  %v2447_v54 = vadd.f32 %v6206_v19, %v2428_v30 }
 0x167   : > { %v2456_v8 = vmax.f32 %v2444_v50, 0.0  ;;  %v2445_v36 = vadd.f32 %v6206_v19, %v2426_v32  ;;  %v5304_v53 = vpop.f32.mrb[52].mxu0 }
 0x168   : > { %v4962_v38 = vpack.c.bf16 %v2458_v35, %v2458_v35  ;;  %v2459_v56 = vmax.f32 %v2447_v54, 0.0  ;;  %v2396_v39 = vadd.f32 %v5304_v53, %v2315_v42  ;;  %v2387_v40 = vpop.f32.mrb[53].mxu0 }
 0x169   : > { %v4960_v41 = vpack.c.bf16 %v2456_v8, %v2456_v8  ;;  %v2457_v43 = vmax.f32 %v2445_v36, 0.0  ;;  %v2388_v45 = vadd.f32 %v2387_v40, %v6177_v24  ;;  %v5305_v47 = vpop.f32.mrb[54].mxu0 }
 0x16a   : > { %v2525_v48 = vshrl.u32 %v4962_v38, 16  ;;  %v2528_v49 = vshll.u32 %v4962_v38, 16  ;;  %v4963_v52 = vpack.c.bf16 %v2459_v56, %v2459_v56  ;;  %v2431_v1 = vmul.f32 %v6198_v16, %v2396_v39  ;;  %v2390_v55 = vpop.f32.mrb[55].mxu0 }
 0x16b   : > { %v2508_v57 = vshrl.u32 %v4960_v41, 16  ;;  %v2511_v3 = vshll.u32 %v4960_v41, 16  ;;  %v4961_v58 = vpack.c.bf16 %v2457_v43, %v2457_v43  ;;  %v2429_v59 = vmul.f32 %v6198_v16, %v2388_v45 }
 0x16c   : > { %v2527_v60 = vrot.slane %v2525_v48, 7  ;;  %v2533_v42 = vshrl.u32 %v4963_v52, 16  ;;  %v2536_v21 = vshll.u32 %v4963_v52, 16  ;;  %v2450_v23 = vadd.f32 %v6206_v19, %v2431_v1  ;;  %v2654_v1 = vld [vmem:[#allocation3 + $0x24] sm:$0xf] }
 0x16d   : > { %v2510_v0 = vrot.slane %v2508_v57, 7  ;;  %v2516_v2 = vshrl.u32 %v4961_v58, 16  ;;  %v2519_v4 = vshll.u32 %v4961_v58, 16  ;;  %v2448_v5 = vadd.f32 %v6206_v19, %v2429_v59 }
 0x16e   : > { %v2530_v15 = vor.u32 %v2528_v49, %v2527_v60  ;;  %v2531_v7 = vrot.slane %v2527_v60, 4  ;;  %v2535_v17 = vrot.slane %v2533_v42, 7  ;;  %v2462_v11 = vmax.f32 %v2450_v23, 0.0  ;;  %v2647_v42 = vld [vmem:[#allocation3 + $0x18] sm:$0xf] }
 0x16f   : > { %v2513_v12 = vor.u32 %v2511_v3, %v2510_v0  ;;  %v2514_v34 = vrot.slane %v2510_v0, 4  ;;  %v2518_v18 = vrot.slane %v2516_v2, 7  ;;  %v2460_v33 = vmax.f32 %v2448_v5, 0.0  ;;  %v5308_v20 = vpop.f32.mrb[56].mxu0 }
 0x170   : > { %v2641_v22 = vsel %vm6225_vm11, %v2530_v15, %v2640_v63  ;;  %v2538_v25 = vor.u32 %v2536_v21, %v2535_v17  ;;  %v2540_v26 = vrot.slane %v2535_v17, 4  ;;  %v4966_v6 = vpack.c.bf16 %v2462_v11, %v2462_v11  ;;  %v2403_v29 = vpop.f32.mrb[57].mxu0 }
 0x171   : > { %2642 = vst [vmem:[#allocation3 + $0xc] sm:$0xf] %v2641_v22  ;;  %v2631_v30 = vsel %vm6225_vm11, %v2513_v12, %v2630_v10  ;;  %v2521_v50 = vor.u32 %v2519_v4, %v2518_v18  ;;  %v2523_v32 = vrot.slane %v2518_v18, 4  ;;  %v4964_v35 = vpack.c.bf16 %v2460_v33, %v2460_v33  ;;  %v5309_v54 = vpop.f32.mrb[58].mxu0 }
 0x172   : > { %2632 = vst [vmem:[#allocation3] sm:$0xf] %v2631_v30  ;;  %v2539_v8 = vsel %vm6238_vm13, %v2531_v7, %v2538_v25  ;;  %v2645_v36 = vsel %vm6232_vm12, %v2540_v26, %v2644_v37  ;;  %v2559_v53 = vshrl.u32 %v4966_v6, 16  ;;  %v2562_v38 = vshll.u32 %v4966_v6, 16  ;;  %v2406_v56 = vpop.f32.mrb[59].mxu0 }
 0x173   : > { %2643 = vst.msk [vmem:[#allocation3 + $0x10] sm:$0xf] %vm2627_vm7, %v2539_v8  ;;  %2646 = vst [vmem:[#allocation3 + $0x14] sm:$0x1] %v2645_v36  ;;  %v2522_v39 = vsel %vm6238_vm13, %v2514_v34, %v2521_v50  ;;  %v2638_v40 = vsel %vm6232_vm12, %v2523_v32, %v2637_v28  ;;  %v2542_v41 = vshrl.u32 %v4964_v35, 16  ;;  %v2545_v43 = vshll.u32 %v4964_v35, 16 }
 0x174   : > { %2634 = vst.msk [vmem:[#allocation3 + $0x4] sm:$0xf] %vm2627_vm7, %v2522_v39  ;;  %2639 = vst [vmem:[#allocation3 + $0x8] sm:$0x1] %v2638_v40  ;;  %v6256_v45 = vrot.slane %v2559_v53, 7  ;;  %v2399_v48 = vadd.f32 %v5305_v47, %v6183_v44  ;;  %v2391_v49 = vadd.f32 %v2390_v55, %v6179_v27  ;;  %v2412_v52 = vadd.f32 %v5308_v20, %v6193_v13 }
 0x175   : > { %v6261_v57 = vrot.slane %v2542_v41, 7  ;;  %v2404_v3 = vadd.f32 %v2403_v29, %v6187_v61  ;;  %v2415_v58 = vadd.f32 %v5309_v54, %v6201_v31  ;;  %v2407_v59 = vadd.f32 %v2406_v56, %v6189_v62 }
 0x176   : > { %v2564_v60 = vor.u32 %v2562_v38, %v6256_v45  ;;  %v2432_v21 = vmul.f32 %v6198_v16, %v2399_v48  ;;  %v2430_v44 = vmul.f32 %v6198_v16, %v2391_v49  ;;  %v2435_v13 = vmul.f32 %v6198_v16, %v2412_v52 }
 0x177   : > { %v2547_v27 = vor.u32 %v2545_v43, %v6261_v57  ;;  %v2433_v47 = vmul.f32 %v6198_v16, %v2404_v3  ;;  %v2436_v63 = vmul.f32 %v6198_v16, %v2415_v58  ;;  %v2434_v20 = vmul.f32 %v6198_v16, %v2407_v59  ;;  %v2658_v16 = vld [vmem:[#allocation3 + $0x2c] sm:$0x1]  ;;  %v2651_v43 = vld [vmem:[#allocation3 + $0x20] sm:$0x1] }
 0x178   : > { %v2678_v55 = vld [vmem:[#allocation3 + $0xc] sm:$0x1]  ;;  %v2655_v62 = vsel %vm6225_vm11, %v2564_v60, %v2654_v1  ;;  %v2451_v31 = vadd.f32 %v6206_v19, %v2432_v21  ;;  %v2449_v23 = vadd.f32 %v6206_v19, %v2430_v44  ;;  %v2454_v5 = vadd.f32 %v6206_v19, %v2435_v13  ;;  %v2661_v21 = vld [vmem:[#allocation3 + $0x30] sm:$0xf] }
 0x179   : > { %v2679_v0 = vsel %vm6232_vm12, 0, %v2678_v55  ;;  %v2675_v2 = vld [vmem:[#allocation3] sm:$0x1]  ;;  %2656 = vst [vmem:[#allocation3 + $0x24] sm:$0xf] %v2655_v62  ;;  %v2648_v4 = vsel %vm6225_vm11, %v2547_v27, %v2647_v42  ;;  %v2452_v15 = vadd.f32 %v6206_v19, %v2433_v47  ;;  %v2455_v12 = vadd.f32 %v6206_v19, %v2436_v63 }
 0x17a   : > { %2680 = vst [vmem:[#allocation3 + $0xc] sm:$0x1] %v2679_v0  ;;  %v2676_v7 = vsel %vm6232_vm12, 0, %v2675_v2  ;;  %v2697_v10 = vld [vmem:[#allocation3 + $0x14] sm:$0x1]  ;;  %v2463_v17 = vmax.f32 %v2451_v31, 0.0  ;;  %v2453_v50 = vadd.f32 %v6206_v19, %v2434_v20 }
 0x17b   : > { %2649 = vst [vmem:[#allocation3 + $0x18] sm:$0xf] %v2648_v4  ;;  %v2461_v11 = vmax.f32 %v2449_v23, 0.0  ;;  %2677 = vst [vmem:[#allocation3] sm:$0x1] %v2676_v7  ;;  %v2698_v34 = vsel %vm6274_vm14, 0, %v2697_v10 }
 0x17c   : > { %v2694_v37 = vld [vmem:[#allocation3 + $0x8] sm:$0x1]  ;;  %v2466_v18 = vmax.f32 %v2454_v5, 0.0  ;;  %v2464_v33 = vmax.f32 %v2452_v15, 0.0  ;;  %2699 = vst [vmem:[#allocation3 + $0x14] sm:$0x1] %v2698_v34  ;;  %v4967_v25 = vpack.c.bf16 %v2463_v17, %v2463_v17 }
 0x17d   : > { %v2695_v22 = vsel %vm6274_vm14, 0, %v2694_v37  ;;  %v4965_v26 = vpack.c.bf16 %v2461_v11, %v2461_v11  ;;  %v2467_v28 = vmax.f32 %v2455_v12, 0.0  ;;  %v2565_v6 = vrot.slane %v6256_v45, 4  ;;  %v2668_v42 = vld [vmem:[#allocation3 + $0x3c] sm:$0xf] }
 0x17e   : > { %2696 = vst [vmem:[#allocation3 + $0x8] sm:$0x1] %v2695_v22  ;;  %v4970_v29 = vpack.c.bf16 %v2466_v18, %v2466_v18  ;;  %v4968_v30 = vpack.c.bf16 %v2464_v33, %v2464_v33  ;;  %v2548_v32 = vrot.slane %v6261_v57, 4  ;;  %v2567_v35 = vshrl.u32 %v4967_v25, 16  ;;  %v2672_v15 = vld [vmem:[#allocation3 + $0x44] sm:$0x1] }
 0x17f   : > { %v2570_v54 = vshll.u32 %v4967_v25, 16  ;;  %v2550_v8 = vshrl.u32 %v4965_v26, 16  ;;  %v2553_v36 = vshll.u32 %v4965_v26, 16  ;;  %v4971_v45 = vpack.c.bf16 %v2467_v28, %v2467_v28  ;;  %v2665_v18 = vld [vmem:[#allocation3 + $0x38] sm:$0x1] }
 0x180   : > { %v2593_v53 = vshrl.u32 %v4970_v29, 16  ;;  %v2596_v38 = vshll.u32 %v4970_v29, 16  ;;  %v2576_v56 = vshrl.u32 %v4968_v30, 16  ;;  %v2684_v39 = vld [vmem:[#allocation3 + $0x24] sm:$0x1]  ;;  %v2569_v40 = vrot.slane %v2567_v35, 7 }
 0x181   : > { %v2552_v41 = vrot.slane %v2550_v8, 7  ;;  %v2579_v48 = vshll.u32 %v4968_v30, 16  ;;  %v2685_v49 = vsel %vm6232_vm12, 0, %v2684_v39  ;;  %v2465_v57 = vmax.f32 %v2453_v50, 0.0 }
 0x182   : > { %v2681_v19 = vld [vmem:[#allocation3 + $0x18] sm:$0x1]  ;;  %v2595_v52 = vrot.slane %v2593_v53, 7  ;;  %v2578_v1 = vrot.slane %v2576_v56, 7  ;;  %2686 = vst [vmem:[#allocation3 + $0x24] sm:$0x1] %v2685_v49  ;;  %v2572_v58 = vor.u32 %v2570_v54, %v2569_v40 }
 0x183   : > { %v2682_v3 = vsel %vm6232_vm12, 0, %v2681_v19  ;;  %v2574_v59 = vrot.slane %v2569_v40, 4  ;;  %v2555_v60 = vor.u32 %v2553_v36, %v2552_v41  ;;  %v2557_v44 = vrot.slane %v2552_v41, 4 }
 0x184   : > { %2683 = vst [vmem:[#allocation3 + $0x18] sm:$0x1] %v2682_v3  ;;  %v2598_v27 = vor.u32 %v2596_v38, %v2595_v52  ;;  %v2581_v13 = vor.u32 %v2579_v48, %v2578_v1  ;;  %v2573_v47 = vsel %vm6238_vm13, %v2565_v6, %v2572_v58  ;;  %v2601_v0 = vshrl.u32 %v4971_v45, 16 }
 0x185   : > { %v2659_v55 = vsel %vm6232_vm12, %v2574_v59, %v2658_v16  ;;  %v2556_v62 = vsel %vm6238_vm13, %v2548_v32, %v2555_v60  ;;  %2657 = vst.msk [vmem:[#allocation3 + $0x28] sm:$0xf] %vm2627_vm7, %v2573_v47  ;;  %v2652_v31 = vsel %vm6232_vm12, %v2557_v44, %v2651_v43  ;;  %v4969_v2 = vpack.c.bf16 %v2465_v57, %v2465_v57 }
 0x186   : > { %2660 = vst [vmem:[#allocation3 + $0x2c] sm:$0x1] %v2659_v55  ;;  %2650 = vst.msk [vmem:[#allocation3 + $0x1c] sm:$0xf] %vm2627_vm7, %v2556_v62  ;;  %v2669_v23 = vsel %vm6225_vm11, %v2598_v27, %v2668_v42  ;;  %v2662_v63 = vsel %vm6225_vm11, %v2581_v13, %v2661_v21  ;;  %v2603_v4 = vrot.slane %v2601_v0, 7  ;;  %v2604_v5 = vshll.u32 %v4971_v45, 16 }
 0x187   : > { %2653 = vst [vmem:[#allocation3 + $0x20] sm:$0x1] %v2652_v31  ;;  %2670 = vst [vmem:[#allocation3 + $0x3c] sm:$0xf] %v2669_v23  ;;  %v2584_v7 = vshrl.u32 %v4969_v2, 16  ;;  %v2599_v10 = vrot.slane %v2595_v52, 4 }
 0x188   : > { %2663 = vst [vmem:[#allocation3 + $0x30] sm:$0xf] %v2662_v63  ;;  %v2606_v17 = vor.u32 %v2604_v5, %v2603_v4  ;;  %v2608_v11 = vrot.slane %v2603_v4, 4  ;;  %v2587_v34 = vshll.u32 %v4969_v2, 16  ;;  %v2582_v20 = vrot.slane %v2578_v1, 4 }
 0x189   : > { %v2586_v12 = vrot.slane %v2584_v7, 7  ;;  %v5549_v53 = vmov (!%p4865_p7), 0  }
 0x18a   : > { %v2607_v37 = vsel %vm6238_vm13, %v2599_v10, %v2606_v17  ;;  %v2673_v24 = vsel %vm6232_vm12, %v2608_v11, %v2672_v15  ;;  %2716 = vst.msk [vmem:[#allocation3] sm:$0xf] (!%p4865_p7), %vm2627_vm7, %v5549_v53  ;;  %2717 = vst.msk [vmem:[#allocation3 + $0x4] sm:$0xf] (!%p4865_p7), %vm2627_vm7, %v5549_v53 }
 0x18b   : > { %2671 = vst.msk [vmem:[#allocation3 + $0x40] sm:$0xf] %vm2627_vm7, %v2607_v37  ;;  %2674 = vst [vmem:[#allocation3 + $0x44] sm:$0x1] %v2673_v24  ;;  %v2589_v22 = vor.u32 %v2587_v34, %v2586_v12  ;;  %v2591_v25 = vrot.slane %v2586_v12, 4 }
 0x18c   : > { %2719 = vst.msk [vmem:[#allocation3 + $0x8] sm:$0x1] (!%p4865_p7), %vm2635_vm9, %v5549_v53 }
 0x18d   : > { %v2703_v33 = vld [vmem:[#allocation3 + $0x2c] sm:$0x1]  ;;  %v2590_v32 = vsel %vm6238_vm13, %v2582_v20, %v2589_v22  ;;  %v2666_v35 = vsel %vm6232_vm12, %v2591_v25, %v2665_v18 }
 0x18e   : > { %v2704_v26 = vsel %vm6274_vm14, 0, %v2703_v33  ;;  %v2700_v28 = vld [vmem:[#allocation3 + $0x20] sm:$0x1]  ;;  %v2690_v6 = vld [vmem:[#allocation3 + $0x3c] sm:$0x1] }
 0x18f   : > { %2705 = vst [vmem:[#allocation3 + $0x2c] sm:$0x1] %v2704_v26  ;;  %v2701_v29 = vsel %vm6274_vm14, 0, %v2700_v28  ;;  %v2691_v30 = vsel %vm6232_vm12, 0, %v2690_v6  ;;  %v2687_v50 = vld [vmem:[#allocation3 + $0x30] sm:$0x1] }
 0x190   : > { %2702 = vst [vmem:[#allocation3 + $0x20] sm:$0x1] %v2701_v29  ;;  %2692 = vst [vmem:[#allocation3 + $0x3c] sm:$0x1] %v2691_v30  ;;  %v2688_v54 = vsel %vm6232_vm12, 0, %v2687_v50 }
 0x191   : > { %2664 = vst.msk [vmem:[#allocation3 + $0x34] sm:$0xf] %vm2627_vm7, %v2590_v32  ;;  %2667 = vst [vmem:[#allocation3 + $0x38] sm:$0x1] %v2666_v35 }
 0x192   : > { %2689 = vst [vmem:[#allocation3 + $0x30] sm:$0x1] %v2688_v54  ;;  %v2709_v8 = vld [vmem:[#allocation3 + $0x44] sm:$0x1] }
 0x193   : > { %v2710_v16 = vsel %vm6274_vm14, 0, %v2709_v8 }
 0x194   : > { %2711 = vst [vmem:[#allocation3 + $0x44] sm:$0x1] %v2710_v16  ;;  %2715 = sbr.rel (%p4865_p7) target bundleno = 411 (0x19b), region = 52 }
 0x198   : > { %v2706_v36 = vld [vmem:[#allocation3 + $0x38] sm:$0x1] }
 0x199   : > { %v2707_v14 = vsel %vm6274_vm14, 0, %v2706_v36 }
 0x19a   : > { %2708 = vst [vmem:[#allocation3 + $0x38] sm:$0x1] %v2707_v14 }
 0x19b PF: > { %p4866_p8 = scmp.ne.s32.totalorder %s5531_s24, 3 }
 0x19c   : > { %v5550_v9 = vmov (!%p4866_p8), 0  }
 0x19d   : > { %2723 = sbr.rel (%p4866_p8) target bundleno = 420 (0x1a4), region = 56  ;;  %2725 = vst.msk [vmem:[#allocation3 + $0x3c] sm:$0xf] (!%p4866_p8), %vm2627_vm7, %v5550_v9  ;;  %2726 = vst.msk [vmem:[#allocation3 + $0x40] sm:$0xf] (!%p4866_p8), %vm2627_vm7, %v5550_v9 }
 0x19e   : > { %2728 = vst.msk [vmem:[#allocation3 + $0x44] sm:$0x1] (!%p4866_p8), %vm2635_vm9, %v5550_v9 }
 0x1a4 PF: > { %v5461_v61 = vld [vmem:[#allocation3 + $0xc] sm:$0xff]   ;;  %v5462_v38 = vld [vmem:[#allocation3 + $0x18] sm:$0xff]   ;;  %s5551_s16 = smov 64   ;;  %v2766_v56 = vld [vmem:[#allocation3] sm:$0xf]  ;;  %vm2761_vm15 = vcmask 523264  }
 0x1a5   : > { %3004 = vrot.lane.b32.xlu0 %v5461_v61, %s5551_s16  ;;  %v2767_v39 = vld [vmem:[#allocation3 + $0x4] sm:$0xf]  ;;  %v2768_v40 = vld [vmem:[#allocation3 + $0x8] sm:$0x1]  ;;  %3006 = vrot.lane.b32.xlu1 %v5462_v38, %s5551_s16  ;;  %v2779_v41 = vshrl.u32 %v2766_v56, 16  ;;  %v2782_v43 = vshll.u32 %v2766_v56, 16 }
 0x1a6   : > { %v2788_v48 = vshll.u32 %v2767_v39, 16  ;;  %v2792_v45 = vshrl.u32 %v2767_v39, 16  ;;  %v2769_v49 = vld [vmem:[#allocation3 + $0xc] sm:$0xf]  ;;  %v2798_v19 = vshll.u32 %v2768_v40, 16  ;;  %v5465_v61 = vld [vmem:[%s6982_s4 + $0x40] sm:$0xff]  }
 0x1a7   : > { %v2770_v52 = vld [vmem:[#allocation3 + $0x10] sm:$0xf]  ;;  %v2771_v1 = vld [vmem:[#allocation3 + $0x14] sm:$0x1]  ;;  %v2803_v57 = vshrl.u32 %v2769_v49, 16  ;;  %v2781_v3 = vrot.slane %v2779_v41, 4  ;;  %5194 = vmatprep.subr.bf16.mxu1 %v5465_v61 }
 0x1a8   : > { %v2784_v58 = vrot.slane %v2782_v43, 5  ;;  %v2790_v59 = vrot.slane %v2788_v48, 5  ;;  %v2794_v60 = vrot.slane %v2792_v45, 4  ;;  %v3265_v42 = vld [vmem:[#allocation3 + $0x18] sm:$0xf]  ;;  %v2800_v21 = vrot.slane %v2798_v19, 5 }
 0x1a9   : > { %v2805_v44 = vrot.slane %v2803_v57, 4  ;;  %v2806_v27 = vshll.u32 %v2769_v49, 16  ;;  %v2812_v13 = vshll.u32 %v2770_v52, 16  ;;  %v2816_v62 = vshrl.u32 %v2770_v52, 16  ;;  %v3266_v23 = vld [vmem:[#allocation3 + $0x1c] sm:$0xf] }
 0x1aa   : > { %v2785_v47 = vor.u32 %v2784_v58, %v2781_v3  ;;  %v2795_v55 = vor.u32 %v2794_v60, %v2790_v59  ;;  %v2822_v31 = vshll.u32 %v2771_v1, 16  ;;  %v3267_v2 = vld [vmem:[#allocation3 + $0x20] sm:$0x1]  ;;  %v3278_v4 = vshrl.u32 %v3265_v42, 16  ;;  %v3148_v15 = vld [vmem:[#allocation3 + $0xc] sm:$0xe] }
 0x1ab   : > { %v2808_v63 = vrot.slane %v2806_v27, 5  ;;  %v2814_v0 = vrot.slane %v2812_v13, 5  ;;  %v3281_v5 = vshll.u32 %v3265_v42, 16  ;;  %v2818_v17 = vrot.slane %v2816_v62, 4  ;;  %v3149_v12 = vld [vmem:[#allocation3 + $0x10] sm:$0xf] }
 0x1ac   : > { %v2786_v7 = vrot.slane %v2785_v47, 4  ;;  %v2796_v10 = vrot.slane %v2795_v55, 4  ;;  %v2824_v11 = vrot.slane %v2822_v31, 5  ;;  %v3280_v37 = vrot.slane %v3278_v4, 4  ;;  %v3150_v26 = vld [vmem:[#allocation3 + $0x14] sm:$0x1] }
 0x1ad   : > { %v2809_v34 = vor.u32 %v2808_v63, %v2805_v44  ;;  %v3283_v24 = vrot.slane %v3281_v5, 5  ;;  %v3287_v18 = vshll.u32 %v3266_v23, 16  ;;  %v2819_v22 = vor.u32 %v2818_v17, %v2814_v0  ;;  %v2772_v50 = vld [vmem:[#allocation3 + $0x18] sm:$0xf]  ;;  %v2773_v9 = vld [vmem:[#allocation3 + $0x1c] sm:$0xf] }
 0x1ae   : > { %v2791_v33 = vsel %vm5752_vm5, %v2786_v7, %v2790_v59  ;;  %v2801_v20 = vsel %vm5752_vm5, %v2796_v10, %v2800_v21  ;;  %v3291_v25 = vshrl.u32 %v3266_v23, 16  ;;  %v3297_v54 = vshll.u32 %v3267_v2, 16  ;;  %v2774_v40 = vld [vmem:[#allocation3 + $0x20] sm:$0x1]  ;;  %v3268_v43 = vld [vmem:[#allocation3 + $0x24] sm:$0xf] }
 0x1af   : > { %v4871_v28 = vcombine.low %v2791_v33, %v2801_v20  ;;  %v2810_v6 = vrot.slane %v2809_v34, 4  ;;  %v3284_v29 = vor.u32 %v3283_v24, %v3280_v37  ;;  %v3289_v30 = vrot.slane %v3287_v18, 5  ;;  %v3269_v52 = vld [vmem:[#allocation3 + $0x28] sm:$0xf]  ;;  %v5466_v1 = vld [vmem:[%s6982_s4] sm:$0xff]  }
 0x1b0   : > { %v2820_v32 = vrot.slane %v2819_v22, 4  ;;  %v3293_v35 = vrot.slane %v3291_v25, 4  ;;  %v4891_v8 = vrot.slane %v3148_v15, 9  ;;  %v3174_v14 = vrot.slane %v3149_v12, 5  ;;  %v3270_v60 = vld [vmem:[#allocation3 + $0x2c] sm:$0x1]  ;;  %5195 = vmatpush3.bf16.msra.mxu1 %v5466_v1 }
 0x1b1   : > { %2886 = vrot.lane.b32.xlu0 %v4871_v28, %s5551_s16  ;;  %v2815_v16 = vsel %vm5752_vm5, %v2810_v6, %v2814_v0  ;;  %v3285_v36 = vrot.slane %v3284_v29, 4  ;;  %v3177_v53 = vrot.slane %v3150_v26, 5  ;;  %v3299_v39 = vrot.slane %v3297_v54, 5  ;;  %v5467_v13 = vld [vmem:[%s6982_s4 + $0x48] sm:$0xff]   ;;  %v3151_v23 = vld [vmem:[#allocation3 + $0x18] sm:$0xe] }
 0x1b2   : > { %v2825_v38 = vsel %vm5752_vm5, %v2820_v32, %v2824_v11  ;;  %v3294_v56 = vor.u32 %v3293_v35, %v3289_v30  ;;  %v2827_v41 = vshrl.u32 %v2772_v50, 16  ;;  %v3175_v49 = vsel %vm5743_vm4, %v4891_v8, %v3174_v14  ;;  %v3152_v63 = vld [vmem:[#allocation3 + $0x1c] sm:$0xf]  ;;  %v5463_v2 = vld [vmem:[#allocation3 + $0x24] sm:$0xff]   ;;  %5196 = vmatprep.subr.bf16.mxu1 %v5467_v13  ;;  %v3153_v34 = vld [vmem:[#allocation3 + $0x20] sm:$0x1] }
 0x1b3   : > { %v4872_v48 = vcombine.low %v2815_v16, %v2825_v38  ;;  %v3290_v45 = vsel %vm5752_vm5, %v3285_v36, %v3289_v30  ;;  %v3176_v19 = vrot.slane %v3174_v14, 4  ;;  %v2830_v58 = vshll.u32 %v2772_v50, 16  ;;  %v5468_v7 = vld [vmem:[%s6982_s4 + $0x8] sm:$0xff]   ;;  %v5469_v37 = vld [vmem:[%s6982_s4 + $0xc0] sm:$0xff]   ;;  %v5471_v8 = vld [vmem:[%s6982_s4 + $0x50] sm:$0xff]  }
 0x1b4   : > { %v3295_v57 = vrot.slane %v3294_v56, 4  ;;  %v2829_v3 = vrot.slane %v2827_v41, 4  ;;  %v2836_v59 = vshll.u32 %v2773_v9, 16  ;;  %v2840_v21 = vshrl.u32 %v2773_v9, 16  ;;  %v2775_v22 = vld [vmem:[#allocation3 + $0x24] sm:$0xf]  ;;  %5197 = vmatpush3.bf16.msra.mxu1 %v5468_v7  ;;  %5234 = vmatprep.subr.bf16.mxu0 %v5469_v37 }
 0x1b5   : > { %2888 = vrot.lane.b32.xlu1 %v4872_v48, %s5551_s16  ;;  %v3178_v42 = vsel %vm5743_vm4, %v3176_v19, %v3177_v53  ;;  %v2846_v44 = vshll.u32 %v2774_v40, 16  ;;  %v3302_v27 = vshrl.u32 %v3268_v43, 16  ;;  %v2832_v62 = vrot.slane %v2830_v58, 5  ;;  %v5470_v25 = vld [vmem:[%s6982_s4 + $0x80] sm:$0xff]   ;;  %v2776_v30 = vld [vmem:[#allocation3 + $0x28] sm:$0xf]  ;;  %5198 = vmatprep.subr.bf16.mxu1 %v5471_v8 }
 0x1b6   : > { %v3300_v47 = vsel %vm5752_vm5, %v3295_v57, %v3299_v39  ;;  %v4895_v55 = vcombine.low %v3175_v49, %v3178_v42  ;;  %v2838_v31 = vrot.slane %v2836_v59, 5  ;;  %v2842_v4 = vrot.slane %v2840_v21, 4  ;;  %5235 = vmatpush3.bf16.msra.mxu0 %v5470_v25  ;;  %v5472_v9 = vld [vmem:[%s6982_s4 + $0x10] sm:$0xff]   ;;  %v2777_v38 = vld [vmem:[#allocation3 + $0x2c] sm:$0x1] }
 0x1b7   : > { %v4903_v0 = vcombine.low %v3290_v45, %v3300_v47  ;;  %v2848_v5 = vrot.slane %v2846_v44, 5  ;;  %v3304_v15 = vrot.slane %v3302_v27, 4  ;;  %v2833_v10 = vor.u32 %v2832_v62, %v2829_v3  ;;  %v5473_v41 = vld [vmem:[%s6982_s4 + $0xc8] sm:$0xff]   ;;  %v3271_v19 = vld [vmem:[#allocation3 + $0x30] sm:$0xf] }
 0x1b8   : > { %v3305_v17 = vshll.u32 %v3268_v43, 16  ;;  %v3311_v11 = vshll.u32 %v3269_v52, 16  ;;  %v3315_v12 = vshrl.u32 %v3269_v52, 16  ;;  %v2843_v24 = vor.u32 %v2842_v4, %v2838_v31  ;;  %v3272_v52 = vld [vmem:[#allocation3 + $0x34] sm:$0xf]  ;;  %5199 = vmatpush3.bf16.msra.mxu1 %v5472_v9  ;;  %5236 = vmatprep.subr.bf16.mxu0 %v5473_v41 }
 0x1b9   : > { %3385 = vrot.lane.b32.xlu0 %v4903_v0, %s5551_s16  ;;  %3212 = vrot.lane.b32.xlu1 %v4895_v55, %s5551_s16  ;;  %v3321_v18 = vshll.u32 %v3270_v60, 16  ;;  %v4892_v33 = vrot.slane %v3151_v23, 9  ;;  %v3181_v20 = vrot.slane %v3152_v63, 5  ;;  %v2834_v26 = vrot.slane %v2833_v10, 4  ;;  %v3273_v59 = vld [vmem:[#allocation3 + $0x38] sm:$0x1] }
 0x1ba   : > { %v3307_v28 = vrot.slane %v3305_v17, 5  ;;  %v3313_v6 = vrot.slane %v3311_v11, 5  ;;  %v3317_v29 = vrot.slane %v3315_v12, 4  ;;  %v2844_v50 = vrot.slane %v2843_v24, 4  ;;  %v5474_v60 = vld [vmem:[%s6982_s4 + $0x88] sm:$0xff]   ;;  %v5464_v62 = vld [vmem:[#allocation3 + $0x30] sm:$0xff]  }
 0x1bb   : > { %v3323_v32 = vrot.slane %v3321_v18, 5  ;;  %v3182_v35 = vsel %vm5743_vm4, %v4892_v33, %v3181_v20  ;;  %v3183_v54 = vrot.slane %v3181_v20, 4  ;;  %v2839_v16 = vsel %vm5752_vm5, %v2834_v26, %v2838_v31  ;;  %v3154_v13 = vld [vmem:[#allocation3 + $0x24] sm:$0xe]  ;;  %v3155_v47 = vld [vmem:[#allocation3 + $0x28] sm:$0xf]  ;;  %5237 = vmatpush3.bf16.msra.mxu0 %v5474_v60 }
 0x1bc   : > { %v3308_v36 = vor.u32 %v3307_v28, %v3304_v15  ;;  %v3318_v14 = vor.u32 %v3317_v29, %v3313_v6  ;;  %v3184_v53 = vrot.slane %v3153_v34, 5  ;;  %v2849_v61 = vsel %vm5752_vm5, %v2844_v50, %v2848_v5  ;;  %v3156_v0 = vld [vmem:[#allocation3 + $0x2c] sm:$0x1]  ;;  %v3275_v34 = vld [vmem:[#allocation3 + $0x40] sm:$0xf]  ;;  %v5475_v20 = vld [vmem:[%s6982_s4 + $0x58] sm:$0xff]  }
 0x1bd   : > { %3008 = vrot.lane.b32.xlu0 %v5463_v2, %s5551_s16  ;;  %v2851_v56 = vshrl.u32 %v2775_v22, 16  ;;  %v2854_v39 = vshll.u32 %v2775_v22, 16  ;;  %v2860_v40 = vshll.u32 %v2776_v30, 16  ;;  %v4873_v43 = vcombine.low %v2839_v16, %v2849_v61  ;;  %v3274_v2 = vld [vmem:[#allocation3 + $0x3c] sm:$0xf]  ;;  %5200 = vmatprep.subr.bf16.mxu1 %v5475_v20  ;;  %v5477_v61 = vld [vmem:[%s6982_s4 + $0xd0] sm:$0xff]  }
 0x1be   : > { %v3309_v48 = vrot.slane %v3308_v36, 4  ;;  %v3319_v45 = vrot.slane %v3318_v14, 4  ;;  %v3185_v49 = vsel %vm5743_vm4, %v3183_v54, %v3184_v53  ;;  %v2864_v44 = vshrl.u32 %v2776_v30, 16  ;;  %v3276_v50 = vld [vmem:[#allocation3 + $0x44] sm:$0x1]  ;;  %v5476_v54 = vld [vmem:[%s6982_s4 + $0x18] sm:$0xff]   ;;  %5238 = vmatprep.subr.bf16.mxu0 %v5477_v61 }
 0x1bf   : > { %v4896_v1 = vcombine.low %v3182_v35, %v3185_v49  ;;  %v2853_v57 = vrot.slane %v2851_v56, 4  ;;  %v2856_v3 = vrot.slane %v2854_v39, 5  ;;  %v2862_v58 = vrot.slane %v2860_v40, 5  ;;  %2890 = vrot.lane.b32.xlu1 %v4873_v43, %s5551_s16  ;;  %v3157_v35 = vld [vmem:[#allocation3 + $0x30] sm:$0xe]  ;;  %5201 = vmatpush3.bf16.msra.mxu1 %v5476_v54 }
 0x1c0   : > { %v3314_v42 = vsel %vm5752_vm5, %v3309_v48, %v3313_v6  ;;  %v3324_v21 = vsel %vm5752_vm5, %v3319_v45, %v3323_v32  ;;  %v2870_v27 = vshll.u32 %v2777_v38, 16  ;;  %v3326_v23 = vshrl.u32 %v3271_v19, 16  ;;  %v3158_v53 = vld [vmem:[#allocation3 + $0x34] sm:$0xf]  ;;  %v3159_v9 = vld [vmem:[#allocation3 + $0x38] sm:$0x1] }
 0x1c1   : > { %v4904_v55 = vcombine.low %v3314_v42, %v3324_v21  ;;  %v2857_v31 = vor.u32 %v2856_v3, %v2853_v57  ;;  %v3329_v63 = vshll.u32 %v3271_v19, 16  ;;  %v2866_v4 = vrot.slane %v2864_v44, 4  ;;  %v5478_v41 = vld [vmem:[%s6982_s4 + $0x90] sm:$0xff]   ;;  %v5479_v19 = vld [vmem:[%s6982_s4 + $0x60] sm:$0xff]   ;;  %v2906_v20 = vld [vmem:[#allocation3 + $0xc] sm:$0xe] }
 0x1c2   : > { %v2872_v5 = vrot.slane %v2870_v27, 5  ;;  %v3335_v15 = vshll.u32 %v3272_v52, 16  ;;  %v3339_v7 = vshrl.u32 %v3272_v52, 16  ;;  %v3328_v17 = vrot.slane %v3326_v23, 4  ;;  %5239 = vmatpush3.bf16.msra.mxu0 %v5478_v41  ;;  %5202 = vmatprep.subr.bf16.mxu1 %v5479_v19  ;;  %v5489_v61 = vld [vmem:[%s6982_s4 + $0x30] sm:$0xff]   ;;  %v5494_v41 = vld [vmem:[#allocation3 + $0x18] sm:$0xff]  }
 0x1c3   : > { %3387 = vrot.lane.b32.xlu0 %v4904_v55, %s5551_s16  ;;  %v2858_v10 = vrot.slane %v2857_v31, 4  ;;  %v3331_v11 = vrot.slane %v3329_v63, 5  ;;  %v3345_v12 = vshll.u32 %v3273_v59, 16  ;;  %3214 = vrot.lane.b32.xlu1 %v4896_v1, %s5551_s16  ;;  %v2867_v37 = vor.u32 %v2866_v4, %v2862_v58  ;;  %v5481_v63 = vld [vmem:[%s6982_s4 + $0xd8] sm:$0xff]   ;;  %3261 = vst.msk [vmem:[#allocation4 + $0x18] sm:$0xff] %vm2761_vm15, %v5494_v41  ;;  %v5504_v41 = vld [vmem:[#allocation3 + $0x24] sm:$0xff]  }
 0x1c4   : > { %v3337_v24 = vrot.slane %v3335_v15, 5  ;;  %v3341_v18 = vrot.slane %v3339_v7, 4  ;;  %v4893_v33 = vrot.slane %v3154_v13, 9  ;;  %v3188_v28 = vrot.slane %v3155_v47, 5  ;;  %v5480_v13 = vld [vmem:[%s6982_s4 + $0x20] sm:$0xff]   ;;  %5240 = vmatprep.subr.bf16.mxu0 %v5481_v63  ;;  %2765 = vst.msk [vmem:[#allocation4 + $0x78] sm:$0xff] %vm2761_vm15, %v5504_v41 }
 0x1c5   : > { %v2863_v22 = vsel %vm5752_vm5, %v2858_v10, %v2862_v58  ;;  %v3332_v25 = vor.u32 %v3331_v11, %v3328_v17  ;;  %v3347_v26 = vrot.slane %v3345_v12, 5  ;;  %v2868_v6 = vrot.slane %v2867_v37, 4  ;;  %5203 = vmatpush3.bf16.msra.mxu1 %v5480_v13  ;;  %v5483_v17 = vld [vmem:[%s6982_s4 + $0x68] sm:$0xff]   ;;  %v2903_v11 = vld [vmem:[#allocation3] sm:$0xe] }
 0x1c6   : > { %v3342_v29 = vor.u32 %v3341_v18, %v3337_v24  ;;  %v3191_v30 = vrot.slane %v3156_v0, 5  ;;  %v3350_v32 = vshrl.u32 %v3274_v2, 16  ;;  %v3189_v16 = vsel %vm5743_vm4, %v4893_v33, %v3188_v28  ;;  %v2904_v12 = vld [vmem:[#allocation3 + $0x4] sm:$0xf]  ;;  %5204 = vmatprep.subr.bf16.mxu1 %v5483_v17  ;;  %v5484_v33 = vld [vmem:[%s6982_s4 + $0x28] sm:$0xff]  }
 0x1c7   : > { %3010 = vrot.lane.b32.xlu0 %v5464_v62, %s5551_s16  ;;  %v3333_v8 = vrot.slane %v3332_v25, 4  ;;  %v3190_v36 = vrot.slane %v3188_v28, 4  ;;  %v3353_v14 = vshll.u32 %v3274_v2, 16  ;;  %v2873_v38 = vsel %vm5752_vm5, %v2868_v6, %v2872_v5  ;;  %v5482_v5 = vld [vmem:[%s6982_s4 + $0x98] sm:$0xff]   ;;  %v2908_v28 = vld [vmem:[#allocation3 + $0x14] sm:$0x1] }
 0x1c8   : > { %v3343_v56 = vrot.slane %v3342_v29, 4  ;;  %v3352_v39 = vrot.slane %v3350_v32, 4  ;;  %v3359_v40 = vshll.u32 %v3275_v34, 16  ;;  %v4874_v43 = vcombine.low %v2863_v22, %v2873_v38  ;;  %5241 = vmatpush3.bf16.msra.mxu0 %v5482_v5  ;;  %v5485_v32 = vld [vmem:[%s6982_s4 + $0xe0] sm:$0xff]   ;;  %v5490_v38 = vld [vmem:[#allocation3 + $0xc] sm:$0xff]  }
 0x1c9   : > { %v3338_v48 = vsel %vm5752_vm5, %v3333_v8, %v3337_v24  ;;  %v3192_v45 = vsel %vm5743_vm4, %v3190_v36, %v3191_v30  ;;  %v3355_v49 = vrot.slane %v3353_v14, 5  ;;  %v3363_v3 = vshrl.u32 %v3275_v34, 16  ;;  %v2905_v34 = vld [vmem:[#allocation3 + $0x8] sm:$0x1]  ;;  %5205 = vmatpush3.bf16.msra.mxu1 %v5484_v33  ;;  %5242 = vmatprep.subr.bf16.mxu0 %v5485_v32  ;;  %v5487_v36 = vld [vmem:[%s6982_s4 + $0x70] sm:$0xff]   ;;  %2763 = vst.msk [vmem:[#allocation4 + $0x28] sm:$0xff] %vm2761_vm15, %v5490_v38 }
 0x1ca   : > { %v3348_v52 = vsel %vm5752_vm5, %v3343_v56, %v3347_v26  ;;  %v4897_v1 = vcombine.low %v3189_v16, %v3192_v45  ;;  %v3361_v57 = vrot.slane %v3359_v40, 5  ;;  %2892 = vrot.lane.b32.xlu1 %v4874_v43, %s5551_s16  ;;  %v3369_v60 = vshll.u32 %v3276_v50, 16  ;;  %v2907_v26 = vld [vmem:[#allocation3 + $0x10] sm:$0xf]  ;;  %v5486_v16 = vld [vmem:[%s6982_s4 + $0xa0] sm:$0xff]   ;;  %5206 = vmatprep.subr.bf16.mxu1 %v5487_v36  ;;  %v5491_v56 = vld [vmem:[%s6982_s4 + $0xe8] sm:$0xff]  }
 0x1cb   : > { %v4905_v58 = vcombine.low %v3338_v48, %v3348_v52  ;;  %v3356_v59 = vor.u32 %v3355_v49, %v3352_v39  ;;  %v4894_v42 = vrot.slane %v3157_v35, 9  ;;  %v3365_v21 = vrot.slane %v3363_v3, 4  ;;  %v5492_v39 = vld [vmem:[%s6982_s4 + $0xa8] sm:$0xff]   ;;  %v5493_v40 = vld [vmem:[%s6982_s4 + $0x78] sm:$0xff]   ;;  %v3021_v45 = vld [vmem:[#allocation3 + $0x10] sm:$0xf] }
 0x1cc   : > { %v3195_v44 = vrot.slane %v3158_v53, 5  ;;  %v3198_v27 = vrot.slane %v3159_v9, 5  ;;  %v3371_v55 = vrot.slane %v3369_v60, 5  ;;  %v4875_v37 = vrot.slane %v2903_v11, 9  ;;  %5243 = vmatpush3.bf16.msra.mxu0 %v5486_v16  ;;  %v5488_v53 = vld [vmem:[#allocation3] sm:$0xff]   ;;  %v5495_v43 = vld [vmem:[%s6982_s4 + $0x38] sm:$0xff]  }
 0x1cd   : > { %3389 = vrot.lane.b32.xlu0 %v4905_v58, %s5551_s16  ;;  %v3357_v47 = vrot.slane %v3356_v59, 4  ;;  %v3366_v62 = vor.u32 %v3365_v21, %v3361_v57  ;;  %v2929_v24 = vrot.slane %v2904_v12, 5  ;;  %v2932_v18 = vrot.slane %v2905_v34, 5  ;;  %2762 = vst.msk [vmem:[#allocation4] sm:$0xff] %vm2761_vm15, %v5488_v53  ;;  %5207 = vmatpush3.bf16.msra.mxu1 %v5489_v61  ;;  %v3020_v48 = vld [vmem:[#allocation3 + $0xc] sm:$0xf] }
 0x1ce   : > { %v3196_v31 = vsel %vm5743_vm4, %v4894_v42, %v3195_v44  ;;  %v3197_v23 = vrot.slane %v3195_v44, 4  ;;  %3216 = vrot.lane.b32.xlu1 %v4897_v1, %s5551_s16  ;;  %v4876_v6 = vrot.slane %v2906_v20, 9  ;;  %v2936_v29 = vrot.slane %v2907_v26, 5  ;;  %5244 = vmatprep.subr.bf16.mxu0 %v5491_v56  ;;  %v3022_v49 = vld [vmem:[#allocation3 + $0x14] sm:$0x1]  ;;  %v5500_v12 = vld [vmem:[%s6982_s4 + $0xf8] sm:$0xff]  }
 0x1cf   : > { %v3362_v0 = vsel %vm5752_vm5, %v3357_v47, %v3361_v57  ;;  %v3367_v2 = vrot.slane %v3366_v62, 4  ;;  %v2930_v22 = vsel %vm5743_vm4, %v4875_v37, %v2929_v24  ;;  %v2931_v25 = vrot.slane %v2929_v24, 4  ;;  %5208 = vmatprep.subr.bf16.mxu1 %v5493_v40  ;;  %v5496_v58 = vld [vmem:[%s6982_s4 + $0xf0] sm:$0xff]   ;;  %v2909_v62 = vld [vmem:[#allocation3 + $0x18] sm:$0xe] }
 0x1d0   : > { %v3199_v4 = vsel %vm5743_vm4, %v3197_v23, %v3198_v27  ;;  %v2939_v30 = vrot.slane %v2908_v28, 5  ;;  %v2937_v54 = vsel %vm5743_vm4, %v4876_v6, %v2936_v29  ;;  %v2938_v8 = vrot.slane %v2936_v29, 4  ;;  %5245 = vmatpush3.bf16.msra.mxu0 %v5492_v39  ;;  %v5497_v44 = vld [vmem:[%s6982_s4 + $0xb0] sm:$0xff]   ;;  %v2911_v23 = vld [vmem:[#allocation3 + $0x20] sm:$0x1]  ;;  %v5501_v37 = vld [vmem:[%s6982_s4 + $0xb8] sm:$0xff]  }
 0x1d1   : > { %v4898_v15 = vcombine.low %v3196_v31, %v3199_v4  ;;  %v3372_v7 = vsel %vm5752_vm5, %v3367_v2, %v3371_v55  ;;  %v2933_v50 = vsel %vm5743_vm4, %v2931_v25, %v2932_v18  ;;  %v3033_v19 = vshrl.u32 %v3020_v48, 16  ;;  %5209 = vmatpush3.bf16.msra.mxu1 %v5495_v43  ;;  %5246 = vmatprep.subr.bf16.mxu0 %v5496_v58  ;;  %v6518_v55 = vld [vmem:[%s6982_s4 + $0x100] sm:$0xff]   ;;  %v2910_v31 = vld [vmem:[#allocation3 + $0x1c] sm:$0xf]  ;;  %v3023_v33 = vld [vmem:[#allocation3 + $0x18] sm:$0xf] }
 0x1d2   : > { %v4906_v10 = vcombine.low %v3362_v0, %v3372_v7  ;;  %v4879_v35 = vcombine.low %v2930_v22, %v2933_v50  ;;  %v2940_v14 = vsel %vm5743_vm4, %v2938_v8, %v2939_v30  ;;  %v3036_v52 = vshll.u32 %v3020_v48, 16  ;;  %v5499_v0 = vld [vmem:[#allocation3 + $0x18] sm:$0xff]   ;;  %5310 = vmatprep.subr.bf16.mxu1 %v6518_v55  ;;  %v5502_v18 = vld [vmem:[#allocation3 + $0x24] sm:$0xff]   ;;  %v3025_v25 = vld [vmem:[#allocation3 + $0x20] sm:$0x1] }
 0x1d3   : > { %3218 = vrot.lane.b32.xlu1 %v4898_v15, %s5551_s16  ;;  %v4880_v9 = vcombine.low %v2937_v54, %v2940_v14  ;;  %v3042_v1 = vshll.u32 %v3021_v45, 16  ;;  %v3046_v57 = vshrl.u32 %v3021_v45, 16  ;;  %v3052_v3 = vshll.u32 %v3022_v49, 16  ;;  %2764 = vst.msk [vmem:[#allocation4 + $0x50] sm:$0xff] %vm2761_vm15, %v5499_v0  ;;  %v3024_v20 = vld [vmem:[#allocation3 + $0x1c] sm:$0xf] }
 0x1d4   : > { %3391 = vrot.lane.b32.xlu0 %v4906_v10, %s5551_s16  ;;  %2971 = vst.msk [vmem:[#allocation4 + $0x8] sm:$0xff] %vm2761_vm15, %v4879_v35  ;;  %v3035_v59 = vrot.slane %v3033_v19, 4  ;;  %v3038_v60 = vrot.slane %v3036_v52, 5  ;;  %5247 = vmatpush3.bf16.msra.mxu0 %v5497_v44  ;;  %v4877_v63 = vrot.slane %v2909_v62, 9  ;;  %v2943_v5 = vrot.slane %v2910_v31, 5  ;;  %3262 = vst.msk [vmem:[#allocation4 + $0x40] sm:$0xff] %vm2761_vm15, %v5502_v18 }
 0x1d5   : > { %2972 = vst.msk [vmem:[#allocation4 + $0x30] sm:$0xff] %vm2761_vm15, %v4880_v9  ;;  %v3044_v42 = vrot.slane %v3042_v1, 5  ;;  %v3048_v21 = vrot.slane %v3046_v57, 4  ;;  %v3054_v47 = vrot.slane %v3052_v3, 5  ;;  %v2946_v15 = vrot.slane %v2911_v23, 5  ;;  %5248 = vmatprep.subr.bf16.mxu0 %v5500_v12  ;;  %v5505_v48 = vld [vmem:[#allocation3 + $0x30] sm:$0xff]  }
 0x1d6   : > { %v3039_v27 = vor.u32 %v3038_v60, %v3035_v59  ;;  %v2944_v17 = vsel %vm5743_vm4, %v4877_v63, %v2943_v5  ;;  %v2945_v11 = vrot.slane %v2943_v5, 4  ;;  %v3057_v26 = vshrl.u32 %v3023_v33, 16  ;;  %v2912_v50 = vld [vmem:[#allocation3 + $0x24] sm:$0xe]  ;;  %v2913_v32 = vld [vmem:[#allocation3 + $0x28] sm:$0xf] }
 0x1d7   : > { %v3049_v13 = vor.u32 %v3048_v21, %v3044_v42  ;;  %v3060_v28 = vshll.u32 %v3023_v33, 16  ;;  %v3066_v6 = vshll.u32 %v3024_v20, 16  ;;  %v3070_v29 = vshrl.u32 %v3024_v20, 16  ;;  %v2914_v16 = vld [vmem:[#allocation3 + $0x2c] sm:$0x1]  ;;  %3263 = vst.msk [vmem:[#allocation4 + $0x68] sm:$0xff] %vm2761_vm15, %v5505_v48 }
 0x1d8   : > { %v3040_v2 = vrot.slane %v3039_v27, 4  ;;  %v2947_v24 = vsel %vm5743_vm4, %v2945_v11, %v2946_v15  ;;  %5249 = vmatpush3.bf16.msra.mxu0 %v5501_v37  ;;  %v3076_v30 = vshll.u32 %v3025_v25, 16  ;;  %v3059_v35 = vrot.slane %v3057_v26, 4  ;;  %v3026_v45 = vld [vmem:[#allocation3 + $0x24] sm:$0xf] }
 0x1d9   : > { %v3050_v4 = vrot.slane %v3049_v13, 4  ;;  %v4881_v22 = vcombine.low %v2944_v17, %v2947_v24  ;;  %v3062_v54 = vrot.slane %v3060_v28, 5  ;;  %v3068_v8 = vrot.slane %v3066_v6, 5  ;;  %v3027_v49 = vld [vmem:[#allocation3 + $0x28] sm:$0xf] }
 0x1da   : > { %v3045_v7 = vsel %vm5752_vm5, %v3040_v2, %v3044_v42  ;;  %v4878_v36 = vrot.slane %v2912_v50, 9  ;;  %v3072_v14 = vrot.slane %v3070_v29, 4  ;;  %v3078_v53 = vrot.slane %v3076_v30, 5  ;;  %v3028_v1 = vld [vmem:[#allocation3 + $0x2c] sm:$0x1] }
 0x1db   : > { %v3055_v10 = vsel %vm5752_vm5, %v3050_v4, %v3054_v47  ;;  %2973 = vst.msk [vmem:[#allocation4 + $0x58] sm:$0xff] %vm2761_vm15, %v4881_v22  ;;  %v2950_v9 = vrot.slane %v2913_v32, 5  ;;  %v2953_v61 = vrot.slane %v2914_v16, 5  ;;  %v3063_v38 = vor.u32 %v3062_v54, %v3059_v35  ;;  %v5507_v47 = vld [vmem:[#allocation3 + $0x3c] sm:$0xff]   ;;  %v3029_v63 = vld [vmem:[#allocation3 + $0x30] sm:$0xf] }
 0x1dc   : > { %v4887_v34 = vcombine.low %v3045_v7, %v3055_v10  ;;  %v3073_v56 = vor.u32 %v3072_v14, %v3068_v8  ;;  %v3081_v57 = vshrl.u32 %v3026_v45, 16  ;;  %v3084_v3 = vshll.u32 %v3026_v45, 16  ;;  %3264 = vst.msk [vmem:[#allocation4 + $0x90] sm:$0xff] %vm2761_vm15, %v5507_v47  ;;  %v3030_v4 = vld [vmem:[#allocation3 + $0x34] sm:$0xf] }
 0x1dd   : > { %v2951_v39 = vsel %vm5743_vm4, %v4878_v36, %v2950_v9  ;;  %v2952_v40 = vrot.slane %v2950_v9, 4  ;;  %v3064_v43 = vrot.slane %v3063_v38, 4  ;;  %v3090_v60 = vshll.u32 %v3027_v49, 16  ;;  %v3031_v5 = vld [vmem:[#allocation3 + $0x38] sm:$0x1] }
 0x1de   : > { %3144 = vst.msk [vmem:[#allocation4 + $0x10] sm:$0xff] %vm2761_vm15, %v4887_v34  ;;  %v3074_v19 = vrot.slane %v3073_v56, 4  ;;  %v3094_v42 = vshrl.u32 %v3027_v49, 16  ;;  %v3083_v44 = vrot.slane %v3081_v57, 4  ;;  %v3086_v27 = vrot.slane %v3084_v3, 5 }
 0x1df   : > { %v2954_v52 = vsel %vm5743_vm4, %v2952_v40, %v2953_v61  ;;  %v3069_v58 = vsel %vm5752_vm5, %v3064_v43, %v3068_v8  ;;  %v3100_v13 = vshll.u32 %v3028_v1, 16  ;;  %v3092_v31 = vrot.slane %v3090_v60, 5  ;;  %v3401_v22 = vld [vmem:[#allocation3 + $0x18] sm:$0xe]  ;;  %v3402_v28 = vld [vmem:[#allocation3 + $0x1c] sm:$0xf] }
 0x1e0   : > { %v4882_v59 = vcombine.low %v2951_v39, %v2954_v52  ;;  %v3079_v21 = vsel %vm5752_vm5, %v3074_v19, %v3078_v53  ;;  %v3096_v23 = vrot.slane %v3094_v42, 4  ;;  %v3087_v0 = vor.u32 %v3086_v27, %v3083_v44  ;;  %v3403_v6 = vld [vmem:[#allocation3 + $0x20] sm:$0x1]  ;;  %v3404_v54 = vld [vmem:[#allocation3 + $0x24] sm:$0xe] }
 0x1e1   : > { %v4888_v62 = vcombine.low %v3069_v58, %v3079_v21  ;;  %v3102_v2 = vrot.slane %v3100_v13, 5  ;;  %v3105_v15 = vshrl.u32 %v3029_v63, 16  ;;  %v3108_v10 = vshll.u32 %v3029_v63, 16  ;;  %v3405_v8 = vld [vmem:[#allocation3 + $0x28] sm:$0xf] }
 0x1e2   : > { %2974 = vst.msk [vmem:[#allocation4 + $0x80] sm:$0xff] %vm2761_vm15, %v4882_v59  ;;  %v3097_v7 = vor.u32 %v3096_v23, %v3092_v31  ;;  %v3114_v17 = vshll.u32 %v3030_v4, 16  ;;  %v3118_v11 = vshrl.u32 %v3030_v4, 16  ;;  %v3088_v12 = vrot.slane %v3087_v0, 4  ;;  %v3406_v14 = vld [vmem:[#allocation3 + $0x2c] sm:$0x1] }
 0x1e3   : > { %3145 = vst.msk [vmem:[#allocation4 + $0x38] sm:$0xff] %vm2761_vm15, %v4888_v62  ;;  %v3107_v34 = vrot.slane %v3105_v15, 4  ;;  %v3124_v37 = vshll.u32 %v3031_v5, 16  ;;  %v3110_v18 = vrot.slane %v3108_v10, 5  ;;  %v4907_v29 = vrot.slane %v3401_v22, 9 }
 0x1e4   : > { %v3098_v24 = vrot.slane %v3097_v7, 4  ;;  %v3116_v33 = vrot.slane %v3114_v17, 5  ;;  %v3120_v20 = vrot.slane %v3118_v11, 4  ;;  %v3093_v25 = vsel %vm5752_vm5, %v3088_v12, %v3092_v31  ;;  %v3407_v40 = vld [vmem:[#allocation3 + $0x30] sm:$0xe] }
 0x1e5   : > { %v3126_v26 = vrot.slane %v3124_v37, 5  ;;  %v3111_v50 = vor.u32 %v3110_v18, %v3107_v34  ;;  %v3427_v35 = vrot.slane %v3402_v28, 5  ;;  %v3430_v36 = vrot.slane %v3403_v6, 5  ;;  %v3408_v45 = vld [vmem:[#allocation3 + $0x34] sm:$0xf]  ;;  %v5503_v34 = vld [vmem:[%s6982_s4 + $0x108] sm:$0xff]  }
 0x1e6   : > { %v3103_v30 = vsel %vm5752_vm5, %v3098_v24, %v3102_v2  ;;  %v3121_v32 = vor.u32 %v3120_v20, %v3116_v33  ;;  %v4908_v53 = vrot.slane %v3404_v54, 9  ;;  %v3434_v9 = vrot.slane %v3405_v8, 5  ;;  %v3409_v49 = vld [vmem:[#allocation3 + $0x38] sm:$0x1]  ;;  %v3410_v3 = vld [vmem:[#allocation3 + $0x3c] sm:$0xe] }
 0x1e7   : > { %v4889_v16 = vcombine.low %v3093_v25, %v3103_v30  ;;  %v3112_v61 = vrot.slane %v3111_v50, 4  ;;  %v3428_v56 = vsel %vm5743_vm4, %v4907_v29, %v3427_v35  ;;  %v3429_v39 = vrot.slane %v3427_v35, 4  ;;  %v3411_v58 = vld [vmem:[#allocation3 + $0x40] sm:$0xf]  ;;  %v3412_v44 = vld [vmem:[#allocation3 + $0x44] sm:$0x1] }
 0x1e8   : > { %v3122_v38 = vrot.slane %v3121_v32, 4  ;;  %v3435_v41 = vsel %vm5743_vm4, %v4908_v53, %v3434_v9  ;;  %v3436_v43 = vrot.slane %v3434_v9, 4  ;;  %v3437_v48 = vrot.slane %v3406_v14, 5 }
 0x1e9   : > { %3146 = vst.msk [vmem:[#allocation4 + $0x60] sm:$0xff] %vm2761_vm15, %v4889_v16  ;;  %v3117_v19 = vsel %vm5752_vm5, %v3112_v61, %v3116_v33  ;;  %v3431_v1 = vsel %vm5743_vm4, %v3429_v39, %v3430_v36  ;;  %v4909_v57 = vrot.slane %v3407_v40, 9  ;;  %v3441_v21 = vrot.slane %v3408_v45, 5  ;;  %v5506_v33 = vld [vmem:[%s6982_s4 + $0x110] sm:$0xff]  }
 0x1ea   : > { %v3127_v52 = vsel %vm5752_vm5, %v3122_v38, %v3126_v26  ;;  %v4911_v60 = vcombine.low %v3428_v56, %v3431_v1  ;;  %v3438_v42 = vsel %vm5743_vm4, %v3436_v43, %v3437_v48  ;;  %v3444_v13 = vrot.slane %v3409_v49, 5  ;;  %v5508_v26 = vld [vmem:[%s6982_s4 + $0x118] sm:$0xff]  }
 0x1eb   : > { %v4890_v59 = vcombine.low %v3117_v19, %v3127_v52  ;;  %v4912_v27 = vcombine.low %v3435_v41, %v3438_v42  ;;  %v4910_v47 = vrot.slane %v3410_v3, 9  ;;  %v3448_v62 = vrot.slane %v3411_v58, 5 }
 0x1ec   : > { %3469 = vst.msk [vmem:[#allocation4 + $0x20] sm:$0xff] %vm2761_vm15, %v4911_v60  ;;  %v3442_v51 = vsel %vm5743_vm4, %v4909_v57, %v3441_v21  ;;  %v3443_v31 = vrot.slane %v3441_v21, 4  ;;  %v3451_v23 = vrot.slane %v3412_v44, 5  ;;  %vm2898_vm0 = vcmask 1048064  }
 0x1ed   : > { %3147 = vst.msk [vmem:[#allocation4 + $0x88] sm:$0xff] %vm2761_vm15, %v4890_v59  ;;  %3470 = vst.msk [vmem:[#allocation4 + $0x48] sm:$0xff] %vm2761_vm15, %v4912_v27  ;;  %v3449_v63 = vsel %vm5743_vm4, %v4910_v47, %v3448_v62  ;;  %v3450_v0 = vrot.slane %v3448_v62, 4  ;;  %vm4260_vm1 = vcmask 1041409   ;;  %vm4262_vm2 = vcmask 1042434  }
 0x1ee   : > { %v3445_v2 = vsel %vm5743_vm4, %v3443_v31, %v3444_v13  ;;  %vm4264_vm3 = vcmask 1043459   ;;  %vm4268_vm5 = vcmask 1045509   ;;  %vm4270_vm6 = vcmask 1046534  }
 0x1ef   : > { %v4913_v4 = vcombine.low %v3442_v51, %v3445_v2  ;;  %v3452_v5 = vsel %vm5743_vm4, %v3450_v0, %v3451_v23  ;;  %vm4266_vm4 = vcmask 1044484   ;;  %vm4272_vm7 = vcmask 1047559  }
 0x1f0   : > { %v4914_v15 = vcombine.low %v3449_v63, %v3452_v5 }
 0x1f1   : > { %3471 = vst.msk [vmem:[#allocation4 + $0x70] sm:$0xff] %vm2761_vm15, %v4913_v4 }
 0x1f2   : > { %3472 = vst.msk [vmem:[#allocation4 + $0x98] sm:$0xff] %vm2761_vm15, %v4914_v15 }
 0x1f3   : > { %v3477_v53 = vld [vmem:[#allocation4 + $0x20] sm:$0xff] }
 0x1f4   : > { %v3482_v40 = vld [vmem:[#allocation4 + $0x48] sm:$0xff] }
 0x1f8   : > { %v3487_v41 = vld [vmem:[#allocation4 + $0x70] sm:$0xff] }
 0x1f9   : > { %v3492_v45 = vld [vmem:[#allocation4 + $0x98] sm:$0xff] }
 0x217   : > { %v3005_v7 = vpop.permute.xlu0 %3004  ;;  %v3007_v10 = vpop.permute.xlu1 %3006 }
 0x218   : > { %3016 = vst.msk [vmem:[#allocation4 + $0x8] sm:$0xff] %vm2898_vm0, %v3005_v7  ;;  %3017 = vst.msk [vmem:[#allocation4 + $0x30] sm:$0xff] %vm2898_vm0, %v3007_v10 }
 0x21f   : > { %v3474_v17 = vld [vmem:[#allocation4 + $0x8] sm:$0xff]  ;;  %v3479_v46 = vld [vmem:[#allocation4 + $0x30] sm:$0xff] }
 0x220   : > { %3825 = vmatprep.mubr.bf16.mxu1 %v3474_v17 }
 0x223   : > { %v2887_v11 = vpop.permute.xlu0 %2886 }
 0x224   : > { %2899 = vst.msk [vmem:[#allocation4] sm:$0xff] %vm2898_vm0, %v2887_v11 }
 0x227   : > { %v2889_v12 = vpop.permute.xlu1 %2888 }
 0x228   : > { %2900 = vst.msk [vmem:[#allocation4 + $0x28] sm:$0xff] %vm2898_vm0, %v2889_v12 }
 0x22b   : > { %v3386_v37 = vpop.permute.xlu0 %3385  ;;  %v3213_v24 = vpop.permute.xlu1 %3212  ;;  %v3473_v18 = vld [vmem:[#allocation4] sm:$0xff] }
 0x22c   : > { %3397 = vst.msk [vmem:[#allocation4 + $0x18] sm:$0xff] %vm2898_vm0, %v3386_v37  ;;  %3224 = vst.msk [vmem:[#allocation4 + $0x10] sm:$0xff] %vm2898_vm0, %v3213_v24  ;;  %3826 = vmatmul.mubr.bf16.vlgmr.msra.gmra.mrb[48].mxu1 %v3473_v18  ;;  %v5552_v24 = vmov 1983009808  }
 0x22d   : > { %5311 = vmatpush3.bf16.msra.mxu1 %v6518_v55  ;;  %3833 = vmatprep.mubr.bf16.mxu1 %v3479_v46  ;;  %v3998_v18 = vunpack.c.l.s4 %v5552_v24 }
 0x22e   : > { %5312 = vmatprep.subr.bf16.mxu1 %v5503_v34 }
 0x22f   : > { %v3009_v20 = vpop.permute.xlu0 %3008  ;;  %v3478_v22 = vld [vmem:[#allocation4 + $0x28] sm:$0xff] }
 0x230   : > { %3018 = vst.msk [vmem:[#allocation4 + $0x58] sm:$0xff] %vm2898_vm0, %v3009_v20 }
 0x231   : > { %5313 = vmatpush3.bf16.msra.mxu1 %v5503_v34  ;;  %v2891_v25 = vpop.permute.xlu1 %2890 }
 0x232   : > { %5314 = vmatprep.subr.bf16.mxu1 %v5506_v33  ;;  %2901 = vst.msk [vmem:[#allocation4 + $0x50] sm:$0xff] %vm2898_vm0, %v2891_v25 }
 0x233   : > { %v3476_v55 = vld [vmem:[#allocation4 + $0x18] sm:$0xff]  ;;  %v3475_v28 = vld [vmem:[#allocation4 + $0x10] sm:$0xff] }
 0x234   : > { %3890 = vmatprep.mubr.bf16.mxu0 %v3476_v55  ;;  %3834 = vmatmul.mubr.bf16.gmra.mrb[52].mxu1 %v3478_v22 }
 0x235   : > { %v3388_v6 = vpop.permute.xlu0 %3387  ;;  %3891 = vmatmul.mubr.bf16.vlgmr.msra.gmra.mrb[60].mxu0 %v3475_v28  ;;  %5315 = vmatpush3.bf16.msra.mxu1 %v5506_v33  ;;  %v3215_v29 = vpop.permute.xlu1 %3214  ;;  %v4000_v33 = vlaneseq }
 0x236   : > { %3398 = vst.msk [vmem:[#allocation4 + $0x40] sm:$0xff] %vm2898_vm0, %v3388_v6  ;;  %5316 = vmatprep.subr.bf16.mxu1 %v5508_v26  ;;  %3225 = vst.msk [vmem:[#allocation4 + $0x38] sm:$0xff] %vm2898_vm0, %v3215_v29  ;;  %v3999_v6 = vunpack.c.0.s8 %v3998_v18 }
 0x237   : > { %v3484_v30 = vld [vmem:[#allocation4 + $0x58] sm:$0xff]  ;;  %v4001_v29 = vshrl.u32 %v4000_v33, 7 }
 0x238   : > { %3841 = vmatprep.mubr.bf16.mxu1 %v3484_v30 }
 0x239   : > { %v3011_v50 = vpop.permute.xlu0 %3010  ;;  %5317 = vmatpush3.bf16.msra.mxu1 %v5508_v26  ;;  %v3483_v32 = vld [vmem:[#allocation4 + $0x50] sm:$0xff] }
 0x23a   : > { %3019 = vst.msk [vmem:[#allocation4 + $0x80] sm:$0xff] %vm2898_vm0, %v3011_v50 }
 0x23c   : > { %3842 = vmatmul.mubr.bf16.gmra.mrb[56].mxu1 %v3483_v32  ;;  %v2893_v35 = vpop.permute.xlu1 %2892 }
 0x23d   : > { %v3481_v54 = vld [vmem:[#allocation4 + $0x40] sm:$0xff]  ;;  %2902 = vst.msk [vmem:[#allocation4 + $0x78] sm:$0xff] %vm2898_vm0, %v2893_v35  ;;  %v3480_v8 = vld [vmem:[#allocation4 + $0x38] sm:$0xff] }
 0x23e   : > { %3898 = vmatprep.mubr.bf16.mxu0 %v3481_v54 }
 0x23f   : > { %v3390_v16 = vpop.permute.xlu0 %3389  ;;  %3899 = vmatmul.mubr.bf16.gmra.mrb[64].mxu0 %v3480_v8 }
 0x240   : > { %3399 = vst.msk [vmem:[#allocation4 + $0x68] sm:$0xff] %vm2898_vm0, %v3390_v16  ;;  %v3217_v36 = vpop.permute.xlu1 %3216  ;;  %v6616_v16 = vsub.s32 %v3999_v6, %v4001_v29 }
 0x241   : > { %v3489_v14 = vld [vmem:[#allocation4 + $0x80] sm:$0xff]  ;;  %3226 = vst.msk [vmem:[#allocation4 + $0x60] sm:$0xff] %vm2898_vm0, %v3217_v36 }
 0x242   : > { %3849 = vmatprep.mubr.bf16.mxu1 %v3489_v14 }
 0x244   : > { %v3488_v61 = vld [vmem:[#allocation4 + $0x78] sm:$0xff] }
 0x245   : > { %v3219_v9 = vpop.permute.xlu1 %3218  ;;  %3850 = vmatmul.mubr.bf16.gmra.mrb[60].mxu1 %v3488_v61  ;;  %v6618_v61 = vsub.s32 0, %v4001_v29 }
 0x246   : > { %3227 = vst.msk [vmem:[#allocation4 + $0x88] sm:$0xff] %vm2898_vm0, %v3219_v9  ;;  %v3392_v38 = vpop.permute.xlu0 %3391  ;;  %5318 = vmatprep.mubr.msk.bf16.mxu1 %vm2761_vm15, %v3477_v53 }
 0x247   : > { %v3486_v56 = vld [vmem:[#allocation4 + $0x68] sm:$0xff]  ;;  %3400 = vst.msk [vmem:[#allocation4 + $0x90] sm:$0xff] %vm2898_vm0, %v3392_v38  ;;  %v6620_v38 = vsub.s32 1, %v4001_v29 }
 0x248   : > { %3906 = vmatprep.mubr.bf16.mxu0 %v3486_v56  ;;  %v3485_v39 = vld [vmem:[#allocation4 + $0x60] sm:$0xff] }
 0x249   : > { %3907 = vmatmul.mubr.bf16.gmra.mrb[68].mxu0 %v3485_v39 }
 0x24d   : > { %5319 = vmatmul.mubr.msk.bf16.vlgmr.msra.gmra.mrb[64].mxu1 %vm2761_vm15, %v3482_v40  ;;  %v3490_v48 = vld [vmem:[#allocation4 + $0x88] sm:$0xff] }
 0x24e   : > { %v3491_v43 = vld [vmem:[#allocation4 + $0x90] sm:$0xff]  ;;  %5322 = vmatprep.mubr.msk.bf16.mxu1 %vm2761_vm15, %v3487_v41 }
 0x24f   : > { %3914 = vmatprep.mubr.bf16.mxu0 %v3491_v43 }
 0x251   : > { %3915 = vmatmul.mubr.bf16.gmra.mrb[72].mxu0 %v3490_v48 }
 0x255   : > { %5323 = vmatmul.mubr.msk.bf16.gmra.mrb[68].mxu1 %vm2761_vm15, %v3492_v45 }
 0x2ff   : > { %v5210_v49 = vpop.f32.mrb[48].mxu1 }
 0x300   : > { %v5211_v19 = vpop.f32.mrb[49].mxu1 }
 0x301   : > { %v5212_v52 = vadd.f32 %v5211_v19, %v5210_v49  ;;  %v5213_v1 = vpop.f32.mrb[50].mxu1 }
 0x302   : > { %v5214_v57 = vpop.f32.mrb[51].mxu1 }
 0x303   : > { %v5215_v3 = vadd.f32 %v5214_v57, %v5213_v1 }
 0x307   : > { %v5216_v58 = vpop.f32.mrb[52].mxu1 }
 0x308   : > { %v5250_v59 = vpop.f32.mrb[60].mxu0  ;;  %v5217_v60 = vpop.f32.mrb[53].mxu1 }
 0x309   : > { %v5251_v42 = vpop.f32.mrb[61].mxu0  ;;  %v5218_v21 = vadd.f32 %v5217_v60, %v5216_v58  ;;  %v5219_v44 = vpop.f32.mrb[54].mxu1 }
 0x30a   : > { %v5252_v27 = vadd.f32 %v5251_v42, %v5250_v59  ;;  %v5253_v13 = vpop.f32.mrb[62].mxu0  ;;  %v5220_v47 = vpop.f32.mrb[55].mxu1 }
 0x30b   : > { %v5254_v62 = vpop.f32.mrb[63].mxu0  ;;  %v5221_v51 = vadd.f32 %v5220_v47, %v5219_v44 }
 0x30c   : > { %v5255_v31 = vadd.f32 %v5254_v62, %v5253_v13  ;;  %v3893_v23 = vadd.f32 %v5252_v27, %v5212_v52 }
 0x30e   : > { %v3896_v63 = vadd.f32 %v5255_v31, %v5215_v3 }
 0x30f   : > { %v5222_v0 = vpop.f32.mrb[56].mxu1 }
 0x310   : > { %v5223_v2 = vpop.f32.mrb[57].mxu1 }
 0x311   : > { %v5224_v4 = vadd.f32 %v5223_v2, %v5222_v0  ;;  %v5225_v5 = vpop.f32.mrb[58].mxu1 }
 0x312   : > { %v5256_v15 = vpop.f32.mrb[64].mxu0  ;;  %v5226_v7 = vpop.f32.mrb[59].mxu1 }
 0x313   : > { %v5257_v10 = vpop.f32.mrb[65].mxu0  ;;  %v5227_v17 = vadd.f32 %v5226_v7, %v5225_v5 }
 0x314   : > { %v5258_v11 = vadd.f32 %v5257_v10, %v5256_v15  ;;  %v5259_v12 = vpop.f32.mrb[66].mxu0 }
 0x315   : > { %v5260_v46 = vpop.f32.mrb[67].mxu0 }
 0x316   : > { %v5261_v34 = vadd.f32 %v5260_v46, %v5259_v12  ;;  %v3901_v37 = vadd.f32 %v5258_v11, %v5218_v21 }
 0x318   : > { %v3904_v20 = vadd.f32 %v5261_v34, %v5221_v51  ;;  %v5228_v22 = vpop.f32.mrb[60].mxu1 }
 0x319   : > { %v5229_v25 = vpop.f32.mrb[61].mxu1 }
 0x31a   : > { %v6612_v26 = vadd.f32 %v5229_v25, %v5228_v22  ;;  %v5231_v55 = vpop.f32.mrb[62].mxu1 }
 0x31b   : > { %v5232_v28 = vpop.f32.mrb[63].mxu1 }
 0x31c   : > { %v5262_v30 = vpop.f32.mrb[68].mxu0  ;;  %v6614_v50 = vadd.f32 %v5232_v28, %v5231_v55 }
 0x31d   : > { %v5263_v32 = vpop.f32.mrb[69].mxu0 }
 0x31e   : > { %v5264_v35 = vadd.f32 %v5263_v32, %v5262_v30  ;;  %v5265_v54 = vpop.f32.mrb[70].mxu0 }
 0x31f   : > { %v5266_v8 = vpop.f32.mrb[71].mxu0 }
 0x320   : > { %v5267_v36 = vadd.f32 %v5266_v8, %v5265_v54  ;;  %v5320_v14 = vpop.f32.mrb[64].mxu1  ;;  %v3909_v53 = vadd.f32 %v5264_v35, %v5224_v4 }
 0x321   : > { %v3966_v9 = vadd.f32 %v5320_v14, %v3901_v37  ;;  %v3957_v56 = vpop.f32.mrb[65].mxu1 }
 0x322   : > { %v3958_v39 = vadd.f32 %v3957_v56, %v3893_v23  ;;  %v5321_v40 = vpop.f32.mrb[66].mxu1  ;;  %v6622_v41 = vadd.f32 %v5267_v36, %v5227_v17 }
 0x323   : > { %v4030_v43 = vcombine.high %v3966_v9, %v3966_v9  ;;  %v4037_v48 = vrot.slane %v3966_v9, %v6616_v16  ;;  %v3969_v45 = vadd.f32 %v5321_v40, %v3904_v20  ;;  %v3960_v49 = vpop.f32.mrb[67].mxu1 }
 0x324   : > { %v5268_v19 = vpop.f32.mrb[72].mxu0  ;;  %v3996_v52 = vcombine.high %v3958_v39, %v3958_v39  ;;  %v4003_v1 = vrot.slane %v3958_v39, %v6616_v16  ;;  %v3961_v57 = vadd.f32 %v3960_v49, %v3896_v63 }
 0x325   : > { %v5269_v3 = vpop.f32.mrb[73].mxu0  ;;  %v6627_v58 = vrot.slane %v4030_v43, %v6616_v16  ;;  %v4045_v59 = vcombine.high %v4037_v48, %v4037_v48  ;;  %v4167_v60 = vrot.slane %v4037_v48, %v6618_v61  ;;  %v4334_v42 = vrot.slane %v4037_v48, %v6620_v38 }
 0x326   : > { %v5270_v21 = vadd.f32 %v5269_v3, %v5268_v19  ;;  %v5271_v44 = vpop.f32.mrb[74].mxu0  ;;  %v6632_v27 = vrot.slane %v3996_v52, %v6616_v16  ;;  %v4011_v13 = vcombine.high %v4003_v1, %v4003_v1  ;;  %v4135_v47 = vrot.slane %v4003_v1, %v6618_v61 }
 0x327   : > { %v5272_v62 = vpop.f32.mrb[75].mxu0  ;;  %v6637_v51 = vcombine.high %v6627_v58, %v6627_v58  ;;  %v4171_v31 = vrot.slane %v4045_v59, %v6618_v61  ;;  %v4175_v23 = vrot.slane %v6627_v58, %v6618_v61  ;;  %v4338_v63 = vrot.slane %v4045_v59, %v6620_v38 }
 0x328   : > { %v5273_v0 = vadd.f32 %v5272_v62, %v5271_v44  ;;  %v4342_v2 = vrot.slane %v6627_v58, %v6620_v38  ;;  %v6647_v4 = vcombine.high %v6632_v27, %v6632_v27  ;;  %v4139_v5 = vrot.slane %v4011_v13, %v6618_v61  ;;  %v5324_v15 = vpop.f32.mrb[68].mxu1 }
 0x329   : > { %v4179_v7 = vrot.slane %v6637_v51, %v6618_v61  ;;  %v4274_v10 = vsel %vm4260_vm1, %v4171_v31, %v4167_v60  ;;  %v4346_v17 = vrot.slane %v6637_v51, %v6620_v38  ;;  %v6656_v11 = vsel %vm4260_vm1, %v4338_v63, %v4334_v42  ;;  %v3973_v12 = vpop.f32.mrb[69].mxu1 }
 0x32a   : > { %v6659_v46 = vsel %vm4262_vm2, %v4175_v23, %v4274_v10  ;;  %v4143_v34 = vrot.slane %v6632_v27, %v6618_v61  ;;  %v4147_v37 = vrot.slane %v6647_v4, %v6618_v61  ;;  %v4261_v24 = vsel %vm4260_vm1, %v4139_v5, %v4135_v47  ;;  %v6666_v18 = vpop.f32.mrb[70].mxu1 }
 0x32b   : > { %v4302_v33 = vrot.slane %v4003_v1, %v6620_v38  ;;  %v4306_v20 = vrot.slane %v4011_v13, %v6620_v38  ;;  %v4310_v22 = vrot.slane %v6632_v27, %v6620_v38  ;;  %v4314_v25 = vrot.slane %v6647_v4, %v6620_v38  ;;  %v3976_v55 = vpop.f32.mrb[71].mxu1 }
 0x32c   : > { %v6675_v28 = vsel %vm4262_vm2, %v4143_v34, %v4261_v24  ;;  %v4047_v6 = vcombine.high %v3969_v45, %v3969_v45  ;;  %v6678_v29 = vrot.slane %v3969_v45, %v6616_v16  ;;  %v4013_v30 = vcombine.high %v3961_v57, %v3961_v57 }
 0x32d   : > { %v6681_v32 = vsel %vm4260_vm1, %v4306_v20, %v4302_v33  ;;  %v6684_v35 = vrot.slane %v3961_v57, %v6616_v16  ;;  %v3917_v54 = vadd.f32 %v5270_v21, %v6612_v26  ;;  %v3974_v8 = vadd.f32 %v3973_v12, %v3909_v53 }
 0x32e   : > { %v6688_v36 = vrot.slane %v4047_v6, %v6616_v16  ;;  %v6692_v14 = vcombine.high %v6678_v29, %v6678_v29  ;;  %v4183_v9 = vrot.slane %v6678_v29, %v6618_v61  ;;  %v4350_v56 = vrot.slane %v6678_v29, %v6620_v38 }
 0x32f   : > { %v6699_v39 = vrot.slane %v4013_v30, %v6616_v16  ;;  %v6703_v26 = vcombine.high %v6684_v35, %v6684_v35  ;;  %v4151_v53 = vrot.slane %v6684_v35, %v6618_v61  ;;  %v4318_v40 = vrot.slane %v6684_v35, %v6620_v38 }
 0x330   : > { %v4187_v43 = vrot.slane %v6692_v14, %v6618_v61  ;;  %v4191_v48 = vrot.slane %v6688_v36, %v6618_v61  ;;  %v4354_v45 = vrot.slane %v6692_v14, %v6620_v38  ;;  %v3982_v49 = vadd.f32 %v5324_v15, %v3917_v54 }
 0x331   : > { %v4155_v19 = vrot.slane %v6703_v26, %v6618_v61  ;;  %v4159_v52 = vrot.slane %v6699_v39, %v6618_v61  ;;  %v4322_v1 = vrot.slane %v6703_v26, %v6620_v38  ;;  %v4064_v57 = vcombine.high %v3974_v8, %v3974_v8 }
 0x332   : > { %v4098_v3 = vcombine.high %v3982_v49, %v3982_v49  ;;  %v4105_v59 = vrot.slane %v3982_v49, %v6616_v16  ;;  %v4071_v60 = vrot.slane %v3974_v8, %v6616_v16  ;;  %v3920_v42 = vadd.f32 %v5273_v0, %v6614_v50 }
 0x333   : > { %v6725_v21 = vrot.slane %v4064_v57, %v6616_v16  ;;  %v3977_v44 = vadd.f32 %v3976_v55, %v6622_v41  ;;  %v6730_v13 = vcombine.high %v6688_v36, %v6688_v36  ;;  %v4358_v47 = vrot.slane %v6688_v36, %v6620_v38 }
 0x334   : > { %v6735_v62 = vrot.slane %v4098_v3, %v6616_v16  ;;  %v4113_v31 = vcombine.high %v4105_v59, %v4105_v59  ;;  %v4231_v23 = vrot.slane %v4105_v59, %v6618_v61  ;;  %v4398_v50 = vrot.slane %v4105_v59, %v6620_v38 }
 0x335   : > { %v4079_v63 = vcombine.high %v4071_v60, %v4071_v60  ;;  %v6741_v41 = vcombine.high %v6725_v21, %v6725_v21  ;;  %v4199_v0 = vrot.slane %v4071_v60, %v6618_v61  ;;  %v4207_v5 = vrot.slane %v6725_v21, %v6618_v61 }
 0x336   : > { %v6748_v15 = vcombine.high %v6735_v62, %v6735_v62  ;;  %v4235_v10 = vrot.slane %v4113_v31, %v6618_v61  ;;  %v4239_v12 = vrot.slane %v6735_v62, %v6618_v61  ;;  %v4402_v34 = vrot.slane %v4113_v31, %v6620_v38 }
 0x337   : > { %v4406_v24 = vrot.slane %v6735_v62, %v6620_v38  ;;  %v4203_v33 = vrot.slane %v4079_v63, %v6618_v61  ;;  %v4211_v20 = vrot.slane %v6741_v41, %v6618_v61  ;;  %v4366_v55 = vrot.slane %v4071_v60, %v6620_v38 }
 0x338   : > { %v4243_v6 = vrot.slane %v6748_v15, %v6618_v61  ;;  %v4288_v30 = vsel %vm4260_vm1, %v4235_v10, %v4231_v23  ;;  %v4410_v54 = vrot.slane %v6748_v15, %v6620_v38  ;;  %v4448_v8 = vsel %vm4260_vm1, %v4402_v34, %v4398_v50 }
 0x339   : > { %v6767_v49 = vsel %vm4262_vm2, %v4239_v12, %v4288_v30  ;;  %v4281_v57 = vsel %vm4260_vm1, %v4203_v33, %v4199_v0  ;;  %v4370_v3 = vrot.slane %v4079_v63, %v6620_v38  ;;  %v4374_v59 = vrot.slane %v6725_v21, %v6620_v38 }
 0x33a   : > { %v6774_v60 = vsel %vm4262_vm2, %v4207_v5, %v4281_v57  ;;  %v4378_v62 = vrot.slane %v6741_v41, %v6620_v38  ;;  %v3985_v31 = vadd.f32 %v6666_v18, %v3920_v42  ;;  %v4081_v23 = vcombine.high %v3977_v44, %v3977_v44  ;;  %v4955_v41 = vld [vmem:[%s6983_s5] ss:$0 sm:$0xff] }
 0x33b   : > { %v4441_v50 = vsel %vm4260_vm1, %v4370_v3, %v4366_v55  ;;  %v6781_v10 = vrot.slane %v3977_v44, %v6616_v16  ;;  %v4362_v63 = vrot.slane %v6730_v13, %v6620_v38  ;;  %v4435_v21 = vsel %vm4262_vm2, %v4342_v2, %v6656_v11 }
 0x33c   : > { %v4115_v0 = vcombine.high %v3985_v31, %v3985_v31  ;;  %v6791_v5 = vrot.slane %v3985_v31, %v6616_v16  ;;  %v6794_v18 = vrot.slane %v4081_v23, %v6616_v16  ;;  %v4436_v42 = vsel %vm4264_vm3, %v4346_v17, %v4435_v21 }
 0x33d   : > { %v6802_v44 = vcombine.high %v6781_v10, %v6781_v10  ;;  %v4215_v58 = vrot.slane %v6781_v10, %v6618_v61  ;;  %v4382_v2 = vrot.slane %v6781_v10, %v6620_v38  ;;  %v4437_v11 = vsel %vm4266_vm4, %v4350_v56, %v4436_v42 }
 0x33e   : > { %v6813_v12 = vrot.slane %v4115_v0, %v6616_v16  ;;  %v4130_v17 = vcombine.high %v6791_v5, %v6791_v5  ;;  %v4247_v34 = vrot.slane %v6791_v5, %v6618_v61  ;;  %v4414_v33 = vrot.slane %v6791_v5, %v6620_v38 }
 0x33f   : > { %v4219_v55 = vrot.slane %v6802_v44, %v6618_v61  ;;  %v4223_v30 = vrot.slane %v6794_v18, %v6618_v61  ;;  %v4386_v56 = vrot.slane %v6802_v44, %v6620_v38  ;;  %v4438_v16 = vsel %vm4268_vm5, %v4354_v45, %v4437_v11 }
 0x340   : > { %v4251_v57 = vrot.slane %v4130_v17, %v6618_v61  ;;  %v4255_v3 = vrot.slane %v6813_v12, %v6618_v61  ;;  %v4418_v31 = vrot.slane %v4130_v17, %v6620_v38  ;;  %v4439_v23 = vsel %vm4270_vm6, %v4358_v47, %v4438_v16 }
 0x341   : > { %v4440_v21 = vsel %vm4272_vm7, %v4362_v63, %v4439_v23  ;;  %v4029_v0 = vcombine.high %v6699_v39, %v6699_v39  ;;  %v4326_v5 = vrot.slane %v6699_v39, %v6620_v38  ;;  %v4428_v45 = vsel %vm4262_vm2, %v4310_v22, %v6681_v32 }
 0x342   : > { %4457 = vrot.lane.b32.xlu1 %v4440_v21, %s5551_s16  ;;  %v4429_v47 = vsel %vm4264_vm3, %v4314_v25, %v4428_v45  ;;  %v4131_v63 = vcombine.high %v6813_v12, %v6813_v12  ;;  %v4422_v42 = vrot.slane %v6813_v12, %v6620_v38  ;;  %v4449_v44 = vsel %vm4262_vm2, %v4406_v24, %v4448_v8 }
 0x343   : > { %v4330_v11 = vrot.slane %v4029_v0, %v6620_v38  ;;  %v4430_v27 = vsel %vm4266_vm4, %v4318_v40, %v4429_v47  ;;  %v4450_v22 = vsel %vm4264_vm3, %v4410_v54, %v4449_v44  ;;  %v4097_v25 = vcombine.high %v6794_v18, %v6794_v18 }
 0x344   : > { %v4431_v32 = vsel %vm4268_vm5, %v4322_v1, %v4430_v27  ;;  %v4426_v12 = vrot.slane %v4131_v63, %v6620_v38  ;;  %v4451_v24 = vsel %vm4266_vm4, %v4414_v33, %v4450_v22  ;;  %v4390_v8 = vrot.slane %v6794_v18, %v6620_v38 }
 0x345   : > { %v4432_v17 = vsel %vm4270_vm6, %v4326_v5, %v4431_v32  ;;  %v4452_v40 = vsel %vm4268_vm5, %v4418_v31, %v4451_v24  ;;  %v4394_v54 = vrot.slane %v4097_v25, %v6620_v38  ;;  %v4442_v16 = vsel %vm4262_vm2, %v4374_v59, %v4441_v50 }
 0x346   : > { %v4433_v23 = vsel %vm4272_vm7, %v4330_v11, %v4432_v17  ;;  %v4453_v21 = vsel %vm4270_vm6, %v4422_v42, %v4452_v40  ;;  %v4443_v1 = vsel %vm4264_vm3, %v4378_v62, %v4442_v16  ;;  %v4195_v33 = vrot.slane %v6730_v13, %v6618_v61 }
 0x347   : > { %4455 = vrot.lane.b32.xlu0 %v4433_v23, %s5551_s16  ;;  %v4454_v18 = vsel %vm4272_vm7, %v4426_v12, %v4453_v21  ;;  %v4444_v5 = vsel %vm4266_vm4, %v4382_v2, %v4443_v1  ;;  %v4276_v38 = vsel %vm4264_vm3, %v4179_v7, %v6659_v46  ;;  %v4163_v59 = vrot.slane %v4029_v0, %v6618_v61 }
 0x348   : > { %4461 = vrot.lane.b32.xlu1 %v4454_v18, %s5551_s16  ;;  %v4445_v62 = vsel %vm4268_vm5, %v4386_v56, %v4444_v5  ;;  %v4277_v13 = vsel %vm4266_vm4, %v4183_v9, %v4276_v38  ;;  %v4265_v50 = vsel %vm4264_vm3, %v4147_v37, %v6675_v28  ;;  %v4259_v51 = vrot.slane %v4131_v63, %v6618_v61 }
 0x349   : > { %v4446_v7 = vsel %vm4270_vm6, %v4390_v8, %v4445_v62  ;;  %v4278_v46 = vsel %vm4268_vm5, %v4187_v43, %v4277_v13  ;;  %v4267_v29 = vsel %vm4266_vm4, %v4151_v53, %v4265_v50  ;;  %v4290_v4 = vsel %vm4264_vm3, %v4243_v6, %v6767_v49 }
 0x34a   : > { %v4447_v37 = vsel %vm4272_vm7, %v4394_v54, %v4446_v7  ;;  %v4279_v28 = vsel %vm4270_vm6, %v4191_v48, %v4278_v46  ;;  %v4269_v35 = vsel %vm4268_vm5, %v4155_v19, %v4267_v29  ;;  %v4291_v14 = vsel %vm4266_vm4, %v4247_v34, %v4290_v4 }
 0x34b   : > { %4459 = vrot.lane.b32.xlu0 %v4447_v37, %s5551_s16  ;;  %v4280_v9 = vsel %vm4272_vm7, %v4195_v33, %v4279_v28  ;;  %v4271_v53 = vsel %vm4270_vm6, %v4159_v52, %v4269_v35  ;;  %v4292_v36 = vsel %vm4268_vm5, %v4251_v57, %v4291_v14  ;;  %v4227_v43 = vrot.slane %v4097_v25, %v6618_v61 }
 0x34c   : > { %v4273_v48 = vsel %vm4272_vm7, %v4163_v59, %v4271_v53  ;;  %v4293_v26 = vsel %vm4270_vm6, %v4255_v3, %v4292_v36  ;;  %v4283_v19 = vsel %vm4264_vm3, %v4211_v20, %v6774_v60  ;;  %v4956_v20 = vld [vmem:[%s6984_s6] ss:$0 sm:$0xff] }
 0x34d   : > { %v4294_v15 = vsel %vm4272_vm7, %v4259_v51, %v4293_v26  ;;  %v4284_v39 = vsel %vm4266_vm4, %v4215_v58, %v4283_v19 }
 0x34e   : > { %v4285_v52 = vsel %vm4268_vm5, %v4219_v55, %v4284_v39 }
 0x34f   : > { %v4286_v6 = vsel %vm4270_vm6, %v4223_v30, %v4285_v52 }
 0x350   : > { %v4287_v49 = vsel %vm4272_vm7, %v4227_v43, %v4286_v6 }
 0x3b4   : > { %v4458_v2 = vpop.permute.xlu1 %4457 }
 0x3b5   : > { %v4468_v61 = vsel %vm2761_vm15, %v4280_v9, %v4458_v2 }
 0x3b6   : > { %v4479_v60 = vmul.f32 %v4955_v41, %v4468_v61 }
 0x3b8   : > { %v4490_v10 = vadd.f32 %v4956_v20, %v4479_v60 }
 0x3b9   : > { %v4456_v58 = vpop.permute.xlu0 %4455 }
 0x3ba   : > { %v4494_v34 = vmax.f32 %v4490_v10, 0.0  ;;  %v4467_v55 = vsel %vm2761_vm15, %v4273_v48, %v4456_v58  ;;  %v4462_v30 = vpop.permute.xlu1 %4461 }
 0x3bb   : > { %v4478_v56 = vmul.f32 %v4955_v41, %v4467_v55  ;;  %v4470_v57 = vsel %vm2761_vm15, %v4294_v15, %v4462_v30 }
 0x3bc   : > { %4498 = vst [vmem:[%s5662_s19 + $0x8] sm:$0xff] %v4494_v34  ;;  %v4481_v3 = vmul.f32 %v4955_v41, %v4470_v57 }
 0x3bd   : > { %v4489_v31 = vadd.f32 %v4956_v20, %v4478_v56  ;;  %v4460_v0 = vpop.permute.xlu0 %4459 }
 0x3be   : > { %v4492_v45 = vadd.f32 %v4956_v20, %v4481_v3  ;;  %v4469_v47 = vsel %vm2761_vm15, %v4287_v49, %v4460_v0 }
 0x3bf   : > { %v4493_v63 = vmax.f32 %v4489_v31, 0.0  ;;  %v4480_v42 = vmul.f32 %v4955_v41, %v4469_v47 }
 0x3c0   : > { %v4496_v44 = vmax.f32 %v4492_v45, 0.0 }
 0x3c1   : > { %4497 = vst [vmem:[%s5662_s19] sm:$0xff] %v4493_v63  ;;  %v4491_v11 = vadd.f32 %v4956_v20, %v4480_v42 }
 0x3c2   : > { %4500 = vst [vmem:[%s5662_s19 + $0x18] sm:$0xff] %v4496_v44 }
 0x3c3   : > { %v4495_v27 = vmax.f32 %v4491_v11, 0.0 }
 0x3c5   : > { %4499 = vst [vmem:[%s5662_s19 + $0x10] sm:$0xff] %v4495_v27 }
 0x3c6 PF: > { %s17_s28 = sadd.s32 1, %s5547_s28   ;;  %s6998_s24 = smov %s5539_s26 }
 0x3c7   : > { %p14_p9 = scmp.ge.s32.totalorder %s17_s28, 10   ;;  %s6999_s25 = smov %s5543_s27 }
 0x3c8   : > { %s7000_s26 = smov %s7003_s29  ;;  %s7001_s27 = smov %s7007_s30 }
 0x3c9   :  { %16 = sbr.rel (!%p14_p9) target bundleno = 3 (0x3), region = 92 }

</bundles_post_ra>
